<compile_context>
chip_gen: v6e
topology: v6e:2x2x1
jax: 0.10.0
libtpu: 0.0.40
codegen_flags: <defaults>
</compile_context>

<pallas_src>
import functools

import jax
import jax.numpy as jnp
from jax.experimental import pallas as pl
from jax.experimental.pallas import tpu as pltpu

BN_EPS = 1e-5
LEAKY_SLOPE = 0.2
LANES = 128                      # channel padding target (dense lane dim)
_VMEM_LIMIT = 32 * 1024 * 1024


# ---------------------------------------------------------------------------
# Kernels
# ---------------------------------------------------------------------------
def _conv3x3_kernel(x0_ref, x1_ref, x2_ref, w_ref, b_ref, out_ref,
                    stats_ref=None):
    """3x3 stride-1 conv tile as 9 shifted matmuls (+ bias, + BN statistics).

    x{0,1,2}_ref : (1, TH, W + 2, Cin)  bf16  rows shifted by kh = 0, 1, 2
    w_ref        : (9, Cin, Cout)       bf16  (kh * 3 + kw) major
    b_ref        : (1, Cout)            f32
    out_ref      : (1, TH, W, Cout)     f32   conv + bias
    stats_ref    : (2, Cout)            f32   [sum; sumsq], grid-resident acc
    """
    _, th, wout, cout = out_ref.shape
    cin = w_ref.shape[1]

    acc = jnp.zeros((th * wout, cout), jnp.float32)
    x_shifted = (x0_ref, x1_ref, x2_ref)
    for kh in range(3):
        xk = x_shifted[kh][0]                            # (TH, W + 2, Cin) bf16
        for kw in range(3):
            patch = xk[:, kw:kw + wout, :].reshape(th * wout, cin)
            acc += jnp.dot(patch, w_ref[kh * 3 + kw],
                           preferred_element_type=jnp.float32)
    acc += b_ref[...]                                    # (1, Cout) broadcast
    out_ref[...] = acc.reshape(1, th, wout, cout)

    if stats_ref is not None:
        first = jnp.logical_and(pl.program_id(0) == 0, pl.program_id(1) == 0)

        @pl.when(first)
        def _():
            stats_ref[...] = jnp.zeros_like(stats_ref)

        tile_sum = jnp.sum(acc, axis=0, keepdims=True)           # (1, Cout)
        tile_sq = jnp.sum(acc * acc, axis=0, keepdims=True)      # (1, Cout)
        stats_ref[...] += jnp.concatenate([tile_sum, tile_sq], axis=0)


def _bn_leaky_kernel(y_ref, stats_ref, gamma_ref, beta_ref, o_ref, *,
                     inv_count):
    """Training-mode BatchNorm (from accumulated sum/sumsq) + LeakyReLU(0.2)."""
    _, th, wout, c = o_ref.shape
    stats = stats_ref[...]                               # (2, C) f32
    mean = stats[0:1, :] * inv_count                     # (1, C)
    var = jnp.maximum(stats[1:2, :] * inv_count - mean * mean, 0.0)
    inv_std = jax.lax.rsqrt(var + BN_EPS)
    scale = gamma_ref[...] * inv_std                     # (1, C)
    shift = beta_ref[...] - mean * scale                 # (1, C)

    y = y_ref[...].reshape(th * wout, c)                 # f32 conv output tile
    z = y * scale + shift
    z = jnp.where(z > 0, z, LEAKY_SLOPE * z)
    o_ref[...] = z.reshape(1, th, wout, c).astype(o_ref.dtype)


# ---------------------------------------------------------------------------
# Layer wrappers
# ---------------------------------------------------------------------------
def _pick_tile_h(h, w, target_rows=1024):
    th = 1
    for d in range(1, h + 1):
        if h % d == 0 and d * w <= target_rows:
            th = d
    return th


def _conv3x3_layer(x, w9, bias, *, compute_stats, tile_h):
    """x: (N, H, W, Cin) bf16 -> conv+bias (N, H, W, Cout) f32 [, stats (2, Cout)]."""
    n, h, w, cin = x.shape
    cout = w9.shape[2]
    xp = jnp.pad(x, ((0, 0), (1, 1), (1, 1), (0, 0)))    # spatial zero-padding
    wp = w + 2
    # Three H-shifted views (kh = 0, 1, 2); kw shifts are done in-kernel.
    x_sh = [xp[:, kh:kh + h, :, :] for kh in range(3)]

    grid = (n, h // tile_h)
    x_spec = pl.BlockSpec((1, tile_h, wp, cin), lambda i, j: (i, j, 0, 0))
    in_specs = [x_spec, x_spec, x_spec,
                pl.BlockSpec((9, cin, cout), lambda i, j: (0, 0, 0)),
                pl.BlockSpec((1, cout), lambda i, j: (0, 0))]
    y_spec = pl.BlockSpec((1, tile_h, w, cout), lambda i, j: (i, j, 0, 0))
    y_shape = jax.ShapeDtypeStruct((n, h, w, cout), jnp.float32)

    if compute_stats:
        out_shape = (y_shape, jax.ShapeDtypeStruct((2, cout), jnp.float32))
        out_specs = (y_spec, pl.BlockSpec((2, cout), lambda i, j: (0, 0)))
        # The stats block is resident and accumulated across the whole grid.
        semantics = ("arbitrary", "arbitrary")
    else:
        out_shape = y_shape
        out_specs = y_spec
        semantics = ("parallel", "parallel")

    cost = pl.CostEstimate(
        flops=2 * n * h * w * cin * cout * 9,
        transcendentals=0,
        bytes_accessed=(3 * n * h * wp * cin * 2 + 9 * cin * cout * 2
                        + n * h * w * cout * 4))

    return pl.pallas_call(
        _conv3x3_kernel,
        grid=grid,
        in_specs=in_specs,
        out_specs=out_specs,
        out_shape=out_shape,
        compiler_params=pltpu.CompilerParams(
            dimension_semantics=semantics,
            vmem_limit_bytes=_VMEM_LIMIT),
        cost_estimate=cost,
    )(x_sh[0], x_sh[1], x_sh[2], w9, bias)


def _bn_leaky_layer(y, stats, gamma, beta, *, tile_h, count):
    """(N, H, W, C) f32 conv output -> bf16 normalized + LeakyReLU activation."""
    n, h, w, c = y.shape
    grid = (n, h // tile_h)
    tile_spec = pl.BlockSpec((1, tile_h, w, c), lambda i, j: (i, j, 0, 0))
    vec_spec = pl.BlockSpec((1, c), lambda i, j: (0, 0))
    return pl.pallas_call(
        functools.partial(_bn_leaky_kernel, inv_count=1.0 / float(count)),
        grid=grid,
        in_specs=[tile_spec,
                  pl.BlockSpec((2, c), lambda i, j: (0, 0)),
                  vec_spec, vec_spec],
        out_specs=tile_spec,
        out_shape=jax.ShapeDtypeStruct((n, h, w, c), jnp.bfloat16),
        compiler_params=pltpu.CompilerParams(
            dimension_semantics=("parallel", "parallel"),
            vmem_limit_bytes=_VMEM_LIMIT),
    )(y, stats, gamma, beta)


# ---------------------------------------------------------------------------
# Parameter preparation (PyTorch layout -> padded kernel operands)
# ---------------------------------------------------------------------------
def _prep_conv(w, b):
    """(Cout, Cin, 3, 3) weight + (Cout,) bias -> (9, 128, 128) bf16, (1, 128) f32."""
    cout, cin, kh, kw = w.shape
    w9 = jnp.transpose(w, (2, 3, 1, 0)).reshape(kh * kw, cin, cout)
    w9 = jnp.pad(w9, ((0, 0), (0, LANES - cin), (0, LANES - cout)))
    bias = jnp.pad(b, (0, LANES - cout)).reshape(1, LANES)
    return w9.astype(jnp.bfloat16), bias.astype(jnp.float32)


def _prep_bn(gamma, beta):
    c = gamma.shape[0]
    g = jnp.pad(gamma, (0, LANES - c), constant_values=1.0)
    bt = jnp.pad(beta, (0, LANES - c))
    return (g.reshape(1, LANES).astype(jnp.float32),
            bt.reshape(1, LANES).astype(jnp.float32))


@jax.jit
def seg_encoder_forward(x, w1, b1, g1, be1, w2, b2, g2, be2, w3, b3):
    """x: (N, in_dim, H, W) f32 NCHW -> (N, out_dim, H, W) f32 NCHW."""
    n, cin, h, w = x.shape
    out_dim = w3.shape[0]
    tile_h = _pick_tile_h(h, w)
    count = n * h * w

    # NCHW -> NHWC, pad channels to a dense 128-wide lane dim, bf16 MXU operands.
    a = jnp.transpose(x, (0, 2, 3, 1))
    a = jnp.pad(a, ((0, 0), (0, 0), (0, 0), (0, LANES - cin)))
    a = a.astype(jnp.bfloat16)

    w9_1, bias1 = _prep_conv(w1, b1)
    w9_2, bias2 = _prep_conv(w2, b2)
    w9_3, bias3 = _prep_conv(w3, b3)
    gp1, bp1 = _prep_bn(g1, be1)
    gp2, bp2 = _prep_bn(g2, be2)

    y1, s1 = _conv3x3_layer(a, w9_1, bias1, compute_stats=True, tile_h=tile_h)
    a1 = _bn_leaky_layer(y1, s1, gp1, bp1, tile_h=tile_h, count=count)
    y2, s2 = _conv3x3_layer(a1, w9_2, bias2, compute_stats=True, tile_h=tile_h)
    a2 = _bn_leaky_layer(y2, s2, gp2, bp2, tile_h=tile_h, count=count)
    y3 = _conv3x3_layer(a2, w9_3, bias3, compute_stats=False, tile_h=tile_h)

    out = y3[:, :, :, :out_dim]                  # drop channel padding
    return jnp.transpose(out, (0, 3, 1, 2))      # NHWC -> NCHW (model boundary)


# ---------------------------------------------------------------------------
# Plain-JAX reference (mirrors the kernel's bf16 matmul operands / bf16
# inter-layer activations so only accumulation-order noise remains).
# ---------------------------------------------------------------------------
def _reference(x, w1, b1, g1, be1, w2, b2, g2, be2, w3, b3):
    def conv(a, w, b):
        y = jax.lax.conv_general_dilated(
            a.astype(jnp.bfloat16), w.astype(jnp.bfloat16),
            window_strides=(1, 1), padding=[(1, 1), (1, 1)],
            dimension_numbers=("NCHW", "OIHW", "NCHW"),
            preferred_element_type=jnp.float32)
        return y + b.reshape(1, -1, 1, 1)

    def bn_leaky(y, gamma, beta):
        mean = jnp.mean(y, axis=(0, 2, 3), keepdims=True)
        var = jnp.maximum(
            jnp.mean(y * y, axis=(0, 2, 3), keepdims=True) - mean * mean, 0.0)
        scale = gamma.reshape(1, -1, 1, 1) * jax.lax.rsqrt(var + BN_EPS)
        shift = beta.reshape(1, -1, 1, 1) - mean * scale
        z = y * scale + shift
        z = jnp.where(z > 0, z, LEAKY_SLOPE * z)
        return z.astype(jnp.bfloat16).astype(jnp.float32)

    a1 = bn_leaky(conv(x, w1, b1), g1, be1)
    a2 = bn_leaky(conv(a1, w2, b2), g2, be2)
    return conv(a2, w3, b3)


if __name__ == "__main__":
    # SegEncoder(in_dim=4, out_dim=4); input (N=2, C=4, H=16, W=16)
    N, Cin, H, W = 2, 4, 16, 16
    HID, OUT = 32, 4

    key = jax.random.PRNGKey(0)
    ks = jax.random.split(key, 4)
    x = jax.random.normal(ks[0], (N, Cin, H, W), jnp.float32)

    def conv_init(k, cout, cin):
        k1, k2 = jax.random.split(k)
        bound = 1.0 / (cin * 9) ** 0.5          # PyTorch default Conv2d init
        w = jax.random.uniform(k1, (cout, cin, 3, 3), jnp.float32, -bound, bound)
        b = jax.random.uniform(k2, (cout,), jnp.float32, -bound, bound)
        return w, b

    w1, b1 = conv_init(ks[1], HID, Cin)
    w2, b2 = conv_init(ks[2], HID, HID)
    w3, b3 = conv_init(ks[3], OUT, HID)
    g1 = jnp.ones((HID,), jnp.float32); be1 = jnp.zeros((HID,), jnp.float32)
    g2 = jnp.ones((HID,), jnp.float32); be2 = jnp.zeros((HID,), jnp.float32)

    out = seg_encoder_forward(x, w1, b1, g1, be1, w2, b2, g2, be2, w3, b3)
    out = jax.block_until_ready(out)

    ref = _reference(x, w1, b1, g1, be1, w2, b2, g2, be2, w3, b3)

    assert out.shape == (N, OUT, H, W), out.shape
    # Tolerance covers bf16 MXU operands / bf16 inter-layer activations
    # (occasional one-ulp rounding flips propagated through three layers).
    max_err = float(jnp.max(jnp.abs(out - ref)))
    assert jnp.allclose(out, ref, atol=2e-2, rtol=2e-2), max_err

    print("KERNEL_OK")
</pallas_src>

<mosaic_0001>
module attributes {stable_mosaic.version = 11 : i64} {
  func.func @_conv3x3_kernel(%arg0: i32, %arg1: i32, %arg2: memref<1x16x18x128xbf16, #tpu.memory_space<vmem>>, %arg3: memref<1x16x18x128xbf16, #tpu.memory_space<vmem>>, %arg4: memref<1x16x18x128xbf16, #tpu.memory_space<vmem>>, %arg5: memref<9x128x128xbf16, #tpu.memory_space<vmem>>, %arg6: memref<1x128xf32, #tpu.memory_space<vmem>>, %arg7: memref<1x16x16x128xf32, #tpu.memory_space<vmem>>, %arg8: memref<2x128xf32, #tpu.memory_space<vmem>>) attributes {dimension_semantics = [#tpu.dimension_semantics<arbitrary>, #tpu.dimension_semantics<arbitrary>], iteration_bounds = array<i64: 2, 1>, scalar_prefetch = 0 : i64, scratch_operands = 0 : i64, tpu.core_type = #tpu.core_type<tc>, window_params = [{transform_indices = @transform_0, window_bounds = array<i64: 1, 16, 18, 128>}, {transform_indices = @transform_1, window_bounds = array<i64: 1, 16, 18, 128>}, {transform_indices = @transform_2, window_bounds = array<i64: 1, 16, 18, 128>}, {pipeline_mode = #tpu.pipeline_mode<synchronous>, transform_indices = @transform_3, window_bounds = array<i64: 9, 128, 128>}, {pipeline_mode = #tpu.pipeline_mode<synchronous>, transform_indices = @transform_4, window_bounds = array<i64: 1, 128>}, {transform_indices = @transform_5, window_bounds = array<i64: 1, 16, 16, 128>}, {pipeline_mode = #tpu.pipeline_mode<synchronous>, transform_indices = @transform_6, window_bounds = array<i64: 2, 128>}]} {
    %cst = arith.constant 0.000000e+00 : f32
    %0 = vector.broadcast %cst : f32 to vector<256x128xf32>
    %c0 = arith.constant 0 : index
    %c0_0 = arith.constant 0 : index
    %c0_1 = arith.constant 0 : index
    %c0_2 = arith.constant 0 : index
    %1 = vector.load %arg2[%c0, %c0_0, %c0_1, %c0_2] : memref<1x16x18x128xbf16, #tpu.memory_space<vmem>>, vector<1x16x18x128xbf16>
    %2 = vector.shape_cast %1 : vector<1x16x18x128xbf16> to vector<16x18x128xbf16>
    %3 = vector.extract_strided_slice %2 {offsets = [0, 0, 0], sizes = [16, 16, 128], strides = [1, 1, 1]} : vector<16x18x128xbf16> to vector<16x16x128xbf16>
    %4 = vector.shape_cast %3 : vector<16x16x128xbf16> to vector<256x128xbf16>
    %c0_3 = arith.constant 0 : index
    %c0_4 = arith.constant 0 : index
    %c0_5 = arith.constant 0 : index
    %5 = vector.load %arg5[%c0_3, %c0_4, %c0_5] : memref<9x128x128xbf16, #tpu.memory_space<vmem>>, vector<1x128x128xbf16>
    %6 = vector.shape_cast %5 : vector<1x128x128xbf16> to vector<128x128xbf16>
    %cst_6 = arith.constant dense<0.000000e+00> : vector<256x128xf32>
    %7 = tpu.matmul %4, %6, %cst_6 {dimension_numbers = #tpu.dot_dimension_numbers<[1], [0], [0], [1], [0, 0, 1, 1], [], []>} : vector<256x128xbf16>, vector<128x128xbf16>, vector<256x128xf32> -> vector<256x128xf32>
    %8 = arith.addf %0, %7 : vector<256x128xf32>
    %9 = vector.extract_strided_slice %2 {offsets = [0, 1, 0], sizes = [16, 16, 128], strides = [1, 1, 1]} : vector<16x18x128xbf16> to vector<16x16x128xbf16>
    %10 = vector.shape_cast %9 : vector<16x16x128xbf16> to vector<256x128xbf16>
    %c1 = arith.constant 1 : index
    %c0_7 = arith.constant 0 : index
    %c0_8 = arith.constant 0 : index
    %11 = vector.load %arg5[%c1, %c0_7, %c0_8] : memref<9x128x128xbf16, #tpu.memory_space<vmem>>, vector<1x128x128xbf16>
    %12 = vector.shape_cast %11 : vector<1x128x128xbf16> to vector<128x128xbf16>
    %cst_9 = arith.constant dense<0.000000e+00> : vector<256x128xf32>
    %13 = tpu.matmul %10, %12, %cst_9 {dimension_numbers = #tpu.dot_dimension_numbers<[1], [0], [0], [1], [0, 0, 1, 1], [], []>} : vector<256x128xbf16>, vector<128x128xbf16>, vector<256x128xf32> -> vector<256x128xf32>
    %14 = arith.addf %8, %13 : vector<256x128xf32>
    %15 = vector.extract_strided_slice %2 {offsets = [0, 2, 0], sizes = [16, 16, 128], strides = [1, 1, 1]} : vector<16x18x128xbf16> to vector<16x16x128xbf16>
    %16 = vector.shape_cast %15 : vector<16x16x128xbf16> to vector<256x128xbf16>
    %c2 = arith.constant 2 : index
    %c0_10 = arith.constant 0 : index
    %c0_11 = arith.constant 0 : index
    %17 = vector.load %arg5[%c2, %c0_10, %c0_11] : memref<9x128x128xbf16, #tpu.memory_space<vmem>>, vector<1x128x128xbf16>
    %18 = vector.shape_cast %17 : vector<1x128x128xbf16> to vector<128x128xbf16>
    %cst_12 = arith.constant dense<0.000000e+00> : vector<256x128xf32>
    %19 = tpu.matmul %16, %18, %cst_12 {dimension_numbers = #tpu.dot_dimension_numbers<[1], [0], [0], [1], [0, 0, 1, 1], [], []>} : vector<256x128xbf16>, vector<128x128xbf16>, vector<256x128xf32> -> vector<256x128xf32>
    %20 = arith.addf %14, %19 : vector<256x128xf32>
    %c0_13 = arith.constant 0 : index
    %c0_14 = arith.constant 0 : index
    %c0_15 = arith.constant 0 : index
    %c0_16 = arith.constant 0 : index
    %21 = vector.load %arg3[%c0_13, %c0_14, %c0_15, %c0_16] : memref<1x16x18x128xbf16, #tpu.memory_space<vmem>>, vector<1x16x18x128xbf16>
    %22 = vector.shape_cast %21 : vector<1x16x18x128xbf16> to vector<16x18x128xbf16>
    %23 = vector.extract_strided_slice %22 {offsets = [0, 0, 0], sizes = [16, 16, 128], strides = [1, 1, 1]} : vector<16x18x128xbf16> to vector<16x16x128xbf16>
    %24 = vector.shape_cast %23 : vector<16x16x128xbf16> to vector<256x128xbf16>
    %c3 = arith.constant 3 : index
    %c0_17 = arith.constant 0 : index
    %c0_18 = arith.constant 0 : index
    %25 = vector.load %arg5[%c3, %c0_17, %c0_18] : memref<9x128x128xbf16, #tpu.memory_space<vmem>>, vector<1x128x128xbf16>
    %26 = vector.shape_cast %25 : vector<1x128x128xbf16> to vector<128x128xbf16>
    %cst_19 = arith.constant dense<0.000000e+00> : vector<256x128xf32>
    %27 = tpu.matmul %24, %26, %cst_19 {dimension_numbers = #tpu.dot_dimension_numbers<[1], [0], [0], [1], [0, 0, 1, 1], [], []>} : vector<256x128xbf16>, vector<128x128xbf16>, vector<256x128xf32> -> vector<256x128xf32>
    %28 = arith.addf %20, %27 : vector<256x128xf32>
    %29 = vector.extract_strided_slice %22 {offsets = [0, 1, 0], sizes = [16, 16, 128], strides = [1, 1, 1]} : vector<16x18x128xbf16> to vector<16x16x128xbf16>
    %30 = vector.shape_cast %29 : vector<16x16x128xbf16> to vector<256x128xbf16>
    %c4 = arith.constant 4 : index
    %c0_20 = arith.constant 0 : index
    %c0_21 = arith.constant 0 : index
    %31 = vector.load %arg5[%c4, %c0_20, %c0_21] : memref<9x128x128xbf16, #tpu.memory_space<vmem>>, vector<1x128x128xbf16>
    %32 = vector.shape_cast %31 : vector<1x128x128xbf16> to vector<128x128xbf16>
    %cst_22 = arith.constant dense<0.000000e+00> : vector<256x128xf32>
    %33 = tpu.matmul %30, %32, %cst_22 {dimension_numbers = #tpu.dot_dimension_numbers<[1], [0], [0], [1], [0, 0, 1, 1], [], []>} : vector<256x128xbf16>, vector<128x128xbf16>, vector<256x128xf32> -> vector<256x128xf32>
    %34 = arith.addf %28, %33 : vector<256x128xf32>
    %35 = vector.extract_strided_slice %22 {offsets = [0, 2, 0], sizes = [16, 16, 128], strides = [1, 1, 1]} : vector<16x18x128xbf16> to vector<16x16x128xbf16>
    %36 = vector.shape_cast %35 : vector<16x16x128xbf16> to vector<256x128xbf16>
    %c5 = arith.constant 5 : index
    %c0_23 = arith.constant 0 : index
    %c0_24 = arith.constant 0 : index
    %37 = vector.load %arg5[%c5, %c0_23, %c0_24] : memref<9x128x128xbf16, #tpu.memory_space<vmem>>, vector<1x128x128xbf16>
    %38 = vector.shape_cast %37 : vector<1x128x128xbf16> to vector<128x128xbf16>
    %cst_25 = arith.constant dense<0.000000e+00> : vector<256x128xf32>
    %39 = tpu.matmul %36, %38, %cst_25 {dimension_numbers = #tpu.dot_dimension_numbers<[1], [0], [0], [1], [0, 0, 1, 1], [], []>} : vector<256x128xbf16>, vector<128x128xbf16>, vector<256x128xf32> -> vector<256x128xf32>
    %40 = arith.addf %34, %39 : vector<256x128xf32>
    %c0_26 = arith.constant 0 : index
    %c0_27 = arith.constant 0 : index
    %c0_28 = arith.constant 0 : index
    %c0_29 = arith.constant 0 : index
    %41 = vector.load %arg4[%c0_26, %c0_27, %c0_28, %c0_29] : memref<1x16x18x128xbf16, #tpu.memory_space<vmem>>, vector<1x16x18x128xbf16>
    %42 = vector.shape_cast %41 : vector<1x16x18x128xbf16> to vector<16x18x128xbf16>
    %43 = vector.extract_strided_slice %42 {offsets = [0, 0, 0], sizes = [16, 16, 128], strides = [1, 1, 1]} : vector<16x18x128xbf16> to vector<16x16x128xbf16>
    %44 = vector.shape_cast %43 : vector<16x16x128xbf16> to vector<256x128xbf16>
    %c6 = arith.constant 6 : index
    %c0_30 = arith.constant 0 : index
    %c0_31 = arith.constant 0 : index
    %45 = vector.load %arg5[%c6, %c0_30, %c0_31] : memref<9x128x128xbf16, #tpu.memory_space<vmem>>, vector<1x128x128xbf16>
    %46 = vector.shape_cast %45 : vector<1x128x128xbf16> to vector<128x128xbf16>
    %cst_32 = arith.constant dense<0.000000e+00> : vector<256x128xf32>
    %47 = tpu.matmul %44, %46, %cst_32 {dimension_numbers = #tpu.dot_dimension_numbers<[1], [0], [0], [1], [0, 0, 1, 1], [], []>} : vector<256x128xbf16>, vector<128x128xbf16>, vector<256x128xf32> -> vector<256x128xf32>
    %48 = arith.addf %40, %47 : vector<256x128xf32>
    %49 = vector.extract_strided_slice %42 {offsets = [0, 1, 0], sizes = [16, 16, 128], strides = [1, 1, 1]} : vector<16x18x128xbf16> to vector<16x16x128xbf16>
    %50 = vector.shape_cast %49 : vector<16x16x128xbf16> to vector<256x128xbf16>
    %c7 = arith.constant 7 : index
    %c0_33 = arith.constant 0 : index
    %c0_34 = arith.constant 0 : index
    %51 = vector.load %arg5[%c7, %c0_33, %c0_34] : memref<9x128x128xbf16, #tpu.memory_space<vmem>>, vector<1x128x128xbf16>
    %52 = vector.shape_cast %51 : vector<1x128x128xbf16> to vector<128x128xbf16>
    %cst_35 = arith.constant dense<0.000000e+00> : vector<256x128xf32>
    %53 = tpu.matmul %50, %52, %cst_35 {dimension_numbers = #tpu.dot_dimension_numbers<[1], [0], [0], [1], [0, 0, 1, 1], [], []>} : vector<256x128xbf16>, vector<128x128xbf16>, vector<256x128xf32> -> vector<256x128xf32>
    %54 = arith.addf %48, %53 : vector<256x128xf32>
    %55 = vector.extract_strided_slice %42 {offsets = [0, 2, 0], sizes = [16, 16, 128], strides = [1, 1, 1]} : vector<16x18x128xbf16> to vector<16x16x128xbf16>
    %56 = vector.shape_cast %55 : vector<16x16x128xbf16> to vector<256x128xbf16>
    %c8 = arith.constant 8 : index
    %c0_36 = arith.constant 0 : index
    %c0_37 = arith.constant 0 : index
    %57 = vector.load %arg5[%c8, %c0_36, %c0_37] : memref<9x128x128xbf16, #tpu.memory_space<vmem>>, vector<1x128x128xbf16>
    %58 = vector.shape_cast %57 : vector<1x128x128xbf16> to vector<128x128xbf16>
    %cst_38 = arith.constant dense<0.000000e+00> : vector<256x128xf32>
    %59 = tpu.matmul %56, %58, %cst_38 {dimension_numbers = #tpu.dot_dimension_numbers<[1], [0], [0], [1], [0, 0, 1, 1], [], []>} : vector<256x128xbf16>, vector<128x128xbf16>, vector<256x128xf32> -> vector<256x128xf32>
    %60 = arith.addf %54, %59 : vector<256x128xf32>
    %c0_39 = arith.constant 0 : index
    %c0_40 = arith.constant 0 : index
    %61 = vector.load %arg6[%c0_39, %c0_40] : memref<1x128xf32, #tpu.memory_space<vmem>>, vector<1x128xf32>
    %62 = vector.broadcast %61 : vector<1x128xf32> to vector<256x128xf32>
    %63 = arith.addf %60, %62 : vector<256x128xf32>
    %64 = vector.shape_cast %63 : vector<256x128xf32> to vector<1x16x16x128xf32>
    %c0_41 = arith.constant 0 : index
    %c0_42 = arith.constant 0 : index
    %c0_43 = arith.constant 0 : index
    %c0_44 = arith.constant 0 : index
    %65 = vector.load %arg7[%c0_41, %c0_42, %c0_43, %c0_44] : memref<1x16x16x128xf32, #tpu.memory_space<vmem>>, vector<1x16x16x128xf32>
    tpu.vector_store %arg7[%c0_41, %c0_42, %c0_43, %c0_44], %64 {strides = array<i32>} : memref<1x16x16x128xf32, #tpu.memory_space<vmem>>, vector<1x16x16x128xf32>,
    %c0_i32 = arith.constant 0 : i32
    %66 = arith.cmpi eq, %arg0, %c0_i32 : i32
    %c0_i32_45 = arith.constant 0 : i32
    %67 = arith.cmpi eq, %arg1, %c0_i32_45 : i32
    %68 = arith.andi %66, %67 : i1
    %69 = arith.extui %68 : i1 to i32
    %c0_i32_46 = arith.constant 0 : i32
    %70 = arith.cmpi ne, %69, %c0_i32_46 : i32
    scf.if %70 {
      %cst_53 = arith.constant 0.000000e+00 : f32
      %80 = vector.broadcast %cst_53 : f32 to vector<2x128xf32>
      %c0_54 = arith.constant 0 : index
      %c0_55 = arith.constant 0 : index
      %81 = vector.load %arg8[%c0_54, %c0_55] : memref<2x128xf32, #tpu.memory_space<vmem>>, vector<2x128xf32>
      tpu.vector_store %arg8[%c0_54, %c0_55], %80 {strides = array<i32>} : memref<2x128xf32, #tpu.memory_space<vmem>>, vector<2x128xf32>,
    } else {
    }
    %cst_47 = arith.constant dense<0.000000e+00> : vector<128xf32>
    %71 = vector.multi_reduction <add>, %63, %cst_47 [0] : vector<256x128xf32> to vector<128xf32>
    %72 = vector.shape_cast %71 : vector<128xf32> to vector<1x128xf32>
    %73 = arith.mulf %63, %63 : vector<256x128xf32>
    %cst_48 = arith.constant dense<0.000000e+00> : vector<128xf32>
    %74 = vector.multi_reduction <add>, %73, %cst_48 [0] : vector<256x128xf32> to vector<128xf32>
    %75 = vector.shape_cast %74 : vector<128xf32> to vector<1x128xf32>
    %c0_49 = arith.constant 0 : index
    %c0_50 = arith.constant 0 : index
    %76 = vector.load %arg8[%c0_49, %c0_50] : memref<2x128xf32, #tpu.memory_space<vmem>>, vector<2x128xf32>
    %77 = tpu.concatenate %72, %75 in 0 : vector<1x128xf32>, vector<1x128xf32> -> vector<2x128xf32>
    %78 = arith.addf %76, %77 : vector<2x128xf32>
    %c0_51 = arith.constant 0 : index
    %c0_52 = arith.constant 0 : index
    %79 = vector.load %arg8[%c0_51, %c0_52] : memref<2x128xf32, #tpu.memory_space<vmem>>, vector<2x128xf32>
    tpu.vector_store %arg8[%c0_51, %c0_52], %78 {strides = array<i32>} : memref<2x128xf32, #tpu.memory_space<vmem>>, vector<2x128xf32>,
    return
  }
  func.func @transform_0(%arg0: i32, %arg1: i32) -> (i32, i32, i32, i32) {
    %c0_i32 = arith.constant 0 : i32
    %c0_i32_0 = arith.constant 0 : i32
    %c0_i32_1 = arith.constant 0 : i32
    return %arg0, %arg1, %c0_i32, %c0_i32_0 : i32, i32, i32, i32
  }
  func.func @transform_1(%arg0: i32, %arg1: i32) -> (i32, i32, i32, i32) {
    %c0_i32 = arith.constant 0 : i32
    %c0_i32_0 = arith.constant 0 : i32
    %c0_i32_1 = arith.constant 0 : i32
    return %arg0, %arg1, %c0_i32, %c0_i32_0 : i32, i32, i32, i32
  }
  func.func @transform_2(%arg0: i32, %arg1: i32) -> (i32, i32, i32, i32) {
    %c0_i32 = arith.constant 0 : i32
    %c0_i32_0 = arith.constant 0 : i32
    %c0_i32_1 = arith.constant 0 : i32
    return %arg0, %arg1, %c0_i32, %c0_i32_0 : i32, i32, i32, i32
  }
  func.func @transform_3(%arg0: i32, %arg1: i32) -> (i32, i32, i32) {
    %c0_i32 = arith.constant 0 : i32
    %c0_i32_0 = arith.constant 0 : i32
    %c0_i32_1 = arith.constant 0 : i32
    %c0_i32_2 = arith.constant 0 : i32
    return %c0_i32, %c0_i32_0, %c0_i32_1 : i32, i32, i32
  }
  func.func @transform_4(%arg0: i32, %arg1: i32) -> (i32, i32) {
    %c0_i32 = arith.constant 0 : i32
    %c0_i32_0 = arith.constant 0 : i32
    %c0_i32_1 = arith.constant 0 : i32
    return %c0_i32, %c0_i32_0 : i32, i32
  }
  func.func @transform_5(%arg0: i32, %arg1: i32) -> (i32, i32, i32, i32) {
    %c0_i32 = arith.constant 0 : i32
    %c0_i32_0 = arith.constant 0 : i32
    %c0_i32_1 = arith.constant 0 : i32
    return %arg0, %arg1, %c0_i32, %c0_i32_0 : i32, i32, i32, i32
  }
  func.func @transform_6(%arg0: i32, %arg1: i32) -> (i32, i32) {
    %c0_i32 = arith.constant 0 : i32
    %c0_i32_0 = arith.constant 0 : i32
    %c0_i32_1 = arith.constant 0 : i32
    return %c0_i32, %c0_i32_0 : i32, i32
  }
}

module attributes {stable_mosaic.version = 11 : i64} {
  func.func @_bn_leaky_kernel(%arg0: i32, %arg1: i32, %arg2: memref<1x16x16x128xf32, #tpu.memory_space<vmem>>, %arg3: memref<2x128xf32, #tpu.memory_space<vmem>>, %arg4: memref<1x128xf32, #tpu.memory_space<vmem>>, %arg5: memref<1x128xf32, #tpu.memory_space<vmem>>, %arg6: memref<1x16x16x128xbf16, #tpu.memory_space<vmem>>) attributes {dimension_semantics = [#tpu.dimension_semantics<parallel>, #tpu.dimension_semantics<parallel>], iteration_bounds = array<i64: 2, 1>, scalar_prefetch = 0 : i64, scratch_operands = 0 : i64, tpu.core_type = #tpu.core_type<tc>, window_params = [{transform_indices = @transform_0, window_bounds = array<i64: 1, 16, 16, 128>}, {pipeline_mode = #tpu.pipeline_mode<synchronous>, transform_indices = @transform_1, window_bounds = array<i64: 2, 128>}, {pipeline_mode = #tpu.pipeline_mode<synchronous>, transform_indices = @transform_2, window_bounds = array<i64: 1, 128>}, {pipeline_mode = #tpu.pipeline_mode<synchronous>, transform_indices = @transform_3, window_bounds = array<i64: 1, 128>}, {transform_indices = @transform_4, window_bounds = array<i64: 1, 16, 16, 128>}]} {
    %c0 = arith.constant 0 : index
    %c0_0 = arith.constant 0 : index
    %0 = vector.load %arg3[%c0, %c0_0] : memref<2x128xf32, #tpu.memory_space<vmem>>, vector<2x128xf32>
    %1 = vector.extract_strided_slice %0 {offsets = [0, 0], sizes = [1, 128], strides = [1, 1]} : vector<2x128xf32> to vector<1x128xf32>
    %cst = arith.constant 0.001953125 : f32
    %2 = vector.broadcast %cst : f32 to vector<1x128xf32>
    %3 = arith.mulf %1, %2 : vector<1x128xf32>
    %4 = vector.extract_strided_slice %0 {offsets = [1, 0], sizes = [1, 128], strides = [1, 1]} : vector<2x128xf32> to vector<1x128xf32>
    %cst_1 = arith.constant 0.001953125 : f32
    %5 = vector.broadcast %cst_1 : f32 to vector<1x128xf32>
    %6 = arith.mulf %4, %5 : vector<1x128xf32>
    %7 = arith.mulf %3, %3 : vector<1x128xf32>
    %8 = arith.subf %6, %7 : vector<1x128xf32>
    %cst_2 = arith.constant 0.000000e+00 : f32
    %9 = vector.broadcast %cst_2 : f32 to vector<1x128xf32>
    %10 = arith.maximumf %8, %9 : vector<1x128xf32>
    %cst_3 = arith.constant 9.99999974E-6 : f32
    %11 = vector.broadcast %cst_3 : f32 to vector<1x128xf32>
    %12 = arith.addf %10, %11 : vector<1x128xf32>
    %13 = math.rsqrt %12 : vector<1x128xf32>
    %c0_4 = arith.constant 0 : index
    %c0_5 = arith.constant 0 : index
    %14 = vector.load %arg4[%c0_4, %c0_5] : memref<1x128xf32, #tpu.memory_space<vmem>>, vector<1x128xf32>
    %15 = arith.mulf %14, %13 : vector<1x128xf32>
    %c0_6 = arith.constant 0 : index
    %c0_7 = arith.constant 0 : index
    %16 = vector.load %arg5[%c0_6, %c0_7] : memref<1x128xf32, #tpu.memory_space<vmem>>, vector<1x128xf32>
    %17 = arith.mulf %3, %15 : vector<1x128xf32>
    %18 = arith.subf %16, %17 : vector<1x128xf32>
    %c0_8 = arith.constant 0 : index
    %c0_9 = arith.constant 0 : index
    %c0_10 = arith.constant 0 : index
    %c0_11 = arith.constant 0 : index
    %19 = vector.load %arg2[%c0_8, %c0_9, %c0_10, %c0_11] : memref<1x16x16x128xf32, #tpu.memory_space<vmem>>, vector<1x16x16x128xf32>
    %20 = vector.shape_cast %19 : vector<1x16x16x128xf32> to vector<256x128xf32>
    %21 = vector.broadcast %15 : vector<1x128xf32> to vector<256x128xf32>
    %22 = arith.mulf %20, %21 : vector<256x128xf32>
    %23 = vector.broadcast %18 : vector<1x128xf32> to vector<256x128xf32>
    %24 = arith.addf %22, %23 : vector<256x128xf32>
    %cst_12 = arith.constant 0.000000e+00 : f32
    %25 = vector.broadcast %cst_12 : f32 to vector<256x128xf32>
    %26 = arith.cmpf ogt, %24, %25 : vector<256x128xf32>
    %cst_13 = arith.constant 2.000000e-01 : f32
    %27 = vector.broadcast %cst_13 : f32 to vector<256x128xf32>
    %28 = arith.mulf %27, %24 : vector<256x128xf32>
    %29 = arith.select %26, %24, %28 : vector<256x128xi1>, vector<256x128xf32>
    %30 = vector.shape_cast %29 : vector<256x128xf32> to vector<1x16x16x128xf32>
    %31 = arith.truncf %30 : vector<1x16x16x128xf32> to vector<1x16x16x128xbf16>
    %c0_14 = arith.constant 0 : index
    %c0_15 = arith.constant 0 : index
    %c0_16 = arith.constant 0 : index
    %c0_17 = arith.constant 0 : index
    %32 = vector.load %arg6[%c0_14, %c0_15, %c0_16, %c0_17] : memref<1x16x16x128xbf16, #tpu.memory_space<vmem>>, vector<1x16x16x128xbf16>
    tpu.vector_store %arg6[%c0_14, %c0_15, %c0_16, %c0_17], %31 {strides = array<i32>} : memref<1x16x16x128xbf16, #tpu.memory_space<vmem>>, vector<1x16x16x128xbf16>,
    return
  }
  func.func @transform_0(%arg0: i32, %arg1: i32) -> (i32, i32, i32, i32) {
    %c0_i32 = arith.constant 0 : i32
    %c0_i32_0 = arith.constant 0 : i32
    %c0_i32_1 = arith.constant 0 : i32
    return %arg0, %arg1, %c0_i32, %c0_i32_0 : i32, i32, i32, i32
  }
  func.func @transform_1(%arg0: i32, %arg1: i32) -> (i32, i32) {
    %c0_i32 = arith.constant 0 : i32
    %c0_i32_0 = arith.constant 0 : i32
    %c0_i32_1 = arith.constant 0 : i32
    return %c0_i32, %c0_i32_0 : i32, i32
  }
  func.func @transform_2(%arg0: i32, %arg1: i32) -> (i32, i32) {
    %c0_i32 = arith.constant 0 : i32
    %c0_i32_0 = arith.constant 0 : i32
    %c0_i32_1 = arith.constant 0 : i32
    return %c0_i32, %c0_i32_0 : i32, i32
  }
  func.func @transform_3(%arg0: i32, %arg1: i32) -> (i32, i32) {
    %c0_i32 = arith.constant 0 : i32
    %c0_i32_0 = arith.constant 0 : i32
    %c0_i32_1 = arith.constant 0 : i32
    return %c0_i32, %c0_i32_0 : i32, i32
  }
  func.func @transform_4(%arg0: i32, %arg1: i32) -> (i32, i32, i32, i32) {
    %c0_i32 = arith.constant 0 : i32
    %c0_i32_0 = arith.constant 0 : i32
    %c0_i32_1 = arith.constant 0 : i32
    return %arg0, %arg1, %c0_i32, %c0_i32_0 : i32, i32, i32, i32
  }
}

module attributes {stable_mosaic.version = 11 : i64} {
  func.func @_conv3x3_kernel(%arg0: i32, %arg1: i32, %arg2: memref<1x16x18x128xbf16, #tpu.memory_space<vmem>>, %arg3: memref<1x16x18x128xbf16, #tpu.memory_space<vmem>>, %arg4: memref<1x16x18x128xbf16, #tpu.memory_space<vmem>>, %arg5: memref<9x128x128xbf16, #tpu.memory_space<vmem>>, %arg6: memref<1x128xf32, #tpu.memory_space<vmem>>, %arg7: memref<1x16x16x128xf32, #tpu.memory_space<vmem>>) attributes {dimension_semantics = [#tpu.dimension_semantics<parallel>, #tpu.dimension_semantics<parallel>], iteration_bounds = array<i64: 2, 1>, scalar_prefetch = 0 : i64, scratch_operands = 0 : i64, tpu.core_type = #tpu.core_type<tc>, window_params = [{transform_indices = @transform_0, window_bounds = array<i64: 1, 16, 18, 128>}, {transform_indices = @transform_1, window_bounds = array<i64: 1, 16, 18, 128>}, {transform_indices = @transform_2, window_bounds = array<i64: 1, 16, 18, 128>}, {pipeline_mode = #tpu.pipeline_mode<synchronous>, transform_indices = @transform_3, window_bounds = array<i64: 9, 128, 128>}, {pipeline_mode = #tpu.pipeline_mode<synchronous>, transform_indices = @transform_4, window_bounds = array<i64: 1, 128>}, {transform_indices = @transform_5, window_bounds = array<i64: 1, 16, 16, 128>}]} {
    %cst = arith.constant 0.000000e+00 : f32
    %0 = vector.broadcast %cst : f32 to vector<256x128xf32>
    %c0 = arith.constant 0 : index
    %c0_0 = arith.constant 0 : index
    %c0_1 = arith.constant 0 : index
    %c0_2 = arith.constant 0 : index
    %1 = vector.load %arg2[%c0, %c0_0, %c0_1, %c0_2] : memref<1x16x18x128xbf16, #tpu.memory_space<vmem>>, vector<1x16x18x128xbf16>
    %2 = vector.shape_cast %1 : vector<1x16x18x128xbf16> to vector<16x18x128xbf16>
    %3 = vector.extract_strided_slice %2 {offsets = [0, 0, 0], sizes = [16, 16, 128], strides = [1, 1, 1]} : vector<16x18x128xbf16> to vector<16x16x128xbf16>
    %4 = vector.shape_cast %3 : vector<16x16x128xbf16> to vector<256x128xbf16>
    %c0_3 = arith.constant 0 : index
    %c0_4 = arith.constant 0 : index
    %c0_5 = arith.constant 0 : index
    %5 = vector.load %arg5[%c0_3, %c0_4, %c0_5] : memref<9x128x128xbf16, #tpu.memory_space<vmem>>, vector<1x128x128xbf16>
    %6 = vector.shape_cast %5 : vector<1x128x128xbf16> to vector<128x128xbf16>
    %cst_6 = arith.constant dense<0.000000e+00> : vector<256x128xf32>
    %7 = tpu.matmul %4, %6, %cst_6 {dimension_numbers = #tpu.dot_dimension_numbers<[1], [0], [0], [1], [0, 0, 1, 1], [], []>} : vector<256x128xbf16>, vector<128x128xbf16>, vector<256x128xf32> -> vector<256x128xf32>
    %8 = arith.addf %0, %7 : vector<256x128xf32>
    %9 = vector.extract_strided_slice %2 {offsets = [0, 1, 0], sizes = [16, 16, 128], strides = [1, 1, 1]} : vector<16x18x128xbf16> to vector<16x16x128xbf16>
    %10 = vector.shape_cast %9 : vector<16x16x128xbf16> to vector<256x128xbf16>
    %c1 = arith.constant 1 : index
    %c0_7 = arith.constant 0 : index
    %c0_8 = arith.constant 0 : index
    %11 = vector.load %arg5[%c1, %c0_7, %c0_8] : memref<9x128x128xbf16, #tpu.memory_space<vmem>>, vector<1x128x128xbf16>
    %12 = vector.shape_cast %11 : vector<1x128x128xbf16> to vector<128x128xbf16>
    %cst_9 = arith.constant dense<0.000000e+00> : vector<256x128xf32>
    %13 = tpu.matmul %10, %12, %cst_9 {dimension_numbers = #tpu.dot_dimension_numbers<[1], [0], [0], [1], [0, 0, 1, 1], [], []>} : vector<256x128xbf16>, vector<128x128xbf16>, vector<256x128xf32> -> vector<256x128xf32>
    %14 = arith.addf %8, %13 : vector<256x128xf32>
    %15 = vector.extract_strided_slice %2 {offsets = [0, 2, 0], sizes = [16, 16, 128], strides = [1, 1, 1]} : vector<16x18x128xbf16> to vector<16x16x128xbf16>
    %16 = vector.shape_cast %15 : vector<16x16x128xbf16> to vector<256x128xbf16>
    %c2 = arith.constant 2 : index
    %c0_10 = arith.constant 0 : index
    %c0_11 = arith.constant 0 : index
    %17 = vector.load %arg5[%c2, %c0_10, %c0_11] : memref<9x128x128xbf16, #tpu.memory_space<vmem>>, vector<1x128x128xbf16>
    %18 = vector.shape_cast %17 : vector<1x128x128xbf16> to vector<128x128xbf16>
    %cst_12 = arith.constant dense<0.000000e+00> : vector<256x128xf32>
    %19 = tpu.matmul %16, %18, %cst_12 {dimension_numbers = #tpu.dot_dimension_numbers<[1], [0], [0], [1], [0, 0, 1, 1], [], []>} : vector<256x128xbf16>, vector<128x128xbf16>, vector<256x128xf32> -> vector<256x128xf32>
    %20 = arith.addf %14, %19 : vector<256x128xf32>
    %c0_13 = arith.constant 0 : index
    %c0_14 = arith.constant 0 : index
    %c0_15 = arith.constant 0 : index
    %c0_16 = arith.constant 0 : index
    %21 = vector.load %arg3[%c0_13, %c0_14, %c0_15, %c0_16] : memref<1x16x18x128xbf16, #tpu.memory_space<vmem>>, vector<1x16x18x128xbf16>
    %22 = vector.shape_cast %21 : vector<1x16x18x128xbf16> to vector<16x18x128xbf16>
    %23 = vector.extract_strided_slice %22 {offsets = [0, 0, 0], sizes = [16, 16, 128], strides = [1, 1, 1]} : vector<16x18x128xbf16> to vector<16x16x128xbf16>
    %24 = vector.shape_cast %23 : vector<16x16x128xbf16> to vector<256x128xbf16>
    %c3 = arith.constant 3 : index
    %c0_17 = arith.constant 0 : index
    %c0_18 = arith.constant 0 : index
    %25 = vector.load %arg5[%c3, %c0_17, %c0_18] : memref<9x128x128xbf16, #tpu.memory_space<vmem>>, vector<1x128x128xbf16>
    %26 = vector.shape_cast %25 : vector<1x128x128xbf16> to vector<128x128xbf16>
    %cst_19 = arith.constant dense<0.000000e+00> : vector<256x128xf32>
    %27 = tpu.matmul %24, %26, %cst_19 {dimension_numbers = #tpu.dot_dimension_numbers<[1], [0], [0], [1], [0, 0, 1, 1], [], []>} : vector<256x128xbf16>, vector<128x128xbf16>, vector<256x128xf32> -> vector<256x128xf32>
    %28 = arith.addf %20, %27 : vector<256x128xf32>
    %29 = vector.extract_strided_slice %22 {offsets = [0, 1, 0], sizes = [16, 16, 128], strides = [1, 1, 1]} : vector<16x18x128xbf16> to vector<16x16x128xbf16>
    %30 = vector.shape_cast %29 : vector<16x16x128xbf16> to vector<256x128xbf16>
    %c4 = arith.constant 4 : index
    %c0_20 = arith.constant 0 : index
    %c0_21 = arith.constant 0 : index
    %31 = vector.load %arg5[%c4, %c0_20, %c0_21] : memref<9x128x128xbf16, #tpu.memory_space<vmem>>, vector<1x128x128xbf16>
    %32 = vector.shape_cast %31 : vector<1x128x128xbf16> to vector<128x128xbf16>
    %cst_22 = arith.constant dense<0.000000e+00> : vector<256x128xf32>
    %33 = tpu.matmul %30, %32, %cst_22 {dimension_numbers = #tpu.dot_dimension_numbers<[1], [0], [0], [1], [0, 0, 1, 1], [], []>} : vector<256x128xbf16>, vector<128x128xbf16>, vector<256x128xf32> -> vector<256x128xf32>
    %34 = arith.addf %28, %33 : vector<256x128xf32>
    %35 = vector.extract_strided_slice %22 {offsets = [0, 2, 0], sizes = [16, 16, 128], strides = [1, 1, 1]} : vector<16x18x128xbf16> to vector<16x16x128xbf16>
    %36 = vector.shape_cast %35 : vector<16x16x128xbf16> to vector<256x128xbf16>
    %c5 = arith.constant 5 : index
    %c0_23 = arith.constant 0 : index
    %c0_24 = arith.constant 0 : index
    %37 = vector.load %arg5[%c5, %c0_23, %c0_24] : memref<9x128x128xbf16, #tpu.memory_space<vmem>>, vector<1x128x128xbf16>
    %38 = vector.shape_cast %37 : vector<1x128x128xbf16> to vector<128x128xbf16>
    %cst_25 = arith.constant dense<0.000000e+00> : vector<256x128xf32>
    %39 = tpu.matmul %36, %38, %cst_25 {dimension_numbers = #tpu.dot_dimension_numbers<[1], [0], [0], [1], [0, 0, 1, 1], [], []>} : vector<256x128xbf16>, vector<128x128xbf16>, vector<256x128xf32> -> vector<256x128xf32>
    %40 = arith.addf %34, %39 : vector<256x128xf32>
    %c0_26 = arith.constant 0 : index
    %c0_27 = arith.constant 0 : index
    %c0_28 = arith.constant 0 : index
    %c0_29 = arith.constant 0 : index
    %41 = vector.load %arg4[%c0_26, %c0_27, %c0_28, %c0_29] : memref<1x16x18x128xbf16, #tpu.memory_space<vmem>>, vector<1x16x18x128xbf16>
    %42 = vector.shape_cast %41 : vector<1x16x18x128xbf16> to vector<16x18x128xbf16>
    %43 = vector.extract_strided_slice %42 {offsets = [0, 0, 0], sizes = [16, 16, 128], strides = [1, 1, 1]} : vector<16x18x128xbf16> to vector<16x16x128xbf16>
    %44 = vector.shape_cast %43 : vector<16x16x128xbf16> to vector<256x128xbf16>
    %c6 = arith.constant 6 : index
    %c0_30 = arith.constant 0 : index
    %c0_31 = arith.constant 0 : index
    %45 = vector.load %arg5[%c6, %c0_30, %c0_31] : memref<9x128x128xbf16, #tpu.memory_space<vmem>>, vector<1x128x128xbf16>
    %46 = vector.shape_cast %45 : vector<1x128x128xbf16> to vector<128x128xbf16>
    %cst_32 = arith.constant dense<0.000000e+00> : vector<256x128xf32>
    %47 = tpu.matmul %44, %46, %cst_32 {dimension_numbers = #tpu.dot_dimension_numbers<[1], [0], [0], [1], [0, 0, 1, 1], [], []>} : vector<256x128xbf16>, vector<128x128xbf16>, vector<256x128xf32> -> vector<256x128xf32>
    %48 = arith.addf %40, %47 : vector<256x128xf32>
    %49 = vector.extract_strided_slice %42 {offsets = [0, 1, 0], sizes = [16, 16, 128], strides = [1, 1, 1]} : vector<16x18x128xbf16> to vector<16x16x128xbf16>
    %50 = vector.shape_cast %49 : vector<16x16x128xbf16> to vector<256x128xbf16>
    %c7 = arith.constant 7 : index
    %c0_33 = arith.constant 0 : index
    %c0_34 = arith.constant 0 : index
    %51 = vector.load %arg5[%c7, %c0_33, %c0_34] : memref<9x128x128xbf16, #tpu.memory_space<vmem>>, vector<1x128x128xbf16>
    %52 = vector.shape_cast %51 : vector<1x128x128xbf16> to vector<128x128xbf16>
    %cst_35 = arith.constant dense<0.000000e+00> : vector<256x128xf32>
    %53 = tpu.matmul %50, %52, %cst_35 {dimension_numbers = #tpu.dot_dimension_numbers<[1], [0], [0], [1], [0, 0, 1, 1], [], []>} : vector<256x128xbf16>, vector<128x128xbf16>, vector<256x128xf32> -> vector<256x128xf32>
    %54 = arith.addf %48, %53 : vector<256x128xf32>
    %55 = vector.extract_strided_slice %42 {offsets = [0, 2, 0], sizes = [16, 16, 128], strides = [1, 1, 1]} : vector<16x18x128xbf16> to vector<16x16x128xbf16>
    %56 = vector.shape_cast %55 : vector<16x16x128xbf16> to vector<256x128xbf16>
    %c8 = arith.constant 8 : index
    %c0_36 = arith.constant 0 : index
    %c0_37 = arith.constant 0 : index
    %57 = vector.load %arg5[%c8, %c0_36, %c0_37] : memref<9x128x128xbf16, #tpu.memory_space<vmem>>, vector<1x128x128xbf16>
    %58 = vector.shape_cast %57 : vector<1x128x128xbf16> to vector<128x128xbf16>
    %cst_38 = arith.constant dense<0.000000e+00> : vector<256x128xf32>
    %59 = tpu.matmul %56, %58, %cst_38 {dimension_numbers = #tpu.dot_dimension_numbers<[1], [0], [0], [1], [0, 0, 1, 1], [], []>} : vector<256x128xbf16>, vector<128x128xbf16>, vector<256x128xf32> -> vector<256x128xf32>
    %60 = arith.addf %54, %59 : vector<256x128xf32>
    %c0_39 = arith.constant 0 : index
    %c0_40 = arith.constant 0 : index
    %61 = vector.load %arg6[%c0_39, %c0_40] : memref<1x128xf32, #tpu.memory_space<vmem>>, vector<1x128xf32>
    %62 = vector.broadcast %61 : vector<1x128xf32> to vector<256x128xf32>
    %63 = arith.addf %60, %62 : vector<256x128xf32>
    %64 = vector.shape_cast %63 : vector<256x128xf32> to vector<1x16x16x128xf32>
    %c0_41 = arith.constant 0 : index
    %c0_42 = arith.constant 0 : index
    %c0_43 = arith.constant 0 : index
    %c0_44 = arith.constant 0 : index
    %65 = vector.load %arg7[%c0_41, %c0_42, %c0_43, %c0_44] : memref<1x16x16x128xf32, #tpu.memory_space<vmem>>, vector<1x16x16x128xf32>
    tpu.vector_store %arg7[%c0_41, %c0_42, %c0_43, %c0_44], %64 {strides = array<i32>} : memref<1x16x16x128xf32, #tpu.memory_space<vmem>>, vector<1x16x16x128xf32>,
    return
  }
  func.func @transform_0(%arg0: i32, %arg1: i32) -> (i32, i32, i32, i32) {
    %c0_i32 = arith.constant 0 : i32
    %c0_i32_0 = arith.constant 0 : i32
    %c0_i32_1 = arith.constant 0 : i32
    return %arg0, %arg1, %c0_i32, %c0_i32_0 : i32, i32, i32, i32
  }
  func.func @transform_1(%arg0: i32, %arg1: i32) -> (i32, i32, i32, i32) {
    %c0_i32 = arith.constant 0 : i32
    %c0_i32_0 = arith.constant 0 : i32
    %c0_i32_1 = arith.constant 0 : i32
    return %arg0, %arg1, %c0_i32, %c0_i32_0 : i32, i32, i32, i32
  }
  func.func @transform_2(%arg0: i32, %arg1: i32) -> (i32, i32, i32, i32) {
    %c0_i32 = arith.constant 0 : i32
    %c0_i32_0 = arith.constant 0 : i32
    %c0_i32_1 = arith.constant 0 : i32
    return %arg0, %arg1, %c0_i32, %c0_i32_0 : i32, i32, i32, i32
  }
  func.func @transform_3(%arg0: i32, %arg1: i32) -> (i32, i32, i32) {
    %c0_i32 = arith.constant 0 : i32
    %c0_i32_0 = arith.constant 0 : i32
    %c0_i32_1 = arith.constant 0 : i32
    %c0_i32_2 = arith.constant 0 : i32
    return %c0_i32, %c0_i32_0, %c0_i32_1 : i32, i32, i32
  }
  func.func @transform_4(%arg0: i32, %arg1: i32) -> (i32, i32) {
    %c0_i32 = arith.constant 0 : i32
    %c0_i32_0 = arith.constant 0 : i32
    %c0_i32_1 = arith.constant 0 : i32
    return %c0_i32, %c0_i32_0 : i32, i32
  }
  func.func @transform_5(%arg0: i32, %arg1: i32) -> (i32, i32, i32, i32) {
    %c0_i32 = arith.constant 0 : i32
    %c0_i32_0 = arith.constant 0 : i32
    %c0_i32_1 = arith.constant 0 : i32
    return %arg0, %arg1, %c0_i32, %c0_i32_0 : i32, i32, i32, i32
  }
}

</mosaic_0001>

<bundles_post_ra>
// kernel: seg_encoder_forward.6
= control target key start
LH: loop header
LB: loop body
LE: loop exit
PB: predicated region body
PF: predicated region fallthrough
CT: control target
= control target key end

     0   :  { %s983_s15 = smov 0   ;;  %s985_s16 = smov 0   ;;  %s1149_s0 = inlined_call_operand.vmem [shape: f32[2,16,16,128], index: 0, kind: input, shape index: {}]   ;;  %s1150_s1 = inlined_call_operand.vmem [shape: f32[2,128], index: 1, kind: input, shape index: {}]   ;;  %s1151_s2 = inlined_call_operand.vmem [shape: f32[1,128], index: 2, kind: input, shape index: {}]   ;;  %s1152_s3 = inlined_call_operand.vmem [shape: f32[1,128], index: 3, kind: input, shape index: {}]   ;;  %s1153_s4 = inlined_call_operand.vmem [shape: bf16[2,16,16,128], index: 4, kind: output, shape index: {}]  }
   0x1   :  { %s987_s17 = smov 0  }
   0x2 LB: > { %s26_s18 = sadd.s32 1, %s951_s16  ;;  %p738_p0 = scmp.ge.s32.totalorder %s955_s17, 1  ;;  %s955_s17 = sphi %s987_s17, %s14_s17   ;;  %s951_s16 = sphi %s985_s16, %s1155_s16   ;;  %s947_s15 = sphi %s983_s15, %s1154_s15  }
   0x3   : > { %p28_p1 = scmp.ge.s32.totalorder %s26_s18, 2  ;;  %p184_p2 = scmp.lt.s32.totalorder %s955_s17, 3 }
   0x5   : > { %s1157_s18 = smov (%p28_p1, %s26_s18), 0  ;;  %p185_p3 = pnand %p738_p0, %p184_p2 }
   0x6   : > { %p221_p4 = scmp.lt.s32.totalorder (!%p185_p3), %s947_s15, 1 }
   0x7   : > { %188 = sbr.rel (%p185_p3) target bundleno = 98 (0x62), region = 36 }
   0xc   : > { %v242_v0 = vld [vmem:[%s1150_s1] sm:$0x3]  ;;  %v957_v7 = vmov 1966171168   ;;  %v257_v9 = vlaneseq  ;;  %s1159_s15 = smov (!%p221_p4, %s947_s15), 1 }
   0xd   : > { %v243_v1 = vmul.f32 0.001953125, %v242_v0  ;;  %v255_v8 = vunpack.c.l.s4 %v957_v7  ;;  %s777_s21 = sshll.u32 %s1159_s15, 8  ;;  %v252_v16 = vld [vmem:[%s1151_s2] sm:$0x1]  ;;  %s778_s29 = sshll.u32 %s1159_s15, 7 }
   0xe   : > { %v258_v11 = vshrl.u32 %v257_v9, 7  ;;  %s1010_s24 = scalar_lea.vmem %s1149_s0, %s777_s21  ;;  %v271_v20 = vld [vmem:[%s1152_s3] sm:$0x1]  ;;  %s1062_s6 = scalar_lea.vmem %s1153_s4, %s778_s29 }
   0xf   : > { %v244_v2 = vmul.f32 %v243_v1, %v243_v1  ;;  %v256_v10 = vunpack.c.0.s8 %v255_v8  ;;  %v274_v21 = vld [vmem:[%s1010_s24] sm:$0xff]  ;;  %v275_v22 = vld [vmem:[%s1010_s24 + $0x8] sm:$0xff]  ;;  %v276_v23 = vld [vmem:[%s1010_s24 + $0x10] sm:$0xff] }
  0x10   : > { %v309_v18 = vsub.s32 0, %v258_v11  ;;  %v277_v24 = vld [vmem:[%s1010_s24 + $0x18] sm:$0xff]  ;;  %v278_v25 = vld [vmem:[%s1010_s24 + $0x20] sm:$0xff]  ;;  %v279_v28 = vld [vmem:[%s1010_s24 + $0x28] sm:$0xff] }
  0x11   : > { %v246_v3 = vrot.slane %v244_v2, 7  ;;  %v259_v12 = vsub.s32 %v256_v10, %v258_v11  ;;  %v280_v29 = vld [vmem:[%s1010_s24 + $0x30] sm:$0xff]  ;;  %v281_v30 = vld [vmem:[%s1010_s24 + $0x38] sm:$0xff]  ;;  %v282_v31 = vld [vmem:[%s1010_s24 + $0x40] sm:$0xff] }
  0x12   : > { %v283_v32 = vld [vmem:[%s1010_s24 + $0x48] sm:$0xff]  ;;  %v284_v33 = vld [vmem:[%s1010_s24 + $0x50] sm:$0xff]  ;;  %v285_v38 = vld [vmem:[%s1010_s24 + $0x58] sm:$0xff] }
  0x13   : > { %v248_v4 = vsub.f32 %v243_v1, %v246_v3  ;;  %v286_v39 = vld [vmem:[%s1010_s24 + $0x60] sm:$0xff]  ;;  %v287_v40 = vld [vmem:[%s1010_s24 + $0x68] sm:$0xff] }
  0x15   : > { %v249_v5 = vmax.f32 %v248_v4, 0.0 }
  0x17   : > { %v250_v6 = vadd.f32 1e-05, %v249_v5 }
  0x19   : > { %931 = vrsqrt.f32 %v250_v6 }
  0x26   : > { %v932_v13 = vpop.eup %931 }
  0x27   : > { %v260_v14 = vrot.slane %v932_v13, %v259_v12 }
  0x29   : > { %v261_v15 = vcombine.high %v260_v14, %v260_v14 }
  0x2b   : > { %v268_v17 = vrot.slane %v261_v15, %v259_v12 }
  0x2d   : > { %v270_v19 = vmul.f32 %v268_v17, %v252_v16 }
  0x2f   : > { %v272_v26 = vmul.f32 %v270_v19, %v243_v1  ;;  %v1023_v27 = vrot.slane %v270_v19, %v309_v18 }
  0x31   : > { %v273_v34 = vsub.f32 %v271_v20, %v272_v26  ;;  %v312_v35 = vmul.f32 %v1023_v27, %v274_v21  ;;  %v313_v36 = vmul.f32 %v1023_v27, %v275_v22  ;;  %v314_v37 = vmul.f32 %v1023_v27, %v276_v23  ;;  %v288_v23 = vld [vmem:[%s1010_s24 + $0x70] sm:$0xff] }
  0x32   : > { %v315_v41 = vmul.f32 %v1023_v27, %v277_v24  ;;  %v316_v42 = vmul.f32 %v1023_v27, %v278_v25  ;;  %v317_v43 = vmul.f32 %v1023_v27, %v279_v28  ;;  %v318_v44 = vmul.f32 %v1023_v27, %v280_v29 }
  0x33   : > { %v1041_v45 = vrot.slane %v273_v34, %v309_v18  ;;  %v319_v46 = vmul.f32 %v1023_v27, %v281_v30  ;;  %v320_v47 = vmul.f32 %v1023_v27, %v282_v31  ;;  %v321_v48 = vmul.f32 %v1023_v27, %v283_v32  ;;  %v289_v31 = vld [vmem:[%s1010_s24 + $0x78] sm:$0xff]  ;;  %v290_v32 = vld [vmem:[%s1010_s24 + $0x80] sm:$0xff] }
  0x34   : > { %v322_v49 = vmul.f32 %v1023_v27, %v284_v33  ;;  %v323_v50 = vmul.f32 %v1023_v27, %v285_v38  ;;  %v324_v51 = vmul.f32 %v1023_v27, %v286_v39  ;;  %v325_v52 = vmul.f32 %v1023_v27, %v287_v40  ;;  %v292_v38 = vld [vmem:[%s1010_s24 + $0x90] sm:$0xff]  ;;  %v293_v39 = vld [vmem:[%s1010_s24 + $0x98] sm:$0xff] }
  0x35   : > { %v350_v53 = vadd.f32 %v1041_v45, %v312_v35  ;;  %v351_v54 = vadd.f32 %v1041_v45, %v313_v36  ;;  %v352_v55 = vadd.f32 %v1041_v45, %v314_v37  ;;  %v353_v56 = vadd.f32 %v1041_v45, %v315_v41  ;;  %v291_v37 = vld [vmem:[%s1010_s24 + $0x88] sm:$0xff] }
  0x36   : > { %v354_v57 = vadd.f32 %v1041_v45, %v316_v42  ;;  %v355_v58 = vadd.f32 %v1041_v45, %v317_v43  ;;  %v356_v59 = vadd.f32 %v1041_v45, %v318_v44  ;;  %v357_v60 = vadd.f32 %v1041_v45, %v319_v46 }
  0x37   : > { %vm382_vm0 = vcmp.gt.f32.partialorder %v350_v53, 0.0  ;;  %vm383_vm1 = vcmp.gt.f32.partialorder %v351_v54, 0.0  ;;  %v414_v61 = vmul.f32 0.2, %v350_v53  ;;  %v415_v62 = vmul.f32 0.2, %v351_v54 }
  0x38   : > { %vm384_vm2 = vcmp.gt.f32.partialorder %v352_v55, 0.0  ;;  %vm385_vm3 = vcmp.gt.f32.partialorder %v353_v56, 0.0  ;;  %v416_v63 = vmul.f32 0.2, %v352_v55  ;;  %v417_v0 = vmul.f32 0.2, %v353_v56 }
  0x39   : > { %v446_v1 = vsel %vm382_vm0, %v350_v53, %v414_v61  ;;  %v447_v2 = vsel %vm383_vm1, %v351_v54, %v415_v62  ;;  %vm386_vm4 = vcmp.gt.f32.partialorder %v354_v57, 0.0  ;;  %vm387_vm5 = vcmp.gt.f32.partialorder %v355_v58, 0.0  ;;  %v294_v61 = vld [vmem:[%s1010_s24 + $0xa0] sm:$0xff]  ;;  %v295_v62 = vld [vmem:[%s1010_s24 + $0xa8] sm:$0xff] }
  0x3a   : > { %v814_v3 = vpack.c.bf16 %v447_v2, %v446_v1  ;;  %v448_v4 = vsel %vm384_vm2, %v352_v55, %v416_v63  ;;  %v449_v5 = vsel %vm385_vm3, %v353_v56, %v417_v0  ;;  %v418_v6 = vmul.f32 0.2, %v354_v57  ;;  %v296_v63 = vld [vmem:[%s1010_s24 + $0xb0] sm:$0xff] }
  0x3b   : > { %v819_v7 = vpack.c.bf16 %v449_v5, %v448_v4  ;;  %v419_v8 = vmul.f32 0.2, %v355_v58  ;;  %vm388_vm6 = vcmp.gt.f32.partialorder %v356_v59, 0.0  ;;  %vm389_vm7 = vcmp.gt.f32.partialorder %v357_v60, 0.0  ;;  %v297_v4 = vld [vmem:[%s1010_s24 + $0xb8] sm:$0xff]  ;;  %v298_v5 = vld [vmem:[%s1010_s24 + $0xc0] sm:$0xff] }
  0x3c   : > { %815 = vst [vmem:[%s1062_s6] sm:$0xff] %v814_v3   ;;  %v450_v9 = vsel %vm386_vm4, %v354_v57, %v418_v6  ;;  %v420_v10 = vmul.f32 0.2, %v356_v59  ;;  %v421_v11 = vmul.f32 0.2, %v357_v60  ;;  %v358_v12 = vadd.f32 %v1041_v45, %v320_v47 }
  0x3d   : > { %891 = vst [vmem:[%s1062_s6 + $0x8] sm:$0xff] %v819_v7   ;;  %v451_v13 = vsel %vm387_vm5, %v355_v58, %v419_v8  ;;  %v359_v14 = vadd.f32 %v1041_v45, %v321_v48  ;;  %v360_v15 = vadd.f32 %v1041_v45, %v322_v49  ;;  %v361_v16 = vadd.f32 %v1041_v45, %v323_v50 }
  0x3e   : > { %v824_v17 = vpack.c.bf16 %v451_v13, %v450_v9  ;;  %v452_v18 = vsel %vm388_vm6, %v356_v59, %v420_v10  ;;  %v453_v19 = vsel %vm389_vm7, %v357_v60, %v421_v11  ;;  %vm390_vm8 = vcmp.gt.f32.partialorder %v358_v12, 0.0  ;;  %v299_v10 = vld [vmem:[%s1010_s24 + $0xc8] sm:$0xff] }
  0x3f   : > { %v829_v20 = vpack.c.bf16 %v453_v19, %v452_v18  ;;  %vm391_vm9 = vcmp.gt.f32.partialorder %v359_v14, 0.0  ;;  %v422_v21 = vmul.f32 0.2, %v358_v12  ;;  %v423_v22 = vmul.f32 0.2, %v359_v14 }
  0x40   : > { %892 = vst [vmem:[%s1062_s6 + $0x10] sm:$0xff] %v824_v17   ;;  %vm392_vm10 = vcmp.gt.f32.partialorder %v360_v15, 0.0  ;;  %vm393_vm11 = vcmp.gt.f32.partialorder %v361_v16, 0.0  ;;  %v424_v24 = vmul.f32 0.2, %v360_v15  ;;  %v362_v29 = vadd.f32 %v1041_v45, %v324_v51 }
  0x41   : > { %v425_v25 = vmul.f32 0.2, %v361_v16  ;;  %893 = vst [vmem:[%s1062_s6 + $0x18] sm:$0xff] %v829_v20   ;;  %v454_v26 = vsel %vm390_vm8, %v358_v12, %v422_v21  ;;  %v455_v28 = vsel %vm391_vm9, %v359_v14, %v423_v22  ;;  %v363_v30 = vadd.f32 %v1041_v45, %v325_v52 }
  0x42   : > { %v834_v33 = vpack.c.bf16 %v455_v28, %v454_v26  ;;  %v456_v34 = vsel %vm392_vm10, %v360_v15, %v424_v24  ;;  %v326_v36 = vmul.f32 %v1023_v27, %v288_v23  ;;  %vm394_vm12 = vcmp.gt.f32.partialorder %v362_v29, 0.0  ;;  %v300_v15 = vld [vmem:[%s1010_s24 + $0xd0] sm:$0xff]  ;;  %v301_v28 = vld [vmem:[%s1010_s24 + $0xd8] sm:$0xff] }
  0x43   : > { %v457_v35 = vsel %vm393_vm11, %v361_v16, %v425_v25  ;;  %vm395_vm13 = vcmp.gt.f32.partialorder %v363_v30, 0.0  ;;  %v426_v41 = vmul.f32 0.2, %v362_v29  ;;  %v427_v42 = vmul.f32 0.2, %v363_v30 }
  0x44   : > { %v839_v40 = vpack.c.bf16 %v457_v35, %v456_v34  ;;  %894 = vst [vmem:[%s1062_s6 + $0x20] sm:$0xff] %v834_v33   ;;  %v327_v43 = vmul.f32 %v1023_v27, %v289_v31  ;;  %v364_v44 = vadd.f32 %v1041_v45, %v326_v36  ;;  %v328_v46 = vmul.f32 %v1023_v27, %v290_v32 }
  0x45   : > { %v458_v47 = vsel %vm394_vm12, %v362_v29, %v426_v41  ;;  %v329_v48 = vmul.f32 %v1023_v27, %v291_v37  ;;  %v330_v49 = vmul.f32 %v1023_v27, %v292_v38  ;;  %v331_v50 = vmul.f32 %v1023_v27, %v293_v39  ;;  %v302_v37 = vld [vmem:[%s1010_s24 + $0xe0] sm:$0xff]  ;;  %v303_v38 = vld [vmem:[%s1010_s24 + $0xe8] sm:$0xff] }
  0x46   : > { %895 = vst [vmem:[%s1062_s6 + $0x28] sm:$0xff] %v839_v40   ;;  %v459_v51 = vsel %vm395_vm13, %v363_v30, %v427_v42  ;;  %v365_v52 = vadd.f32 %v1041_v45, %v327_v43  ;;  %vm396_vm14 = vcmp.gt.f32.partialorder %v364_v44, 0.0  ;;  %v428_v53 = vmul.f32 0.2, %v364_v44  ;;  %v304_v43 = vld [vmem:[%s1010_s24 + $0xf0] sm:$0xff] }
  0x47   : > { %v844_v54 = vpack.c.bf16 %v459_v51, %v458_v47  ;;  %v366_v55 = vadd.f32 %v1041_v45, %v328_v46  ;;  %v367_v56 = vadd.f32 %v1041_v45, %v329_v48  ;;  %v368_v57 = vadd.f32 %v1041_v45, %v330_v49 }
  0x48   : > { %vm397_vm15 = vcmp.gt.f32.partialorder %v365_v52, 0.0  ;;  %v429_v58 = vmul.f32 0.2, %v365_v52  ;;  %v460_v59 = vsel %vm396_vm14, %v364_v44, %v428_v53  ;;  %v369_v60 = vadd.f32 %v1041_v45, %v331_v50  ;;  %v305_v44 = vld [vmem:[%s1010_s24 + $0xf8] sm:$0xff] }
  0x49   : > { %896 = vst [vmem:[%s1062_s6 + $0x30] sm:$0xff] %v844_v54   ;;  %vm398_vm0 = vcmp.gt.f32.partialorder %v366_v55, 0.0  ;;  %vm399_vm1 = vcmp.gt.f32.partialorder %v367_v56, 0.0  ;;  %v430_v0 = vmul.f32 0.2, %v366_v55  ;;  %vm400_vm2 = vcmp.gt.f32.partialorder %v368_v57, 0.0 }
  0x4a   : > { %v431_v1 = vmul.f32 0.2, %v367_v56  ;;  %v461_v2 = vsel %vm397_vm15, %v365_v52, %v429_v58  ;;  %vm401_vm3 = vcmp.gt.f32.partialorder %v369_v60, 0.0  ;;  %v432_v3 = vmul.f32 0.2, %v368_v57 }
  0x4b   : > { %v849_v6 = vpack.c.bf16 %v461_v2, %v460_v59  ;;  %v462_v7 = vsel %vm398_vm0, %v366_v55, %v430_v0  ;;  %v433_v9 = vmul.f32 0.2, %v369_v60  ;;  %v332_v13 = vmul.f32 %v1023_v27, %v294_v61 }
  0x4c   : > { %v463_v8 = vsel %vm399_vm1, %v367_v56, %v431_v1  ;;  %v464_v12 = vsel %vm400_vm2, %v368_v57, %v432_v3  ;;  %v333_v14 = vmul.f32 %v1023_v27, %v295_v62  ;;  %v334_v17 = vmul.f32 %v1023_v27, %v296_v63 }
  0x4d   : > { %v854_v11 = vpack.c.bf16 %v463_v8, %v462_v7  ;;  %897 = vst [vmem:[%s1062_s6 + $0x38] sm:$0xff] %v849_v6   ;;  %v465_v16 = vsel %vm401_vm3, %v369_v60, %v433_v9  ;;  %v335_v18 = vmul.f32 %v1023_v27, %v297_v4  ;;  %v336_v19 = vmul.f32 %v1023_v27, %v298_v5 }
  0x4e   : > { %v859_v20 = vpack.c.bf16 %v465_v16, %v464_v12  ;;  %v370_v21 = vadd.f32 %v1041_v45, %v332_v13  ;;  %v371_v22 = vadd.f32 %v1041_v45, %v333_v14  ;;  %v337_v23 = vmul.f32 %v1023_v27, %v299_v10 }
  0x4f   : > { %898 = vst [vmem:[%s1062_s6 + $0x40] sm:$0xff] %v854_v11   ;;  %v372_v24 = vadd.f32 %v1041_v45, %v334_v17  ;;  %v373_v25 = vadd.f32 %v1041_v45, %v335_v18  ;;  %v374_v26 = vadd.f32 %v1041_v45, %v336_v19  ;;  %v338_v29 = vmul.f32 %v1023_v27, %v300_v15 }
  0x50   : > { %899 = vst [vmem:[%s1062_s6 + $0x48] sm:$0xff] %v859_v20   ;;  %vm402_vm4 = vcmp.gt.f32.partialorder %v370_v21, 0.0  ;;  %vm403_vm5 = vcmp.gt.f32.partialorder %v371_v22, 0.0  ;;  %v434_v30 = vmul.f32 0.2, %v370_v21  ;;  %v375_v36 = vadd.f32 %v1041_v45, %v337_v23 }
  0x51   : > { %v435_v31 = vmul.f32 0.2, %v371_v22  ;;  %vm404_vm6 = vcmp.gt.f32.partialorder %v372_v24, 0.0  ;;  %vm405_vm7 = vcmp.gt.f32.partialorder %v373_v25, 0.0  ;;  %v436_v32 = vmul.f32 0.2, %v372_v24 }
  0x52   : > { %v437_v33 = vmul.f32 0.2, %v373_v25  ;;  %v466_v34 = vsel %vm402_vm4, %v370_v21, %v434_v30  ;;  %vm406_vm8 = vcmp.gt.f32.partialorder %v374_v26, 0.0  ;;  %v438_v42 = vmul.f32 0.2, %v374_v26 }
  0x53   : > { %v467_v35 = vsel %vm403_vm5, %v371_v22, %v435_v31  ;;  %v468_v40 = vsel %vm404_vm6, %v372_v24, %v436_v32  ;;  %vm407_vm9 = vcmp.gt.f32.partialorder %v375_v36, 0.0  ;;  %v439_v47 = vmul.f32 0.2, %v375_v36 }
  0x54   : > { %v864_v39 = vpack.c.bf16 %v467_v35, %v466_v34  ;;  %v469_v41 = vsel %vm405_vm7, %v373_v25, %v437_v33  ;;  %v339_v48 = vmul.f32 %v1023_v27, %v301_v28  ;;  %v470_v49 = vsel %vm406_vm8, %v374_v26, %v438_v42 }
  0x55   : > { %v869_v46 = vpack.c.bf16 %v469_v41, %v468_v40  ;;  %v376_v50 = vadd.f32 %v1041_v45, %v338_v29  ;;  %v340_v51 = vmul.f32 %v1023_v27, %v302_v37  ;;  %v341_v52 = vmul.f32 %v1023_v27, %v303_v38 }
  0x56   : > { %900 = vst [vmem:[%s1062_s6 + $0x50] sm:$0xff] %v864_v39   ;;  %v471_v53 = vsel %vm407_vm9, %v375_v36, %v439_v47  ;;  %v377_v54 = vadd.f32 %v1041_v45, %v339_v48  ;;  %v342_v55 = vmul.f32 %v1023_v27, %v304_v43  ;;  %v343_v56 = vmul.f32 %v1023_v27, %v305_v44 }
  0x57   : > { %901 = vst [vmem:[%s1062_s6 + $0x58] sm:$0xff] %v869_v46   ;;  %v874_v57 = vpack.c.bf16 %v471_v53, %v470_v49  ;;  %vm408_vm10 = vcmp.gt.f32.partialorder %v376_v50, 0.0  ;;  %v440_v58 = vmul.f32 0.2, %v376_v50  ;;  %v378_v59 = vadd.f32 %v1041_v45, %v340_v51 }
  0x58   : > { %vm409_vm11 = vcmp.gt.f32.partialorder %v377_v54, 0.0  ;;  %v441_v60 = vmul.f32 0.2, %v377_v54  ;;  %v379_v61 = vadd.f32 %v1041_v45, %v341_v52  ;;  %v380_v62 = vadd.f32 %v1041_v45, %v342_v55 }
  0x59   : > { %902 = vst [vmem:[%s1062_s6 + $0x60] sm:$0xff] %v874_v57   ;;  %v472_v63 = vsel %vm408_vm10, %v376_v50, %v440_v58  ;;  %vm410_vm12 = vcmp.gt.f32.partialorder %v378_v59, 0.0  ;;  %v442_v0 = vmul.f32 0.2, %v378_v59  ;;  %v381_v1 = vadd.f32 %v1041_v45, %v343_v56 }
  0x5a   : > { %v473_v27 = vsel %vm409_vm11, %v377_v54, %v441_v60  ;;  %vm411_vm13 = vcmp.gt.f32.partialorder %v379_v61, 0.0  ;;  %v443_v2 = vmul.f32 0.2, %v379_v61  ;;  %vm412_vm14 = vcmp.gt.f32.partialorder %v380_v62, 0.0 }
  0x5b   : > { %v879_v3 = vpack.c.bf16 %v473_v27, %v472_v63  ;;  %v474_v4 = vsel %vm410_vm12, %v378_v59, %v442_v0  ;;  %vm413_vm15 = vcmp.gt.f32.partialorder %v381_v1, 0.0  ;;  %v444_v5 = vmul.f32 0.2, %v380_v62 }
  0x5c   : > { %v475_v6 = vsel %vm411_vm13, %v379_v61, %v443_v2  ;;  %v445_v7 = vmul.f32 0.2, %v381_v1 }
  0x5d   : > { %903 = vst [vmem:[%s1062_s6 + $0x68] sm:$0xff] %v879_v3   ;;  %v884_v8 = vpack.c.bf16 %v475_v6, %v474_v4  ;;  %v476_v9 = vsel %vm412_vm14, %v380_v62, %v444_v5 }
  0x5e   : > { %v477_v10 = vsel %vm413_vm15, %v381_v1, %v445_v7 }
  0x5f   : > { %904 = vst [vmem:[%s1062_s6 + $0x70] sm:$0xff] %v884_v8   ;;  %v889_v11 = vpack.c.bf16 %v477_v10, %v476_v9 }
  0x61   : > { %905 = vst [vmem:[%s1062_s6 + $0x78] sm:$0xff] %v889_v11  }
  0x62 PF: > { %s14_s17 = sadd.s32 1, %s955_s17   ;;  %s1154_s15 = smov %s951_s16 }
  0x63   : > { %p11_p5 = scmp.ge.s32.totalorder %s14_s17, 4   ;;  %s1155_s16 = smov %s1157_s18 }
  0x65   :  { %13 = sbr.rel (!%p11_p5) target bundleno = 2 (0x2), region = 66 }

// kernel: seg_encoder_forward.5
= control target key start
LH: loop header
LB: loop body
LE: loop exit
PB: predicated region body
PF: predicated region fallthrough
CT: control target
= control target key end

     0   :  { %s6608_s21 = smov 0   ;;  %s6610_s22 = smov 0   ;;  %s9746_s0 = inlined_call_operand.vmem [shape: bf16[2,16,18,128], index: 0, kind: input, shape index: {}]   ;;  %s9747_s1 = inlined_call_operand.vmem [shape: bf16[2,16,18,128], index: 1, kind: input, shape index: {}]   ;;  %s9748_s2 = inlined_call_operand.vmem [shape: bf16[2,16,18,128], index: 2, kind: input, shape index: {}]   ;;  %s9749_s3 = inlined_call_operand.vmem [shape: bf16[9,128,128], index: 3, kind: input, shape index: {}]   ;;  %s9750_s4 = inlined_call_operand.vmem [shape: f32[1,128], index: 4, kind: input, shape index: {}]   ;;  %s9751_s5 = inlined_call_operand.vmem [shape: f32[2,16,16,128], index: 5, kind: output, shape index: {0}]   ;;  %s9752_s6 = inlined_call_operand.vmem [shape: f32[2,128], index: 6, kind: output, shape index: {1}]  }
   0x1   :  { %s6612_s23 = smov 0  }
   0x2 LB: > { %s29_s24 = sadd.s32 1, %s6566_s22  ;;  %p5325_p0 = scmp.ge.s32.totalorder %s6570_s23, 1  ;;  %s6570_s23 = sphi %s6612_s23, %s17_s23   ;;  %s6566_s22 = sphi %s6610_s22, %s10208_s22   ;;  %s6562_s21 = sphi %s6608_s21, %s10207_s21  }
   0x3   : > { %p31_p1 = scmp.ge.s32.totalorder %s29_s24, 2  ;;  %p268_p2 = scmp.lt.s32.totalorder %s6570_s23, 3 }
   0x5   : > { %s10210_s24 = smov (%p31_p1, %s29_s24), 0  ;;  %p269_p3 = pnand %p5325_p0, %p268_p2 }
   0x7   : > { %272 = sbr.rel (%p269_p3) target bundleno = 644 (0x284), region = 40 }
   0xc   : > { %v6419_v0 = vld [vmem:[%s9749_s3 + $0x78] sm:$0xff]   ;;  %p329_p4 = scmp.lt.s32.totalorder %s6562_s21, 1  ;;  %v6420_v1 = vld [vmem:[%s9749_s3 + $0x70] sm:$0xff]   ;;  %v6421_v2 = vld [vmem:[%s9749_s3 + $0x68] sm:$0xff]   ;;  %vm437_vm0 = vsmask.f32 3328 }
   0xd   : > { %5945 = vmatprep.subr.bf16.mxu0 %v6419_v0  ;;  %6377 = vmatprep.subr.bf16.mxu1 %v6419_v0  ;;  %v6422_v3 = vld [vmem:[%s9749_s3 + $0x60] sm:$0xff]   ;;  %vm438_vm1 = vsmask.f32 7440  ;;  %v6423_v17 = vld [vmem:[%s9749_s3 + $0x58] sm:$0xff]   ;;  %v9817_v27 = vmov 0  ;;  %v6424_v33 = vld [vmem:[%s9749_s3 + $0x50] sm:$0xff]  }
   0xe   : > { %s6636_s29 = scalar_select %p329_p4, %s6562_s21, 1  ;;  %5946 = vmatpush3.bf16.msra.mxu0 %v6419_v0  ;;  %6385 = vmatpush3.bf16.msra.mxu1 %v6419_v0  ;;  %vm6679_vm2 = vmor %vm437_vm0, %vm438_vm1  ;;  %v6425_v58 = vld [vmem:[%s9749_s3 + $0x48] sm:$0xff]   ;;  %vm1435_vm3 = vcmask 1042432   ;;  %vm1436_vm4 = vcmask 1046532  }
   0xf   : > { %5947 = vmatprep.subr.bf16.mxu0 %v6420_v1  ;;  %6378 = vmatprep.subr.bf16.mxu1 %v6420_v1  ;;  %v9818_v27 = vsel %vm6679_vm2, 4294967295, %v9817_v27  ;;  %vm6988_vm5 = vmor %vm1435_vm3, %vm1436_vm4  ;;  %p5059_p5 = scmp.eq.s32.totalorder %s6562_s21, 0 }
  0x10   : > { %s6642_s8 = smul.u32 192, %s6636_s29  ;;  %9819 = vst [vmem:[#allocation2_spill] sm:$0xff] %v9818_v27 }
  0x12   : > { %s6648_s11 = scalar_lea.vmem %s9746_s0, %s6642_s8  ;;  %5948 = vmatpush3.bf16.msra.mxu0 %v6420_v1  ;;  %6386 = vmatpush3.bf16.msra.mxu1 %v6420_v1  ;;  %s7201_s12 = scalar_lea.vmem %s9747_s1, %s6642_s8 }
  0x13   : > { %5949 = vmatprep.subr.bf16.mxu0 %v6421_v2  ;;  %6379 = vmatprep.subr.bf16.mxu1 %v6421_v2  ;;  %v6654_v4 = vld [vmem:[%s6648_s11] sm:$0xf]  ;;  %v6657_v5 = vld [vmem:[%s6648_s11 + $0x4] sm:$0xf]  ;;  %v6660_v6 = vld [vmem:[%s6648_s11 + $0x8] sm:$0x1]  ;;  %s7840_s28 = scalar_lea.vmem %s9748_s2, %s6642_s8 }
  0x14   : > { %v441_v7 = vshrl.u32 %v6654_v4, 16  ;;  %v444_v8 = vshll.u32 %v6654_v4, 16  ;;  %v450_v9 = vshll.u32 %v6657_v5, 16  ;;  %v454_v10 = vshrl.u32 %v6657_v5, 16  ;;  %v397_v12 = vld [vmem:[%s6648_s11 + $0x60] sm:$0xf] }
  0x15   : > { %v460_v11 = vshll.u32 %v6660_v6, 16  ;;  %v398_v15 = vld [vmem:[%s6648_s11 + $0x64] sm:$0xf]  ;;  %v399_v16 = vld [vmem:[%s6648_s11 + $0x68] sm:$0x1]  ;;  %v633_v21 = vshrl.u32 %v397_v12, 16 }
  0x16   : > { %5950 = vmatpush3.bf16.msra.mxu0 %v6421_v2  ;;  %6387 = vmatpush3.bf16.msra.mxu1 %v6421_v2  ;;  %v443_v13 = vrot.slane %v441_v7, 4  ;;  %v446_v14 = vrot.slane %v444_v8, 5  ;;  %v452_v18 = vrot.slane %v450_v9, 5  ;;  %v456_v19 = vrot.slane %v454_v10, 4  ;;  %v6675_v26 = vld [vmem:[%s6648_s11 + $0xc] sm:$0xf] }
  0x17   : > { %5951 = vmatprep.subr.bf16.mxu0 %v6422_v3  ;;  %6380 = vmatprep.subr.bf16.mxu1 %v6422_v3  ;;  %v636_v23 = vshll.u32 %v397_v12, 16  ;;  %v642_v24 = vshll.u32 %v398_v15, 16  ;;  %v646_v25 = vshrl.u32 %v398_v15, 16  ;;  %v462_v29 = vrot.slane %v460_v11, 5  ;;  %v6684_v32 = vld [vmem:[%s6648_s11 + $0x10] sm:$0xf] }
  0x18   : > { %v447_v22 = vor.u32 %v446_v14, %v443_v13  ;;  %v457_v28 = vor.u32 %v456_v19, %v452_v18  ;;  %v635_v30 = vrot.slane %v633_v21, 4  ;;  %v652_v31 = vshll.u32 %v399_v16, 16  ;;  %v6690_v40 = vld [vmem:[%s6648_s11 + $0x14] sm:$0x1]  ;;  %v400_v47 = vld [vmem:[%s6648_s11 + $0x6c] sm:$0xf] }
  0x19   : > { %v638_v35 = vrot.slane %v636_v23, 5  ;;  %v644_v36 = vrot.slane %v642_v24, 5  ;;  %v648_v37 = vrot.slane %v646_v25, 4  ;;  %v465_v41 = vshrl.u32 %v6675_v26, 16  ;;  %v401_v52 = vld [vmem:[%s6648_s11 + $0x70] sm:$0xf] }
  0x1a   : > { %5952 = vmatpush3.bf16.msra.mxu0 %v6422_v3  ;;  %6388 = vmatpush3.bf16.msra.mxu1 %v6422_v3  ;;  %v448_v34 = vrot.slane %v447_v22, 4  ;;  %v458_v38 = vrot.slane %v457_v28, 4  ;;  %v654_v39 = vrot.slane %v652_v31, 5  ;;  %v468_v42 = vshll.u32 %v6675_v26, 16  ;;  %v402_v57 = vld [vmem:[%s6648_s11 + $0x74] sm:$0x1] }
  0x1b   : > { %5953 = vmatprep.subr.bf16.mxu0 %v6423_v17  ;;  %6381 = vmatprep.subr.bf16.mxu1 %v6423_v17  ;;  %v639_v44 = vor.u32 %v638_v35, %v635_v30  ;;  %v649_v45 = vor.u32 %v648_v37, %v644_v36  ;;  %v474_v46 = vshll.u32 %v6684_v32, 16  ;;  %v467_v49 = vrot.slane %v465_v41, 4  ;;  %v6713_v14 = vld [vmem:[%s6648_s11 + $0x18] sm:$0xf]  ;;  %v6426_v15 = vld [vmem:[%s9749_s3 + $0x40] sm:$0xff]  }
  0x1c   : > { %v453_v43 = vsel %vm6679_vm2, %v448_v34, %v452_v18  ;;  %v463_v48 = vsel %vm6679_vm2, %v458_v38, %v462_v29  ;;  %v470_v50 = vrot.slane %v468_v42, 5  ;;  %v478_v51 = vshrl.u32 %v6684_v32, 16  ;;  %v6721_v19 = vld [vmem:[%s6648_s11 + $0x1c] sm:$0xf]  ;;  %v6726_v25 = vld [vmem:[%s6648_s11 + $0x20] sm:$0x1] }
  0x1d   : > { %v5347_v53 = vcombine.low %v453_v43, %v463_v48  ;;  %v640_v54 = vrot.slane %v639_v44, 4  ;;  %v650_v55 = vrot.slane %v649_v45, 4  ;;  %v476_v56 = vrot.slane %v474_v46, 5  ;;  %v403_v34 = vld [vmem:[%s6648_s11 + $0x78] sm:$0xf] }
  0x1e   : > { %5954 = vmatpush3.bf16.msra.mxu0 %v6423_v17  ;;  %6389 = vmatpush3.bf16.msra.mxu1 %v6423_v17  ;;  %v471_v59 = vor.u32 %v470_v50, %v467_v49  ;;  %v480_v60 = vrot.slane %v478_v51, 4  ;;  %v484_v61 = vshll.u32 %v6690_v40, 16  ;;  %v657_v1 = vshrl.u32 %v400_v47, 16  ;;  %v6427_v41 = vld [vmem:[%s9749_s3 + $0x38] sm:$0xff]   ;;  %v405_v49 = vld [vmem:[%s6648_s11 + $0x80] sm:$0x1] }
  0x1f   : > { %5955 = vmatprep.subr.bf16.mxu0 %v6424_v33  ;;  %6382 = vmatprep.subr.bf16.mxu1 %v6424_v33  ;;  %v645_v63 = vsel %vm6679_vm2, %v640_v54, %v644_v36  ;;  %v655_v0 = vsel %vm6679_vm2, %v650_v55, %v654_v39  ;;  %v660_v2 = vshll.u32 %v400_v47, 16  ;;  %v666_v12 = vshll.u32 %v401_v52, 16  ;;  %v6735_v39 = vld [vmem:[%s6648_s11 + $0x7c] sm:$0xf] }
  0x20   : > { %5961 = vmatprep.mubr.bf16.mxu0 %v5347_v53  ;;  %v5355_v3 = vcombine.low %v645_v63, %v655_v0  ;;  %v472_v7 = vrot.slane %v471_v59, 4  ;;  %v481_v8 = vor.u32 %v480_v60, %v476_v56  ;;  %v486_v9 = vrot.slane %v484_v61, 5  ;;  %v6428_v42 = vld [vmem:[%s9749_s3 + $0xb8] sm:$0xff]   ;;  %v6430_v59 = vld [vmem:[%s9749_s3 + $0xb0] sm:$0xff]   ;;  %v6762_v0 = vld [vmem:[%s6648_s11 + $0x28] sm:$0xf] }
  0x21   : > { %v659_v10 = vrot.slane %v657_v1, 4  ;;  %v662_v11 = vrot.slane %v660_v2, 5  ;;  %v670_v13 = vshrl.u32 %v401_v52, 16  ;;  %v676_v18 = vshll.u32 %v402_v57, 16  ;;  %v6429_v52 = vld [vmem:[%s9749_s3 + $0x30] sm:$0xff]  }
  0x22   : > { %5956 = vmatpush3.bf16.msra.mxu0 %v6424_v33  ;;  %6390 = vmatpush3.bf16.msra.mxu1 %v6424_v33  ;;  %v477_v16 = vsel %vm6679_vm2, %v472_v7, %v476_v56  ;;  %v482_v17 = vrot.slane %v481_v8, 4  ;;  %v668_v23 = vrot.slane %v666_v12, 5  ;;  %v489_v28 = vshrl.u32 %v6713_v14, 16  ;;  %v6753_v57 = vld [vmem:[%s6648_s11 + $0x24] sm:$0xf] }
  0x23   : > { %5957 = vmatprep.subr.bf16.mxu0 %v6425_v58  ;;  %6383 = vmatprep.subr.bf16.mxu1 %v6425_v58  ;;  %v663_v22 = vor.u32 %v662_v11, %v659_v10  ;;  %v672_v24 = vrot.slane %v670_v13, 4  ;;  %v678_v30 = vrot.slane %v676_v18, 5  ;;  %v492_v31 = vshll.u32 %v6713_v14, 16  ;;  %v6765_v8 = vld [vmem:[%s6648_s11 + $0x2c] sm:$0x1] }
  0x24   : > { %5977 = vmatprep.mubr.bf16.mxu1 %v5355_v3  ;;  %v487_v29 = vsel %vm6679_vm2, %v482_v17, %v486_v9  ;;  %v498_v33 = vshll.u32 %v6721_v19, 16  ;;  %v491_v38 = vrot.slane %v489_v28, 4  ;;  %v502_v45 = vshrl.u32 %v6721_v19, 16  ;;  %v6769_v13 = vld [vmem:[%s6648_s11 + $0x84] sm:$0xf] }
  0x25   : > { %v5348_v35 = vcombine.low %v477_v16, %v487_v29  ;;  %v664_v36 = vrot.slane %v663_v22, 4  ;;  %v673_v37 = vor.u32 %v672_v24, %v668_v23  ;;  %v494_v43 = vrot.slane %v492_v31, 5  ;;  %v6776_v22 = vld [vmem:[%s6648_s11 + $0x88] sm:$0xf]  ;;  %v6974_v20 = vld [vmem:[%s6648_s11 + $0xbc] sm:$0x1] }
  0x26   : > { %5958 = vmatpush3.bf16.msra.mxu0 %v6425_v58  ;;  %6391 = vmatpush3.bf16.msra.mxu1 %v6425_v58  ;;  %v500_v44 = vrot.slane %v498_v33, 5  ;;  %v508_v46 = vshll.u32 %v6726_v25, 16  ;;  %v681_v50 = vshrl.u32 %v403_v34, 16  ;;  %v684_v51 = vshll.u32 %v403_v34, 16  ;;  %9821 = vst [vmem:[#allocation4_spill] sm:$0xff] %v6974_v20 }
  0x27   : > { %5959 = vmatprep.subr.bf16.mxu0 %v6426_v15  ;;  %6384 = vmatprep.subr.bf16.mxu1 %v6426_v15  ;;  %v669_v47 = vsel %vm6679_vm2, %v664_v36, %v668_v23  ;;  %v674_v48 = vrot.slane %v673_v37, 4  ;;  %v495_v53 = vor.u32 %v494_v43, %v491_v38  ;;  %v504_v54 = vrot.slane %v502_v45, 4  ;;  %v6785_v36 = vld [vmem:[%s6648_s11 + $0x8c] sm:$0x1] }
  0x28   : > { %v510_v55 = vrot.slane %v508_v46, 5  ;;  %v690_v56 = vshll.u32 %v6735_v39, 16  ;;  %v683_v60 = vrot.slane %v681_v50, 4  ;;  %v686_v61 = vrot.slane %v684_v51, 5  ;;  %v6432_v37 = vld [vmem:[%s9749_s3 + $0xa8] sm:$0xff]  }
  0x29   : > { %v679_v58 = vsel %vm6679_vm2, %v674_v48, %v678_v30  ;;  %v694_v63 = vshrl.u32 %v6735_v39, 16  ;;  %v496_v2 = vrot.slane %v495_v53, 4  ;;  %v505_v3 = vor.u32 %v504_v54, %v500_v44  ;;  %v6431_v30 = vld [vmem:[%s9749_s3 + $0x28] sm:$0xff]   ;;  %v6800_v53 = vld [vmem:[%s6648_s11 + $0x30] sm:$0xf] }
  0x2a   : > { %5960 = vmatpush3.bf16.msra.mxu0 %v6426_v15  ;;  %6392 = vmatpush3.bf16.msra.mxu1 %v6426_v15  ;;  %v5356_v1 = vcombine.low %v669_v47, %v679_v58  ;;  %v692_v7 = vrot.slane %v690_v56, 5  ;;  %v687_v9 = vor.u32 %v686_v61, %v683_v60  ;;  %v700_v11 = vshll.u32 %v405_v49, 16  ;;  %v6809_v60 = vld [vmem:[%s6648_s11 + $0x34] sm:$0xf] }
  0x2b   : > { %5993 = vmatprep.subr.bf16.mxu1 %v6427_v41  ;;  %6041 = vmatprep.subr.bf16.mxu0 %v6428_v42  ;;  %v696_v10 = vrot.slane %v694_v63, 4  ;;  %v513_v12 = vshrl.u32 %v6753_v57, 16  ;;  %v501_v15 = vsel %vm6679_vm2, %v496_v2, %v500_v44  ;;  %v506_v16 = vrot.slane %v505_v3, 4 }
  0x2c   : > { %v516_v17 = vshll.u32 %v6753_v57, 16  ;;  %v522_v18 = vshll.u32 %v6762_v0, 16  ;;  %v688_v23 = vrot.slane %v687_v9, 4  ;;  %v702_v28 = vrot.slane %v700_v11, 5 }
  0x2d   : > { %5962 = vmatmul.mubr.bf16.vlgmr.msra.gmra.mxu0 %v5348_v35  ;;  %5978 = vmatmul.mubr.bf16.vlgmr.msra.gmra.mxu1 %v5356_v1  ;;  %v697_v24 = vor.u32 %v696_v10, %v692_v7  ;;  %v515_v29 = vrot.slane %v513_v12, 4  ;;  %v511_v31 = vsel %vm6679_vm2, %v506_v16, %v510_v55  ;;  %v526_v35 = vshrl.u32 %v6762_v0, 16  ;;  %v6817_v16 = vld [vmem:[%s6648_s11 + $0x38] sm:$0x1] }
  0x2e   : > { %5994 = vmatpush3.bf16.msra.mxu1 %v6427_v41  ;;  %6042 = vmatpush3.bf16.msra.mxu0 %v6428_v42  ;;  %v518_v33 = vrot.slane %v516_v17, 5  ;;  %v524_v34 = vrot.slane %v522_v18, 5  ;;  %v5349_v38 = vcombine.low %v501_v15, %v511_v31  ;;  %v693_v41 = vsel %vm6679_vm2, %v688_v23, %v692_v7  ;;  %v6821_v18 = vld [vmem:[%s6648_s11 + $0x90] sm:$0xf]  ;;  %v6827_v31 = vld [vmem:[%s6648_s11 + $0x94] sm:$0xf] }
  0x2f   : > { %5995 = vmatprep.subr.bf16.mxu1 %v6429_v52  ;;  %6043 = vmatprep.subr.bf16.mxu0 %v6430_v59  ;;  %v698_v42 = vrot.slane %v697_v24, 4  ;;  %v532_v43 = vshll.u32 %v6765_v8, 16  ;;  %v528_v45 = vrot.slane %v526_v35, 4  ;;  %v705_v46 = vshrl.u32 %v6769_v13, 16 }
  0x30   : > { %v519_v44 = vor.u32 %v518_v33, %v515_v29  ;;  %v708_v47 = vshll.u32 %v6769_v13, 16  ;;  %v714_v50 = vshll.u32 %v6776_v22, 16  ;;  %v718_v51 = vshrl.u32 %v6776_v22, 16  ;;  %5965 = vmatprep.mubr.bf16.mxu0 %v5349_v38  ;;  %v6436_v38 = vld [vmem:[%s9749_s3 + $0x98] sm:$0xff]  }
  0x31   : > { %v703_v48 = vsel %vm6679_vm2, %v698_v42, %v702_v28  ;;  %v534_v49 = vrot.slane %v532_v43, 5  ;;  %v529_v56 = vor.u32 %v528_v45, %v524_v34  ;;  %v707_v58 = vrot.slane %v705_v46, 4  ;;  %v6437_v46 = vld [vmem:[%s9749_s3 + $0x10] sm:$0xff]  }
  0x32   : > { %5996 = vmatpush3.bf16.msra.mxu1 %v6429_v52  ;;  %6044 = vmatpush3.bf16.msra.mxu0 %v6430_v59  ;;  %v5357_v54 = vcombine.low %v693_v41, %v703_v48  ;;  %v520_v55 = vrot.slane %v519_v44, 4  ;;  %v6433_v52 = vld [vmem:[%s9749_s3 + $0x20] sm:$0xff]   ;;  %v710_v61 = vrot.slane %v708_v47, 5  ;;  %v716_v63 = vrot.slane %v714_v50, 5  ;;  %v6837_v44 = vld [vmem:[%s6648_s11 + $0x98] sm:$0x1] }
  0x33   : > { %5997 = vmatprep.subr.bf16.mxu1 %v6431_v30  ;;  %v6434_v59 = vld [vmem:[%s9749_s3 + $0xa0] sm:$0xff]   ;;  %v720_v1 = vrot.slane %v718_v51, 4  ;;  %v724_v2 = vshll.u32 %v6785_v36, 16  ;;  %6045 = vmatprep.subr.bf16.mxu0 %v6432_v37  ;;  %v530_v7 = vrot.slane %v529_v56, 4  ;;  %v537_v9 = vshrl.u32 %v6800_v53, 16 }
  0x34   : > { %5981 = vmatprep.mubr.bf16.mxu1 %v5357_v54  ;;  %v525_v3 = vsel %vm6679_vm2, %v520_v55, %v524_v34  ;;  %v540_v10 = vshll.u32 %v6800_v53, 16  ;;  %v711_v11 = vor.u32 %v710_v61, %v707_v58  ;;  %v546_v17 = vshll.u32 %v6809_v60, 16  ;;  %v6850_v51 = vld [vmem:[%s6648_s11 + $0x3c] sm:$0xf]  ;;  %v6853_v54 = vld [vmem:[%s6648_s11 + $0x40] sm:$0xf] }
  0x35   : > { %v721_v12 = vor.u32 %v720_v1, %v716_v63  ;;  %v726_v15 = vrot.slane %v724_v2, 5  ;;  %v535_v23 = vsel %vm6679_vm2, %v530_v7, %v534_v49  ;;  %v539_v24 = vrot.slane %v537_v9, 4  ;;  %v6438_v55 = vld [vmem:[%s9749_s3 + $0x90] sm:$0xff]   ;;  %v6860_v7 = vld [vmem:[%s6648_s11 + $0x44] sm:$0x1] }
  0x36   : > { %5998 = vmatpush3.bf16.msra.mxu1 %v6431_v30  ;;  %6046 = vmatpush3.bf16.msra.mxu0 %v6432_v37  ;;  %v542_v28 = vrot.slane %v540_v10, 5  ;;  %v550_v29 = vshrl.u32 %v6809_v60, 16  ;;  %v6435_v30 = vld [vmem:[%s9749_s3 + $0x18] sm:$0xff]   ;;  %v5350_v33 = vcombine.low %v525_v3, %v535_v23  ;;  %v712_v34 = vrot.slane %v711_v11, 4 }
  0x37   : > { %5999 = vmatprep.subr.bf16.mxu1 %v6433_v52  ;;  %6047 = vmatprep.subr.bf16.mxu0 %v6434_v59  ;;  %v722_v35 = vrot.slane %v721_v12, 4  ;;  %v548_v37 = vrot.slane %v546_v17, 5  ;;  %v556_v43 = vshll.u32 %v6817_v16, 16  ;;  %v729_v45 = vshrl.u32 %v6821_v18, 16  ;;  %v6863_v9 = vld [vmem:[%s6648_s11 + $0x9c] sm:$0xf] }
  0x38   : > { %v543_v41 = vor.u32 %v542_v28, %v539_v24  ;;  %v552_v42 = vrot.slane %v550_v29, 4  ;;  %5966 = vmatmul.mubr.bf16.gmra.mxu0 %v5350_v33  ;;  %v717_v47 = vsel %vm6679_vm2, %v712_v34, %v716_v63  ;;  %v732_v49 = vshll.u32 %v6821_v18, 16  ;;  %v6872_v28 = vld [vmem:[%s6648_s11 + $0xa0] sm:$0xf]  ;;  %v6439_v29 = vld [vmem:[%s9749_s3 + $0x8] sm:$0xff]  }
  0x39   : > { %v727_v48 = vsel %vm6679_vm2, %v722_v35, %v726_v15  ;;  %v738_v50 = vshll.u32 %v6827_v31, 16  ;;  %v558_v63 = vrot.slane %v556_v43, 5  ;;  %v742_v3 = vshrl.u32 %v6827_v31, 16 }
  0x3a   : > { %6000 = vmatpush3.bf16.msra.mxu1 %v6433_v52  ;;  %v5358_v56 = vcombine.low %v717_v47, %v727_v48  ;;  %6048 = vmatpush3.bf16.msra.mxu0 %v6434_v59  ;;  %v544_v58 = vrot.slane %v543_v41, 4  ;;  %v553_v61 = vor.u32 %v552_v42, %v548_v37  ;;  %v731_v52 = vrot.slane %v729_v45, 4  ;;  %v6440_v41 = vld [vmem:[%s9749_s3 + $0x88] sm:$0xff]  }
  0x3b   : > { %6001 = vmatprep.subr.bf16.mxu1 %v6435_v30  ;;  %v734_v1 = vrot.slane %v732_v49, 5  ;;  %v740_v2 = vrot.slane %v738_v50, 5  ;;  %6049 = vmatprep.subr.bf16.mxu0 %v6436_v38  ;;  %v748_v11 = vshll.u32 %v6837_v44, 16  ;;  %v561_v12 = vshrl.u32 %v6850_v51, 16 }
  0x3c   : > { %5982 = vmatmul.mubr.bf16.gmra.mxu1 %v5358_v56  ;;  %v549_v10 = vsel %vm6679_vm2, %v544_v58, %v548_v37  ;;  %v554_v59 = vrot.slane %v553_v61, 4  ;;  %v744_v17 = vrot.slane %v742_v3, 4  ;;  %v564_v23 = vshll.u32 %v6850_v51, 16  ;;  %v6888_v61 = vld [vmem:[%s6648_s11 + $0xa4] sm:$0x1] }
  0x3d   : > { %v735_v15 = vor.u32 %v734_v1, %v731_v52  ;;  %v570_v24 = vshll.u32 %v6853_v54, 16  ;;  %v750_v34 = vrot.slane %v748_v11, 5  ;;  %v563_v35 = vrot.slane %v561_v12, 4 }
  0x3e   : > { %6002 = vmatpush3.bf16.msra.mxu1 %v6435_v30  ;;  %v559_v33 = vsel %vm6679_vm2, %v554_v59, %v558_v63  ;;  %v574_v37 = vshrl.u32 %v6853_v54, 16  ;;  %6050 = vmatpush3.bf16.msra.mxu0 %v6436_v38  ;;  %v745_v43 = vor.u32 %v744_v17, %v740_v2  ;;  %v566_v45 = vrot.slane %v564_v23, 5  ;;  %v6893_v59 = vld [vmem:[%s6648_s11 + $0x48] sm:$0xf]  ;;  %v6902_v17 = vld [vmem:[%s6648_s11 + $0x4c] sm:$0xf] }
  0x3f   : > { %6003 = vmatprep.subr.bf16.mxu1 %v6437_v46  ;;  %v5351_v42 = vcombine.low %v549_v10, %v559_v33  ;;  %v736_v30 = vrot.slane %v735_v15, 4  ;;  %6051 = vmatprep.subr.bf16.mxu0 %v6438_v55  ;;  %v572_v47 = vrot.slane %v570_v24, 5  ;;  %v580_v49 = vshll.u32 %v6860_v7, 16 }
  0x40   : > { %v576_v48 = vrot.slane %v574_v37, 4  ;;  %v753_v50 = vshrl.u32 %v6863_v9, 16  ;;  %v746_v56 = vrot.slane %v745_v43, 4  ;;  %v567_v58 = vor.u32 %v566_v45, %v563_v35 }
  0x41   : > { %5969 = vmatprep.mubr.bf16.mxu0 %v5351_v42  ;;  %v741_v38 = vsel %vm6679_vm2, %v736_v30, %v740_v2  ;;  %v756_v63 = vshll.u32 %v6863_v9, 16  ;;  %v582_v1 = vrot.slane %v580_v49, 5  ;;  %v762_v10 = vshll.u32 %v6872_v28, 16  ;;  %v6441_v2 = vld [vmem:[%s9749_s3] sm:$0xff]   ;;  %v6911_v30 = vld [vmem:[%s6648_s11 + $0x50] sm:$0x1] }
  0x42   : > { %6004 = vmatpush3.bf16.msra.mxu1 %v6437_v46  ;;  %v577_v52 = vor.u32 %v576_v48, %v572_v47  ;;  %v755_v3 = vrot.slane %v753_v50, 4  ;;  %6052 = vmatpush3.bf16.msra.mxu0 %v6438_v55  ;;  %v751_v11 = vsel %vm6679_vm2, %v746_v56, %v750_v34  ;;  %v568_v12 = vrot.slane %v567_v58, 4  ;;  %v6442_v55 = vld [vmem:[%s9749_s3 + $0x80] sm:$0xff]  }
  0x43   : > { %6005 = vmatprep.subr.bf16.mxu1 %v6439_v29  ;;  %v758_v15 = vrot.slane %v756_v63, 5  ;;  %v766_v46 = vshrl.u32 %v6872_v28, 16  ;;  %6053 = vmatprep.subr.bf16.mxu0 %v6440_v41  ;;  %v5359_v23 = vcombine.low %v741_v38, %v751_v11  ;;  %v764_v33 = vrot.slane %v762_v10, 5  ;;  %v6919_v38 = vld [vmem:[%s6648_s11 + $0xa8] sm:$0xf] }
  0x44   : > { %v578_v24 = vrot.slane %v577_v52, 4  ;;  %v772_v35 = vshll.u32 %v6888_v61, 16  ;;  %v573_v34 = vsel %vm6679_vm2, %v568_v12, %v572_v47  ;;  %v585_v43 = vshrl.u32 %v6893_v59, 16  ;;  %v6924_v47 = vld [vmem:[%s9749_s3 + $0xf8] sm:$0xff]   ;;  %v6927_v52 = vld [vmem:[%s6648_s11 + $0xac] sm:$0xf] }
  0x45   : > { %v759_v37 = vor.u32 %v758_v15, %v755_v3  ;;  %v768_v42 = vrot.slane %v766_v46, 4  ;;  %5985 = vmatprep.mubr.bf16.mxu1 %v5359_v23  ;;  %v588_v49 = vshll.u32 %v6893_v59, 16  ;;  %v594_v50 = vshll.u32 %v6902_v17, 16  ;;  %v6937_v12 = vld [vmem:[%s6648_s11 + $0xb0] sm:$0x1] }
  0x46   : > { %6006 = vmatpush3.bf16.msra.mxu1 %v6439_v29  ;;  %v583_v45 = vsel %vm6679_vm2, %v578_v24, %v582_v1  ;;  %v774_v48 = vrot.slane %v772_v35, 5  ;;  %6054 = vmatpush3.bf16.msra.mxu0 %v6440_v41  ;;  %v587_v63 = vrot.slane %v585_v43, 4  ;;  %v6932_v1 = vld [vmem:[%s9749_s3 + $0x138] sm:$0xff]   ;;  %v598_v10 = vshrl.u32 %v6902_v17, 16  ;;  %9820 = vst [vmem:[#allocation3_spill] sm:$0xff] %v6937_v12 }
  0x47   : > { %v5352_v29 = vcombine.low %v573_v34, %v583_v45  ;;  %v760_v56 = vrot.slane %v759_v37, 4  ;;  %v769_v58 = vor.u32 %v768_v42, %v764_v33  ;;  %6007 = vmatprep.subr.bf16.mxu1 %v6441_v2  ;;  %6055 = vmatprep.subr.bf16.mxu0 %v6442_v55  ;;  %v590_v41 = vrot.slane %v588_v49, 5  ;;  %v6940_v15 = vld [vmem:[%s6648_s11 + $0x54] sm:$0xf]  ;;  %v6947_v34 = vld [vmem:[%s6648_s11 + $0x58] sm:$0xf] }
  0x48   : > { %v596_v3 = vrot.slane %v594_v50, 5  ;;  %v604_v11 = vshll.u32 %v6911_v30, 16  ;;  %v777_v24 = vshrl.u32 %v6919_v38, 16  ;;  %v780_v35 = vshll.u32 %v6919_v38, 16 }
  0x49   : > { %5970 = vmatmul.mubr.bf16.gmra.mxu0 %v5352_v29  ;;  %v765_v46 = vsel %vm6679_vm2, %v760_v56, %v764_v33  ;;  %v770_v23 = vrot.slane %v769_v58, 4  ;;  %v591_v37 = vor.u32 %v590_v41, %v587_v63  ;;  %v600_v42 = vrot.slane %v598_v10, 4 }
  0x4a   : > { %6008 = vmatpush3.bf16.msra.mxu1 %v6441_v2  ;;  %v606_v43 = vrot.slane %v604_v11, 5  ;;  %v786_v45 = vshll.u32 %v6927_v52, 16  ;;  %6056 = vmatpush3.bf16.msra.mxu0 %v6442_v55  ;;  %v779_v49 = vrot.slane %v777_v24, 4  ;;  %v782_v50 = vrot.slane %v780_v35, 5  ;;  %v6956_v55 = vld [vmem:[%s6648_s11 + $0x5c] sm:$0x1] }
  0x4b   : > { %6089 = vmatprep.subr.bf16.mxu1 %v6924_v47  ;;  %v775_v33 = vsel %vm6679_vm2, %v770_v23, %v774_v48  ;;  %v790_v29 = vshrl.u32 %v6927_v52, 16  ;;  %6137 = vmatprep.subr.bf16.mxu0 %v6932_v1  ;;  %v592_v56 = vrot.slane %v591_v37, 4  ;;  %v601_v58 = vor.u32 %v600_v42, %v596_v3  ;;  %v6961_v48 = vld [vmem:[%s6648_s11 + $0xb4] sm:$0xf]  ;;  %v6968_v37 = vld [vmem:[%s6648_s11 + $0xb8] sm:$0xf] }
  0x4c   : > { %v5360_v2 = vcombine.low %v765_v46, %v775_v33  ;;  %v788_v63 = vrot.slane %v786_v45, 5  ;;  %v783_v41 = vor.u32 %v782_v50, %v779_v49  ;;  %v796_v11 = vshll.u32 %v6937_v12, 16 }
  0x4d   : > { %v792_v10 = vrot.slane %v790_v29, 4  ;;  %v609_v21 = vshrl.u32 %v6940_v15, 16  ;;  %v597_v23 = vsel %vm6679_vm2, %v592_v56, %v596_v3  ;;  %v602_v24 = vrot.slane %v601_v58, 4 }
  0x4e   : > { %5986 = vmatmul.mubr.bf16.gmra.mxu1 %v5360_v2  ;;  %v612_v46 = vshll.u32 %v6940_v15, 16  ;;  %v618_v35 = vshll.u32 %v6947_v34, 16  ;;  %v784_v42 = vrot.slane %v783_v41, 4  ;;  %v798_v33 = vrot.slane %v796_v11, 5 }
  0x4f   : > { %v793_v45 = vor.u32 %v792_v10, %v788_v63  ;;  %v611_v49 = vrot.slane %v609_v21, 4  ;;  %v607_v50 = vsel %vm6679_vm2, %v602_v24, %v606_v43  ;;  %v622_v2 = vshrl.u32 %v6947_v34, 16 }
  0x50   : > { %v614_v29 = vrot.slane %v612_v46, 5  ;;  %v620_v62 = vrot.slane %v618_v35, 5  ;;  %v5353_v3 = vcombine.low %v597_v23, %v607_v50  ;;  %v789_v56 = vsel %vm6679_vm2, %v784_v42, %v788_v63 }
  0x51   : > { %v794_v58 = vrot.slane %v793_v45, 4  ;;  %v628_v12 = vshll.u32 %v6956_v55, 16  ;;  %v624_v10 = vrot.slane %v622_v2, 4  ;;  %v801_v21 = vshrl.u32 %v6961_v48, 16 }
  0x52   : > { %v615_v41 = vor.u32 %v614_v29, %v611_v49  ;;  %v804_v11 = vshll.u32 %v6961_v48, 16  ;;  %5973 = vmatprep.mubr.bf16.mxu0 %v5353_v3  ;;  %v810_v46 = vshll.u32 %v6968_v37, 16  ;;  %v814_v23 = vshrl.u32 %v6968_v37, 16 }
  0x53   : > { %v799_v43 = vsel %vm6679_vm2, %v794_v58, %v798_v33  ;;  %v630_v24 = vrot.slane %v628_v12, 5  ;;  %v625_v42 = vor.u32 %v624_v10, %v620_v62  ;;  %v803_v45 = vrot.slane %v801_v21, 4 }
  0x54   : > { %v5361_v35 = vcombine.low %v789_v56, %v799_v43  ;;  %v616_v63 = vrot.slane %v615_v41, 4  ;;  %v806_v50 = vrot.slane %v804_v11, 5  ;;  %v812_v49 = vrot.slane %v810_v46, 5 }
  0x55   : > { %v816_v29 = vrot.slane %v814_v23, 4  ;;  %v820_v2 = vshll.u32 %v6974_v20, 16  ;;  %v9822_v3 = vmov 0  ;;  %v626_v33 = vrot.slane %v625_v42, 4 }
  0x56   : > { %v9823_v3 = vsel %vm6988_vm5, 4294967295, %v9822_v3  ;;  %5989 = vmatprep.mubr.bf16.mxu1 %v5361_v35  ;;  %v621_v12 = vsel %vm6679_vm2, %v616_v63, %v620_v62  ;;  %v5395_v56 = vrot.slane %v6654_v4, 9  ;;  %v1440_v58 = vrot.slane %v6657_v5, 5 }
  0x57   : > { %9824 = vst [vmem:[#allocation5_spill] sm:$0xff] %v9823_v3  ;;  %v807_v41 = vor.u32 %v806_v50, %v803_v45  ;;  %v817_v10 = vor.u32 %v816_v29, %v812_v49  ;;  %v822_v21 = vrot.slane %v820_v2, 5  ;;  %v5396_v11 = vrot.slane %v6675_v26, 9 }
  0x58   : > { %v631_v43 = vsel %vm6679_vm2, %v626_v33, %v630_v24  ;;  %v1441_v46 = vsel %vm6988_vm5, %v5395_v56, %v1440_v58  ;;  %v1442_v23 = vrot.slane %v1440_v58, 4  ;;  %v1447_v35 = vrot.slane %v6684_v32, 5 }
  0x59   : > { %v5354_v62 = vcombine.low %v621_v12, %v631_v43  ;;  %v808_v63 = vrot.slane %v807_v41, 4  ;;  %v818_v42 = vrot.slane %v817_v10, 4  ;;  %v5371_v20 = vcombine.low %v6654_v4, %v6657_v5 }
  0x5a   : > { %v9825_v45 = vrot.slane %v6660_v6, 5  ;;  %v1449_v29 = vrot.slane %v1447_v35, 4  ;;  %v5397_v24 = vrot.slane %v6713_v14, 9  ;;  %v1454_v56 = vrot.slane %v6721_v19, 5 }
  0x5b   : > { %5974 = vmatmul.mubr.bf16.gmra.mxu0 %v5354_v62  ;;  %v813_v2 = vsel %vm6679_vm2, %v808_v63, %v812_v49  ;;  %v823_v12 = vsel %vm6679_vm2, %v818_v42, %v822_v21  ;;  %v1448_v4 = vsel %vm6988_vm5, %v5396_v11, %v1447_v35  ;;  %v9826_v5 = vrot.slane %v6690_v40, 5  ;;  %v6450_v42 = vld [vmem:[%s9749_s3 + $0x130] sm:$0xff]  }
  0x5c   : > { %v1444_v50 = vsel %vm6988_vm5, %v1442_v23, %v9825_v45  ;;  %v5362_v58 = vcombine.low %v813_v2, %v823_v12  ;;  %v1457_v41 = vrot.slane %v6726_v25, 5  ;;  %v1455_v49 = vsel %vm6988_vm5, %v5397_v24, %v1454_v56 }
  0x5d   : > { %v5427_v33 = vcombine.low %v1441_v46, %v1444_v50  ;;  %v1451_v6 = vsel %vm6988_vm5, %v1449_v29, %v9826_v5  ;;  %v1456_v10 = vrot.slane %v1454_v56, 4  ;;  %v5398_v21 = vrot.slane %v6753_v57, 9 }
  0x5e   : > { %5990 = vmatmul.mubr.bf16.gmra.mxu1 %v5362_v58  ;;  %v1461_v43 = vrot.slane %v6762_v0, 5  ;;  %v1464_v46 = vrot.slane %v6765_v8, 5  ;;  %v5428_v11 = vcombine.low %v1448_v4, %v1451_v6  ;;  %v5399_v23 = vrot.slane %v6800_v53, 9 }
  0x5f   : > { %6057 = vmatprep.mubr.bf16.mxu0 %v5427_v33  ;;  %6009 = vmatprep.mubr.bf16.mxu1 %v5371_v20  ;;  %v1458_v40 = vsel %vm6988_vm5, %v1456_v10, %v1457_v41  ;;  %v1468_v25 = vrot.slane %v6809_v60, 5  ;;  %v1471_v63 = vrot.slane %v6817_v16, 5  ;;  %v1475_v8 = vrot.slane %v6853_v54, 5  ;;  %v7082_v10 = vld [vmem:[%s6648_s11 + $0x64] sm:$0xf] }
  0x60   : > { %v5429_v35 = vcombine.low %v1455_v49, %v1458_v40  ;;  %v1463_v62 = vrot.slane %v1461_v43, 4  ;;  %v5373_v20 = vcombine.low %v6713_v14, %v6721_v19  ;;  %v1462_v50 = vsel %vm6988_vm5, %v5398_v21, %v1461_v43  ;;  %v6449_v14 = vld [vmem:[%s9749_s3 + $0xf0] sm:$0xff]  }
  0x61   : > { %v1470_v45 = vrot.slane %v1468_v25, 4  ;;  %v5400_v29 = vrot.slane %v6850_v51, 9  ;;  %v1482_v24 = vrot.slane %v6902_v17, 5  ;;  %v1469_v2 = vsel %vm6988_vm5, %v5399_v23, %v1468_v25 }
  0x62   : > { %v1465_v16 = vsel %vm6988_vm5, %v1463_v62, %v1464_v46  ;;  %v1478_v12 = vrot.slane %v6860_v7, 5  ;;  %v5401_v33 = vrot.slane %v6893_v59, 9  ;;  %v1477_v56 = vrot.slane %v1475_v8, 4  ;;  %v6454_v7 = vld [vmem:[%s9749_s3 + $0x128] sm:$0xff]   ;;  %v6458_v62 = vld [vmem:[%s9749_s3 + $0x120] sm:$0xff]  }
  0x63   : > { %6058 = vmatmul.mubr.bf16.vlgmr.msra.gmra.mxu0 %v5428_v11  ;;  %v1472_v19 = vsel %vm6988_vm5, %v1470_v45, %v1471_v63  ;;  %v1484_v58 = vrot.slane %v1482_v24, 4  ;;  %v1485_v4 = vrot.slane %v6911_v30, 5  ;;  %v9827_v5 = vcombine.low %v6675_v26, %v6684_v32  ;;  %v6453_v26 = vld [vmem:[%s9749_s3 + $0xe8] sm:$0xff]   ;;  %v6457_v45 = vld [vmem:[%s9749_s3 + $0xe0] sm:$0xff]  }
  0x64   : > { %6138 = vmatpush3.bf16.msra.mxu0 %v6932_v1  ;;  %6061 = vmatprep.mubr.bf16.mxu0 %v5429_v35  ;;  %v1489_v1 = vrot.slane %v6947_v34, 5  ;;  %v5430_v6 = vcombine.low %v1462_v50, %v1465_v16  ;;  %v5431_v41 = vcombine.low %v1469_v2, %v1472_v19  ;;  %v7064_v30 = vsel %vm6988_vm5, %v5400_v29, %v1475_v8  ;;  %v6541_v63 = vld [vmem:[%s6648_s11 + $0x68] sm:$0x1]  ;;  %v7124_v2 = vld [vmem:[%s6648_s11 + $0x6c] sm:$0xf]  ;;  %v6462_v19 = vld [vmem:[%s9749_s3 + $0x118] sm:$0xff]  }
  0x65   : > { %6139 = vmatprep.subr.bf16.mxu0 %v6450_v42  ;;  %v7068_v49 = vsel %vm6988_vm5, %v1477_v56, %v1478_v12  ;;  %v7075_v32 = vsel %vm6988_vm5, %v5401_v33, %v1482_v24  ;;  %v1496_v21 = vrot.slane %v7082_v10, 5  ;;  %v5374_v43 = vcombine.low %v6753_v57, %v6762_v0  ;;  %v7099_v57 = vld [vmem:[%s6648_s11 + $0x60] sm:$0xf]  ;;  %v7128_v33 = vld [vmem:[%s6648_s11 + $0x70] sm:$0xf] }
  0x66   : > { %6010 = vmatmul.mubr.bf16.vlgmr.msra.gmra.mxu1 %v9827_v5  ;;  %v5402_v46 = vrot.slane %v6940_v15, 9  ;;  %v1491_v11 = vrot.slane %v1489_v1, 4  ;;  %v1492_v40 = vrot.slane %v6956_v55, 5  ;;  %v5375_v23 = vcombine.low %v6800_v53, %v6809_v60 }
  0x67   : > { %6090 = vmatpush3.bf16.msra.mxu1 %v6924_v47  ;;  %6013 = vmatprep.mubr.bf16.mxu1 %v5373_v20  ;;  %v7079_v47 = vsel %vm6988_vm5, %v1484_v58, %v1485_v4  ;;  %v5376_v25 = vcombine.low %v6850_v51, %v6853_v54  ;;  %v5377_v35 = vcombine.low %v6893_v59, %v6902_v17  ;;  %v5403_v0 = vrot.slane %v7099_v57, 9  ;;  %v7242_v59 = vld [vmem:[%s6648_s11 + $0x78] sm:$0xf]  ;;  %v7356_v4 = vld [vmem:[%s7201_s12 + $0x2c] sm:$0x1] }
  0x68   : > { %6091 = vmatprep.subr.bf16.mxu1 %v6449_v14  ;;  %6140 = vmatpush3.bf16.msra.mxu0 %v6450_v42  ;;  %v1499_v42 = vrot.slane %v6541_v63, 5  ;;  %v5432_v53 = vcombine.low %v7064_v30, %v7068_v49  ;;  %v5433_v60 = vcombine.low %v7075_v32, %v7079_v47  ;;  %v1498_v8 = vrot.slane %v1496_v21, 4  ;;  %v6461_v30 = vld [vmem:[%s9749_s3 + $0xd8] sm:$0xff]   ;;  %9835 = vst [vmem:[#allocation9_spill] sm:$0xff] %v7356_v4 }
  0x69   : > { %6141 = vmatprep.subr.bf16.mxu0 %v6454_v7  ;;  %v5406_v20 = vrot.slane %v6769_v13, 9  ;;  %v1517_v50 = vrot.slane %v6776_v22, 5  ;;  %v1520_v29 = vrot.slane %v6785_v36, 5  ;;  %v7117_v24 = vsel %vm6988_vm5, %v5402_v46, %v1489_v1  ;;  %v6466_v46 = vld [vmem:[%s9749_s3 + $0x110] sm:$0xff]  }
  0x6a   : > { %v7121_v16 = vsel %vm6988_vm5, %v1491_v11, %v1492_v40  ;;  %v5404_v12 = vrot.slane %v7124_v2, 9  ;;  %v7133_v36 = vsel %vm6988_vm5, %v5403_v0, %v1496_v21  ;;  %v5407_v1 = vrot.slane %v6821_v18, 9  ;;  %v7333_v40 = vld [vmem:[%s7201_s12 + $0x24] sm:$0xf] }
  0x6b   : > { %6062 = vmatmul.mubr.bf16.gmra.mxu0 %v5430_v6  ;;  %6092 = vmatpush3.bf16.msra.mxu1 %v6449_v14  ;;  %v1503_v14 = vrot.slane %v7128_v33, 5  ;;  %v7140_v56 = vsel %vm6988_vm5, %v5406_v20, %v1517_v50  ;;  %v1519_v58 = vrot.slane %v1517_v50, 4  ;;  %v1524_v5 = vrot.slane %v6827_v31, 5  ;;  %v6465_v20 = vld [vmem:[%s9749_s3 + $0xd0] sm:$0xff]   ;;  %9832 = vst [vmem:[#allocation6_spill] sm:$0xff] %v7333_v40 }
  0x6c   : > { %6065 = vmatprep.mubr.bf16.mxu0 %v5431_v41  ;;  %6093 = vmatprep.subr.bf16.mxu1 %v6453_v26  ;;  %v1527_v6 = vrot.slane %v6837_v44, 5  ;;  %v7150_v41 = vsel %vm6988_vm5, %v1498_v8, %v1499_v42  ;;  %v5408_v32 = vrot.slane %v6863_v9, 9  ;;  %v1534_v11 = vrot.slane %v6888_v61, 5  ;;  %v9828_v61 = vld [vmem:[#allocation3_spill] sm:$0xff] }
  0x6d   : > { %6142 = vmatpush3.bf16.msra.mxu0 %v6454_v7  ;;  %v1510_v7 = vrot.slane %v6735_v39, 5  ;;  %v7157_v49 = vsel %vm6988_vm5, %v1519_v58, %v1520_v29  ;;  %v7166_v47 = vsel %vm6988_vm5, %v5407_v1, %v1524_v5  ;;  %v1526_v21 = vrot.slane %v1524_v5, 4  ;;  %v9829_v5 = vld [vmem:[#allocation4_spill] sm:$0xff] }
  0x6e   : > { %6014 = vmatmul.mubr.bf16.gmra.mxu1 %v5374_v43  ;;  %6143 = vmatprep.subr.bf16.mxu0 %v6458_v62  ;;  %v5438_v44 = vcombine.low %v7140_v56, %v7157_v49  ;;  %v1531_v43 = vrot.slane %v6872_v28, 5  ;;  %v1541_v8 = vrot.slane %v9828_v61, 5  ;;  %v5410_v58 = vrot.slane %v6961_v48, 9  ;;  %v7330_v29 = vld [vmem:[%s7201_s12 + $0x14] sm:$0x1] }
  0x6f   : > { %6017 = vmatprep.mubr.bf16.mxu1 %v5375_v23  ;;  %6094 = vmatpush3.bf16.msra.mxu1 %v6453_v26  ;;  %v5409_v23 = vrot.slane %v6919_v38, 9  ;;  %v7179_v0 = vsel %vm6988_vm5, %v1526_v21, %v1527_v6  ;;  %v1545_v1 = vrot.slane %v6968_v37, 5  ;;  %v1548_v6 = vrot.slane %v9829_v5, 5 }
  0x70   : > { %6095 = vmatprep.subr.bf16.mxu1 %v6457_v45  ;;  %v7183_v63 = vsel %vm6988_vm5, %v5408_v32, %v1531_v43  ;;  %v1533_v42 = vrot.slane %v1531_v43, 4  ;;  %v5434_v32 = vcombine.low %v7117_v24, %v7121_v16  ;;  %v1505_v51 = vrot.slane %v1503_v14, 4  ;;  %v7237_v16 = vld [vmem:[%s7201_s12] sm:$0xf] }
  0x71   : > { %6144 = vmatpush3.bf16.msra.mxu0 %v6458_v62  ;;  %v1538_v62 = vrot.slane %v6927_v52, 5  ;;  %v1547_v24 = vrot.slane %v1545_v1, 4  ;;  %v5405_v17 = vrot.slane %v7242_v59, 9  ;;  %v1512_v61 = vrot.slane %v1510_v7, 4 }
  0x72   : > { %6145 = vmatprep.subr.bf16.mxu0 %v6462_v19 }
  0x73   : > { %6066 = vmatmul.mubr.bf16.gmra.mxu0 %v5432_v53  ;;  %6096 = vmatpush3.bf16.msra.mxu1 %v6457_v45  ;;  %v7193_v45 = vsel %vm6988_vm5, %v5409_v23, %v1538_v62  ;;  %v1540_v50 = vrot.slane %v1538_v62, 4  ;;  %v5435_v62 = vcombine.low %v7133_v36, %v7150_v41  ;;  %v7258_v36 = vsel %vm6988_vm5, %v1547_v24, %v1548_v6  ;;  %v6473_v6 = vld [vmem:[%s9749_s3 + $0xc0] sm:$0xff]   ;;  %v7305_v24 = vld [vmem:[%s7201_s12 + $0x18] sm:$0xf] }
  0x74   : > { %6069 = vmatprep.mubr.bf16.mxu0 %v5433_v60  ;;  %6097 = vmatprep.subr.bf16.mxu1 %v6461_v30  ;;  %v7205_v60 = vsel %vm6988_vm5, %v1533_v42, %v1534_v11  ;;  %v6470_v11 = vld [vmem:[%s9749_s3 + $0x108] sm:$0xff]   ;;  %v5378_v42 = vcombine.low %v6940_v15, %v6947_v34  ;;  %v5379_v41 = vcombine.low %v7099_v57, %v7082_v10  ;;  %v6474_v15 = vld [vmem:[%s9749_s3 + $0x100] sm:$0xff]   ;;  %v2275_v34 = vshrl.u32 %v7237_v16, 16 }
  0x75   : > { %6146 = vmatpush3.bf16.msra.mxu0 %v6462_v19  ;;  %v6544_v19 = vld [vmem:[%s6648_s11 + $0x74] sm:$0x1]  ;;  %v7223_v23 = vsel %vm6988_vm5, %v1540_v50, %v1541_v8  ;;  %v6546_v8 = vld [vmem:[%s6648_s11 + $0x80] sm:$0x1]  ;;  %v1504_v10 = vsel %vm6988_vm5, %v5404_v12, %v1503_v14  ;;  %v1511_v12 = vsel %vm6988_vm5, %v5405_v17, %v1510_v7  ;;  %v7302_v7 = vld [vmem:[%s9749_s3 + $0x178] sm:$0xff]   ;;  %9830 = vst [vmem:[#allocation3_spill] sm:$0xff] %v7305_v24 }
  0x76   : > { %6018 = vmatmul.mubr.bf16.gmra.mxu1 %v5376_v25  ;;  %v1506_v21 = vrot.slane %v6544_v19, 5  ;;  %6147 = vmatprep.subr.bf16.mxu0 %v6466_v46  ;;  %v7234_v25 = vsel %vm6988_vm5, %v5410_v58, %v1545_v1  ;;  %v1513_v50 = vrot.slane %v6546_v8, 5  ;;  %v7297_v19 = vld [vmem:[%s9749_s3 + $0x1b8] sm:$0xff]  }
  0x77   : > { %6021 = vmatprep.mubr.bf16.mxu1 %v5377_v35  ;;  %6098 = vmatpush3.bf16.msra.mxu1 %v6461_v30  ;;  %v6469_v35 = vld [vmem:[%s9749_s3 + $0xc8] sm:$0xff]   ;;  %v7249_v30 = vld [vmem:[%s7201_s12 + $0x4] sm:$0xf] }
  0x78   : > { %6099 = vmatprep.subr.bf16.mxu1 %v6465_v20  ;;  %v1507_v57 = vsel %vm6988_vm5, %v1505_v51, %v1506_v21  ;;  %v2288_v1 = vshrl.u32 %v7249_v30, 16  ;;  %v2284_v5 = vshll.u32 %v7249_v30, 16  ;;  %v1514_v14 = vsel %vm6988_vm5, %v1512_v61, %v1513_v50 }
  0x79   : > { %6148 = vmatpush3.bf16.msra.mxu0 %v6466_v46  ;;  %v2278_v46 = vshll.u32 %v7237_v16, 16  ;;  %v5436_v21 = vcombine.low %v1504_v10, %v1507_v57  ;;  %v2277_v51 = vrot.slane %v2275_v34, 4  ;;  %v5437_v50 = vcombine.low %v1511_v12, %v1514_v14  ;;  %v6547_v12 = vld [vmem:[%s6648_s11 + $0x7c] sm:$0xf] }
  0x7a   : > { %6149 = vmatprep.subr.bf16.mxu0 %v6470_v11  ;;  %v7313_v17 = vrot.slane %v2284_v5, 5 }
  0x7b   : > { %6070 = vmatmul.mubr.bf16.gmra.mxu0 %v5434_v32  ;;  %6100 = vmatpush3.bf16.msra.mxu1 %v6465_v20  ;;  %v7283_v32 = vld [vmem:[%s7201_s12 + $0xc] sm:$0xf]  ;;  %v7292_v20 = vld [vmem:[%s7201_s12 + $0x10] sm:$0xf]  ;;  %v2280_v39 = vrot.slane %v2278_v46, 5 }
  0x7c   : > { %6073 = vmatprep.mubr.bf16.mxu0 %v5435_v62  ;;  %6101 = vmatprep.subr.bf16.mxu1 %v6469_v35  ;;  %v7311_v62 = vld [vmem:[%s7201_s12 + $0x8] sm:$0x1]  ;;  %v2299_v61 = vshrl.u32 %v7283_v32, 16  ;;  %v2302_v8 = vshll.u32 %v7283_v32, 16  ;;  %v2312_v34 = vshrl.u32 %v7292_v20, 16  ;;  %v2308_v46 = vshll.u32 %v7292_v20, 16 }
  0x7d   : > { %6150 = vmatpush3.bf16.msra.mxu0 %v6470_v11  ;;  %v7308_v11 = vld [vmem:[%s7201_s12 + $0x1c] sm:$0xf]  ;;  %v2294_v5 = vshll.u32 %v7311_v62, 16  ;;  %v2281_v14 = vor.u32 %v2280_v39, %v2277_v51  ;;  %v9859_v3 = vcombine.low %v7283_v32, %v7292_v20 }
  0x7e   : > { %6022 = vmatmul.mubr.bf16.gmra.mxu1 %v5378_v42  ;;  %6151 = vmatprep.subr.bf16.mxu0 %v6474_v15  ;;  %9831 = vst [vmem:[#allocation4_spill] sm:$0xff] %v7308_v11  ;;  %v2290_v42 = vrot.slane %v2288_v1, 4  ;;  %v2336_v10 = vshrl.u32 %v7308_v11, 16  ;;  %v2332_v57 = vshll.u32 %v7308_v11, 16  ;;  %v5380_v1 = vcombine.low %v7124_v2, %v7128_v33 }
  0x7f   : > { %6025 = vmatprep.mubr.bf16.mxu1 %v5379_v41  ;;  %6102 = vmatpush3.bf16.msra.mxu1 %v6469_v35  ;;  %v2323_v35 = vshrl.u32 %v7305_v24, 16  ;;  %v2326_v41 = vshll.u32 %v7305_v24, 16  ;;  %v2301_v58 = vrot.slane %v2299_v61, 4  ;;  %v2304_v33 = vrot.slane %v2302_v8, 5 }
  0x80   : > { %6103 = vmatprep.subr.bf16.mxu1 %v6473_v6  ;;  %v2291_v2 = vor.u32 %v2290_v42, %v7313_v17  ;;  %v7336_v26 = vrot.slane %v2308_v46, 5  ;;  %v2314_v54 = vrot.slane %v2312_v34, 4  ;;  %v7342_v51 = vrot.slane %v2332_v57, 5 }
  0x81   : > { %6152 = vmatpush3.bf16.msra.mxu0 %v6474_v15  ;;  %v5381_v15 = vcombine.low %v7242_v59, %v6547_v12  ;;  %v2325_v59 = vrot.slane %v2323_v35, 4  ;;  %v2338_v39 = vrot.slane %v2336_v10, 4  ;;  %v2296_v61 = vrot.slane %v2294_v5, 5  ;;  %v7346_v12 = vld [vmem:[%s7201_s12 + $0x20] sm:$0x1] }
  0x82   : > { %6233 = vmatprep.subr.bf16.mxu0 %v7297_v19  ;;  %9834 = vst [vmem:[#allocation8_spill] sm:$0xff] %v7346_v12  ;;  %v2347_v42 = vshrl.u32 %v7333_v40, 16  ;;  %v2350_v8 = vshll.u32 %v7333_v40, 16  ;;  %v2282_v35 = vrot.slane %v2281_v14, 4  ;;  %v2305_v10 = vor.u32 %v2304_v33, %v2301_v58 }
  0x83   : > { %6074 = vmatmul.mubr.bf16.gmra.mxu0 %v5436_v21  ;;  %6104 = vmatpush3.bf16.msra.mxu1 %v6473_v6  ;;  %v7340_v21 = vld [vmem:[%s7201_s12 + $0x28] sm:$0xf]  ;;  %v2328_v6 = vrot.slane %v2326_v41, 5  ;;  %v2292_v41 = vrot.slane %v2291_v2, 4  ;;  %v2315_v57 = vor.u32 %v2314_v54, %v7336_v26  ;;  %v2339_v5 = vor.u32 %v2338_v39, %v7342_v51  ;;  %v7364_v2 = vld [vmem:[%s7201_s12 + $0x30] sm:$0xf] }
  0x84   : > { %6077 = vmatprep.mubr.bf16.mxu0 %v5437_v50  ;;  %6185 = vmatprep.subr.bf16.mxu1 %v7302_v7  ;;  %9833 = vst [vmem:[#allocation7_spill] sm:$0xff] %v7340_v21  ;;  %v2318_v50 = vshll.u32 %v7330_v29, 16  ;;  %v2360_v34 = vshrl.u32 %v7340_v21, 16  ;;  %v2356_v46 = vshll.u32 %v7340_v21, 16  ;;  %v2342_v43 = vshll.u32 %v7346_v12, 16  ;;  %9836 = vst [vmem:[#allocation10_spill] sm:$0xff] %v7364_v2 }
  0x85   : > { %v2349_v55 = vrot.slane %v2347_v42, 4  ;;  %v9837_v54 = vcombine.low %v7166_v47, %v7179_v0  ;;  %v2287_v33 = vsel %vm6679_vm2, %v2282_v35, %v7313_v17  ;;  %v2306_v56 = vrot.slane %v2305_v10, 4 }
  0x86   : > { %6026 = vmatmul.mubr.bf16.gmra.mxu1 %v5380_v1  ;;  %v2329_v1 = vor.u32 %v2328_v6, %v2325_v59  ;;  %v2320_v53 = vrot.slane %v2318_v50, 5  ;;  %v7361_v14 = vrot.slane %v2356_v46, 5  ;;  %v2362_v58 = vrot.slane %v2360_v34, 4 }
  0x87   : > { %6029 = vmatprep.mubr.bf16.mxu1 %v5381_v15  ;;  %v2352_v15 = vrot.slane %v2350_v8, 5  ;;  %v2297_v59 = vsel %vm6679_vm2, %v2292_v41, %v2296_v61  ;;  %v2316_v49 = vrot.slane %v2315_v57, 4  ;;  %v2340_v39 = vrot.slane %v2339_v5, 4  ;;  %v7412_v5 = vld [vmem:[%s7201_s12 + $0x40] sm:$0xf] }
  0x88   : > { %v2330_v6 = vrot.slane %v2329_v1, 4  ;;  %v2344_v50 = vrot.slane %v2342_v43, 5  ;;  %v2366_v42 = vshll.u32 %v7356_v4, 16  ;;  %v9839_v47 = vcombine.low %v6769_v13, %v6776_v22  ;;  %v7391_v13 = vld [vmem:[%s7201_s12 + $0x38] sm:$0x1]  ;;  %9843 = vst [vmem:[#allocation14_spill] sm:$0xff] %v7412_v5 }
  0x89   : > { %v2353_v0 = vor.u32 %v2352_v15, %v2349_v55  ;;  %v2371_v17 = vshrl.u32 %v7364_v2, 16  ;;  %v2374_v61 = vshll.u32 %v7364_v2, 16  ;;  %v9840_v8 = vcombine.low %v6821_v18, %v6827_v31  ;;  %9841 = vst [vmem:[#allocation12_spill] sm:$0xff] %v7391_v13  ;;  %v7399_v31 = vld [vmem:[%s7201_s12 + $0x3c] sm:$0xf] }
  0x8a   : > { %v5467_v34 = vcombine.low %v7237_v16, %v7249_v30  ;;  %v2363_v43 = vor.u32 %v2362_v58, %v7361_v14  ;;  %v5507_v22 = vcombine.low %v2287_v33, %v2297_v59  ;;  %9842 = vst [vmem:[#allocation13_spill] sm:$0xff] %v7399_v31  ;;  %v2311_v41 = vsel %vm6679_vm2, %v2306_v56, %v7336_v26  ;;  %v7415_v59 = vld [vmem:[%s7201_s12 + $0x48] sm:$0xf]  ;;  %v7550_v4 = vld [vmem:[%s7201_s12 + $0x78] sm:$0xf] }
  0x8b   : > { %6078 = vmatmul.mubr.bf16.gmra.mxu0 %v5438_v44  ;;  %v7375_v44 = vld [vmem:[%s7201_s12 + $0x34] sm:$0xf]  ;;  %v2321_v10 = vsel %vm6679_vm2, %v2316_v49, %v2320_v53  ;;  %v2335_v57 = vsel %vm6679_vm2, %v2330_v6, %v7342_v51  ;;  %v2345_v1 = vsel %vm6679_vm2, %v2340_v39, %v2344_v50  ;;  %v2354_v15 = vrot.slane %v2353_v0, 4  ;;  %9844 = vst [vmem:[#allocation15_spill] sm:$0xff] %v7415_v59  ;;  %v7423_v6 = vld [vmem:[%s7201_s12 + $0x4c] sm:$0xf] }
  0x8c   : > { %6081 = vmatprep.mubr.bf16.mxu0 %v9837_v54  ;;  %9838 = vst [vmem:[#allocation11_spill] sm:$0xff] %v7375_v44  ;;  %v2384_v46 = vshrl.u32 %v7375_v44, 16  ;;  %v2380_v18 = vshll.u32 %v7375_v44, 16  ;;  %v2368_v58 = vrot.slane %v2366_v42, 5  ;;  %v2373_v54 = vrot.slane %v2371_v17, 4  ;;  %9846 = vst [vmem:[#allocation16_spill] sm:$0xff] %v7423_v6 }
  0x8d   : > { %v2376_v33 = vrot.slane %v2374_v61, 5  ;;  %v9845_v26 = vcombine.low %v7183_v63, %v7205_v60  ;;  %v2364_v53 = vrot.slane %v2363_v43, 4  ;;  %v2390_v51 = vshll.u32 %v7391_v13, 16  ;;  %v7433_v63 = vld [vmem:[%s7201_s12 + $0x44] sm:$0x1] }
  0x8e   : > { %6030 = vmatmul.mubr.bf16.gmra.mxu1 %v9839_v47  ;;  %v2386_v56 = vrot.slane %v2384_v46, 4  ;;  %v2395_v49 = vshrl.u32 %v7399_v31, 16  ;;  %v9847_v39 = vcombine.low %v7193_v45, %v7223_v23  ;;  %v7428_v50 = vrot.slane %v2380_v18, 5  ;;  %9848 = vst [vmem:[#allocation17_spill] sm:$0xff] %v7433_v63 }
  0x8f   : > { %6033 = vmatprep.mubr.bf16.mxu1 %v9840_v8  ;;  %v2398_v42 = vshll.u32 %v7399_v31, 16  ;;  %v2408_v47 = vshrl.u32 %v7412_v5, 16  ;;  %v2404_v60 = vshll.u32 %v7412_v5, 16  ;;  %v7436_v0 = vcombine.low %v2311_v41, %v2321_v10 }
  0x90   : > { %v2419_v45 = vshrl.u32 %v7415_v59, 16  ;;  %v2422_v23 = vshll.u32 %v7415_v59, 16  ;;  %v9849_v61 = vcombine.low %v6863_v9, %v6872_v28  ;;  %v7445_v8 = vcombine.low %v2335_v57, %v2345_v1  ;;  %v7462_v1 = vld [vmem:[%s7201_s12 + $0x54] sm:$0xf] }
  0x91   : > { %v2432_v46 = vshrl.u32 %v7423_v6, 16  ;;  %v2428_v18 = vshll.u32 %v7423_v6, 16  ;;  %v9850_v41 = vcombine.low %v6919_v38, %v6927_v52  ;;  %v2359_v9 = vsel %vm6679_vm2, %v2354_v15, %v7361_v14  ;;  %v7474_v14 = vld [vmem:[%s7201_s12 + $0x60] sm:$0xf] }
  0x92   : > { %v2369_v28 = vsel %vm6679_vm2, %v2364_v53, %v2368_v58  ;;  %v2377_v10 = vor.u32 %v2376_v33, %v2373_v54  ;;  %v7459_v57 = vrot.slane %v2390_v51, 5  ;;  %v2400_v38 = vrot.slane %v2398_v42, 5  ;;  %v7478_v53 = vld [vmem:[%s7201_s12 + $0x64] sm:$0xf] }
  0x93   : > { %6082 = vmatmul.mubr.bf16.gmra.mxu0 %v9845_v26  ;;  %v7465_v26 = vld [vmem:[%s7201_s12 + $0x58] sm:$0xf]  ;;  %v7468_v52 = vrot.slane %v2404_v60, 5  ;;  %v2410_v15 = vrot.slane %v2408_v47, 4  ;;  %v2414_v58 = vshll.u32 %v7433_v63, 16  ;;  %v2421_v54 = vrot.slane %v2419_v45, 4 }
  0x94   : > { %6085 = vmatprep.mubr.bf16.mxu0 %v9847_v39  ;;  %v2387_v39 = vor.u32 %v2386_v56, %v7428_v50  ;;  %v2424_v33 = vrot.slane %v2422_v23, 5  ;;  %v7480_v51 = vrot.slane %v2428_v18, 5  ;;  %v2434_v43 = vrot.slane %v2432_v46, 4 }
  0x95   : > { %v2443_v56 = vshrl.u32 %v7462_v1, 16  ;;  %v9852_v42 = vcombine.low %v7234_v25, %v7258_v36  ;;  %v7487_v60 = vcombine.low %v2359_v9, %v2369_v28  ;;  %v2456_v45 = vshrl.u32 %v7465_v26, 16 }
  0x96   : > { %6034 = vmatmul.mubr.bf16.gmra.mxu1 %v9849_v61  ;;  %v2397_v61 = vrot.slane %v2395_v49, 4  ;;  %v2446_v49 = vshll.u32 %v7462_v1, 16  ;;  %v2452_v23 = vshll.u32 %v7465_v26, 16  ;;  %v2378_v46 = vrot.slane %v2377_v10, 4 }
  0x97   : > { %6037 = vmatprep.mubr.bf16.mxu1 %v9850_v41  ;;  %v7471_v41 = vld [vmem:[%s7201_s12 + $0x50] sm:$0x1]  ;;  %v2388_v18 = vrot.slane %v2387_v39, 4  ;;  %v2467_v17 = vshrl.u32 %v7474_v14, 16  ;;  %v2470_v25 = vshll.u32 %v7474_v14, 16  ;;  %v2411_v9 = vor.u32 %v2410_v15, %v7468_v52 }
  0x98   : > { %9851 = vst [vmem:[#allocation18_spill] sm:$0xff] %v7471_v41  ;;  %v2401_v36 = vor.u32 %v2400_v38, %v2397_v61  ;;  %v7496_v28 = vrot.slane %v2414_v58, 5  ;;  %v9853_v47 = vcombine.low %v6961_v48, %v6968_v37  ;;  %v2435_v10 = vor.u32 %v2434_v43, %v7480_v51  ;;  %v7504_v39 = vld [vmem:[%s7201_s12 + $0x5c] sm:$0x1]  ;;  %v7509_v38 = vld [vmem:[%s7201_s12 + $0x6c] sm:$0xf] }
  0x99   : > { %9854 = vst [vmem:[#allocation19_spill] sm:$0xff] %v7504_v39  ;;  %v2480_v35 = vshrl.u32 %v7478_v53, 16  ;;  %v2476_v61 = vshll.u32 %v7478_v53, 16  ;;  %9855 = vst [vmem:[#allocation20_spill] sm:$0xff] %v7509_v38  ;;  %v7512_v15 = vld [vmem:[%s7201_s12 + $0x70] sm:$0xf]  ;;  %v2393_v55 = vsel %vm6679_vm2, %v2388_v18, %v7459_v57 }
  0x9a   : > { %9856 = vst [vmem:[#allocation21_spill] sm:$0xff] %v7512_v15  ;;  %v6482_v48 = vld [vmem:[%s9749_s3 + $0x1b0] sm:$0xff]   ;;  %v2445_v37 = vrot.slane %v2443_v56, 4  ;;  %v2448_v43 = vrot.slane %v2446_v49, 5  ;;  %v7520_v58 = vrot.slane %v2452_v23, 5  ;;  %v2491_v63 = vshrl.u32 %v7509_v38, 16 }
  0x9b   : > { %6086 = vmatmul.mubr.bf16.gmra.mxu0 %v9852_v42  ;;  %v2438_v42 = vshll.u32 %v7471_v41, 16  ;;  %v2472_v41 = vrot.slane %v2470_v25, 5  ;;  %v2494_v56 = vshll.u32 %v7509_v38, 16  ;;  %v2504_v49 = vshrl.u32 %v7512_v15, 16 }
  0x9c   : > { %6153 = vmatprep.mubr.bf16.mxu0 %v5507_v22  ;;  %v2425_v22 = vor.u32 %v2424_v33, %v2421_v54  ;;  %v2458_v54 = vrot.slane %v2456_v45, 4  ;;  %v7523_v33 = vld [vmem:[%s7201_s12 + $0x68] sm:$0x1]  ;;  %v2500_v45 = vshll.u32 %v7512_v15, 16  ;;  %v7535_v23 = vrot.slane %v2401_v36, 4 }
  0x9d   : > { %9857 = vst [vmem:[#allocation22_spill] sm:$0xff] %v7523_v33  ;;  %v7537_v13 = vrot.slane %v2411_v9, 4  ;;  %v7544_v57 = vrot.slane %v2435_v10, 4  ;;  %v7546_v18 = vrot.slane %v2438_v42, 5  ;;  %v2462_v25 = vshll.u32 %v7504_v39, 16 }
  0x9e   : > { %6038 = vmatmul.mubr.bf16.gmra.mxu1 %v9853_v47  ;;  %v2383_v47 = vsel %vm6679_vm2, %v2378_v46, %v7428_v50  ;;  %v7539_v50 = vrot.slane %v2476_v61, 5  ;;  %v2482_v46 = vrot.slane %v2480_v35, 4  ;;  %v6481_v35 = vld [vmem:[%s9749_s3 + $0x170] sm:$0xff]   ;;  %v2449_v36 = vor.u32 %v2448_v43, %v2445_v37  ;;  %v7563_v10 = vld [vmem:[%s7201_s12 + $0x7c] sm:$0xf] }
  0x9f   : > { %6105 = vmatprep.mubr.bf16.mxu1 %v5467_v34  ;;  %v2469_v34 = vrot.slane %v2467_v17, 4  ;;  %v7542_v17 = vrot.slane %v2425_v22, 4  ;;  %v2459_v9 = vor.u32 %v2458_v54, %v7520_v58  ;;  %v2486_v22 = vshll.u32 %v7523_v33, 16 }
  0xa0   : > { %v2496_v61 = vrot.slane %v2494_v56, 5  ;;  %v7568_v39 = vrot.slane %v2500_v45, 5  ;;  %v2506_v12 = vrot.slane %v2504_v49, 4  ;;  %v5511_v37 = vcombine.low %v2383_v47, %v2393_v55  ;;  %v7602_v49 = vld [vmem:[%s7201_s12 + $0x84] sm:$0xf] }
  0xa1   : > { %v2473_v42 = vor.u32 %v2472_v41, %v2469_v34  ;;  %v2483_v43 = vor.u32 %v2482_v46, %v7539_v50  ;;  %v2515_v41 = vshrl.u32 %v7550_v4, 16  ;;  %v2518_v54 = vshll.u32 %v7550_v4, 16 }
  0xa2   : > { %v2407_v34 = vsel %vm6679_vm2, %v7535_v23, %v7468_v52  ;;  %v2528_v55 = vshrl.u32 %v7563_v10, 16  ;;  %v2524_v47 = vshll.u32 %v7563_v10, 16  ;;  %v2431_v52 = vsel %vm6679_vm2, %v7542_v17, %v7480_v51  ;;  %v6489_v51 = vld [vmem:[%s9749_s3 + $0x160] sm:$0xff]  }
  0xa3   : > { %6154 = vmatmul.mubr.bf16.vlgmr.msra.gmra.mxu0 %v7436_v0  ;;  %v6486_v0 = vld [vmem:[%s9749_s3 + $0x1a8] sm:$0xff]   ;;  %v2464_v56 = vrot.slane %v2462_v25, 5  ;;  %v2474_v45 = vrot.slane %v2473_v42, 4  ;;  %v2488_v23 = vrot.slane %v2486_v22, 5  ;;  %v6490_v17 = vld [vmem:[%s9749_s3 + $0x1a0] sm:$0xff]   ;;  %v2507_v22 = vor.u32 %v2506_v12, %v7568_v39 }
  0xa4   : > { %6234 = vmatpush3.bf16.msra.mxu0 %v7297_v19  ;;  %6157 = vmatprep.mubr.bf16.mxu0 %v7445_v8  ;;  %v7566_v19 = vld [vmem:[%s7201_s12 + $0x74] sm:$0x1]  ;;  %v2493_v8 = vrot.slane %v2491_v63, 4  ;;  %v9860_v63 = vcombine.low %v7305_v24, %v7308_v11  ;;  %v7615_v25 = vld [vmem:[%s7201_s12 + $0x80] sm:$0x1]  ;;  %v2530_v33 = vrot.slane %v2528_v55, 4  ;;  %v9862_v55 = vcombine.low %v7333_v40, %v7340_v21 }
  0xa5   : > { %6235 = vmatprep.subr.bf16.mxu0 %v6482_v48  ;;  %9858 = vst [vmem:[#allocation23_spill] sm:$0xff] %v7566_v19  ;;  %v2510_v46 = vshll.u32 %v7566_v19, 16  ;;  %9861 = vst [vmem:[#allocation24_spill] sm:$0xff] %v7615_v25  ;;  %v7621_v19 = vrot.slane %v2524_v47, 5  ;;  %v7648_v47 = vld [vmem:[%s7201_s12 + $0x90] sm:$0xf] }
  0xa6   : > { %6106 = vmatmul.mubr.bf16.vlgmr.msra.gmra.mxu1 %v9859_v3  ;;  %v2417_v3 = vsel %vm6679_vm2, %v7537_v13, %v7496_v28  ;;  %v2441_v13 = vsel %vm6679_vm2, %v7544_v57, %v7546_v18  ;;  %v2450_v28 = vrot.slane %v2449_v36, 4  ;;  %v2484_v57 = vrot.slane %v2483_v43, 4  ;;  %v7716_v42 = vld [vmem:[%s7201_s12 + $0x98] sm:$0x1] }
  0xa7   : > { %6186 = vmatpush3.bf16.msra.mxu1 %v7302_v7  ;;  %6109 = vmatprep.mubr.bf16.mxu1 %v9860_v63  ;;  %v6485_v7 = vld [vmem:[%s9749_s3 + $0x168] sm:$0xff]   ;;  %v2497_v18 = vor.u32 %v2496_v61, %v2493_v8  ;;  %v2517_v36 = vrot.slane %v2515_v41, 4  ;;  %v2539_v43 = vshrl.u32 %v7602_v49, 16  ;;  %v2542_v8 = vshll.u32 %v7602_v49, 16  ;;  %9865 = vst [vmem:[#allocation26_spill] sm:$0xff] %v7716_v42 }
  0xa8   : > { %6187 = vmatprep.subr.bf16.mxu1 %v6481_v35  ;;  %6236 = vmatpush3.bf16.msra.mxu0 %v6482_v48  ;;  %v2460_v48 = vrot.slane %v2459_v9, 4  ;;  %v7606_v63 = vld [vmem:[%s7201_s12 + $0x88] sm:$0xf]  ;;  %v2520_v9 = vrot.slane %v2518_v54, 5  ;;  %v5513_v41 = vcombine.low %v2431_v52, %v2441_v13  ;;  %v2455_v12 = vsel %vm6679_vm2, %v2450_v28, %v7520_v58  ;;  %v6494_v54 = vld [vmem:[%s9749_s3 + $0x198] sm:$0xff]  }
  0xa9   : > { %6237 = vmatprep.subr.bf16.mxu0 %v6486_v0  ;;  %v2552_v61 = vshrl.u32 %v7606_v63, 16  ;;  %v2489_v58 = vsel %vm6679_vm2, %v2484_v57, %v2488_v23  ;;  %v7651_v52 = vld [vmem:[%s7201_s12 + $0x94] sm:$0xf]  ;;  %v9863_v13 = vcombine.low %v7364_v2, %v7375_v44  ;;  %v7656_v28 = vrot.slane %v2507_v22, 4  ;;  %v7664_v23 = vld [vmem:[%s7201_s12 + $0x8c] sm:$0x1] }
  0xaa   : > { %9864 = vst [vmem:[#allocation25_spill] sm:$0xff] %v7664_v23  ;;  %v2544_v57 = vrot.slane %v2542_v8, 5  ;;  %v2582_v21 = vshll.u32 %v7716_v42, 16  ;;  %v3047_v27 = vrot.slane %v7465_v26, 5 }
  0xab   : > { %6158 = vmatmul.mubr.bf16.gmra.mxu0 %v7487_v60  ;;  %6188 = vmatpush3.bf16.msra.mxu1 %v6481_v35  ;;  %v2548_v60 = vshll.u32 %v7606_v63, 16  ;;  %v5512_v35 = vcombine.low %v2407_v34, %v2417_v3  ;;  %v7643_v34 = vrot.slane %v2497_v18, 4  ;;  %v7645_v3 = vrot.slane %v2510_v46, 5 }
  0xac   : > { %6161 = vmatprep.mubr.bf16.mxu0 %v5511_v37  ;;  %6189 = vmatprep.subr.bf16.mxu1 %v6485_v7  ;;  %v2465_v37 = vsel %vm6679_vm2, %v2460_v48, %v2464_v56  ;;  %v2521_v56 = vor.u32 %v2520_v9, %v2517_v36  ;;  %v2531_v48 = vor.u32 %v2530_v33, %v7621_v19  ;;  %v2541_v46 = vrot.slane %v2539_v43, 4 }
  0xad   : > { %6238 = vmatpush3.bf16.msra.mxu0 %v6486_v0  ;;  %v2479_v0 = vsel %vm6679_vm2, %v2474_v45, %v7539_v50  ;;  %v6493_v50 = vld [vmem:[%s9749_s3 + $0x158] sm:$0xff]   ;;  %v2534_v45 = vshll.u32 %v7615_v25, 16  ;;  %v7666_v18 = vrot.slane %v2548_v60, 5  ;;  %v2563_v36 = vshrl.u32 %v7648_v47, 16 }
  0xae   : > { %6110 = vmatmul.mubr.bf16.gmra.mxu1 %v9862_v55  ;;  %6239 = vmatprep.subr.bf16.mxu0 %v6490_v17  ;;  %v2554_v55 = vrot.slane %v2552_v61, 4  ;;  %v2566_v33 = vshll.u32 %v7648_v47, 16  ;;  %v2576_v9 = vshrl.u32 %v7651_v52, 16  ;;  %v7678_v8 = vcombine.low %v2479_v0, %v2489_v58  ;;  %v6498_v61 = vld [vmem:[%s9749_s3 + $0x190] sm:$0xff]  }
  0xaf   : > { %6113 = vmatprep.mubr.bf16.mxu1 %v9863_v13  ;;  %6190 = vmatpush3.bf16.msra.mxu1 %v6485_v7  ;;  %v7669_v7 = vld [vmem:[%s7201_s12 + $0x9c] sm:$0xf]  ;;  %v5514_v13 = vcombine.low %v2455_v12, %v2465_v37  ;;  %v7692_v37 = vrot.slane %v2521_v56, 4  ;;  %v7694_v0 = vrot.slane %v2534_v45, 5  ;;  %v7702_v58 = vrot.slane %v2531_v48, 4  ;;  %v6502_v56 = vld [vmem:[%s9749_s3 + $0x188] sm:$0xff]  }
  0xb0   : > { %6191 = vmatprep.subr.bf16.mxu1 %v6489_v51  ;;  %v2545_v43 = vor.u32 %v2544_v57, %v2541_v46  ;;  %v2555_v22 = vor.u32 %v2554_v55, %v7666_v18  ;;  %v2558_v60 = vshll.u32 %v7664_v23, 16  ;;  %v7710_v45 = vld [vmem:[%s7201_s12 + $0xa8] sm:$0xf]  ;;  %v7713_v12 = vld [vmem:[%s7201_s12 + $0xac] sm:$0xf]  ;;  %v2568_v25 = vrot.slane %v2566_v33, 5 }
  0xb1   : > { %6240 = vmatpush3.bf16.msra.mxu0 %v6490_v17  ;;  %v2572_v17 = vshll.u32 %v7651_v52, 16  ;;  %v2578_v48 = vrot.slane %v2576_v9, 4  ;;  %v2587_v46 = vshrl.u32 %v7669_v7, 16  ;;  %v9866_v57 = vcombine.low %v7399_v31, %v7412_v5  ;;  %v7738_v5 = vld [vmem:[%s7201_s12 + $0xb4] sm:$0xf] }
  0xb2   : > { %6241 = vmatprep.subr.bf16.mxu0 %v6494_v54  ;;  %v2590_v23 = vshll.u32 %v7669_v7, 16  ;;  %v9867_v33 = vcombine.low %v7415_v59, %v7423_v6  ;;  %v2611_v9 = vshrl.u32 %v7710_v45, 16  ;;  %v2620_v31 = vshll.u32 %v7713_v12, 16  ;;  %9868 = vst [vmem:[#allocation27_spill] sm:$0xff] %v7738_v5  ;;  %v7753_v6 = vld [vmem:[%s7201_s12 + $0xa4] sm:$0x1] }
  0xb3   : > { %6162 = vmatmul.mubr.bf16.gmra.mxu0 %v5512_v35  ;;  %6192 = vmatpush3.bf16.msra.mxu1 %v6489_v51  ;;  %v6497_v35 = vld [vmem:[%s9749_s3 + $0x150] sm:$0xff]   ;;  %v7700_v51 = vld [vmem:[%s7201_s12 + $0xa0] sm:$0xf]  ;;  %v7722_v55 = vrot.slane %v2572_v17, 5  ;;  %v2614_v17 = vshll.u32 %v7710_v45, 16  ;;  %v2527_v44 = vsel %vm6679_vm2, %v7692_v37, %v7621_v19  ;;  %v7750_v59 = vrot.slane %v2558_v60, 5 }
  0xb4   : > { %6165 = vmatprep.mubr.bf16.mxu0 %v5513_v41  ;;  %6193 = vmatprep.subr.bf16.mxu1 %v6493_v50  ;;  %v2565_v41 = vrot.slane %v2563_v36, 4  ;;  %v2596_v2 = vshll.u32 %v7700_v51, 16  ;;  %v6501_v36 = vld [vmem:[%s9749_s3 + $0x148] sm:$0xff]   ;;  %v7755_v40 = vrot.slane %v2555_v22, 4  ;;  %v2589_v19 = vrot.slane %v2587_v46, 4  ;;  %v6505_v22 = vld [vmem:[%s9749_s3 + $0x140] sm:$0xff]  }
  0xb5   : > { %6242 = vmatpush3.bf16.msra.mxu0 %v6494_v54  ;;  %v2600_v54 = vshrl.u32 %v7700_v51, 16  ;;  %v7759_v37 = vld [vmem:[%s7201_s12 + $0xb8] sm:$0xf]  ;;  %v2579_v11 = vor.u32 %v2578_v48, %v7722_v55  ;;  %v7765_v60 = vld [vmem:[%s7201_s12 + $0xb0] sm:$0x1]  ;;  %v7773_v48 = vrot.slane %v2620_v31, 5  ;;  %v9869_v31 = vsel %vm6679_vm2, %v7656_v28, %v7645_v3 }
  0xb6   : > { %6114 = vmatmul.mubr.bf16.gmra.mxu1 %v9866_v57  ;;  %6243 = vmatprep.subr.bf16.mxu0 %v6498_v61  ;;  %v2624_v57 = vshrl.u32 %v7713_v12, 16  ;;  %v2569_v24 = vor.u32 %v2568_v25, %v2565_v41  ;;  %v6506_v25 = vld [vmem:[%s9749_s3 + $0x180] sm:$0xff]   ;;  %v2616_v41 = vrot.slane %v2614_v17, 5  ;;  %v2638_v46 = vshll.u32 %v7738_v5, 16 }
  0xb7   : > { %6117 = vmatprep.mubr.bf16.mxu1 %v9867_v33  ;;  %6194 = vmatpush3.bf16.msra.mxu1 %v6493_v50  ;;  %v2537_v50 = vsel %vm6679_vm2, %v7702_v58, %v7694_v0  ;;  %v7748_v33 = vrot.slane %v2545_v43, 4  ;;  %v2592_v0 = vrot.slane %v2590_v23, 5  ;;  %v7762_v58 = vrot.slane %v2596_v2, 5 }
  0xb8   : > { %6195 = vmatprep.subr.bf16.mxu1 %v6497_v35  ;;  %v2602_v43 = vrot.slane %v2600_v54, 4  ;;  %v2626_v2 = vrot.slane %v2624_v57, 4  ;;  %v2635_v23 = vshrl.u32 %v7738_v5, 16  ;;  %v2648_v54 = vshrl.u32 %v7759_v37, 16 }
  0xb9   : > { %6244 = vmatpush3.bf16.msra.mxu0 %v6498_v61  ;;  %v2613_v61 = vrot.slane %v2611_v9, 4  ;;  %v2644_v42 = vshll.u32 %v7759_v37, 16  ;;  %v2584_v9 = vrot.slane %v2582_v21, 5  ;;  %v2606_v17 = vshll.u32 %v7753_v6, 16 }
  0xba   : > { %6245 = vmatprep.subr.bf16.mxu0 %v6502_v56  ;;  %v9871_v57 = vcombine.low %v7462_v1, %v7465_v26  ;;  %v2593_v5 = vor.u32 %v2592_v0, %v2589_v19  ;;  %v2603_v3 = vor.u32 %v2602_v43, %v7762_v58  ;;  %v9872_v21 = vcombine.low %v7474_v14, %v7478_v53  ;;  %v7813_v19 = vld [vmem:[%s9749_s3 + $0x1f8] sm:$0xff]  }
  0xbb   : > { %6166 = vmatmul.mubr.bf16.gmra.mxu0 %v5514_v13  ;;  %6196 = vmatpush3.bf16.msra.mxu1 %v6497_v35  ;;  %v5476_v13 = vcombine.low %v7509_v38, %v7512_v15  ;;  %v2570_v38 = vrot.slane %v2569_v24, 4  ;;  %v2580_v15 = vrot.slane %v2579_v11, 4  ;;  %v2617_v28 = vor.u32 %v2616_v41, %v2613_v61  ;;  %v7808_v11 = vld [vmem:[%s7201_s12 + $0xbc] sm:$0x1] }
  0xbc   : > { %6169 = vmatprep.mubr.bf16.mxu0 %v7678_v8  ;;  %6197 = vmatprep.subr.bf16.mxu1 %v6501_v36  ;;  %v9870_v8 = vsel %vm6679_vm2, %v7643_v34, %v7568_v39  ;;  %v7800_v39 = vld [vmem:[%s9749_s3 + $0x238] sm:$0xff]   ;;  %v5517_v34 = vcombine.low %v2527_v44, %v2537_v50  ;;  %v2630_v24 = vshll.u32 %v7765_v60, 16  ;;  %v2637_v0 = vrot.slane %v2635_v23, 4 }
  0xbd   : > { %v5516_v35 = vcombine.low %v9870_v8, %v9869_v31  ;;  %6246 = vmatpush3.bf16.msra.mxu0 %v6502_v56  ;;  %v2627_v56 = vor.u32 %v2626_v2, %v7773_v48  ;;  %v2640_v43 = vrot.slane %v2638_v46, 5  ;;  %v7815_v31 = vrot.slane %v2644_v42, 5 }
  0xbe   : > { %6118 = vmatmul.mubr.bf16.gmra.mxu1 %v9871_v57  ;;  %6247 = vmatprep.subr.bf16.mxu0 %v6506_v25  ;;  %v2650_v8 = vrot.slane %v2648_v54, 4  ;;  %v5477_v44 = vcombine.low %v7550_v4, %v7563_v10  ;;  %v2561_v50 = vsel %vm6679_vm2, %v7755_v40, %v7750_v59  ;;  %v2608_v61 = vrot.slane %v2606_v17, 5 }
  0xbf   : > { %6121 = vmatprep.mubr.bf16.mxu1 %v9872_v21  ;;  %6198 = vmatpush3.bf16.msra.mxu1 %v6501_v36  ;;  %v2551_v36 = vsel %vm6679_vm2, %v7748_v33, %v7666_v18  ;;  %v2575_v42 = vsel %vm6679_vm2, %v2570_v38, %v7722_v55  ;;  %v2585_v41 = vsel %vm6679_vm2, %v2580_v15, %v2584_v9  ;;  %v2594_v2 = vrot.slane %v2593_v5, 4  ;;  %v7865_v21 = vld [vmem:[%s7840_s28 + $0x4] sm:$0xf] }
  0xc0   : > { %6199 = vmatprep.subr.bf16.mxu1 %v6505_v22  ;;  %v2604_v23 = vrot.slane %v2603_v3, 4  ;;  %v2618_v18 = vrot.slane %v2617_v28, 4  ;;  %v2628_v33 = vrot.slane %v2627_v56, 4  ;;  %v2632_v46 = vrot.slane %v2630_v24, 5 }
  0xc1   : > { %6248 = vmatpush3.bf16.msra.mxu0 %v6506_v25  ;;  %v2654_v40 = vshll.u32 %v7808_v11, 16  ;;  %v2641_v59 = vor.u32 %v2640_v43, %v2637_v0  ;;  %v2651_v25 = vor.u32 %v2650_v8, %v7815_v31  ;;  %v2998_v38 = vrot.slane %v7249_v30, 5 }
  0xc2   : > { %6329 = vmatprep.subr.bf16.mxu0 %v7800_v39  ;;  %v5478_v5 = vcombine.low %v7602_v49, %v7606_v63  ;;  %v5479_v15 = vcombine.low %v7648_v47, %v7651_v52  ;;  %v5480_v55 = vcombine.low %v7669_v7, %v7700_v51  ;;  %v3005_v30 = vrot.slane %v7292_v20, 5 }
  0xc3   : > { %6170 = vmatmul.mubr.bf16.gmra.mxu0 %v5516_v35  ;;  %6200 = vmatpush3.bf16.msra.mxu1 %v6505_v22  ;;  %v5518_v22 = vcombine.low %v2551_v36, %v2561_v50  ;;  %v5519_v54 = vcombine.low %v2575_v42, %v2585_v41  ;;  %v2599_v35 = vsel %vm6679_vm2, %v2594_v2, %v7762_v58  ;;  %v2656_v3 = vrot.slane %v2654_v40, 5  ;;  %v7885_v41 = vld [vmem:[%s7840_s28 + $0x10] sm:$0xf] }
  0xc4   : > { %6173 = vmatprep.mubr.bf16.mxu0 %v5517_v34  ;;  %6281 = vmatprep.subr.bf16.mxu1 %v7813_v19  ;;  %v2609_v9 = vsel %vm6679_vm2, %v2604_v23, %v2608_v61  ;;  %v2623_v17 = vsel %vm6679_vm2, %v2618_v18, %v7773_v48  ;;  %v2633_v57 = vsel %vm6679_vm2, %v2628_v33, %v2632_v46  ;;  %v5531_v20 = vrot.slane %v7237_v16, 9  ;;  %v7877_v61 = vld [vmem:[%s7840_s28 + $0xc] sm:$0xf] }
  0xc5   : > { %v2642_v58 = vrot.slane %v2641_v59, 4  ;;  %v2652_v34 = vrot.slane %v2651_v25, 4  ;;  %v3000_v28 = vrot.slane %v2998_v38, 4  ;;  %v3001_v56 = vrot.slane %v7311_v62, 5  ;;  %9876 = vst [vmem:[#allocation5_spill] sm:$0xff] %v7885_v41 }
  0xc6   : > { %6122 = vmatmul.mubr.bf16.gmra.mxu1 %v5476_v13  ;;  %v7862_v13 = vld [vmem:[%s7840_s28] sm:$0xf]  ;;  %v5481_v48 = vcombine.low %v7710_v45, %v7713_v12  ;;  %v5532_v24 = vrot.slane %v7283_v32, 9  ;;  %v3007_v0 = vrot.slane %v3005_v30, 4  ;;  %v3008_v43 = vrot.slane %v7330_v29, 5 }
  0xc7   : > { %6125 = vmatprep.mubr.bf16.mxu1 %v5477_v44  ;;  %v5520_v8 = vcombine.low %v2599_v35, %v2609_v9  ;;  %v5521_v16 = vcombine.low %v2623_v17, %v2633_v57  ;;  %v9873_v44 = vld [vmem:[#allocation27_spill] sm:$0xff]  ;;  %v7881_v42 = vsel %vm6988_vm5, %v5531_v20, %v2998_v38  ;;  %v3857_v29 = vshrl.u32 %v7877_v61, 16  ;;  %v7948_v32 = vld [vmem:[%s7840_s28 + $0x24] sm:$0xf] }
  0xc8   : > { %9874 = vst [vmem:[#allocation27_spill] sm:$0xff] %v7877_v61  ;;  %v3860_v2 = vshll.u32 %v7877_v61, 16  ;;  %v2647_v23 = vsel %vm6679_vm2, %v2642_v58, %v7815_v31  ;;  %v2657_v18 = vsel %vm6679_vm2, %v2652_v34, %v2656_v3  ;;  %v7896_v33 = vsel %vm6988_vm5, %v3000_v28, %v3001_v56  ;;  %v9877_v31 = vld [vmem:[#allocation4_spill] sm:$0xff]  ;;  %v9878_v9 = vld [vmem:[#allocation7_spill] sm:$0xff]  ;;  %v7930_v56 = vld [vmem:[%s7840_s28 + $0x1c] sm:$0xf] }
  0xc9   : > { %v3866_v46 = vshll.u32 %v7885_v41, 16  ;;  %v7901_v40 = vsel %vm6988_vm5, %v5532_v24, %v3005_v30  ;;  %v7905_v59 = vsel %vm6988_vm5, %v3007_v0, %v3008_v43  ;;  %v3870_v25 = vshrl.u32 %v7885_v41, 16  ;;  %v9883_v0 = vld [vmem:[#allocation3_spill] sm:$0xff]  ;;  %v9887_v28 = vld [vmem:[#allocation9_spill] sm:$0xff] }
  0xca   : > { %v3012_v38 = vrot.slane %v9877_v31, 5  ;;  %v9782_v35 = vrot.slane %v7885_v41, 5  ;;  %v3019_v30 = vrot.slane %v9878_v9, 5  ;;  %v7917_v3 = vrot.slane %v3857_v29, 4 }
  0xcb   : > { %6174 = vmatmul.mubr.bf16.gmra.mxu0 %v5518_v22  ;;  %v7919_v20 = vrot.slane %v3860_v2, 5  ;;  %v7923_v34 = vrot.slane %v3866_v46, 5  ;;  %v7932_v24 = vrot.slane %v3870_v25, 4  ;;  %v5533_v43 = vrot.slane %v9883_v0, 9  ;;  %v9884_v2 = vld [vmem:[#allocation8_spill] sm:$0xff]  ;;  %v9886_v46 = vld [vmem:[#allocation6_spill] sm:$0xff] }
  0xcc   : > { %6177 = vmatprep.mubr.bf16.mxu0 %v5519_v54  ;;  %9879 = vst [vmem:[#allocation4_spill] sm:$0xff] %v7917_v3  ;;  %v3014_v29 = vrot.slane %v3012_v38, 4  ;;  %v5534_v31 = vrot.slane %v9886_v46, 9  ;;  %v3021_v9 = vrot.slane %v3019_v30, 4  ;;  %v3022_v54 = vrot.slane %v9887_v28, 5  ;;  %9888 = vst [vmem:[#allocation8_spill] sm:$0xff] %v7948_v32 }
  0xcd   : > { %9880 = vst [vmem:[#allocation7_spill] sm:$0xff] %v7919_v20  ;;  %9881 = vst [vmem:[#allocation28_spill] sm:$0xff] %v7923_v34  ;;  %v3905_v28 = vshrl.u32 %v7948_v32, 16  ;;  %v7962_v0 = vsel %vm6988_vm5, %v5533_v43, %v3012_v38  ;;  %v9890_v43 = vld [vmem:[#allocation10_spill] sm:$0xff]  ;;  %v9891_v46 = vld [vmem:[#allocation12_spill] sm:$0xff]  ;;  %v9905_v26 = vcombine.low %v7881_v42, %v7896_v33  ;;  %v3054_v3 = vrot.slane %v7478_v53, 5 }
  0xce   : > { %6126 = vmatmul.mubr.bf16.gmra.mxu1 %v5478_v5  ;;  %v5522_v5 = vcombine.low %v2647_v23, %v2657_v18  ;;  %9882 = vst [vmem:[#allocation29_spill] sm:$0xff] %v7932_v24  ;;  %v3015_v23 = vrot.slane %v9884_v2, 5  ;;  %v7938_v18 = vrot.slane %v9782_v35, 4  ;;  %v7951_v2 = vld [vmem:[%s7840_s28 + $0x28] sm:$0xf]  ;;  %v7975_v25 = vsel %vm6988_vm5, %v5534_v31, %v3019_v30  ;;  %v9893_v31 = vld [vmem:[#allocation14_spill] sm:$0xff] }
  0xcf   : > { %6129 = vmatprep.mubr.bf16.mxu1 %v5479_v15  ;;  %v7927_v15 = vld [vmem:[%s7840_s28 + $0x18] sm:$0xf]  ;;  %v9889_v35 = vld [vmem:[#allocation11_spill] sm:$0xff]  ;;  %v3914_v22 = vshll.u32 %v7951_v2, 16  ;;  %v7979_v38 = vsel %vm6988_vm5, %v3021_v9, %v3022_v54  ;;  %v3029_v57 = vrot.slane %v9891_v46, 5  ;;  %v3033_v17 = vrot.slane %v9893_v31, 5 }
  0xd0   : > { %9885 = vst [vmem:[#allocation3_spill] sm:$0xff] %v7938_v18  ;;  %v3026_v58 = vrot.slane %v9889_v35, 5  ;;  %v7966_v35 = vsel %vm6988_vm5, %v3014_v29, %v3015_v23  ;;  %v5535_v29 = vrot.slane %v9890_v43, 9  ;;  %v7989_v30 = vld [vmem:[%s7840_s28 + $0x30] sm:$0xf]  ;;  %v7994_v9 = vrot.slane %v3905_v28, 4 }
  0xd1   : > { %9892 = vst [vmem:[#allocation6_spill] sm:$0xff] %v7989_v30  ;;  %v7998_v36 = vrot.slane %v3914_v22, 5  ;;  %v8010_v18 = vld [vmem:[%s7840_s28 + $0x3c] sm:$0xf]  ;;  %v8018_v54 = vld [vmem:[%s7840_s28 + $0x40] sm:$0xf] }
  0xd2   : > { %v3028_v23 = vrot.slane %v3026_v58, 4  ;;  %9894 = vst [vmem:[#allocation9_spill] sm:$0xff] %v7994_v9  ;;  %v8014_v28 = vsel %vm6988_vm5, %v5535_v29, %v3026_v58  ;;  %v3035_v46 = vrot.slane %v3033_v17, 4  ;;  %v9899_v31 = vld [vmem:[#allocation17_spill] sm:$0xff]  ;;  %v9901_v29 = vcombine.low %v7862_v13, %v7865_v21 }
  0xd3   : > { %6178 = vmatmul.mubr.bf16.gmra.mxu0 %v5520_v8  ;;  %v3908_v8 = vshll.u32 %v7948_v32, 16  ;;  %9896 = vst [vmem:[#allocation10_spill] sm:$0xff] %v7998_v36  ;;  %v3953_v36 = vshrl.u32 %v8010_v18, 16  ;;  %v8090_v33 = vld [vmem:[%s7840_s28 + $0x58] sm:$0xf] }
  0xd4   : > { %6181 = vmatprep.mubr.bf16.mxu0 %v5521_v16  ;;  %v3918_v16 = vshrl.u32 %v7951_v2, 16 }
  0xd5   : > { %v7996_v43 = vrot.slane %v3908_v8, 5  ;;  %v9898_v8 = vld [vmem:[#allocation13_spill] sm:$0xff]  ;;  %v8050_v34 = vrot.slane %v3953_v36, 4 }
  0xd6   : > { %6130 = vmatmul.mubr.bf16.gmra.mxu1 %v5480_v55  ;;  %v8005_v50 = vrot.slane %v3918_v16, 4  ;;  %v5536_v22 = vrot.slane %v9898_v8, 9  ;;  %v3956_v55 = vshll.u32 %v8010_v18, 16  ;;  %v8024_v16 = vsel %vm6988_vm5, %v3028_v23, %v3029_v57 }
  0xd7   : > { %6133 = vmatprep.mubr.bf16.mxu1 %v5481_v48  ;;  %9895 = vst [vmem:[#allocation11_spill] sm:$0xff] %v7996_v43  ;;  %v8001_v48 = vld [vmem:[%s7840_s28 + $0x34] sm:$0xf]  ;;  %v3966_v57 = vshrl.u32 %v8018_v54, 16  ;;  %9903 = vst [vmem:[#allocation14_spill] sm:$0xff] %v8050_v34 }
  0xd8   : > { %9897 = vst [vmem:[#allocation12_spill] sm:$0xff] %v8005_v50  ;;  %v3036_v50 = vrot.slane %v9899_v31, 5  ;;  %v9900_v43 = vld [vmem:[#allocation16_spill] sm:$0xff]  ;;  %v8048_v8 = vsel %vm6988_vm5, %v5536_v22, %v3033_v17  ;;  %v8052_v23 = vrot.slane %v3956_v55, 5  ;;  %v8055_v31 = vld [vmem:[%s7840_s28 + $0x48] sm:$0xf] }
  0xd9   : > { %v3040_v58 = vrot.slane %v9900_v43, 5  ;;  %v9906_v43 = vld [vmem:[#allocation15_spill] sm:$0xff]  ;;  %v9907_v17 = vld [vmem:[#allocation18_spill] sm:$0xff]  ;;  %v6514_v55 = vld [vmem:[%s9749_s3 + $0x230] sm:$0xff]   ;;  %v8074_v42 = vrot.slane %v3966_v57, 4  ;;  %v4010_v57 = vshll.u32 %v8090_v33, 16 }
  0xda   : > { %9904 = vst [vmem:[#allocation13_spill] sm:$0xff] %v8052_v23  ;;  %v5537_v9 = vrot.slane %v9906_v43, 9  ;;  %v3043_v36 = vrot.slane %v9907_v17, 5  ;;  %v8067_v22 = vld [vmem:[%s7840_s28 + $0x4c] sm:$0xf]  ;;  %v3049_v43 = vrot.slane %v3047_v27, 4 }
  0xdb   : > { %6182 = vmatmul.mubr.bf16.gmra.mxu0 %v5522_v5  ;;  %v3962_v5 = vshll.u32 %v8018_v54, 16  ;;  %v3042_v24 = vrot.slane %v3040_v58, 4  ;;  %9909 = vst [vmem:[#allocation16_spill] sm:$0xff] %v8074_v42  ;;  %v8081_v17 = vld [vmem:[%s7840_s28 + $0x54] sm:$0xf] }
  0xdc   : > { %6249 = vmatprep.mubr.bf16.mxu0 %v9901_v29  ;;  %v9902_v29 = vcombine.low %v9873_v44, %v7759_v37  ;;  %v4004_v20 = vshll.u32 %v8081_v17, 16 }
  0xdd   : > { %v8072_v23 = vrot.slane %v3962_v5, 5  ;;  %v8102_v53 = vsel %vm6988_vm5, %v3042_v24, %v3043_v36  ;;  %v9912_v5 = vcombine.low %v7927_v15, %v7930_v56  ;;  %v9913_v36 = vld [vmem:[#allocation21_spill] sm:$0xff]  ;;  %v9914_v24 = vld [vmem:[#allocation22_spill] sm:$0xff] }
  0xde   : > { %6134 = vmatmul.mubr.bf16.gmra.mxu1 %v9902_v29  ;;  %v8062_v29 = vsel %vm6988_vm5, %v3035_v46, %v3036_v50  ;;  %v5538_v50 = vrot.slane %v7462_v1, 9  ;;  %v4001_v1 = vshrl.u32 %v8081_v17, 16  ;;  %v9911_v46 = vcombine.low %v7877_v61, %v7885_v41 }
  0xdf   : > { %6201 = vmatprep.mubr.bf16.mxu1 %v9905_v26  ;;  %9908 = vst [vmem:[#allocation17_spill] sm:$0xff] %v8072_v23  ;;  %v9910_v26 = vld [vmem:[#allocation19_spill] sm:$0xff]  ;;  %v3056_v23 = vrot.slane %v3054_v3, 4  ;;  %v3057_v61 = vrot.slane %v9914_v24, 5  ;;  %v8151_v24 = vrot.slane %v4010_v57, 5 }
  0xe0   : > { %v3050_v34 = vrot.slane %v9910_v26, 5  ;;  %v8098_v26 = vsel %vm6988_vm5, %v5537_v9, %v3040_v58  ;;  %v8117_v58 = vsel %vm6988_vm5, %v5538_v50, %v3047_v27  ;;  %v5539_v9 = vrot.slane %v7474_v14, 9  ;;  %v8143_v14 = vld [vmem:[%s7840_s28 + $0x64] sm:$0xf]  ;;  %v9922_v57 = vld [vmem:[#allocation23_spill] sm:$0xff] }
  0xe1   : > { %v9915_v27 = vcombine.low %v7901_v40, %v7905_v59  ;;  %v8136_v41 = vrot.slane %v4001_v1, 4  ;;  %v9917_v40 = vcombine.low %v7962_v0, %v7966_v35  ;;  %v8149_v59 = vrot.slane %v4004_v20, 5  ;;  %9919 = vst [vmem:[#allocation19_spill] sm:$0xff] %v8151_v24  ;;  %v9921_v35 = vld [vmem:[#allocation20_spill] sm:$0xff] }
  0xe2   : > { %v8125_v42 = vsel %vm6988_vm5, %v3049_v43, %v3050_v34  ;;  %v4014_v34 = vshrl.u32 %v8090_v33, 16  ;;  %v8140_v43 = vld [vmem:[%s7840_s28 + $0x60] sm:$0xf]  ;;  %v5540_v20 = vrot.slane %v9921_v35, 9  ;;  %v3064_v50 = vrot.slane %v9922_v57, 5 }
  0xe3   : > { %6250 = vmatmul.mubr.bf16.vlgmr.msra.gmra.mxu0 %v9911_v46  ;;  %v6513_v46 = vld [vmem:[%s9749_s3 + $0x1f0] sm:$0xff]   ;;  %9916 = vst [vmem:[#allocation15_spill] sm:$0xff] %v8136_v41  ;;  %9918 = vst [vmem:[#allocation18_spill] sm:$0xff] %v8149_v59  ;;  %v8170_v1 = vsel %vm6988_vm5, %v5539_v9, %v3054_v3  ;;  %v6522_v35 = vld [vmem:[%s9749_s3 + $0x220] sm:$0xff]   ;;  %v9926_v41 = vcombine.low %v7989_v30, %v8001_v48 }
  0xe4   : > { %6330 = vmatpush3.bf16.msra.mxu0 %v7800_v39  ;;  %6253 = vmatprep.mubr.bf16.mxu0 %v9912_v5  ;;  %v3061_v39 = vrot.slane %v9913_v36, 5  ;;  %v6518_v5 = vld [vmem:[%s9749_s3 + $0x228] sm:$0xff]   ;;  %v8166_v24 = vld [vmem:[%s7840_s28 + $0x70] sm:$0xf]  ;;  %v8178_v59 = vrot.slane %v4014_v34, 4 }
  0xe5   : > { %6331 = vmatprep.subr.bf16.mxu0 %v6514_v55  ;;  %v8156_v36 = vld [vmem:[%s7840_s28 + $0x6c] sm:$0xf]  ;;  %9923 = vst [vmem:[#allocation22_spill] sm:$0xff] %v8166_v24  ;;  %v4058_v3 = vshll.u32 %v8166_v24, 16  ;;  %v4062_v9 = vshrl.u32 %v8166_v24, 16 }
  0xe6   : > { %6202 = vmatmul.mubr.bf16.vlgmr.msra.gmra.mxu1 %v9915_v27  ;;  %9920 = vst [vmem:[#allocation21_spill] sm:$0xff] %v8156_v36  ;;  %v4049_v27 = vshrl.u32 %v8156_v36, 16  ;;  %v4052_v0 = vshll.u32 %v8156_v36, 16  ;;  %9924 = vst [vmem:[#allocation20_spill] sm:$0xff] %v8178_v59  ;;  %v8207_v59 = vsel %vm6988_vm5, %v5540_v20, %v3061_v39  ;;  %v8215_v57 = vld [vmem:[%s7840_s28 + $0x78] sm:$0xf]  ;;  %v9932_v20 = vcombine.low %v7975_v25, %v7979_v38 }
  0xe7   : > { %6282 = vmatpush3.bf16.msra.mxu1 %v7813_v19  ;;  %6205 = vmatprep.mubr.bf16.mxu1 %v9917_v40  ;;  %v6517_v19 = vld [vmem:[%s9749_s3 + $0x1e8] sm:$0xff]   ;;  %v3063_v40 = vrot.slane %v3061_v39, 4  ;;  %9928 = vst [vmem:[#allocation30_spill] sm:$0xff] %v8215_v57  ;;  %v5544_v39 = vrot.slane %v7669_v7, 9  ;;  %v3092_v7 = vrot.slane %v7753_v6, 5  ;;  %v9936_v25 = vcombine.low %v8014_v28, %v8024_v16  ;;  %v6525_v6 = vld [vmem:[%s9749_s3 + $0x1d8] sm:$0xff]  }
  0xe8   : > { %6283 = vmatprep.subr.bf16.mxu1 %v6513_v46  ;;  %6332 = vmatpush3.bf16.msra.mxu0 %v6514_v55  ;;  %v8174_v55 = vsel %vm6988_vm5, %v3056_v23, %v3057_v61  ;;  %v9925_v61 = vcombine.low %v7948_v32, %v7951_v2  ;;  %v8217_v32 = vrot.slane %v4049_v27, 4  ;;  %v8219_v30 = vrot.slane %v4052_v0, 5  ;;  %v8256_v16 = vld [vmem:[%s7840_s28 + $0x84] sm:$0xf] }
  0xe9   : > { %6333 = vmatprep.subr.bf16.mxu0 %v6518_v5  ;;  %v8211_v34 = vsel %vm6988_vm5, %v3063_v40, %v3064_v50  ;;  %v3089_v27 = vrot.slane %v7700_v51, 5  ;;  %v9943_v38 = vcombine.low %v8010_v18, %v8018_v54  ;;  %v3099_v0 = vrot.slane %v7765_v60, 5 }
  0xea   : > { %9929 = vst [vmem:[#allocation31_spill] sm:$0xff] %v8217_v32  ;;  %9930 = vst [vmem:[#allocation32_spill] sm:$0xff] %v8219_v30  ;;  %v9998_v30 = vld [vmem:[#allocation9_spill] sm:$0xff] }
  0xeb   : > { %6254 = vmatmul.mubr.bf16.gmra.mxu0 %v9925_v61  ;;  %6284 = vmatpush3.bf16.msra.mxu1 %v6513_v46  ;;  %v6521_v61 = vld [vmem:[%s9749_s3 + $0x1e0] sm:$0xff]   ;;  %v5541_v46 = vrot.slane %v7550_v4, 9  ;;  %v6526_v4 = vld [vmem:[%s9749_s3 + $0x218] sm:$0xff]  }
  0xec   : > { %6257 = vmatprep.mubr.bf16.mxu0 %v9926_v41  ;;  %6285 = vmatprep.subr.bf16.mxu1 %v6517_v19  ;;  %v3068_v41 = vrot.slane %v7563_v10, 5  ;;  %v8231_v10 = vrot.slane %v4058_v3, 5 }
  0xed   : > { %v8203_v23 = vpop.f32.mrf.mxu0  ;;  %6334 = vmatpush3.bf16.msra.mxu0 %v6518_v5  ;;  %v8229_v50 = vpop.f32.mrf.mxu1  ;;  %v8233_v5 = vrot.slane %v4062_v9, 4  ;;  %v9938_v9 = vld [vmem:[#allocation24_spill] sm:$0xff] }
  0xee   : > { %9927 = vst [vmem:[#allocation23_spill] sm:$0xff] %v8203_v23  ;;  %v8223_v23 = vld [vmem:[%s7840_s28 + $0x7c] sm:$0xf]  ;;  %6206 = vmatmul.mubr.bf16.gmra.mxu1 %v9932_v20  ;;  %6335 = vmatprep.subr.bf16.mxu0 %v6522_v35  ;;  %9933 = vst [vmem:[#allocation34_spill] sm:$0xff] %v8229_v50  ;;  %v3071_v20 = vrot.slane %v9938_v9, 5  ;;  %v3070_v51 = vrot.slane %v3068_v41, 4  ;;  %v8264_v9 = vsel %vm6988_vm5, %v5541_v46, %v3068_v41 }
  0xef   : > { %9931 = vst [vmem:[#allocation33_spill] sm:$0xff] %v8223_v23  ;;  %9934 = vst [vmem:[#allocation35_spill] sm:$0xff] %v8231_v10  ;;  %6209 = vmatprep.mubr.bf16.mxu1 %v9936_v25  ;;  %6286 = vmatpush3.bf16.msra.mxu1 %v6517_v19  ;;  %v8247_v3 = vpop.f32.mrf.mxu0  ;;  %v8260_v19 = vsel %vm6988_vm5, %v5544_v39, %v3089_v27  ;;  %v3091_v25 = vrot.slane %v3089_v27, 4  ;;  %v8270_v50 = vld [vmem:[%s7840_s28 + $0x88] sm:$0xf]  ;;  %v8272_v28 = vpop.f32.mrf.mxu1  ;;  %v5542_v39 = vrot.slane %v7602_v49, 9 }
  0xf0   : > { %9935 = vst [vmem:[#allocation36_spill] sm:$0xff] %v8233_v5  ;;  %9937 = vst [vmem:[#allocation37_spill] sm:$0xff] %v8247_v3  ;;  %6287 = vmatprep.subr.bf16.mxu1 %v6521_v61  ;;  %v3075_v27 = vrot.slane %v7606_v63, 5  ;;  %v6530_v46 = vld [vmem:[%s9749_s3 + $0x210] sm:$0xff]   ;;  %v5545_v63 = vrot.slane %v7710_v45, 9  ;;  %v3082_v45 = vrot.slane %v7651_v52, 5  ;;  %v9946_v49 = vcombine.low %v8048_v8, %v8062_v29 }
  0xf1   : > { %9939 = vst [vmem:[#allocation24_spill] sm:$0xff] %v8256_v16  ;;  %6336 = vmatpush3.bf16.msra.mxu0 %v6522_v35  ;;  %9940 = vst [vmem:[#allocation38_spill] sm:$0xff] %v8270_v50  ;;  %v9942_v35 = vld [vmem:[#allocation25_spill] sm:$0xff]  ;;  %v8282_v41 = vsel %vm6988_vm5, %v3091_v25, %v3092_v7  ;;  %v8287_v40 = vpop.f32.mrf.mxu0  ;;  %v9945_v7 = vcombine.low %v8055_v31, %v8067_v22  ;;  %v4097_v25 = vshrl.u32 %v8256_v16, 16  ;;  %v4106_v52 = vshll.u32 %v8270_v50, 16 }
  0xf2   : > { %9941 = vst [vmem:[#allocation39_spill] sm:$0xff] %v8272_v28  ;;  %6337 = vmatprep.subr.bf16.mxu0 %v6526_v4  ;;  %v3078_v3 = vrot.slane %v9942_v35, 5  ;;  %9944 = vst [vmem:[#allocation25_spill] sm:$0xff] %v8287_v40  ;;  %v3096_v35 = vrot.slane %v7713_v12, 5  ;;  %v6529_v12 = vld [vmem:[%s9749_s3 + $0x1d0] sm:$0xff]   ;;  %v3077_v28 = vrot.slane %v3075_v27, 4 }
  0xf3   : > { %6258 = vmatmul.mubr.bf16.gmra.mxu0 %v9943_v38  ;;  %6288 = vmatpush3.bf16.msra.mxu1 %v6521_v61  ;;  %v8299_v38 = vsel %vm6988_vm5, %v3070_v51, %v3071_v20  ;;  %v5546_v20 = vrot.slane %v9873_v44, 9  ;;  %v3103_v51 = vrot.slane %v7759_v37, 5  ;;  %v8317_v61 = vpop.f32.mrf.mxu1  ;;  %v4100_v40 = vshll.u32 %v8256_v16, 16  ;;  %v8328_v8 = vpop.f32.mrf.mxu0  ;;  %v3441_v10 = vld [vmem:[%s7840_s28 + $0x2c] sm:$0x1] }
  0xf4   : > { %6261 = vmatprep.mubr.bf16.mxu0 %v9945_v7  ;;  %6289 = vmatprep.subr.bf16.mxu1 %v6525_v6  ;;  %v8310_v60 = vsel %vm6988_vm5, %v5545_v63, %v3096_v35  ;;  %v3098_v7 = vrot.slane %v3096_v35, 4  ;;  %9947 = vst [vmem:[#allocation40_spill] sm:$0xff] %v8317_v61  ;;  %v3106_v44 = vrot.slane %v7808_v11, 5  ;;  %v9948_v37 = vcombine.low %v8098_v26, %v8102_v53 }
  0xf5   : > { %6338 = vmatpush3.bf16.msra.mxu0 %v6526_v4  ;;  %v6534_v4 = vld [vmem:[%s9749_s3 + $0x208] sm:$0xff]   ;;  %9949 = vst [vmem:[#allocation41_spill] sm:$0xff] %v8328_v8  ;;  %v4110_v29 = vshrl.u32 %v8270_v50, 16  ;;  %v8337_v63 = vsel %vm6988_vm5, %v5546_v20, %v3103_v51  ;;  %v3105_v11 = vrot.slane %v3103_v51, 4  ;;  %v5543_v26 = vrot.slane %v7648_v47, 9 }
  0xf6   : > { %6210 = vmatmul.mubr.bf16.gmra.mxu1 %v9946_v49  ;;  %6339 = vmatprep.subr.bf16.mxu0 %v6530_v46  ;;  %v8333_v49 = vsel %vm6988_vm5, %v3098_v7, %v3099_v0  ;;  %v3084_v53 = vrot.slane %v3082_v45, 4  ;;  %v8350_v20 = vsel %vm6988_vm5, %v5542_v39, %v3075_v27  ;;  %v8352_v47 = vrot.slane %v4097_v25, 4  ;;  %v8355_v51 = vld [vmem:[%s7840_s28 + $0x90] sm:$0xf]  ;;  %v6538_v0 = vld [vmem:[%s9749_s3 + $0x200] sm:$0xff]   ;;  %v8367_v7 = vpop.f32.mrf.mxu1 }
  0xf7   : > { %6213 = vmatprep.mubr.bf16.mxu1 %v9948_v37  ;;  %6290 = vmatpush3.bf16.msra.mxu1 %v6525_v6  ;;  %v9950_v6 = vld [vmem:[#allocation26_spill] sm:$0xff]  ;;  %v6533_v37 = vld [vmem:[%s9749_s3 + $0x1c8] sm:$0xff]   ;;  %v8362_v61 = vsel %vm6988_vm5, %v3105_v11, %v3106_v44  ;;  %9952 = vst [vmem:[#allocation42_spill] sm:$0xff] %v8367_v7  ;;  %v8371_v39 = vsel %vm6988_vm5, %v3077_v28, %v3078_v3  ;;  %v8373_v27 = vrot.slane %v4100_v40, 5  ;;  %v8378_v25 = vld [vmem:[%s7840_s28 + $0x9c] sm:$0xf] }
  0xf8   : > { %6291 = vmatprep.subr.bf16.mxu1 %v6529_v12  ;;  %v3085_v35 = vrot.slane %v9950_v6, 5  ;;  %9951 = vst [vmem:[#allocation26_spill] sm:$0xff] %v8352_v47  ;;  %v8358_v6 = vld [vmem:[%s7840_s28 + $0x94] sm:$0xf]  ;;  %9955 = vst [vmem:[#allocation45_spill] sm:$0xff] %v8378_v25  ;;  %v9957_v11 = vcombine.low %v8081_v17, %v8090_v33  ;;  %v8388_v7 = vpop.f32.mrf.mxu0  ;;  %v4145_v40 = vshrl.u32 %v8378_v25, 16 }
  0xf9   : > { %6340 = vmatpush3.bf16.msra.mxu0 %v6530_v46  ;;  %9953 = vst [vmem:[#allocation43_spill] sm:$0xff] %v8373_v27  ;;  %v8375_v46 = vrot.slane %v4106_v52, 5  ;;  %v8381_v47 = vld [vmem:[%s7840_s28 + $0xa0] sm:$0xf]  ;;  %9958 = vst [vmem:[#allocation47_spill] sm:$0xff] %v8388_v7  ;;  %v4148_v28 = vshll.u32 %v8378_v25, 16  ;;  %v10000_v32 = vcombine.low %v8355_v51, %v8358_v6 }
  0xfa   : > { %9956 = vst [vmem:[#allocation46_spill] sm:$0xff] %v8381_v47  ;;  %6341 = vmatprep.subr.bf16.mxu0 %v6534_v4  ;;  %v4154_v52 = vshll.u32 %v8381_v47, 16  ;;  %v8397_v44 = vrot.slane %v4110_v29, 4  ;;  %v4158_v3 = vshrl.u32 %v8381_v47, 16  ;;  %v6537_v27 = vld [vmem:[%s9749_s3 + $0x1c0] sm:$0xff]   ;;  %v8440_v29 = vrot.slane %v4145_v40, 4 }
  0xfb   : > { %9954 = vst [vmem:[#allocation44_spill] sm:$0xff] %v8375_v46  ;;  %6262 = vmatmul.mubr.bf16.gmra.mxu0 %v9957_v11  ;;  %6292 = vmatpush3.bf16.msra.mxu1 %v6529_v12  ;;  %v9959_v46 = vcombine.low %v8140_v43, %v8143_v14  ;;  %v8401_v11 = vsel %vm6988_vm5, %v5543_v26, %v3082_v45  ;;  %v8430_v7 = vld [vmem:[%s7840_s28 + $0xac] sm:$0xf]  ;;  %v8447_v45 = vld [vmem:[%s7840_s28 + $0xb4] sm:$0xf]  ;;  %v9972_v40 = vshll.u32 %v7862_v13, 16 }
  0xfc   : > { %9960 = vst [vmem:[#allocation48_spill] sm:$0xff] %v8397_v44  ;;  %v8405_v12 = vsel %vm6988_vm5, %v3084_v53, %v3085_v35  ;;  %6293 = vmatprep.subr.bf16.mxu1 %v6533_v37  ;;  %v8418_v53 = vld [vmem:[%s7840_s28 + $0xa8] sm:$0xf]  ;;  %v9961_v35 = vcombine.low %v8117_v58, %v8125_v42  ;;  %v8423_v44 = vpop.f32.mrf.mxu1  ;;  %v9963_v42 = vcombine.low %v8170_v1, %v8174_v55  ;;  %v8436_v58 = vpop.f32.mrf.mxu0  ;;  %9965 = vst [vmem:[#allocation51_spill] sm:$0xff] %v8440_v29  ;;  %v8452_v8 = vld [vmem:[%s7840_s28 + $0xb8] sm:$0xf] }
  0xfd   : > { %6265 = vmatprep.mubr.bf16.mxu0 %v9959_v46  ;;  %6342 = vmatpush3.bf16.msra.mxu0 %v6534_v4  ;;  %9962 = vst [vmem:[#allocation49_spill] sm:$0xff] %v8423_v44  ;;  %v3842_v4 = vshll.u32 %v7865_v21, 16  ;;  %9964 = vst [vmem:[#allocation50_spill] sm:$0xff] %v8436_v58  ;;  %v8442_v46 = vrot.slane %v4148_v28, 5  ;;  %v8444_v26 = vrot.slane %v4154_v52, 5  ;;  %v8449_v44 = vrot.slane %v4158_v3, 4 }
  0xfe   : > { %6214 = vmatmul.mubr.bf16.gmra.mxu1 %v9961_v35  ;;  %6343 = vmatprep.subr.bf16.mxu0 %v6538_v0  ;;  %9968 = vst [vmem:[#allocation54_spill] sm:$0xff] %v8447_v45  ;;  %9970 = vst [vmem:[#allocation56_spill] sm:$0xff] %v8452_v8  ;;  %v4193_v1 = vshrl.u32 %v8447_v45, 16  ;;  %v9971_v55 = vshrl.u32 %v7862_v13, 16  ;;  %v3838_v35 = vrot.slane %v9972_v40, 5  ;;  %v4202_v3 = vshll.u32 %v8452_v8, 16  ;;  %v8478_v58 = vpop.f32.mrf.mxu0 }
  0xff   : > { %6217 = vmatprep.mubr.bf16.mxu1 %v9963_v42  ;;  %9966 = vst [vmem:[#allocation52_spill] sm:$0xff] %v8442_v46  ;;  %9967 = vst [vmem:[#allocation53_spill] sm:$0xff] %v8444_v26  ;;  %6294 = vmatpush3.bf16.msra.mxu1 %v6533_v37  ;;  %v4196_v37 = vshll.u32 %v8447_v45, 16  ;;  %v8466_v26 = vpop.f32.mrf.mxu1  ;;  %v8471_v40 = vrot.slane %v3842_v4, 5  ;;  %v9974_v28 = vshrl.u32 %v7865_v21, 16  ;;  %v9975_v29 = vcombine.low %v8156_v36, %v8166_v24 }
 0x100   : > { %9969 = vst [vmem:[#allocation55_spill] sm:$0xff] %v8449_v44  ;;  %6295 = vmatprep.subr.bf16.mxu1 %v6537_v27  ;;  %v3835_v42 = vrot.slane %v9971_v55, 4  ;;  %v8464_v44 = vld [vmem:[%s7840_s28 + $0x8] sm:$0x1]  ;;  %9973 = vst [vmem:[#allocation57_spill] sm:$0xff] %v8466_v26  ;;  %v4206_v46 = vshrl.u32 %v8452_v8, 16 }
 0x101   : > { %6344 = vmatpush3.bf16.msra.mxu0 %v6538_v0  ;;  %v3848_v52 = vrot.slane %v9974_v28, 4  ;;  %9976 = vst [vmem:[#allocation58_spill] sm:$0xff] %v8478_v58  ;;  %v3435_v4 = vld [vmem:[%s7840_s28 + $0x14] sm:$0x1]  ;;  %v9977_v28 = vcombine.low %v8215_v57, %v8223_v23  ;;  %v8489_v5 = vrot.slane %v4193_v1, 4  ;;  %v3852_v58 = vshll.u32 %v8464_v44, 16  ;;  %v8502_v1 = vpop.f32.mrf.mxu1 }
 0x102   : > { %v3890_v0 = vshll.u32 %v7930_v56, 16  ;;  %v8493_v36 = vrot.slane %v4196_v37, 5  ;;  %v8495_v26 = vrot.slane %v4202_v3, 5  ;;  %v5667_v55 = vrot.slane %v7862_v13, 9  ;;  %9982 = vst [vmem:[#allocation62_spill] sm:$0xff] %v8502_v1  ;;  %v9984_v37 = vld [vmem:[#allocation4_spill] sm:$0xff] }
 0x103   : > { %6266 = vmatmul.mubr.bf16.gmra.mxu0 %v9975_v29  ;;  %6296 = vmatpush3.bf16.msra.mxu1 %v6537_v27  ;;  %9978 = vst [vmem:[#allocation59_spill] sm:$0xff] %v8489_v5  ;;  %v3839_v29 = vor.u32 %v3838_v35, %v3835_v42  ;;  %v4556_v27 = vrot.slane %v7865_v21, 5  ;;  %v9981_v57 = vcombine.low %v8207_v59, %v8211_v34  ;;  %v8512_v21 = vpop.f32.mrf.mxu0  ;;  %v8514_v5 = vrot.slane %v4206_v46, 4 }
 0x104   : > { %6269 = vmatprep.mubr.bf16.mxu0 %v9977_v28  ;;  %9979 = vst [vmem:[#allocation60_spill] sm:$0xff] %v8493_v36  ;;  %9980 = vst [vmem:[#allocation61_spill] sm:$0xff] %v8495_v26  ;;  %v3849_v42 = vor.u32 %v3848_v52, %v8471_v40  ;;  %v9983_v28 = vld [vmem:[#allocation7_spill] sm:$0xff]  ;;  %v3876_v26 = vshll.u32 %v3435_v4, 16  ;;  %v9986_v13 = vcombine.low %v8264_v9, %v8299_v38  ;;  %v4559_v59 = vrot.slane %v8464_v44, 5 }
 0x105   : > { %v9985_v36 = vor.u32 %v9983_v28, %v9984_v37  ;;  %9987 = vst [vmem:[#allocation7_spill] sm:$0xff] %v8512_v21  ;;  %9988 = vst [vmem:[#allocation4_spill] sm:$0xff] %v8514_v5  ;;  %v9990_v52 = vshll.u32 %v7927_v15, 16  ;;  %v3840_v28 = vrot.slane %v3839_v29, 4  ;;  %v3438_v37 = vld [vmem:[%s7840_s28 + $0x20] sm:$0x1]  ;;  %v8528_v46 = vsel %vm6988_vm5, %v5667_v55, %v4556_v27 }
 0x106   : > { %6218 = vmatmul.mubr.bf16.gmra.mxu1 %v9981_v57  ;;  %v9989_v57 = vshrl.u32 %v7927_v15, 16  ;;  %v8522_v1 = vrot.slane %v3890_v0, 5  ;;  %v9991_v9 = vshrl.u32 %v7930_v56, 16  ;;  %v4558_v44 = vrot.slane %v4556_v27, 4  ;;  %v9993_v5 = vld [vmem:[#allocation28_spill] sm:$0xff] }
 0x107   : > { %v3864_v3 = vrot.slane %v9985_v36, 4  ;;  %6221 = vmatprep.mubr.bf16.mxu1 %v9986_v13  ;;  %v3886_v35 = vrot.slane %v9990_v52, 5  ;;  %v3854_v36 = vrot.slane %v3852_v58, 5  ;;  %v9992_v13 = vld [vmem:[#allocation29_spill] sm:$0xff]  ;;  %v4570_v24 = vrot.slane %v7930_v56, 5  ;;  %v8534_v52 = vpop.f32.mrf.mxu1 }
 0x108   : > { %v3883_v34 = vrot.slane %v9989_v57, 4  ;;  %v3896_v38 = vrot.slane %v9991_v9, 4  ;;  %v9994_v57 = vor.u32 %v9992_v13, %v9993_v5  ;;  %9995 = vst [vmem:[#allocation29_spill] sm:$0xff] %v8534_v52  ;;  %v3850_v58 = vrot.slane %v3849_v42, 4  ;;  %v9999_v52 = vld [vmem:[#allocation11_spill] sm:$0xff] }
 0x109   : > { %v3869_v29 = vsel %vm6679_vm2, %v3864_v3, %v9993_v5  ;;  %v3878_v23 = vrot.slane %v3876_v26, 5  ;;  %v4566_v9 = vrot.slane %v3435_v4, 5  ;;  %v9997_v55 = vcombine.low %v8256_v16, %v8270_v50  ;;  %v8543_v27 = vpop.f32.mrf.mxu0  ;;  %v10001_v26 = vld [vmem:[#allocation5_spill] sm:$0xff]  ;;  %v10003_v3 = vld [vmem:[#allocation27_spill] sm:$0xff] }
 0x10a   : > { %v3874_v21 = vrot.slane %v9994_v57, 4  ;;  %v3887_v13 = vor.u32 %v3886_v35, %v3883_v34  ;;  %v3900_v57 = vshll.u32 %v3438_v37, 16  ;;  %v5669_v56 = vrot.slane %v7927_v15, 9  ;;  %v10005_v34 = vld [vmem:[#allocation10_spill] sm:$0xff] }
 0x10b   : > { %6270 = vmatmul.mubr.bf16.gmra.mxu0 %v9997_v55  ;;  %v3911_v42 = vor.u32 %v9999_v52, %v9998_v30  ;;  %v3845_v5 = vsel %vm6679_vm2, %v3840_v28, %v8471_v40  ;;  %v10002_v4 = vrot.slane %v10001_v26, 5  ;;  %v10004_v55 = vrot.slane %v10003_v3, 9  ;;  %v10006_v30 = vld [vmem:[#allocation12_spill] sm:$0xff]  ;;  %v10009_v3 = vld [vmem:[#allocation3_spill] sm:$0xff] }
 0x10c   : > { %6273 = vmatprep.mubr.bf16.mxu0 %v10000_v32  ;;  %v3897_v15 = vor.u32 %v3896_v38, %v8522_v1  ;;  %v3921_v52 = vor.u32 %v10006_v30, %v10005_v34  ;;  %v8567_v32 = vsel %vm6988_vm5, %v4558_v44, %v4559_v59  ;;  %v4572_v16 = vrot.slane %v4570_v24, 4 }
 0x10d   : > { %v8560_v35 = vsel %vm6988_vm5, %v10004_v55, %v10002_v4  ;;  %v4573_v50 = vrot.slane %v3438_v37, 5  ;;  %v3924_v40 = vshll.u32 %v3441_v10, 16  ;;  %v10007_v28 = vcombine.low %v8350_v20, %v8371_v39  ;;  %v8587_v20 = vpop.f32.mrf.mxu0 }
 0x10e   : > { %v8572_v26 = vpop.f32.mrf.mxu1  ;;  %v3855_v4 = vsel %vm6679_vm2, %v3850_v58, %v3854_v36  ;;  %v3879_v38 = vsel %vm6679_vm2, %v3874_v21, %v3878_v23  ;;  %v8581_v59 = vsel %vm6988_vm5, %v10009_v3, %v4566_v9  ;;  %v3938_v37 = vshll.u32 %v8001_v48, 16  ;;  %v10012_v3 = vld [vmem:[#allocation6_spill] sm:$0xff] }
 0x10f   : > { %6222 = vmatmul.mubr.bf16.gmra.mxu1 %v10007_v28  ;;  %10008 = vst [vmem:[#allocation28_spill] sm:$0xff] %v8572_v26  ;;  %v10010_v44 = vcombine.low %v8401_v11, %v8405_v12  ;;  %v3888_v39 = vrot.slane %v3887_v13, 4  ;;  %v3902_v55 = vrot.slane %v3900_v57, 5  ;;  %v8591_v36 = vsel %vm6988_vm5, %v5669_v56, %v4570_v24 }
 0x110   : > { %v3912_v23 = vrot.slane %v3911_v42, 4  ;;  %v3898_v21 = vrot.slane %v3897_v15, 4  ;;  %v3922_v58 = vrot.slane %v3921_v52, 4  ;;  %v10011_v9 = vrot.slane %v7951_v2, 5  ;;  %v8603_v24 = vpop.f32.mrf.mxu1 }
 0x111   : > { %6225 = vmatprep.mubr.bf16.mxu1 %v10010_v44  ;;  %v4580_v28 = vrot.slane %v3441_v10, 5  ;;  %v8597_v11 = vsel %vm6988_vm5, %v4572_v16, %v4573_v50  ;;  %v3926_v12 = vrot.slane %v3924_v40, 5  ;;  %v10013_v44 = vshrl.u32 %v10012_v3, 16  ;;  %10015 = vst [vmem:[#allocation2_spill] sm:$0xff] %v8603_v24  ;;  %v8610_v10 = vld [vmem:[%s7840_s28 + $0x38] sm:$0x1]  ;;  %v8619_v40 = vpop.f32.mrf.mxu0 }
 0x112   : > { %v4579_v30 = vrot.slane %v10011_v9, 4  ;;  %v10014_v57 = vshll.u32 %v10012_v3, 16  ;;  %v5699_v56 = vcombine.low %v8528_v46, %v8567_v32  ;;  %v8607_v42 = vcombine.low %v3869_v29, %v3879_v38  ;;  %v10019_v38 = vld [vmem:[#allocation8_spill] sm:$0xff]  ;;  %v8698_v24 = vld [vmem:[%s7840_s28 + $0x5c] sm:$0x1] }
 0x113   : > { %v3931_v13 = vrot.slane %v10013_v44, 4  ;;  %v8612_v15 = vrot.slane %v3938_v37, 5  ;;  %v10016_v50 = vshrl.u32 %v8001_v48, 16  ;;  %v10017_v52 = vcombine.low %v8378_v25, %v8381_v47 }
 0x114   : > { %v3934_v26 = vrot.slane %v10014_v57, 5  ;;  %v8621_v9 = vcombine.low %v3845_v5, %v3855_v4  ;;  %v3893_v29 = vsel %vm6679_vm2, %v3888_v39, %v8522_v1  ;;  %v10018_v32 = vrot.slane %v7951_v2, 5  ;;  %v8648_v2 = vld [vmem:[%s7840_s28 + $0x44] sm:$0x1] }
 0x115   : > { %v3944_v16 = vrot.slane %v10016_v50, 4  ;;  %6274 = vmatmul.mubr.bf16.gmra.mxu0 %v10017_v52  ;;  %v10020_v37 = vrot.slane %v10019_v38, 9  ;;  %v10021_v57 = vcombine.low %v8418_v53, %v8430_v7  ;;  %v3903_v5 = vsel %vm6679_vm2, %v3898_v21, %v3902_v55 }
 0x116   : > { %v8645_v1 = vsel %vm6988_vm5, %v4579_v30, %v4580_v28  ;;  %v3986_v39 = vshll.u32 %v8067_v22, 16  ;;  %v3917_v50 = vsel %vm6679_vm2, %v3912_v23, %v10005_v34  ;;  %v3927_v52 = vsel %vm6679_vm2, %v3922_v58, %v3926_v12  ;;  %v8660_v30 = vpop.f32.mrf.mxu1  ;;  %v10025_v34 = vld [vmem:[#allocation13_spill] sm:$0xff]  ;;  %v8667_v58 = vpop.f32.mrf.mxu0 }
 0x117   : > { %v8634_v44 = vsel %vm6988_vm5, %v10020_v37, %v10018_v32  ;;  %6277 = vmatprep.mubr.bf16.mxu0 %v10021_v57  ;;  %v3935_v32 = vor.u32 %v3934_v26, %v3931_v13  ;;  %v3948_v55 = vshll.u32 %v8610_v10, 16  ;;  %v10022_v21 = vcombine.low %v8260_v19, %v8282_v41  ;;  %10023 = vst [vmem:[#allocation9_spill] sm:$0xff] %v8660_v30  ;;  %v10024_v57 = vld [vmem:[#allocation14_spill] sm:$0xff]  ;;  %v10027_v12 = vld [vmem:[#allocation17_spill] sm:$0xff]  ;;  %v10028_v13 = vld [vmem:[#allocation16_spill] sm:$0xff] }
 0x118   : > { %v3945_v28 = vor.u32 %v3944_v16, %v8612_v15  ;;  %v5671_v38 = vrot.slane %v10012_v3, 9  ;;  %v4584_v37 = vrot.slane %v8001_v48, 5  ;;  %v3959_v23 = vor.u32 %v10025_v34, %v10024_v57  ;;  %v3450_v41 = vld [vmem:[%s7840_s28 + $0x50] sm:$0x1]  ;;  %v8691_v46 = vpop.f32.mrf.mxu1 }
 0x119   : > { %6226 = vmatmul.mubr.bf16.gmra.mxu1 %v10022_v21  ;;  %v10026_v26 = vcombine.low %v8310_v60, %v8333_v49  ;;  %v8672_v19 = vcombine.low %v3893_v29, %v3903_v5  ;;  %v3969_v3 = vor.u32 %v10028_v13, %v10027_v12  ;;  %v3972_v48 = vshll.u32 %v8648_v2, 16  ;;  %10032 = vst [vmem:[#allocation11_spill] sm:$0xff] %v8691_v46 }
 0x11a   : > { %v10029_v16 = vshrl.u32 %v8055_v31, 16  ;;  %v10030_v57 = vshll.u32 %v8055_v31, 16  ;;  %v8683_v4 = vrot.slane %v3986_v39, 5  ;;  %v10031_v60 = vshrl.u32 %v8067_v22, 16 }
 0x11b   : > { %6229 = vmatprep.mubr.bf16.mxu1 %v10026_v26  ;;  %v8687_v29 = vcombine.low %v3917_v50, %v3927_v52  ;;  %v3936_v5 = vrot.slane %v3935_v32, 4  ;;  %v3950_v26 = vrot.slane %v3948_v55, 5  ;;  %v4587_v13 = vrot.slane %v8610_v10, 5  ;;  %v8700_v25 = vpop.f32.mrf.mxu0 }
 0x11c   : > { %v3979_v21 = vrot.slane %v10029_v16, 4  ;;  %v3982_v34 = vrot.slane %v10030_v57, 5  ;;  %v3992_v49 = vrot.slane %v10031_v60, 4  ;;  %v3946_v30 = vrot.slane %v3945_v28, 4 }
 0x11d   : > { %v8695_v16 = vsel %vm6988_vm5, %v5671_v38, %v4584_v37  ;;  %v4586_v57 = vrot.slane %v4584_v37, 4  ;;  %v3960_v39 = vrot.slane %v3959_v23, 4  ;;  %v10033_v50 = vcombine.low %v8447_v45, %v8452_v8  ;;  %v8710_v46 = vpop.f32.mrf.mxu0  ;;  %v10037_v8 = vld [vmem:[#allocation19_spill] sm:$0xff] }
 0x11e   : > { %v3970_v52 = vrot.slane %v3969_v3, 4  ;;  %v3974_v10 = vrot.slane %v3972_v48, 5  ;;  %v10034_v32 = vrot.slane %v8018_v54, 5  ;;  %v4598_v28 = vrot.slane %v8067_v22, 5  ;;  %v10035_v3 = vld [vmem:[#allocation15_spill] sm:$0xff]  ;;  %v10036_v48 = vld [vmem:[#allocation18_spill] sm:$0xff] }
 0x11f   : > { %6278 = vmatmul.mubr.bf16.gmra.mxu0 %v10033_v50  ;;  %v4594_v38 = vrot.slane %v8648_v2, 5  ;;  %v3983_v37 = vor.u32 %v3982_v34, %v3979_v21  ;;  %v3993_v23 = vor.u32 %v3992_v49, %v8683_v4  ;;  %v3996_v60 = vshll.u32 %v3450_v41, 16 }
 0x120   : > { %v4593_v55 = vrot.slane %v10034_v32, 4  ;;  %6345 = vmatprep.mubr.bf16.mxu0 %v5699_v56  ;;  %v3941_v50 = vsel %vm6679_vm2, %v3936_v5, %v8612_v15  ;;  %v4007_v45 = vor.u32 %v10036_v48, %v10035_v3  ;;  %v10038_v32 = vld [vmem:[#allocation20_spill] sm:$0xff]  ;;  %v4020_v22 = vshll.u32 %v8698_v24, 16  ;;  %v8720_v56 = vpop.f32.mrf.mxu1  ;;  %v10121_v0 = vld [vmem:[#allocation11_spill] sm:$0xff] }
 0x121   : > { %v4017_v47 = vor.u32 %v10038_v32, %v10037_v8  ;;  %v10039_v2 = vcombine.low %v8337_v63, %v8362_v61  ;;  %v3951_v21 = vsel %vm6679_vm2, %v3946_v30, %v3950_v26  ;;  %v8729_v15 = vsel %vm6988_vm5, %v4586_v57, %v4587_v13  ;;  %v8742_v61 = vpop.f32.mrf.mxu0 }
 0x122   : > { %v3965_v34 = vsel %vm6679_vm2, %v3960_v39, %v10027_v12  ;;  %v10040_v49 = vrot.slane %v8018_v54, 5  ;;  %v10041_v5 = vrot.slane %v8010_v18, 9  ;;  %v3975_v63 = vsel %vm6679_vm2, %v3970_v52, %v3974_v10  ;;  %v8748_v12 = vpop.f32.mrf.mxu1 }
 0x123   : > { %6230 = vmatmul.mubr.bf16.gmra.mxu1 %v10039_v2  ;;  %v5673_v30 = vrot.slane %v8055_v31, 9  ;;  %v4600_v26 = vrot.slane %v4598_v28, 4  ;;  %v4601_v13 = vrot.slane %v3450_v41, 5  ;;  %v8752_v18 = vsel %vm6988_vm5, %v4593_v55, %v4594_v38  ;;  %v8754_v48 = vpop.f32.mrf.mxu0 }
 0x124   : > { %v8740_v3 = vsel %vm6988_vm5, %v10041_v5, %v10040_v49  ;;  %6297 = vmatprep.mubr.bf16.mxu1 %v8621_v9  ;;  %v3984_v54 = vrot.slane %v3983_v37, 4  ;;  %v3994_v57 = vrot.slane %v3993_v23, 4  ;;  %v3998_v39 = vrot.slane %v3996_v60, 5  ;;  %v8757_v31 = vpop.f32.mrf.mxu1 }
 0x125   : > { %v4008_v9 = vrot.slane %v4007_v45, 4  ;;  %v4018_v32 = vrot.slane %v4017_v47, 4  ;;  %v4022_v2 = vrot.slane %v4020_v22, 5  ;;  %v4034_v52 = vshll.u32 %v8143_v14, 16  ;;  %10042 = vst [vmem:[#allocation5_spill] sm:$0xff] %v8757_v31  ;;  %v6059_v23 = vpop.f32.mrf.mxu0 }
 0x126   : > { %v8759_v41 = vcombine.low %v3941_v50, %v3951_v21  ;;  %v5703_v10 = vcombine.low %v8695_v16, %v8729_v15  ;;  %v10043_v55 = vrot.slane %v8090_v33, 5  ;;  %v4608_v37 = vrot.slane %v8698_v24, 5  ;;  %v8778_v16 = vld [vmem:[%s7840_s28 + $0x68] sm:$0x1]  ;;  %v8784_v15 = vpop.f32.mrf.mxu1 }
 0x127   : > { %v10044_v45 = vcombine.low %v8560_v35, %v8581_v59  ;;  %v8771_v47 = vsel %vm6988_vm5, %v5673_v30, %v4598_v28  ;;  %v8775_v60 = vsel %vm6988_vm5, %v4600_v26, %v4601_v13  ;;  %v10045_v50 = vshrl.u32 %v8140_v43, 16  ;;  %10047 = vst [vmem:[#allocation27_spill] sm:$0xff] %v8784_v15  ;;  %v1713_v30 = vpop.f32.mrf.mxu0  ;;  %v8808_v13 = vld [vmem:[%s7840_s28 + $0x74] sm:$0x1] }
 0x128   : > { %v4607_v38 = vrot.slane %v10043_v55, 4  ;;  %v10046_v24 = vshll.u32 %v8140_v43, 16  ;;  %v10048_v35 = vcombine.low %v8591_v36, %v8597_v11  ;;  %v8789_v59 = vcombine.low %v3965_v34, %v3975_v63  ;;  %v6011_v55 = vpop.f32.mrf.mxu1 }
 0x129   : > { %6346 = vmatmul.mubr.bf16.vlgmr.msra.gmra.mxu0 %v10044_v45  ;;  %v4027_v22 = vrot.slane %v10045_v50, 4  ;;  %v3989_v49 = vsel %vm6679_vm2, %v3984_v54, %v8683_v4  ;;  %v3999_v5 = vsel %vm6679_vm2, %v3994_v57, %v3998_v39  ;;  %v4013_v26 = vsel %vm6679_vm2, %v4008_v9, %v10037_v8 }
 0x12a   : > { %v4030_v21 = vrot.slane %v10046_v24, 5  ;;  %6349 = vmatprep.mubr.bf16.mxu0 %v10048_v35  ;;  %v4023_v36 = vsel %vm6679_vm2, %v4018_v32, %v4022_v2  ;;  %v8803_v11 = vrot.slane %v4034_v52, 5  ;;  %v10049_v34 = vshrl.u32 %v8143_v14, 16  ;;  %v10052_v32 = vld [vmem:[#allocation23_spill] sm:$0xff]  ;;  %v1292_v45 = vpop.f32.mrf.mxu1  ;;  %v10054_v35 = vld [vmem:[#allocation32_spill] sm:$0xff] }
 0x12b   : > { %6298 = vmatmul.mubr.bf16.vlgmr.msra.gmra.mxu1 %v8607_v42  ;;  %v10050_v54 = vrot.slane %v8090_v33, 5  ;;  %v10051_v8 = vrot.slane %v8081_v17, 9  ;;  %v8823_v39 = vsel %vm6988_vm5, %v4607_v38, %v4608_v37  ;;  %v4044_v9 = vshll.u32 %v8778_v16, 16  ;;  %v6060_v42 = vpop.f32.mrf.mxu0  ;;  %v10053_v24 = vld [vmem:[#allocation31_spill] sm:$0xff]  ;;  %v10056_v37 = vld [vmem:[#allocation36_spill] sm:$0xff] }
 0x12c   : > { %v4040_v63 = vrot.slane %v10049_v34, 4  ;;  %v1301_v2 = vadd.f32 %v6011_v55, %v10052_v32  ;;  %6301 = vmatprep.mubr.bf16.mxu1 %v8672_v19  ;;  %v8828_v52 = vcombine.low %v3989_v49, %v3999_v5  ;;  %v4031_v33 = vor.u32 %v4030_v21, %v4027_v22  ;;  %v10055_v38 = vld [vmem:[#allocation35_spill] sm:$0xff]  ;;  %v10058_v32 = vld [vmem:[#allocation37_spill] sm:$0xff]  ;;  %v6012_v21 = vpop.f32.mrf.mxu1 }
 0x12d   : > { %v8819_v57 = vsel %vm6988_vm5, %v10051_v8, %v10050_v54  ;;  %v4612_v17 = vrot.slane %v8143_v14, 5  ;;  %v8831_v50 = vcombine.low %v4013_v26, %v4023_v36  ;;  %v4055_v34 = vor.u32 %v10054_v35, %v10053_v24  ;;  %v1716_v49 = vpop.f32.mrf.mxu0  ;;  %v10059_v24 = vld [vmem:[#allocation33_spill] sm:$0xff] }
 0x12e   : > { %v4065_v54 = vor.u32 %v10056_v37, %v10055_v38  ;;  %v4068_v8 = vshll.u32 %v8808_v13, 16  ;;  %v8838_v55 = vadd.f32 %v6059_v23, %v1301_v2  ;;  %v1293_v19 = vadd.f32 %v1292_v45, %v10058_v32  ;;  %v10060_v23 = vld [vmem:[#allocation25_spill] sm:$0xff] }
 0x12f   : > { %v4041_v14 = vor.u32 %v4040_v63, %v8803_v11  ;;  %v4046_v5 = vrot.slane %v4044_v9, 5  ;;  %v5675_v26 = vrot.slane %v8140_v43, 9  ;;  %v4615_v36 = vrot.slane %v8778_v16, 5  ;;  %v6063_v4 = vpop.f32.mrf.mxu0  ;;  %v1295_v63 = vpop.f32.mrf.mxu1 }
 0x130   : > { %10057 = vst [vmem:[#allocation10_spill] sm:$0xff] %v8838_v55  ;;  %v4082_v35 = vshll.u32 %v10059_v24, 16  ;;  %v8847_v37 = vadd.f32 %v1713_v30, %v1293_v19  ;;  %v1304_v2 = vadd.f32 %v6012_v21, %v10060_v23  ;;  %v10061_v45 = vcombine.low %v8634_v44, %v8645_v1  ;;  %v10062_v55 = vld [vmem:[#allocation22_spill] sm:$0xff]  ;;  %v10064_v30 = vld [vmem:[#allocation41_spill] sm:$0xff] }
 0x131   : > { %v4032_v32 = vrot.slane %v4031_v33, 4  ;;  %v4614_v22 = vrot.slane %v4612_v17, 4  ;;  %v4056_v9 = vrot.slane %v4055_v34, 4  ;;  %v4066_v28 = vrot.slane %v4065_v54, 4  ;;  %v1729_v21 = vpop.f32.mrf.mxu0  ;;  %v6015_v1 = vpop.f32.mrf.mxu1  ;;  %v10065_v33 = vld [vmem:[#allocation30_spill] sm:$0xff] }
 0x132   : > { %6350 = vmatmul.mubr.bf16.gmra.mxu0 %v10061_v45  ;;  %v4070_v43 = vrot.slane %v4068_v8, 5  ;;  %v10063_v16 = vrot.slane %v10062_v55, 5  ;;  %v8855_v31 = vadd.f32 %v6060_v42, %v1304_v2  ;;  %v1296_v19 = vadd.f32 %v1295_v63, %v10064_v30 }
 0x133   : > { %6353 = vmatprep.mubr.bf16.mxu0 %v5703_v10  ;;  %v4042_v23 = vrot.slane %v4041_v14, 4  ;;  %v4622_v44 = vrot.slane %v8808_v13, 5  ;;  %6302 = vmatmul.mubr.bf16.gmra.mxu1 %v8687_v29  ;;  %v10066_v10 = vshrl.u32 %v10065_v33, 16  ;;  %v10067_v54 = vshll.u32 %v10065_v33, 16  ;;  %v6064_v30 = vpop.f32.mrf.mxu0 }
 0x134   : > { %v4621_v15 = vrot.slane %v10063_v16, 4  ;;  %v8864_v45 = vrot.slane %v4082_v35, 5  ;;  %v10068_v42 = vshrl.u32 %v10059_v24, 16  ;;  %v8868_v63 = vadd.f32 %v1716_v49, %v1296_v19  ;;  %v10069_v16 = vld [vmem:[#allocation47_spill] sm:$0xff]  ;;  %6305 = vmatprep.mubr.bf16.mxu1 %v8759_v41  ;;  %v8881_v35 = vld [vmem:[%s7840_s28 + $0x80] sm:$0x1] }
 0x135   : > { %v4075_v34 = vrot.slane %v10066_v10, 4  ;;  %v4078_v8 = vrot.slane %v10067_v54, 5  ;;  %v1317_v14 = vadd.f32 %v6015_v1, %v10069_v16  ;;  %v8874_v29 = vsel %vm6988_vm5, %v5675_v26, %v4612_v17  ;;  %v1308_v10 = vpop.f32.mrf.mxu1  ;;  %v10071_v19 = vld [vmem:[#allocation21_spill] sm:$0xff]  ;;  %v10073_v54 = vld [vmem:[#allocation50_spill] sm:$0xff]  ;;  %v8913_v16 = vld [vmem:[%s7840_s28 + $0x8c] sm:$0x1] }
 0x136   : > { %v4088_v2 = vrot.slane %v10068_v42, 4  ;;  %v8878_v13 = vsel %vm6988_vm5, %v4614_v22, %v4615_v36  ;;  %v4037_v49 = vsel %vm6679_vm2, %v4032_v32, %v8803_v11  ;;  %v4061_v41 = vsel %vm6679_vm2, %v4056_v9, %v10055_v38  ;;  %v1732_v11 = vpop.f32.mrf.mxu0 }
 0x137   : > { %v4071_v17 = vsel %vm6679_vm2, %v4066_v28, %v4070_v43  ;;  %v10070_v26 = vrot.slane %v10062_v55, 5  ;;  %v10072_v22 = vrot.slane %v10071_v19, 9  ;;  %v8899_v1 = vadd.f32 %v6063_v4, %v1317_v14  ;;  %v6016_v28 = vpop.f32.mrf.mxu1  ;;  %v10078_v19 = vld [vmem:[#allocation43_spill] sm:$0xff] }
 0x138   : > { %v1309_v42 = vadd.f32 %v1308_v10, %v10073_v54  ;;  %v4047_v32 = vsel %vm6679_vm2, %v4042_v23, %v4046_v5  ;;  %v8906_v38 = vsel %vm6988_vm5, %v4621_v15, %v4622_v44  ;;  %v5707_v55 = vcombine.low %v8874_v29, %v8878_v13  ;;  %v10074_v10 = vld [vmem:[#allocation58_spill] sm:$0xff]  ;;  %v6067_v5 = vpop.f32.mrf.mxu0  ;;  %v10081_v54 = vld [vmem:[#allocation48_spill] sm:$0xff] }
 0x139   : > { %v8897_v36 = vsel %vm6988_vm5, %v10072_v22, %v10070_v26  ;;  %v4079_v9 = vor.u32 %v4078_v8, %v4075_v34  ;;  %v4089_v43 = vor.u32 %v4088_v2, %v8864_v45  ;;  %v4092_v4 = vshll.u32 %v8881_v35, 16  ;;  %v1311_v34 = vpop.f32.mrf.mxu1  ;;  %v10077_v13 = vld [vmem:[#allocation26_spill] sm:$0xff] }
 0x13a   : > { %v8915_v14 = vadd.f32 %v1729_v21, %v1309_v42  ;;  %v1320_v26 = vadd.f32 %v6016_v28, %v10074_v10  ;;  %v10075_v15 = vcombine.low %v8740_v3, %v8752_v18  ;;  %v8921_v23 = vcombine.low %v4061_v41, %v4071_v17  ;;  %v10079_v18 = vld [vmem:[#allocation7_spill] sm:$0xff]  ;;  %v1745_v17 = vpop.f32.mrf.mxu0 }
 0x13b   : > { %v5677_v44 = vrot.slane %v10065_v33, 9  ;;  %v10076_v8 = vcombine.low %v8771_v47, %v8775_v60  ;;  %v5651_v2 = vcombine.low %v4037_v49, %v4047_v32  ;;  %v5708_v21 = vcombine.low %v8897_v36, %v8906_v38  ;;  %v10080_v33 = vld [vmem:[#allocation44_spill] sm:$0xff]  ;;  %v6019_v60 = vpop.f32.mrf.mxu1  ;;  %6306 = vmatmul.mubr.bf16.gmra.mxu1 %v8789_v59 }
 0x13c   : > { %6354 = vmatmul.mubr.bf16.gmra.mxu0 %v10075_v15  ;;  %v4626_v29 = vrot.slane %v10059_v24, 5  ;;  %v4103_v22 = vor.u32 %v10078_v19, %v10077_v13  ;;  %v8932_v3 = vadd.f32 %v6064_v30, %v1320_v26  ;;  %v1312_v41 = vadd.f32 %v1311_v34, %v10079_v18  ;;  %v6068_v26 = vpop.f32.mrf.mxu0  ;;  %6309 = vmatprep.mubr.bf16.mxu1 %v8828_v52 }
 0x13d   : > { %6357 = vmatprep.mubr.bf16.mxu0 %v10076_v8  ;;  %v4113_v42 = vor.u32 %v10081_v54, %v10080_v33  ;;  %v4116_v47 = vshll.u32 %v8913_v16, 16  ;;  %v4080_v49 = vrot.slane %v4079_v9, 4  ;;  %v4090_v32 = vrot.slane %v4089_v43, 4  ;;  %v1324_v8 = vpop.f32.mrf.mxu1 }
 0x13e   : > { %v4094_v28 = vrot.slane %v4092_v4, 5  ;;  %v4130_v24 = vshll.u32 %v8358_v6, 16  ;;  %v8940_v10 = vadd.f32 %v1732_v11, %v1312_v41  ;;  %v1333_v30 = vadd.f32 %v6019_v60, %v8543_v27  ;;  %v1748_v52 = vpop.f32.mrf.mxu0 }
 0x13f   : > { %v8946_v15 = vsel %vm6988_vm5, %v5677_v44, %v4626_v29  ;;  %v4629_v34 = vrot.slane %v8881_v35, 5  ;;  %v4628_v59 = vrot.slane %v4626_v29, 4  ;;  %v4104_v9 = vrot.slane %v4103_v22, 4  ;;  %v6020_v41 = vpop.f32.mrf.mxu1 }
 0x140   : > { %v10082_v43 = vshrl.u32 %v8355_v51, 16  ;;  %v10083_v11 = vshll.u32 %v8355_v51, 16  ;;  %v8953_v19 = vadd.f32 %v6067_v5, %v1333_v30  ;;  %v1325_v27 = vadd.f32 %v1324_v8, %v8587_v20  ;;  %v6071_v30 = vpop.f32.mrf.mxu0 }
 0x141   : > { %v4114_v18 = vrot.slane %v4113_v42, 4  ;;  %v4118_v44 = vrot.slane %v4116_v47, 5  ;;  %v4085_v35 = vsel %vm6679_vm2, %v4080_v49, %v8864_v45  ;;  %v4095_v29 = vsel %vm6679_vm2, %v4090_v32, %v4094_v28  ;;  %v10086_v47 = vld [vmem:[#allocation38_spill] sm:$0xff]  ;;  %v3468_v32 = vld [vmem:[%s7840_s28 + $0x98] sm:$0x1]  ;;  %v1327_v28 = vpop.f32.mrf.mxu1 }
 0x142   : > { %v4123_v4 = vrot.slane %v10082_v43, 4  ;;  %v4126_v13 = vrot.slane %v10083_v11, 5  ;;  %v8961_v22 = vrot.slane %v4130_v24, 5  ;;  %v10084_v54 = vshrl.u32 %v8358_v6, 16  ;;  %v10089_v43 = vld [vmem:[#allocation24_spill] sm:$0xff] }
 0x143   : > { %v8965_v60 = vadd.f32 %v1745_v17, %v1325_v27  ;;  %v1336_v20 = vadd.f32 %v6020_v41, %v8619_v40  ;;  %v10085_v42 = vcombine.low %v8819_v57, %v8823_v39  ;;  %v10087_v8 = vrot.slane %v10086_v47, 5  ;;  %v1761_v27 = vpop.f32.mrf.mxu0  ;;  %6310 = vmatmul.mubr.bf16.gmra.mxu1 %v8831_v50 }
 0x144   : > { %v4136_v5 = vrot.slane %v10084_v54, 4  ;;  %v4636_v49 = vrot.slane %v8913_v16, 5  ;;  %v4630_v24 = vsel %vm6988_vm5, %v4628_v59, %v4629_v34  ;;  %v4109_v40 = vsel %vm6679_vm2, %v4104_v9, %v10080_v33  ;;  %v6023_v33 = vpop.f32.mrf.mxu1  ;;  %6313 = vmatprep.mubr.bf16.mxu1 %v5651_v2 }
 0x145   : > { %6358 = vmatmul.mubr.bf16.gmra.mxu0 %v10085_v42  ;;  %v4635_v45 = vrot.slane %v10087_v8, 4  ;;  %v10088_v17 = vmov %v10087_v8  ;;  %v10090_v57 = vrot.slane %v10089_v43, 9  ;;  %v4127_v11 = vor.u32 %v4126_v13, %v4123_v4 }
 0x146   : > { %6361 = vmatprep.mubr.bf16.mxu0 %v5707_v55  ;;  %v8988_v16 = vadd.f32 %v6068_v26, %v1336_v20  ;;  %v1328_v55 = vadd.f32 %v1327_v28, %v8667_v58  ;;  %v4119_v34 = vsel %vm6679_vm2, %v4114_v18, %v4118_v44  ;;  %v4640_v59 = vrot.slane %v8358_v6, 5  ;;  %v6072_v58 = vpop.f32.mrf.mxu0  ;;  %v1340_v18 = vpop.f32.mrf.mxu1 }
 0x147   : > { %v8986_v39 = vsel %vm6988_vm5, %v10090_v57, %v10088_v17  ;;  %v5653_v9 = vcombine.low %v4085_v35, %v4095_v29  ;;  %v4137_v41 = vor.u32 %v4136_v5, %v8961_v22  ;;  %v4140_v54 = vshll.u32 %v3468_v32, 16  ;;  %v10091_v35 = vld [vmem:[#allocation51_spill] sm:$0xff]  ;;  %v10092_v29 = vld [vmem:[#allocation52_spill] sm:$0xff] }
 0x148   : > { %v5679_v42 = vrot.slane %v8355_v51, 9  ;;  %v8997_v4 = vadd.f32 %v1748_v52, %v1328_v55  ;;  %v1349_v26 = vadd.f32 %v6023_v33, %v8700_v25  ;;  %v5709_v13 = vcombine.low %v8946_v15, %v4630_v24  ;;  %v1764_v2 = vpop.f32.mrf.mxu0  ;;  %v6024_v47 = vpop.f32.mrf.mxu1  ;;  %v3474_v33 = vld [vmem:[%s7840_s28 + $0xb0] sm:$0x1] }
 0x149   : > { %v9003_v6 = vsel %vm6988_vm5, %v4635_v45, %v4636_v49  ;;  %v9005_v50 = vcombine.low %v4109_v40, %v4119_v34  ;;  %v4128_v44 = vrot.slane %v4127_v11, 4  ;;  %v4151_v5 = vor.u32 %v10092_v29, %v10091_v35  ;;  %v10100_v35 = vld [vmem:[#allocation34_spill] sm:$0xff] }
 0x14a   : > { %v4178_v51 = vshll.u32 %v8430_v7, 16  ;;  %v9010_v52 = vadd.f32 %v6071_v30, %v1349_v26  ;;  %v1341_v25 = vadd.f32 %v1340_v18, %v8710_v46  ;;  %v4642_v15 = vrot.slane %v4640_v59, 4  ;;  %v6075_v30 = vpop.f32.mrf.mxu0  ;;  %v3471_v46 = vld [vmem:[%s7840_s28 + $0xa4] sm:$0x1]  ;;  %v10097_v26 = vld [vmem:[#allocation55_spill] sm:$0xff] }
 0x14b   : > { %v4643_v20 = vrot.slane %v3468_v32, 5  ;;  %v5710_v8 = vcombine.low %v8986_v39, %v9003_v6  ;;  %v4138_v45 = vrot.slane %v4137_v41, 4  ;;  %v4142_v49 = vrot.slane %v4140_v54, 5  ;;  %v1343_v39 = vpop.f32.mrf.mxu1  ;;  %6314 = vmatmul.mubr.bf16.gmra.mxu1 %v8921_v23  ;;  %v10098_v6 = vld [vmem:[#allocation46_spill] sm:$0xff] }
 0x14c   : > { %v4641_v28 = vsel %vm6988_vm5, %v5679_v42, %v4640_v59  ;;  %v9017_v24 = vadd.f32 %v1761_v27, %v1341_v25  ;;  %v1352_v40 = vadd.f32 %v6024_v47, %v8742_v61  ;;  %v10093_v32 = vshrl.u32 %v8418_v53, 16  ;;  %v1777_v34 = vpop.f32.mrf.mxu0  ;;  %v10096_v42 = vld [vmem:[#allocation53_spill] sm:$0xff]  ;;  %6317 = vmatprep.mubr.bf16.mxu1 %v5653_v9 }
 0x14d   : > { %6362 = vmatmul.mubr.bf16.gmra.mxu0 %v5708_v21  ;;  %v10094_v43 = vshll.u32 %v8418_v53, 16  ;;  %v4133_v11 = vsel %vm6679_vm2, %v4128_v44, %v8961_v22  ;;  %v9031_v61 = vrot.slane %v4151_v5, 4  ;;  %v9033_v55 = vrot.slane %v4178_v51, 5  ;;  %v6027_v54 = vpop.f32.mrf.mxu1 }
 0x14e   : > { %v4171_v17 = vrot.slane %v10093_v32, 4  ;;  %6365 = vmatprep.mubr.bf16.mxu0 %v5709_v13  ;;  %v10095_v36 = vshrl.u32 %v8430_v7, 16  ;;  %v9037_v21 = vadd.f32 %v6072_v58, %v1352_v40  ;;  %v1344_v27 = vadd.f32 %v1343_v39, %v8754_v48  ;;  %v6076_v5 = vpop.f32.mrf.mxu0 }
 0x14f   : > { %v4174_v57 = vrot.slane %v10094_v43, 5  ;;  %v4644_v59 = vsel %vm6988_vm5, %v4642_v15, %v4643_v20  ;;  %v4654_v41 = vrot.slane %v8430_v7, 5  ;;  %v4143_v22 = vsel %vm6679_vm2, %v4138_v45, %v4142_v49  ;;  %v1356_v25 = vpop.f32.mrf.mxu1  ;;  %v10101_v49 = vld [vmem:[#allocation39_spill] sm:$0xff] }
 0x150   : > { %v4184_v38 = vrot.slane %v10095_v36, 4  ;;  %v4161_v13 = vor.u32 %v10097_v26, %v10096_v42  ;;  %v4164_v58 = vshll.u32 %v3471_v46, 16  ;;  %v10099_v18 = vrot.slane %v10098_v6, 5  ;;  %v1780_v32 = vpop.f32.mrf.mxu0  ;;  %v3477_v6 = vld [vmem:[%s7840_s28 + $0xbc] sm:$0x1]  ;;  %s5727_s28 = sshll.u32 %s6636_s29, 8 }
 0x151   : > { %v9051_v44 = vadd.f32 %v1764_v2, %v1344_v27  ;;  %v1365_v29 = vadd.f32 %v6027_v54, %v10100_v35  ;;  %v4650_v7 = vrot.slane %v3471_v46, 5  ;;  %v4175_v51 = vor.u32 %v4174_v57, %v4171_v17  ;;  %v6028_v39 = vpop.f32.mrf.mxu1  ;;  %v10106_v54 = vld [vmem:[#allocation56_spill] sm:$0xff]  ;;  %v10107_v35 = vld [vmem:[#allocation42_spill] sm:$0xff]  ;;  %s9387_s20 = scalar_lea.vmem %s9751_s5, %s5727_s28 }
 0x152   : > { %v4649_v48 = vrot.slane %v10099_v18, 4  ;;  %v5711_v23 = vcombine.low %v4641_v28, %v4644_v59  ;;  %v4185_v15 = vor.u32 %v4184_v38, %v9033_v55  ;;  %v4188_v20 = vshll.u32 %v3474_v33, 16  ;;  %v10103_v28 = vld [vmem:[#allocation45_spill] sm:$0xff]  ;;  %v6079_v59 = vpop.f32.mrf.mxu0 }
 0x153   : > { %v5681_v47 = vrot.slane %v8418_v53, 9  ;;  %v9056_v45 = vadd.f32 %v6075_v30, %v1365_v29  ;;  %v1357_v40 = vadd.f32 %v1356_v25, %v10101_v49  ;;  %v4656_v2 = vrot.slane %v4654_v41, 4  ;;  %v10105_v30 = vld [vmem:[#allocation40_spill] sm:$0xff]  ;;  %v1359_v26 = vpop.f32.mrf.mxu1  ;;  %6318 = vmatmul.mubr.bf16.gmra.mxu1 %v9005_v50  ;;  %v10108_v25 = vld [vmem:[#allocation59_spill] sm:$0xff] }
 0x154   : > { %v4657_v43 = vrot.slane %v3474_v33, 5  ;;  %v5655_v36 = vcombine.low %v4133_v11, %v4143_v22  ;;  %v4162_v9 = vrot.slane %v4161_v13, 4  ;;  %v4166_v46 = vrot.slane %v4164_v58, 5  ;;  %v1793_v29 = vpop.f32.mrf.mxu0 }
 0x155   : > { %v10102_v17 = vmov %v10099_v18  ;;  %v10104_v57 = vrot.slane %v10103_v28, 9  ;;  %v9065_v53 = vadd.f32 %v1777_v34, %v1357_v40  ;;  %v1368_v27 = vadd.f32 %v6028_v39, %v10105_v30  ;;  %6366 = vmatmul.mubr.bf16.gmra.mxu0 %v5710_v8  ;;  %v10112_v39 = vld [vmem:[#allocation49_spill] sm:$0xff] }
 0x156   : > { %v4651_v33 = vsel %vm6988_vm5, %v4649_v48, %v4650_v7  ;;  %v4176_v11 = vrot.slane %v4175_v51, 4  ;;  %v4661_v22 = vrot.slane %v10106_v54, 5  ;;  %6369 = vmatprep.mubr.bf16.mxu0 %v5711_v23  ;;  %v4157_v13 = vsel %vm6679_vm2, %v9031_v61, %v10096_v42  ;;  %v6031_v51 = vpop.f32.mrf.mxu1  ;;  %v10109_v23 = vld [vmem:[#allocation60_spill] sm:$0xff]  ;;  %6321 = vmatprep.mubr.bf16.mxu1 %v5655_v36 }
 0x157   : > { %v4648_v38 = vsel %vm6988_vm5, %v10104_v57, %v10102_v17  ;;  %v4186_v58 = vrot.slane %v4185_v15, 4  ;;  %v4190_v34 = vrot.slane %v4188_v20, 5  ;;  %v9076_v18 = vadd.f32 %v6076_v5, %v1368_v27  ;;  %v10110_v15 = vld [vmem:[#allocation61_spill] sm:$0xff]  ;;  %v10111_v20 = vld [vmem:[#allocation4_spill] sm:$0xff] }
 0x158   : > { %v1360_v8 = vadd.f32 %v1359_v26, %v10107_v35  ;;  %v4655_v48 = vsel %vm6988_vm5, %v5681_v47, %v4654_v41  ;;  %v4658_v7 = vsel %vm6988_vm5, %v4656_v2, %v4657_v43  ;;  %v4167_v61 = vsel %vm6679_vm2, %v4162_v9, %v4166_v46  ;;  %v6080_v47 = vpop.f32.mrf.mxu0  ;;  %v1372_v43 = vpop.f32.mrf.mxu1 }
 0x159   : > { %v5712_v42 = vcombine.low %v4648_v38, %v4651_v33  ;;  %v4199_v5 = vor.u32 %v10109_v23, %v10108_v25  ;;  %v4209_v49 = vor.u32 %v10111_v20, %v10110_v15  ;;  %v1381_v41 = vadd.f32 %v6031_v51, %v10112_v39 }
 0x15a   : > { %v9090_v40 = vadd.f32 %v1780_v32, %v1360_v8  ;;  %v4181_v50 = vsel %vm6679_vm2, %v4176_v11, %v9033_v55  ;;  %v4212_v2 = vshll.u32 %v3477_v6, 16  ;;  %v4191_v9 = vsel %vm6679_vm2, %v4186_v58, %v4190_v34  ;;  %v10113_v32 = vld [vmem:[#allocation57_spill] sm:$0xff]  ;;  %v1796_v30 = vpop.f32.mrf.mxu0  ;;  %v6032_v27 = vpop.f32.mrf.mxu1  ;;  %v10114_v55 = vld [vmem:[#allocation62_spill] sm:$0xff] }
 0x15b   : > { %v5713_v46 = vcombine.low %v4655_v48, %v4658_v7  ;;  %v4663_v17 = vrot.slane %v4661_v22, 4  ;;  %v4664_v28 = vrot.slane %v3477_v6, 5  ;;  %v9098_v57 = vadd.f32 %v6079_v59, %v1381_v41  ;;  %v10115_v6 = vld [vmem:[#allocation54_spill] sm:$0xff] }
 0x15c   : > { %v1373_v38 = vadd.f32 %v1372_v43, %v10113_v32  ;;  %v5656_v33 = vcombine.low %v4157_v13, %v4167_v61  ;;  %v4200_v36 = vrot.slane %v4199_v5, 4  ;;  %v4210_v54 = vrot.slane %v4209_v49, 4  ;;  %v6083_v35 = vpop.f32.mrf.mxu0  ;;  %v1375_v34 = vpop.f32.mrf.mxu1  ;;  %v10118_v5 = vld [vmem:[#allocation28_spill] sm:$0xff] }
 0x15d   : > { %v1384_v11 = vadd.f32 %v6032_v27, %v10114_v55  ;;  %6370 = vmatmul.mubr.bf16.gmra.mxu0 %v5712_v42  ;;  %v5657_v8 = vcombine.low %v4181_v50, %v4191_v9  ;;  %v4214_v58 = vrot.slane %v4212_v2, 5  ;;  %v10116_v59 = vrot.slane %v10115_v6, 9 }
 0x15e   : > { %v9101_v26 = vadd.f32 %v1793_v29, %v1373_v38  ;;  %6373 = vmatprep.mubr.bf16.mxu0 %v5713_v46  ;;  %v4665_v13 = vsel %vm6988_vm5, %v4663_v17, %v4664_v28  ;;  %v10117_v29 = vld [vmem:[#allocation29_spill] sm:$0xff]  ;;  %v1809_v61 = vpop.f32.mrf.mxu0  ;;  %v6035_v25 = vpop.f32.mrf.mxu1  ;;  %6322 = vmatmul.mubr.bf16.gmra.mxu1 %v5656_v33  ;;  %v4205_v42 = vsel %vm6679_vm2, %v4200_v36, %v10110_v15 }
 0x15f   : > { %v4662_v48 = vsel %vm6988_vm5, %v10116_v59, %v4661_v22  ;;  %v9110_v7 = vadd.f32 %v6080_v47, %v1384_v11  ;;  %v1376_v51 = vadd.f32 %v1375_v34, %v10117_v29  ;;  %v1397_v20 = vadd.f32 %v6035_v25, %v10118_v5  ;;  %6325 = vmatprep.mubr.bf16.mxu1 %v5657_v8  ;;  %v10119_v47 = vld [vmem:[#allocation2_spill] sm:$0xff]  ;;  %v10120_v15 = vld [vmem:[#allocation9_spill] sm:$0xff] }
 0x160   : > { %v6084_v49 = vpop.f32.mrf.mxu0  ;;  %v4215_v62 = vsel %vm6679_vm2, %v4210_v54, %v4214_v58  ;;  %v5714_v22 = vcombine.low %v4662_v48, %v4665_v13  ;;  %v1388_v39 = vpop.f32.mrf.mxu1  ;;  %v10122_v59 = vld [vmem:[#allocation5_spill] sm:$0xff] }
 0x161   : > { %v9116_v23 = vadd.f32 %v1796_v30, %v1376_v51  ;;  %v9121_v41 = vadd.f32 %v6083_v35, %v1397_v20  ;;  %v1389_v50 = vadd.f32 %v1388_v39, %v10119_v47  ;;  %v5658_v9 = vcombine.low %v4205_v42, %v4215_v62  ;;  %v10124_v20 = vld [vmem:[#allocation10_spill] sm:$0xff] }
 0x162   : > { %v1812_v2 = vpop.f32.mrf.mxu0  ;;  %v6036_v43 = vpop.f32.mrf.mxu1 }
 0x163   : > { %v9124_v46 = vadd.f32 %v1809_v61, %v1389_v50  ;;  %v1400_v17 = vadd.f32 %v6036_v43, %v10120_v15  ;;  %v10123_v61 = vld [vmem:[#allocation27_spill] sm:$0xff] }
 0x164   : > { %v6087_v28 = vpop.f32.mrf.mxu0  ;;  %v1391_v32 = vpop.f32.mrf.mxu1 }
 0x165   : > { %6374 = vmatmul.mubr.bf16.gmra.mxu0 %v5714_v22  ;;  %v9127_v38 = vadd.f32 %v6084_v49, %v1400_v17  ;;  %v1392_v30 = vadd.f32 %v1391_v32, %v10121_v0 }
 0x166   : > { %v1825_v27 = vpop.f32.mrf.mxu0  ;;  %v6039_v33 = vpop.f32.mrf.mxu1  ;;  %6326 = vmatmul.mubr.bf16.gmra.mxu1 %v5658_v9 }
 0x167   : > { %v9130_v36 = vadd.f32 %v1812_v2, %v1392_v30  ;;  %v1413_v54 = vadd.f32 %v6039_v33, %v8720_v56 }
 0x168   : > { %v6088_v55 = vpop.f32.mrf.mxu0  ;;  %v1404_v11 = vpop.f32.mrf.mxu1 }
 0x169   : > { %v9133_v35 = vadd.f32 %v6087_v28, %v1413_v54  ;;  %v1405_v8 = vadd.f32 %v1404_v11, %v8748_v12 }
 0x16a   : > { %v1828_v58 = vpop.f32.mrf.mxu0  ;;  %v6040_v34 = vpop.f32.mrf.mxu1 }
 0x16b   : > { %v9136_v6 = vadd.f32 %v1825_v27, %v1405_v8  ;;  %v1416_v48 = vadd.f32 %v6040_v34, %v10122_v59 }
 0x16c   : > { %v6155_v13 = vpop.f32.mrf.mxu0  ;;  %v1407_v29 = vpop.f32.mrf.mxu1 }
 0x16d   : > { %v9139_v51 = vadd.f32 %v6088_v55, %v1416_v48  ;;  %v1408_v25 = vadd.f32 %v1407_v29, %v10123_v61 }
 0x16e   : > { %v2821_v42 = vpop.f32.mrf.mxu0  ;;  %v6107_v56 = vpop.f32.mrf.mxu1 }
 0x16f   : > { %v9142_v5 = vadd.f32 %v1828_v58, %v1408_v25  ;;  %v2244_v49 = vadd.f32 %v6107_v56, %v10124_v20 }
 0x170   : > { %v6156_v62 = vpop.f32.mrf.mxu0  ;;  %v2115_v12 = vpop.f32.mrf.mxu1 }
 0x171   : > { %v9145_v22 = vadd.f32 %v6155_v13, %v2244_v49  ;;  %v2242_v39 = vadd.f32 %v2115_v12, %v8847_v37 }
 0x172   : > { %v2824_v47 = vpop.f32.mrf.mxu0  ;;  %v6108_v50 = vpop.f32.mrf.mxu1 }
 0x173   : > { %v9148_v2 = vadd.f32 %v2821_v42, %v2242_v39  ;;  %v2245_v43 = vadd.f32 %v6108_v50, %v8855_v31 }
 0x174   : > { %v6159_v9 = vpop.f32.mrf.mxu0  ;;  %v2118_v15 = vpop.f32.mrf.mxu1 }
 0x175   : > { %v9151_v17 = vadd.f32 %v6156_v62, %v2245_v43  ;;  %v2243_v28 = vadd.f32 %v2118_v15, %v8868_v63 }
 0x176   : > { %v2837_v32 = vpop.f32.mrf.mxu0  ;;  %v6111_v0 = vpop.f32.mrf.mxu1 }
 0x177   : > { %v9154_v30 = vadd.f32 %v2824_v47, %v2243_v28  ;;  %v2248_v27 = vadd.f32 %v6111_v0, %v8899_v1 }
 0x178   : > { %v6160_v33 = vpop.f32.mrf.mxu0  ;;  %v2131_v37 = vpop.f32.mrf.mxu1 }
 0x179   : > { %v9157_v54 = vadd.f32 %v6159_v9, %v2248_v27  ;;  %v2246_v55 = vadd.f32 %v2131_v37, %v8915_v14 }
 0x17a   : > { %v2840_v11 = vpop.f32.mrf.mxu0  ;;  %v6112_v31 = vpop.f32.mrf.mxu1 }
 0x17b   : > { %v9160_v8 = vadd.f32 %v2837_v32, %v2246_v55  ;;  %v2249_v58 = vadd.f32 %v6112_v31, %v8932_v3 }
 0x17c   : > { %v6163_v34 = vpop.f32.mrf.mxu0  ;;  %v2134_v63 = vpop.f32.mrf.mxu1 }
 0x17d   : > { %v9163_v59 = vadd.f32 %v6160_v33, %v2249_v58  ;;  %v2247_v48 = vadd.f32 %v2134_v63, %v8940_v10 }
 0x17e   : > { %v2853_v13 = vpop.f32.mrf.mxu0  ;;  %v6115_v1 = vpop.f32.mrf.mxu1 }
 0x17f   : > { %v9166_v29 = vadd.f32 %v2840_v11, %v2247_v48  ;;  %v2252_v61 = vadd.f32 %v6115_v1, %v8953_v19 }
 0x180   : > { %v6164_v25 = vpop.f32.mrf.mxu0  ;;  %v2147_v14 = vpop.f32.mrf.mxu1 }
 0x181   : > { %v9169_v42 = vadd.f32 %v6163_v34, %v2252_v61  ;;  %v2250_v56 = vadd.f32 %v2147_v14, %v8965_v60 }
 0x182   : > { %v2856_v20 = vpop.f32.mrf.mxu0  ;;  %v6116_v3 = vpop.f32.mrf.mxu1 }
 0x183   : > { %v9172_v49 = vadd.f32 %v2853_v13, %v2250_v56  ;;  %v2253_v62 = vadd.f32 %v6116_v3, %v8988_v16 }
 0x184   : > { %v6167_v12 = vpop.f32.mrf.mxu0  ;;  %v2150_v10 = vpop.f32.mrf.mxu1 }
 0x185   : > { %v9175_v39 = vadd.f32 %v6164_v25, %v2253_v62  ;;  %v2251_v47 = vadd.f32 %v2150_v10, %v8997_v4 }
 0x186   : > { %v2869_v50 = vpop.f32.mrf.mxu0  ;;  %v6119_v19 = vpop.f32.mrf.mxu1 }
 0x187   : > { %v9178_v43 = vadd.f32 %v2856_v20, %v2251_v47  ;;  %v2256_v9 = vadd.f32 %v6119_v19, %v9010_v52 }
 0x188   : > { %v6168_v15 = vpop.f32.mrf.mxu0  ;;  %v2163_v60 = vpop.f32.mrf.mxu1 }
 0x189   : > { %v9181_v28 = vadd.f32 %v6167_v12, %v2256_v9  ;;  %v2254_v32 = vadd.f32 %v2163_v60, %v9017_v24 }
 0x18a   : > { %v2872_v0 = vpop.f32.mrf.mxu0  ;;  %v6120_v16 = vpop.f32.mrf.mxu1 }
 0x18b   : > { %v9184_v27 = vadd.f32 %v2869_v50, %v2254_v32  ;;  %v2257_v33 = vadd.f32 %v6120_v16, %v9037_v21 }
 0x18c   : > { %v6171_v37 = vpop.f32.mrf.mxu0  ;;  %v2166_v4 = vpop.f32.mrf.mxu1 }
 0x18d   : > { %v9187_v55 = vadd.f32 %v6168_v15, %v2257_v33  ;;  %v2255_v11 = vadd.f32 %v2166_v4, %v9051_v44 }
 0x18e   : > { %v2885_v31 = vpop.f32.mrf.mxu0  ;;  %v6123_v52 = vpop.f32.mrf.mxu1 }
 0x18f   : > { %v9190_v58 = vadd.f32 %v2872_v0, %v2255_v11  ;;  %v2260_v34 = vadd.f32 %v6123_v52, %v9056_v45 }
 0x190   : > { %v6172_v63 = vpop.f32.mrf.mxu0  ;;  %v2179_v24 = vpop.f32.mrf.mxu1 }
 0x191   : > { %v9193_v48 = vadd.f32 %v6171_v37, %v2260_v34  ;;  %v2258_v13 = vadd.f32 %v2179_v24, %v9065_v53 }
 0x192   : > { %v2888_v1 = vpop.f32.mrf.mxu0  ;;  %v6124_v21 = vpop.f32.mrf.mxu1 }
 0x193   : > { %v9196_v61 = vadd.f32 %v2885_v31, %v2258_v13  ;;  %v2261_v25 = vadd.f32 %v6124_v21, %v9076_v18 }
 0x194   : > { %v6175_v14 = vpop.f32.mrf.mxu0  ;;  %v2182_v44 = vpop.f32.mrf.mxu1 }
 0x195   : > { %v9199_v56 = vadd.f32 %v6172_v63, %v2261_v25  ;;  %v2259_v20 = vadd.f32 %v2182_v44, %v9090_v40 }
 0x196   : > { %v2901_v3 = vpop.f32.mrf.mxu0  ;;  %v6127_v45 = vpop.f32.mrf.mxu1 }
 0x197   : > { %10125 = vst [vmem:[#allocation12_spill] sm:$0xff] %v9199_v56  ;;  %v9202_v62 = vadd.f32 %v2888_v1, %v2259_v20  ;;  %v2264_v12 = vadd.f32 %v6127_v45, %v9098_v57 }
 0x198   : > { %v6176_v10 = vpop.f32.mrf.mxu0  ;;  %v2195_v53 = vpop.f32.mrf.mxu1 }
 0x199   : > { %10126 = vst [vmem:[#allocation3_spill] sm:$0xff] %v9202_v62  ;;  %v9205_v47 = vadd.f32 %v6175_v14, %v2264_v12  ;;  %v2262_v50 = vadd.f32 %v2195_v53, %v9101_v26 }
 0x19a   : > { %v2904_v19 = vpop.f32.mrf.mxu0  ;;  %v6128_v18 = vpop.f32.mrf.mxu1 }
 0x19b   : > { %10127 = vst [vmem:[#allocation6_spill] sm:$0xff] %v9205_v47  ;;  %v9208_v9 = vadd.f32 %v2901_v3, %v2262_v50  ;;  %v2265_v15 = vadd.f32 %v6128_v18, %v9110_v7 }
 0x19c   : > { %v6179_v60 = vpop.f32.mrf.mxu0  ;;  %v2198_v40 = vpop.f32.mrf.mxu1 }
 0x19d   : > { %10128 = vst [vmem:[#allocation8_spill] sm:$0xff] %v9208_v9  ;;  %v9211_v32 = vadd.f32 %v6176_v10, %v2265_v15  ;;  %v2263_v0 = vadd.f32 %v2198_v40, %v9116_v23 }
 0x19e   : > { %v2917_v16 = vpop.f32.mrf.mxu0  ;;  %v6131_v57 = vpop.f32.mrf.mxu1 }
 0x19f   : > { %10129 = vst [vmem:[#allocation14_spill] sm:$0xff] %v9211_v32  ;;  %v9214_v33 = vadd.f32 %v2904_v19, %v2263_v0  ;;  %v2268_v37 = vadd.f32 %v6131_v57, %v9121_v41 }
 0x1a0   : > { %v6180_v4 = vpop.f32.mrf.mxu0  ;;  %v2211_v26 = vpop.f32.mrf.mxu1 }
 0x1a1   : > { %10130 = vst [vmem:[#allocation13_spill] sm:$0xff] %v9214_v33  ;;  %v9217_v11 = vadd.f32 %v6179_v60, %v2268_v37  ;;  %v2266_v31 = vadd.f32 %v2211_v26, %v9124_v46 }
 0x1a2   : > { %v2920_v52 = vpop.f32.mrf.mxu0  ;;  %v6132_v7 = vpop.f32.mrf.mxu1 }
 0x1a3   : > { %10131 = vst [vmem:[#allocation17_spill] sm:$0xff] %v9217_v11  ;;  %v9220_v34 = vadd.f32 %v2917_v16, %v2266_v31  ;;  %v2269_v63 = vadd.f32 %v6132_v7, %v9127_v38 }
 0x1a4   : > { %v6183_v24 = vpop.f32.mrf.mxu0  ;;  %v2214_v23 = vpop.f32.mrf.mxu1 }
 0x1a5   : > { %10132 = vst [vmem:[#allocation16_spill] sm:$0xff] %v9220_v34  ;;  %v9223_v13 = vadd.f32 %v6180_v4, %v2269_v63  ;;  %v2267_v1 = vadd.f32 %v2214_v23, %v9130_v36 }
 0x1a6   : > { %v2933_v21 = vpop.f32.mrf.mxu0  ;;  %v6135_v41 = vpop.f32.mrf.mxu1 }
 0x1a7   : > { %10133 = vst [vmem:[#allocation15_spill] sm:$0xff] %v9223_v13  ;;  %v9226_v25 = vadd.f32 %v2920_v52, %v2267_v1  ;;  %v2272_v14 = vadd.f32 %v6135_v41, %v9133_v35 }
 0x1a8   : > { %v6184_v44 = vpop.f32.mrf.mxu0  ;;  %v2227_v46 = vpop.f32.mrf.mxu1 }
 0x1a9   : > { %10134 = vst [vmem:[#allocation18_spill] sm:$0xff] %v9226_v25  ;;  %v9229_v20 = vadd.f32 %v6183_v24, %v2272_v14  ;;  %v2270_v3 = vadd.f32 %v2227_v46, %v9136_v6 }
 0x1aa   : > { %v2936_v45 = vpop.f32.mrf.mxu0  ;;  %v6136_v38 = vpop.f32.mrf.mxu1 }
 0x1ab   : > { %10135 = vst [vmem:[#allocation19_spill] sm:$0xff] %v9229_v20  ;;  %v9232_v12 = vadd.f32 %v2933_v21, %v2270_v3  ;;  %v2273_v10 = vadd.f32 %v6136_v38, %v9139_v51 }
 0x1ac   : > { %v9235_v36 = vpop.f32.mrf.mxu0  ;;  %v2230_v53 = vpop.f32.mrf.mxu1 }
 0x1ad   : > { %10136 = vst [vmem:[#allocation20_spill] sm:$0xff] %v9232_v12  ;;  %v9237_v50 = vadd.f32 %v6184_v44, %v2273_v10  ;;  %v2271_v35 = vadd.f32 %v2230_v53, %v9142_v5 }
 0x1ae   : > { %v9240_v19 = vpop.f32.mrf.mxu0  ;;  %v6203_v18 = vpop.f32.mrf.mxu1 }
 0x1af   : > { %10137 = vst [vmem:[#allocation23_spill] sm:$0xff] %v9237_v50  ;;  %v9242_v15 = vadd.f32 %v2936_v45, %v2271_v35 }
 0x1b0   : > { %v9244_v6 = vpop.f32.mrf.mxu0  ;;  %v3271_v60 = vpop.f32.mrf.mxu1 }
 0x1b1   : > { %10138 = vst [vmem:[#allocation31_spill] sm:$0xff] %v9242_v15 }
 0x1b2   : > { %v9246_v40 = vpop.f32.mrf.mxu0  ;;  %v9248_v0 = vpop.f32.mrf.mxu1 }
 0x1b4   : > { %v9250_v51 = vpop.f32.mrf.mxu0  ;;  %v9253_v16 = vpop.f32.mrf.mxu1 }
 0x1b6   : > { %v9255_v57 = vpop.f32.mrf.mxu0  ;;  %v9257_v5 = vpop.f32.mrf.mxu1 }
 0x1b8   : > { %v9259_v37 = vpop.f32.mrf.mxu0  ;;  %v9261_v4 = vpop.f32.mrf.mxu1 }
 0x1ba   : > { %v9263_v26 = vpop.f32.mrf.mxu0  ;;  %v9265_v31 = vpop.f32.mrf.mxu1 }
 0x1bc   : > { %v9267_v52 = vpop.f32.mrf.mxu0  ;;  %v9269_v7 = vpop.f32.mrf.mxu1 }
 0x1be   : > { %v9271_v63 = vpop.f32.mrf.mxu0  ;;  %v9273_v24 = vpop.f32.mrf.mxu1 }
 0x1c0   : > { %v9275_v23 = vpop.f32.mrf.mxu0  ;;  %v9277_v1 = vpop.f32.mrf.mxu1 }
 0x1c2   : > { %v9279_v21 = vpop.f32.mrf.mxu0  ;;  %v9281_v41 = vpop.f32.mrf.mxu1 }
 0x1c4   : > { %v9283_v14 = vpop.f32.mrf.mxu0  ;;  %v9285_v44 = vpop.f32.mrf.mxu1 }
 0x1c6   : > { %v9287_v46 = vpop.f32.mrf.mxu0  ;;  %v9289_v3 = vpop.f32.mrf.mxu1 }
 0x1c8   : > { %v9291_v45 = vpop.f32.mrf.mxu0  ;;  %v9293_v38 = vpop.f32.mrf.mxu1 }
 0x1ca   : > { %v9295_v10 = vpop.f32.mrf.mxu0  ;;  %v9297_v53 = vpop.f32.mrf.mxu1 }
 0x1cc   : > { %v9299_v35 = vpop.f32.mrf.mxu0  ;;  %v9301_v15 = vpop.f32.mrf.mxu1 }
 0x1ce   : > { %v9303_v50 = vpop.f32.mrf.mxu0  ;;  %v9305_v12 = vpop.f32.mrf.mxu1 }
 0x1cf   : > { %10139 = vst [vmem:[#allocation32_spill] sm:$0xff] %v9303_v50 }
 0x1d0   : > { %v9307_v20 = vpop.f32.mrf.mxu0  ;;  %v9309_v25 = vpop.f32.mrf.mxu1 }
 0x1d1   : > { %10140 = vst [vmem:[#allocation35_spill] sm:$0xff] %v9307_v20 }
 0x1d2   : > { %v9311_v13 = vpop.f32.mrf.mxu0  ;;  %v9313_v34 = vpop.f32.mrf.mxu1 }
 0x1d3   : > { %10141 = vst [vmem:[#allocation36_spill] sm:$0xff] %v9311_v13  ;;  %10142 = vst [vmem:[#allocation37_spill] sm:$0xff] %v9313_v34 }
 0x1d4   : > { %v9315_v11 = vpop.f32.mrf.mxu0  ;;  %v9317_v33 = vpop.f32.mrf.mxu1 }
 0x1d5   : > { %10143 = vst [vmem:[#allocation33_spill] sm:$0xff] %v9315_v11  ;;  %10144 = vst [vmem:[#allocation25_spill] sm:$0xff] %v9317_v33 }
 0x1d6   : > { %v9319_v32 = vpop.f32.mrf.mxu0  ;;  %v9321_v9 = vpop.f32.mrf.mxu1 }
 0x1d7   : > { %10145 = vst [vmem:[#allocation22_spill] sm:$0xff] %v9319_v32  ;;  %10146 = vst [vmem:[#allocation41_spill] sm:$0xff] %v9321_v9 }
 0x1d8   : > { %v9323_v47 = vpop.f32.mrf.mxu0  ;;  %v9325_v62 = vpop.f32.mrf.mxu1 }
 0x1d9   : > { %10147 = vst [vmem:[#allocation30_spill] sm:$0xff] %v9323_v47  ;;  %10148 = vst [vmem:[#allocation47_spill] sm:$0xff] %v9325_v62 }
 0x1da   : > { %v9327_v50 = vpop.f32.mrf.mxu0  ;;  %v9329_v20 = vpop.f32.mrf.mxu1 }
 0x1db   : > { %10149 = vst [vmem:[#allocation21_spill] sm:$0xff] %v9327_v50  ;;  %10150 = vst [vmem:[#allocation50_spill] sm:$0xff] %v9329_v20 }
 0x1dc   : > { %v9331_v56 = vpop.f32.mrf.mxu0  ;;  %v9333_v13 = vpop.f32.mrf.mxu1 }
 0x1dd   : > { %10151 = vst [vmem:[#allocation58_spill] sm:$0xff] %v9331_v56  ;;  %10152 = vst [vmem:[#allocation26_spill] sm:$0xff] %v9333_v13 }
 0x1de   : > { %v9335_v34 = vpop.f32.mrf.mxu0  ;;  %v9337_v11 = vpop.f32.mrf.mxu1 }
 0x1df   : > { %10153 = vst [vmem:[#allocation43_spill] sm:$0xff] %v9335_v34  ;;  %10154 = vst [vmem:[#allocation7_spill] sm:$0xff] %v9337_v11 }
 0x1e0   : > { %v9339_v33 = vpop.f32.mrf.mxu0  ;;  %v9341_v32 = vpop.f32.mrf.mxu1 }
 0x1e1   : > { %10155 = vst [vmem:[#allocation44_spill] sm:$0xff] %v9339_v33  ;;  %10156 = vst [vmem:[#allocation48_spill] sm:$0xff] %v9341_v32  ;;  %v3400_v33 = vadd.f32 %v6203_v18, %v9145_v22  ;;  %v3399_v22 = vadd.f32 %v9253_v16, %v9154_v30  ;;  %v3402_v30 = vadd.f32 %v9261_v4, %v9160_v8 }
 0x1e2   : > { %v9343_v9 = vpop.f32.mrf.mxu0  ;;  %v9345_v47 = vpop.f32.mrf.mxu1  ;;  %v3405_v8 = vadd.f32 %v9265_v31, %v9163_v59 }
 0x1e3   : > { %10157 = vst [vmem:[#allocation38_spill] sm:$0xff] %v9343_v9  ;;  %10158 = vst [vmem:[#allocation24_spill] sm:$0xff] %v9345_v47  ;;  %v3398_v47 = vadd.f32 %v3271_v60, %v9148_v2  ;;  %v3404_v2 = vadd.f32 %v9257_v5, %v9157_v54 }
 0x1e4   : > { %v9347_v62 = vpop.f32.mrf.mxu0  ;;  %v9349_v50 = vpop.f32.mrf.mxu1 }
 0x1e5   : > { %10159 = vst [vmem:[#allocation51_spill] sm:$0xff] %v9347_v62  ;;  %10160 = vst [vmem:[#allocation52_spill] sm:$0xff] %v9349_v50 }
 0x1e6   : > { %v9351_v20 = vpop.f32.mrf.mxu0  ;;  %v9353_v56 = vpop.f32.mrf.mxu1 }
 0x1e7   : > { %10161 = vst [vmem:[#allocation53_spill] sm:$0xff] %v9351_v20  ;;  %10162 = vst [vmem:[#allocation55_spill] sm:$0xff] %v9353_v56  ;;  %v3802_v20 = vadd.f32 %v9235_v36, %v3400_v33  ;;  %v3401_v56 = vadd.f32 %v9248_v0, %v9151_v17  ;;  %v9379_v33 = vld [vmem:[%s9750_s4] ss:$0 sm:$0xff] }
 0x1e8   : > { %v9355_v34 = vpop.f32.mrf.mxu0  ;;  %v9357_v11 = vpop.f32.mrf.mxu1 }
 0x1e9   : > { %10163 = vst [vmem:[#allocation46_spill] sm:$0xff] %v9355_v34  ;;  %10164 = vst [vmem:[#allocation34_spill] sm:$0xff] %v9357_v11  ;;  %v3800_v11 = vadd.f32 %v9240_v19, %v3398_v47  ;;  %v3803_v17 = vadd.f32 %v9244_v6, %v3401_v56  ;;  %v3806_v19 = vadd.f32 %v9250_v51, %v3404_v2 }
 0x1ea   : > { %v9360_v32 = vpop.f32.mrf.mxu0  ;;  %v9362_v9 = vpop.f32.mrf.mxu1 }
 0x1eb   : > { %10165 = vst [vmem:[#allocation39_spill] sm:$0xff] %v9360_v32 }
 0x1ec   : > { %v6347_v62 = vpop.f32.mrf.mxu0  ;;  %v9365_v13 = vpop.f32.mrf.mxu1 }
 0x1ee   : > { %v4829_v50 = vpop.f32.mrf.mxu0  ;;  %v6299_v34 = vpop.f32.mrf.mxu1 }
 0x1ef   : > { %v4508_v18 = vadd.f32 %v6299_v34, %v3802_v20  ;;  %v3801_v34 = vadd.f32 %v9246_v40, %v3399_v22  ;;  %v3804_v22 = vadd.f32 %v9255_v57, %v3402_v30 }
 0x1f0   : > { %v6348_v32 = vpop.f32.mrf.mxu0  ;;  %v4379_v36 = vpop.f32.mrf.mxu1 }
 0x1f1   : > { %v4958_v60 = vadd.f32 %v6347_v62, %v4508_v18  ;;  %v4506_v0 = vadd.f32 %v4379_v36, %v3800_v11  ;;  %v3403_v18 = vadd.f32 %v9269_v7, %v9166_v29 }
 0x1f2   : > { %v4832_v47 = vpop.f32.mrf.mxu0  ;;  %v6300_v54 = vpop.f32.mrf.mxu1 }
 0x1f3   : > { %v9391_v20 = vadd.f32 %v9379_v33, %v4958_v60  ;;  %v4956_v56 = vadd.f32 %v4829_v50, %v4506_v0  ;;  %v4509_v62 = vadd.f32 %v6300_v54, %v3803_v17  ;;  %v3807_v17 = vadd.f32 %v9259_v37, %v3405_v8 }
 0x1f4   : > { %v6351_v11 = vpop.f32.mrf.mxu0  ;;  %v4382_v6 = vpop.f32.mrf.mxu1  ;;  %v3406_v0 = vadd.f32 %v9277_v1, %v9172_v49  ;;  %v3805_v30 = vadd.f32 %v9263_v26, %v3403_v18  ;;  %v3407_v8 = vadd.f32 %v9285_v44, %v9178_v43  ;;  %v3410_v18 = vadd.f32 %v9293_v38, %v9184_v27 }
 0x1f5   : > { %5029 = vst [vmem:[%s9387_s20 + $0x10] sm:$0xff] %v9391_v20  ;;  %v9399_v16 = vadd.f32 %v9379_v33, %v4956_v56  ;;  %v4959_v40 = vadd.f32 %v6348_v32, %v4509_v62  ;;  %v4507_v5 = vadd.f32 %v4382_v6, %v3801_v34  ;;  %v3408_v32 = vadd.f32 %v9273_v24, %v9169_v42 }
 0x1f6   : > { %v4845_v4 = vpop.f32.mrf.mxu0  ;;  %v6303_v50 = vpop.f32.mrf.mxu1  ;;  %v3409_v62 = vadd.f32 %v9281_v41, %v9175_v39 }
 0x1f7   : > { %5027 = vst [vmem:[%s9387_s20] sm:$0xff] %v9399_v16  ;;  %v9407_v59 = vadd.f32 %v9379_v33, %v4959_v40  ;;  %v4957_v51 = vadd.f32 %v4832_v47, %v4507_v5  ;;  %v4512_v31 = vadd.f32 %v6303_v50, %v3806_v19  ;;  %v3810_v34 = vadd.f32 %v9267_v52, %v3408_v32 }
 0x1f8   : > { %v6352_v2 = vpop.f32.mrf.mxu0  ;;  %v4395_v36 = vpop.f32.mrf.mxu1  ;;  %v3808_v19 = vadd.f32 %v9271_v63, %v3406_v0  ;;  %v3412_v5 = vadd.f32 %v9289_v3, %v9181_v28  ;;  %v3411_v0 = vadd.f32 %v9301_v15, %v9190_v58 }
 0x1f9   : > { %5030 = vst [vmem:[%s9387_s20 + $0x18] sm:$0xff] %v9407_v59  ;;  %v9415_v29 = vadd.f32 %v9379_v33, %v4957_v51  ;;  %v4962_v57 = vadd.f32 %v6351_v11, %v4512_v31  ;;  %v4510_v7 = vadd.f32 %v4395_v36, %v3804_v22  ;;  %v3811_v22 = vadd.f32 %v9275_v23, %v3409_v62 }
 0x1fa   : > { %v4848_v60 = vpop.f32.mrf.mxu0  ;;  %v6304_v47 = vpop.f32.mrf.mxu1  ;;  %v3809_v31 = vadd.f32 %v9279_v21, %v3407_v8  ;;  %v3814_v32 = vadd.f32 %v9283_v14, %v3412_v5  ;;  %v3813_v62 = vadd.f32 %v9295_v10, %v3411_v0 }
 0x1fb   : > { %5028 = vst [vmem:[%s9387_s20 + $0x8] sm:$0xff] %v9415_v29  ;;  %v9423_v42 = vadd.f32 %v9379_v33, %v4962_v57  ;;  %v4960_v37 = vadd.f32 %v4845_v4, %v4510_v7  ;;  %v4513_v24 = vadd.f32 %v6304_v47, %v3807_v17  ;;  %v3413_v17 = vadd.f32 %v9297_v53, %v9187_v55 }
 0x1fc   : > { %v6355_v54 = vpop.f32.mrf.mxu0  ;;  %v4398_v56 = vpop.f32.mrf.mxu1  ;;  %v3812_v7 = vadd.f32 %v9287_v46, %v3410_v18 }
 0x1fd   : > { %5033 = vst [vmem:[%s9387_s20 + $0x30] sm:$0xff] %v9423_v42  ;;  %v9431_v49 = vadd.f32 %v9379_v33, %v4960_v37  ;;  %v4963_v26 = vadd.f32 %v6352_v2, %v4513_v24  ;;  %v4511_v1 = vadd.f32 %v4398_v56, %v3805_v30  ;;  %v3416_v30 = vadd.f32 %v9305_v12, %v9193_v48 }
 0x1fe   : > { %v4861_v11 = vpop.f32.mrf.mxu0  ;;  %v6307_v6 = vpop.f32.mrf.mxu1  ;;  %v3815_v24 = vadd.f32 %v9291_v45, %v3413_v17 }
 0x1ff   : > { %5031 = vst [vmem:[%s9387_s20 + $0x20] sm:$0xff] %v9431_v49  ;;  %v9439_v39 = vadd.f32 %v9379_v33, %v4963_v26  ;;  %v4961_v52 = vadd.f32 %v4848_v60, %v4511_v1  ;;  %v4516_v41 = vadd.f32 %v6307_v6, %v3810_v34  ;;  %v3414_v34 = vadd.f32 %v9309_v25, %v9196_v61  ;;  %v10167_v6 = vld [vmem:[#allocation37_spill] sm:$0xff] }
 0x200   : > { %v6356_v40 = vpop.f32.mrf.mxu0  ;;  %v4411_v4 = vpop.f32.mrf.mxu1  ;;  %v3818_v1 = vadd.f32 %v9299_v35, %v3416_v30 }
 0x201   : > { %5034 = vst [vmem:[%s9387_s20 + $0x38] sm:$0xff] %v9439_v39  ;;  %v9447_v43 = vadd.f32 %v9379_v33, %v4961_v52  ;;  %v4966_v63 = vadd.f32 %v6355_v54, %v4516_v41  ;;  %v4514_v44 = vadd.f32 %v4411_v4, %v3808_v19  ;;  %v10166_v19 = vld [vmem:[#allocation12_spill] sm:$0xff]  ;;  %v10169_v4 = vld [vmem:[#allocation3_spill] sm:$0xff] }
 0x202   : > { %v4864_v50 = vpop.f32.mrf.mxu0  ;;  %v6308_v51 = vpop.f32.mrf.mxu1  ;;  %v3417_v8 = vadd.f32 %v10167_v6, %v10166_v19  ;;  %v10168_v41 = vld [vmem:[#allocation32_spill] sm:$0xff] }
 0x203   : > { %5032 = vst [vmem:[%s9387_s20 + $0x28] sm:$0xff] %v9447_v43  ;;  %v9455_v28 = vadd.f32 %v9379_v33, %v4966_v63  ;;  %v4964_v23 = vadd.f32 %v4861_v11, %v4514_v44  ;;  %v4517_v3 = vadd.f32 %v6308_v51, %v3811_v22  ;;  %v10170_v22 = vld [vmem:[#allocation25_spill] sm:$0xff]  ;;  %v10171_v51 = vld [vmem:[#allocation6_spill] sm:$0xff] }
 0x204   : > { %v4414_v36 = vpop.f32.mrf.mxu1  ;;  %v3415_v63 = vadd.f32 %v10170_v22, %v10169_v4  ;;  %v10183_v4 = vld [vmem:[#allocation17_spill] sm:$0xff]  ;;  %v10184_v22 = vld [vmem:[#allocation7_spill] sm:$0xff] }
 0x205   : > { %v6359_v2 = vpop.f32.mrf.mxu0  ;;  %5037 = vst [vmem:[%s9387_s20 + $0x50] sm:$0xff] %v9455_v28  ;;  %v9463_v27 = vadd.f32 %v9379_v33, %v4964_v23  ;;  %v4967_v21 = vadd.f32 %v6356_v40, %v4517_v3  ;;  %v4515_v38 = vadd.f32 %v4414_v36, %v3809_v31  ;;  %v3816_v40 = vadd.f32 %v10168_v41, %v3414_v34  ;;  %v10172_v31 = vld [vmem:[#allocation41_spill] sm:$0xff]  ;;  %v10178_v34 = vld [vmem:[#allocation14_spill] sm:$0xff] }
 0x206   : > { %v6311_v60 = vpop.f32.mrf.mxu1  ;;  %v3420_v23 = vadd.f32 %v10172_v31, %v10171_v51 }
 0x207   : > { %v4877_v57 = vpop.f32.mrf.mxu0  ;;  %5035 = vst [vmem:[%s9387_s20 + $0x40] sm:$0xff] %v9463_v27  ;;  %v9471_v55 = vadd.f32 %v9379_v33, %v4967_v21  ;;  %v4965_v14 = vadd.f32 %v4864_v50, %v4515_v38  ;;  %v4520_v53 = vadd.f32 %v6311_v60, %v3814_v32 }
 0x208   : > { %v4427_v37 = vpop.f32.mrf.mxu1 }
 0x209   : > { %v6360_v47 = vpop.f32.mrf.mxu0  ;;  %5038 = vst [vmem:[%s9387_s20 + $0x58] sm:$0xff] %v9471_v55  ;;  %v9479_v58 = vadd.f32 %v9379_v33, %v4965_v14  ;;  %v4970_v15 = vadd.f32 %v6359_v2, %v4520_v53  ;;  %v4518_v46 = vadd.f32 %v4427_v37, %v3812_v7  ;;  %v10173_v2 = vld [vmem:[#allocation35_spill] sm:$0xff]  ;;  %v10176_v14 = vld [vmem:[#allocation36_spill] sm:$0xff] }
 0x20a   : > { %v6312_v56 = vpop.f32.mrf.mxu1  ;;  %v3819_v32 = vadd.f32 %v10173_v2, %v3417_v8  ;;  %v10175_v7 = vld [vmem:[#allocation47_spill] sm:$0xff]  ;;  %v3817_v53 = vadd.f32 %v10176_v14, %v3415_v63  ;;  %v10181_v8 = vld [vmem:[#allocation13_spill] sm:$0xff]  ;;  %v3424_v63 = vadd.f32 %v10184_v22, %v10183_v4  ;;  %v10186_v2 = vld [vmem:[#allocation16_spill] sm:$0xff] }
 0x20b   : > { %v4880_v54 = vpop.f32.mrf.mxu0  ;;  %5036 = vst [vmem:[%s9387_s20 + $0x48] sm:$0xff] %v9479_v58  ;;  %v9487_v48 = vadd.f32 %v9379_v33, %v4970_v15  ;;  %v4968_v12 = vadd.f32 %v4877_v57, %v4518_v46  ;;  %v4521_v45 = vadd.f32 %v6312_v56, %v3815_v24  ;;  %v10174_v57 = vld [vmem:[#allocation8_spill] sm:$0xff]  ;;  %v10177_v15 = vld [vmem:[#allocation33_spill] sm:$0xff]  ;;  %v10179_v56 = vld [vmem:[#allocation50_spill] sm:$0xff] }
 0x20c   : > { %v4430_v11 = vpop.f32.mrf.mxu1  ;;  %v3418_v60 = vadd.f32 %v10175_v7, %v10174_v57  ;;  %v3822_v46 = vadd.f32 %v10177_v15, %v3420_v23  ;;  %v10191_v15 = vld [vmem:[#allocation24_spill] sm:$0xff]  ;;  %v10196_v4 = vld [vmem:[#allocation55_spill] sm:$0xff] }
 0x20d   : > { %v6363_v26 = vpop.f32.mrf.mxu0  ;;  %5041 = vst [vmem:[%s9387_s20 + $0x70] sm:$0xff] %v9487_v48  ;;  %v9495_v61 = vadd.f32 %v9379_v33, %v4968_v12  ;;  %v4971_v25 = vadd.f32 %v6360_v47, %v4521_v45  ;;  %v4519_v10 = vadd.f32 %v4430_v11, %v3813_v62  ;;  %v3421_v62 = vadd.f32 %v10179_v56, %v10178_v34  ;;  %v10180_v11 = vld [vmem:[#allocation22_spill] sm:$0xff] }
 0x20e   : > { %v6315_v5 = vpop.f32.mrf.mxu1  ;;  %v3820_v19 = vadd.f32 %v10180_v11, %v3418_v60  ;;  %v10193_v11 = vld [vmem:[#allocation18_spill] sm:$0xff] }
 0x20f   : > { %v4893_v52 = vpop.f32.mrf.mxu0  ;;  %5039 = vst [vmem:[%s9387_s20 + $0x60] sm:$0xff] %v9495_v61  ;;  %v9503_v35 = vadd.f32 %v9379_v33, %v4971_v25  ;;  %v4969_v44 = vadd.f32 %v4880_v54, %v4519_v10  ;;  %v4524_v50 = vadd.f32 %v6315_v5, %v3818_v1  ;;  %v10182_v25 = vld [vmem:[#allocation26_spill] sm:$0xff] }
 0x210   : > { %v4443_v3 = vpop.f32.mrf.mxu1  ;;  %v3419_v10 = vadd.f32 %v10182_v25, %v10181_v8 }
 0x211   : > { %v6364_v18 = vpop.f32.mrf.mxu0  ;;  %5042 = vst [vmem:[%s9387_s20 + $0x78] sm:$0xff] %v9503_v35  ;;  %v9511_v36 = vadd.f32 %v9379_v33, %v4969_v44  ;;  %v4974_v17 = vadd.f32 %v6363_v26, %v4524_v50  ;;  %v4522_v21 = vadd.f32 %v4443_v3, %v3816_v40  ;;  %v10185_v50 = vld [vmem:[#allocation30_spill] sm:$0xff] }
 0x212   : > { %v6316_v0 = vpop.f32.mrf.mxu1 }
 0x213   : > { %v4896_v38 = vpop.f32.mrf.mxu0  ;;  %5040 = vst [vmem:[%s9387_s20 + $0x68] sm:$0xff] %v9511_v36  ;;  %v9519_v47 = vadd.f32 %v9379_v33, %v4974_v17  ;;  %v4972_v30 = vadd.f32 %v4893_v52, %v4522_v21  ;;  %v4525_v37 = vadd.f32 %v6316_v0, %v3819_v32  ;;  %v10187_v32 = vld [vmem:[#allocation48_spill] sm:$0xff] }
 0x214   : > { %v4446_v54 = vpop.f32.mrf.mxu1  ;;  %v3422_v17 = vadd.f32 %v10187_v32, %v10186_v2  ;;  %v10198_v2 = vld [vmem:[#allocation20_spill] sm:$0xff]  ;;  %v10199_v32 = vld [vmem:[#allocation34_spill] sm:$0xff] }
 0x215   : > { %v6367_v24 = vpop.f32.mrf.mxu0  ;;  %5045 = vst [vmem:[%s9387_s20 + $0x90] sm:$0xff] %v9519_v47  ;;  %v9527_v12 = vadd.f32 %v9379_v33, %v4972_v30  ;;  %v4975_v45 = vadd.f32 %v6364_v18, %v4525_v37  ;;  %v4523_v26 = vadd.f32 %v4446_v54, %v3817_v53  ;;  %v3823_v18 = vadd.f32 %v10185_v50, %v3421_v62  ;;  %v10189_v53 = vld [vmem:[#allocation58_spill] sm:$0xff] }
 0x216   : > { %v6319_v6 = vpop.f32.mrf.mxu1  ;;  %v3826_v30 = vadd.f32 %v10189_v53, %v3424_v63  ;;  %v10197_v63 = vld [vmem:[#allocation44_spill] sm:$0xff] }
 0x217   : > { %v4909_v1 = vpop.f32.mrf.mxu0  ;;  %5043 = vst [vmem:[%s9387_s20 + $0x80] sm:$0xff] %v9527_v12  ;;  %v9535_v52 = vadd.f32 %v9379_v33, %v4975_v45  ;;  %v4973_v41 = vadd.f32 %v4896_v38, %v4523_v26  ;;  %v4528_v40 = vadd.f32 %v6319_v6, %v3822_v46  ;;  %v10188_v38 = vld [vmem:[#allocation21_spill] sm:$0xff]  ;;  %v10192_v45 = vld [vmem:[#allocation43_spill] sm:$0xff] }
 0x218   : > { %v4459_v44 = vpop.f32.mrf.mxu1  ;;  %v3821_v57 = vadd.f32 %v10188_v38, %v3419_v10  ;;  %v3824_v26 = vadd.f32 %v10192_v45, %v3422_v17  ;;  %v10203_v45 = vld [vmem:[#allocation53_spill] sm:$0xff] }
 0x219   : > { %v6368_v5 = vpop.f32.mrf.mxu0  ;;  %5046 = vst [vmem:[%s9387_s20 + $0x98] sm:$0xff] %v9535_v52  ;;  %v9543_v51 = vadd.f32 %v9379_v33, %v4973_v41  ;;  %v4978_v31 = vadd.f32 %v6367_v24, %v4528_v40  ;;  %v4526_v23 = vadd.f32 %v4459_v44, %v3820_v19  ;;  %v10190_v24 = vld [vmem:[#allocation15_spill] sm:$0xff]  ;;  %v10194_v19 = vld [vmem:[#allocation52_spill] sm:$0xff] }
 0x21a   : > { %v6320_v21 = vpop.f32.mrf.mxu1  ;;  %v3425_v46 = vadd.f32 %v10191_v15, %v10190_v24  ;;  %v3423_v6 = vadd.f32 %v10194_v19, %v10193_v11  ;;  %v10195_v40 = vld [vmem:[#allocation19_spill] sm:$0xff] }
 0x21b   : > { %v4912_v3 = vpop.f32.mrf.mxu0  ;;  %5044 = vst [vmem:[%s9387_s20 + $0x88] sm:$0xff] %v9543_v51  ;;  %v9551_v7 = vadd.f32 %v9379_v33, %v4978_v31  ;;  %v4976_v60 = vadd.f32 %v4909_v1, %v4526_v23  ;;  %v4529_v0 = vadd.f32 %v6320_v21, %v3823_v18  ;;  %v10200_v21 = vld [vmem:[#allocation38_spill] sm:$0xff]  ;;  %v10202_v24 = vld [vmem:[#allocation23_spill] sm:$0xff] }
 0x21c   : > { %v4462_v37 = vpop.f32.mrf.mxu1  ;;  %v3827_v44 = vadd.f32 %v10197_v63, %v3425_v46  ;;  %v3825_v38 = vadd.f32 %v10200_v21, %v3423_v6  ;;  %v3429_v15 = vadd.f32 %v9362_v9, %v10202_v24  ;;  %v10204_v11 = vld [vmem:[#allocation31_spill] sm:$0xff] }
 0x21d   : > { %v6371_v14 = vpop.f32.mrf.mxu0  ;;  %5049 = vst [vmem:[%s9387_s20 + $0xb0] sm:$0xff] %v9551_v7  ;;  %v9559_v54 = vadd.f32 %v9379_v33, %v4976_v60  ;;  %v4979_v34 = vadd.f32 %v6368_v5, %v4529_v0  ;;  %v4527_v56 = vadd.f32 %v4462_v37, %v3821_v57  ;;  %v3428_v5 = vadd.f32 %v10196_v4, %v10195_v40  ;;  %v10205_v40 = vld [vmem:[#allocation46_spill] sm:$0xff] }
 0x21e   : > { %v6323_v1 = vpop.f32.mrf.mxu1  ;;  %v3427_v19 = vadd.f32 %v9365_v13, %v10204_v11 }
 0x21f   : > { %v4925_v62 = vpop.f32.mrf.mxu0  ;;  %5047 = vst [vmem:[%s9387_s20 + $0xa0] sm:$0xff] %v9559_v54  ;;  %v9567_v8 = vadd.f32 %v9379_v33, %v4979_v34  ;;  %v4977_v25 = vadd.f32 %v4912_v3, %v4527_v56  ;;  %v4532_v10 = vadd.f32 %v6323_v1, %v3826_v30  ;;  %v3426_v3 = vadd.f32 %v10199_v32, %v10198_v2  ;;  %v10201_v30 = vld [vmem:[#allocation51_spill] sm:$0xff] }
 0x220   : > { %v4475_v22 = vpop.f32.mrf.mxu1  ;;  %v3830_v37 = vadd.f32 %v10201_v30, %v3428_v5  ;;  %v6572_v30 = vmov (%p5059_p5), 0.0  }
 0x221   : > { %v6372_v41 = vpop.f32.mrf.mxu0  ;;  %5050 = vst [vmem:[%s9387_s20 + $0xb8] sm:$0xff] %v9567_v8  ;;  %v9575_v50 = vadd.f32 %v9379_v33, %v4977_v25  ;;  %v4982_v18 = vadd.f32 %v6371_v14, %v4532_v10  ;;  %v4530_v31 = vadd.f32 %v4475_v22, %v3824_v26  ;;  %v3828_v26 = vadd.f32 %v10203_v45, %v3426_v3 }
 0x222   : > { %v6324_v17 = vpop.f32.mrf.mxu1  ;;  %5065 = vst [vmem:[%s9752_s6] sm:$0x3] (%p5059_p5), %v6572_v30 }
 0x223   : > { %v4928_v23 = vpop.f32.mrf.mxu0  ;;  %5048 = vst [vmem:[%s9387_s20 + $0xa8] sm:$0xff] %v9575_v50  ;;  %v9583_v57 = vadd.f32 %v9379_v33, %v4982_v18  ;;  %v4980_v60 = vadd.f32 %v4925_v62, %v4530_v31  ;;  %v4533_v0 = vadd.f32 %v6324_v17, %v3827_v44  ;;  %v10206_v44 = vld [vmem:[#allocation39_spill] sm:$0xff] }
 0x224   : > { %v4478_v14 = vpop.f32.mrf.mxu1  ;;  %v3829_v18 = vadd.f32 %v10206_v44, %v3427_v19 }
 0x225   : > { %v6375_v53 = vpop.f32.mrf.mxu0  ;;  %5053 = vst [vmem:[%s9387_s20 + $0xd0] sm:$0xff] %v9583_v57  ;;  %v9591_v46 = vadd.f32 %v9379_v33, %v4980_v60  ;;  %v4983_v34 = vadd.f32 %v6372_v41, %v4533_v0  ;;  %v4531_v56 = vadd.f32 %v4478_v14, %v3825_v38  ;;  %v3831_v41 = vadd.f32 %v10205_v40, %v3429_v15 }
 0x226   : > { %v6327_v1 = vpop.f32.mrf.mxu1 }
 0x227   : > { %v4941_v62 = vpop.f32.mrf.mxu0  ;;  %5051 = vst [vmem:[%s9387_s20 + $0xc0] sm:$0xff] %v9591_v46  ;;  %v9599_v6 = vadd.f32 %v9379_v33, %v4983_v34  ;;  %v4981_v9 = vadd.f32 %v4928_v23, %v4531_v56  ;;  %v4536_v25 = vadd.f32 %v6327_v1, %v3830_v37 }
 0x228   : > { %v4491_v10 = vpop.f32.mrf.mxu1 }
 0x229   : > { %5054 = vst [vmem:[%s9387_s20 + $0xd8] sm:$0xff] %v9599_v6  ;;  %v9605_v4 = vadd.f32 %v9379_v33, %v4981_v9  ;;  %v4986_v5 = vadd.f32 %v6375_v53, %v4536_v25  ;;  %v4534_v22 = vadd.f32 %v4491_v10, %v3828_v26  ;;  %v6376_v63 = vpop.f32.mrf.mxu0 }
 0x22a   : > { %v6328_v13 = vpop.f32.mrf.mxu1 }
 0x22b   : > { %5052 = vst [vmem:[%s9387_s20 + $0xc8] sm:$0xff] %v9605_v4  ;;  %v9611_v31 = vadd.f32 %v9379_v33, %v4986_v5  ;;  %v4984_v23 = vadd.f32 %v4941_v62, %v4534_v22  ;;  %v4537_v2 = vadd.f32 %v6328_v13, %v3831_v41  ;;  %v4944_v38 = vpop.f32.mrf.mxu0 }
 0x22c   : > { %v4494_v32 = vpop.f32.mrf.mxu1 }
 0x22d   : > { %5057 = vst [vmem:[%s9387_s20 + $0xf0] sm:$0xff] %v9611_v31  ;;  %v9616_v3 = vadd.f32 %v9379_v33, %v4984_v23  ;;  %v4987_v17 = vadd.f32 %v6376_v63, %v4537_v2  ;;  %v4535_v21 = vadd.f32 %v4494_v32, %v3829_v18 }
 0x22f   : > { %5055 = vst [vmem:[%s9387_s20 + $0xe0] sm:$0xff] %v9616_v3  ;;  %v9621_v60 = vadd.f32 %v9379_v33, %v4987_v17  ;;  %v4985_v0 = vadd.f32 %v4944_v38, %v4535_v21  ;;  %5064 = sbr.rel (!%p5059_p5) target bundleno = 564 (0x234), region = 44 }
 0x231   : > { %5058 = vst [vmem:[%s9387_s20 + $0xf8] sm:$0xff] %v9621_v60  ;;  %v9626_v53 = vadd.f32 %v9379_v33, %v4985_v0 }
 0x233   : > { %5056 = vst [vmem:[%s9387_s20 + $0xe8] sm:$0xff] %v9626_v53 }
 0x234 PF: > { %v5066_v37 = vadd.f32 %v9415_v29, %v9399_v16  ;;  %v5103_v33 = vmul.f32 %v9399_v16, %v9399_v16  ;;  %v5104_v15 = vmul.f32 %v9415_v29, %v9415_v29  ;;  %v5105_v56 = vmul.f32 %v9391_v20, %v9391_v20 }
 0x235   : > { %v5106_v26 = vmul.f32 %v9407_v59, %v9407_v59  ;;  %v5107_v11 = vmul.f32 %v9431_v49, %v9431_v49  ;;  %v5108_v29 = vmul.f32 %v9447_v43, %v9447_v43  ;;  %v5109_v25 = vmul.f32 %v9423_v42, %v9423_v42 }
 0x236   : > { %v5067_v14 = vadd.f32 %v5066_v37, %v9391_v20  ;;  %v5135_v1 = vadd.f32 %v5104_v15, %v5103_v33  ;;  %v5110_v40 = vmul.f32 %v9439_v39, %v9439_v39  ;;  %v5111_v5 = vmul.f32 %v9463_v27, %v9463_v27 }
 0x237   : > { %v5112_v13 = vmul.f32 %v9479_v58, %v9479_v58  ;;  %v5113_v44 = vmul.f32 %v9455_v28, %v9455_v28  ;;  %v5114_v23 = vmul.f32 %v9471_v55, %v9471_v55  ;;  %v5115_v32 = vmul.f32 %v9495_v61, %v9495_v61 }
 0x238   : > { %v5068_v24 = vadd.f32 %v5067_v14, %v9407_v59  ;;  %v5136_v16 = vadd.f32 %v5135_v1, %v5105_v56  ;;  %v5116_v21 = vmul.f32 %v9511_v36, %v9511_v36  ;;  %v5117_v0 = vmul.f32 %v9487_v48, %v9487_v48 }
 0x239   : > { %v5118_v37 = vmul.f32 %v9503_v35, %v9503_v35  ;;  %v5120_v15 = vmul.f32 %v9543_v51, %v9543_v51  ;;  %v5121_v56 = vmul.f32 %v9519_v47, %v9519_v47  ;;  %vm5173_vm6 = vcmask 1040384  }
 0x23a   : > { %v5069_v34 = vadd.f32 %v5068_v24, %v9431_v49  ;;  %v5137_v9 = vadd.f32 %v5136_v16, %v5106_v26  ;;  %v5119_v24 = vmul.f32 %v9527_v12, %v9527_v12  ;;  %v5122_v26 = vmul.f32 %v9535_v52, %v9535_v52 }
 0x23b   : > { %v5124_v16 = vmul.f32 %v9575_v50, %v9575_v50 }
 0x23c   : > { %v5070_v45 = vadd.f32 %v5069_v34, %v9447_v43  ;;  %v5138_v10 = vadd.f32 %v5137_v9, %v5107_v11 }
 0x23e   : > { %v5071_v62 = vadd.f32 %v5070_v45, %v9423_v42  ;;  %v5139_v41 = vadd.f32 %v5138_v10, %v5108_v29  ;;  %v5125_v29 = vmul.f32 %v9551_v7, %v9551_v7  ;;  %v5127_v10 = vmul.f32 %v9591_v46, %v9591_v46 }
 0x240   : > { %v5072_v19 = vadd.f32 %v5071_v62, %v9439_v39  ;;  %v5140_v22 = vadd.f32 %v5139_v41, %v5109_v25  ;;  %v5123_v62 = vmul.f32 %v9559_v54, %v9559_v54 }
 0x242   : > { %v5073_v20 = vadd.f32 %v5072_v19, %v9463_v27  ;;  %v5141_v63 = vadd.f32 %v5140_v22, %v5110_v40  ;;  %v5128_v40 = vmul.f32 %v9605_v4, %v9605_v4  ;;  %v5130_v22 = vmul.f32 %v9599_v6, %v9599_v6 }
 0x244   : > { %v5074_v59 = vadd.f32 %v5073_v20, %v9479_v58  ;;  %v5142_v18 = vadd.f32 %v5141_v63, %v5111_v5  ;;  %v5126_v20 = vmul.f32 %v9567_v8, %v9567_v8 }
 0x246   : > { %v5075_v49 = vadd.f32 %v5074_v59, %v9455_v28  ;;  %v5143_v2 = vadd.f32 %v5142_v18, %v5112_v13  ;;  %v5131_v13 = vmul.f32 %v9616_v3, %v9616_v3  ;;  %v5133_v18 = vmul.f32 %v9611_v31, %v9611_v31 }
 0x248   : > { %v5076_v43 = vadd.f32 %v5075_v49, %v9471_v55  ;;  %v5144_v17 = vadd.f32 %v5143_v2, %v5113_v44  ;;  %v5129_v49 = vmul.f32 %v9583_v57, %v9583_v57 }
 0x24a   : > { %v5077_v42 = vadd.f32 %v5076_v43, %v9495_v61  ;;  %v5145_v38 = vadd.f32 %v5144_v17, %v5114_v23 }
 0x24c   : > { %v5078_v39 = vadd.f32 %v5077_v42, %v9511_v36  ;;  %v5146_v30 = vadd.f32 %v5145_v38, %v5115_v32  ;;  %v5132_v42 = vmul.f32 %v9626_v53, %v9626_v53 }
 0x24e   : > { %v5079_v27 = vadd.f32 %v5078_v39, %v9487_v48  ;;  %v5147_v14 = vadd.f32 %v5146_v30, %v5116_v21 }
 0x250   : > { %v5080_v58 = vadd.f32 %v5079_v27, %v9503_v35  ;;  %v5148_v33 = vadd.f32 %v5147_v14, %v5117_v0 }
 0x252   : > { %v5081_v28 = vadd.f32 %v5080_v58, %v9527_v12  ;;  %v5149_v34 = vadd.f32 %v5148_v33, %v5118_v37 }
 0x254   : > { %v5082_v55 = vadd.f32 %v5081_v28, %v9543_v51  ;;  %v5150_v45 = vadd.f32 %v5149_v34, %v5119_v24 }
 0x256   : > { %v5083_v61 = vadd.f32 %v5082_v55, %v9519_v47  ;;  %v5151_v1 = vadd.f32 %v5150_v45, %v5120_v15 }
 0x258   : > { %v5084_v36 = vadd.f32 %v5083_v61, %v9535_v52  ;;  %v5152_v11 = vadd.f32 %v5151_v1, %v5121_v56 }
 0x25a   : > { %v5085_v48 = vadd.f32 %v5084_v36, %v9559_v54  ;;  %v5153_v19 = vadd.f32 %v5152_v11, %v5122_v26 }
 0x25c   : > { %v5086_v35 = vadd.f32 %v5085_v48, %v9575_v50  ;;  %v5154_v9 = vadd.f32 %v5153_v19, %v5123_v62 }
 0x25e   : > { %v5087_v12 = vadd.f32 %v5086_v35, %v9551_v7  ;;  %v5155_v25 = vadd.f32 %v5154_v9, %v5124_v16 }
 0x260   : > { %v5088_v51 = vadd.f32 %v5087_v12, %v9567_v8  ;;  %v5156_v59 = vadd.f32 %v5155_v25, %v5125_v29 }
 0x262   : > { %v5089_v47 = vadd.f32 %v5088_v51, %v9591_v46  ;;  %v5157_v41 = vadd.f32 %v5156_v59, %v5126_v20 }
 0x264   : > { %v5090_v52 = vadd.f32 %v5089_v47, %v9605_v4  ;;  %v5158_v5 = vadd.f32 %v5157_v41, %v5127_v10 }
 0x266   : > { %v5091_v54 = vadd.f32 %v5090_v52, %v9583_v57  ;;  %v5159_v43 = vadd.f32 %v5158_v5, %v5128_v40 }
 0x268   : > { %v5092_v50 = vadd.f32 %v5091_v54, %v9599_v6  ;;  %v5160_v63 = vadd.f32 %v5159_v43, %v5129_v49  ;;  %v5134_v6 = vmul.f32 %v9621_v60, %v9621_v60 }
 0x26a   : > { %v5093_v7 = vadd.f32 %v5092_v50, %v9616_v3  ;;  %v5161_v44 = vadd.f32 %v5160_v63, %v5130_v22 }
 0x26c   : > { %v5094_v8 = vadd.f32 %v5093_v7, %v9626_v53  ;;  %v5162_v39 = vadd.f32 %v5161_v44, %v5131_v13 }
 0x26e   : > { %v5095_v46 = vadd.f32 %v5094_v8, %v9611_v31  ;;  %v5163_v2 = vadd.f32 %v5162_v39, %v5132_v42  ;;  %v5172_v31 = vld [vmem:[%s9752_s6] sm:$0x3] }
 0x270   : > { %v5096_v4 = vadd.f32 %v5095_v46, %v9621_v60  ;;  %v5164_v32 = vadd.f32 %v5163_v2, %v5133_v18 }
 0x272   : > { %v5097_v57 = vrot.slane %v5096_v4, 4  ;;  %v5165_v3 = vadd.f32 %v5164_v32, %v5134_v6 }
 0x274   : > { %v5098_v23 = vadd.f32 %v5097_v57, %v5096_v4  ;;  %v5166_v58 = vrot.slane %v5165_v3, 4 }
 0x276   : > { %v5099_v27 = vrot.slane %v5098_v23, 2  ;;  %v5167_v21 = vadd.f32 %v5166_v58, %v5165_v3 }
 0x278   : > { %v5100_v17 = vadd.f32 %v5099_v27, %v5098_v23  ;;  %v5168_v28 = vrot.slane %v5167_v21, 2 }
 0x27a   : > { %v5101_v38 = vrot.slane %v5100_v17, 1  ;;  %v5169_v53 = vadd.f32 %v5168_v28, %v5167_v21 }
 0x27c   : > { %v5102_v0 = vadd.f32 %v5101_v38, %v5100_v17  ;;  %v5170_v30 = vrot.slane %v5169_v53, 1 }
 0x27e   : > { %v5171_v55 = vadd.f32 %v5170_v30, %v5169_v53 }
 0x280   : > { %v5174_v37 = vsel %vm5173_vm6, %v5102_v0, %v5171_v55 }
 0x281   : > { %v5175_v60 = vadd.f32 %v5174_v37, %v5172_v31 }
 0x283   : > { %5176 = vst [vmem:[%s9752_s6] sm:$0x3] %v5175_v60 }
 0x284 PF: > { %s17_s23 = sadd.s32 1, %s6570_s23   ;;  %s10207_s21 = smov %s6566_s22 }
 0x285   : > { %p14_p6 = scmp.ge.s32.totalorder %s17_s23, 4   ;;  %s10208_s22 = smov %s10210_s24 }
 0x287   :  { %16 = sbr.rel (!%p14_p6) target bundleno = 2 (0x2), region = 96 }

// kernel: seg_encoder_forward.9
= control target key start
LH: loop header
LB: loop body
LE: loop exit
PB: predicated region body
PF: predicated region fallthrough
CT: control target
= control target key end

     0   :  { %s6450_s18 = smov 0   ;;  %s6452_s19 = smov 0   ;;  %s9377_s0 = inlined_call_operand.vmem [shape: bf16[2,16,18,128], index: 0, kind: input, shape index: {}]   ;;  %s9378_s1 = inlined_call_operand.vmem [shape: bf16[2,16,18,128], index: 1, kind: input, shape index: {}]   ;;  %s9379_s2 = inlined_call_operand.vmem [shape: bf16[2,16,18,128], index: 2, kind: input, shape index: {}]   ;;  %s9380_s3 = inlined_call_operand.vmem [shape: bf16[9,128,128], index: 3, kind: input, shape index: {}]   ;;  %s9381_s4 = inlined_call_operand.vmem [shape: f32[1,128], index: 4, kind: input, shape index: {}]   ;;  %s9382_s5 = inlined_call_operand.vmem [shape: f32[2,16,16,128], index: 5, kind: output, shape index: {}]  }
   0x1   :  { %s6454_s20 = smov 0  }
   0x2 LB: > { %s27_s21 = sadd.s32 1, %s6414_s19  ;;  %p5176_p0 = scmp.ge.s32.totalorder %s6418_s20, 1  ;;  %s6418_s20 = sphi %s6454_s20, %s15_s20   ;;  %s6414_s19 = sphi %s6452_s19, %s9838_s19   ;;  %s6410_s18 = sphi %s6450_s18, %s9837_s18  }
   0x3   : > { %p29_p1 = scmp.ge.s32.totalorder %s27_s21, 2  ;;  %p245_p2 = scmp.lt.s32.totalorder %s6418_s20, 3 }
   0x5   : > { %s9840_s21 = smov (%p29_p1, %s27_s21), 0  ;;  %p246_p3 = pnand %p5176_p0, %p245_p2 }
   0x7   : > { %249 = sbr.rel (%p246_p3) target bundleno = 563 (0x233), region = 40 }
   0xc   : > { %v6267_v0 = vld [vmem:[%s9380_s3 + $0x78] sm:$0xff]   ;;  %p304_p4 = scmp.lt.s32.totalorder %s6410_s18, 1  ;;  %v6268_v1 = vld [vmem:[%s9380_s3 + $0x70] sm:$0xff]   ;;  %v6269_v2 = vld [vmem:[%s9380_s3 + $0x68] sm:$0xff]   ;;  %vm412_vm0 = vsmask.f32 3328 }
   0xd   : > { %5794 = vmatprep.subr.bf16.mxu0 %v6267_v0  ;;  %6226 = vmatprep.subr.bf16.mxu1 %v6267_v0  ;;  %v6270_v3 = vld [vmem:[%s9380_s3 + $0x60] sm:$0xff]   ;;  %vm413_vm1 = vsmask.f32 7440  ;;  %v6271_v17 = vld [vmem:[%s9380_s3 + $0x58] sm:$0xff]   ;;  %v9447_v27 = vmov 0  ;;  %v6272_v33 = vld [vmem:[%s9380_s3 + $0x50] sm:$0xff]  }
   0xe   : > { %s9842_s18 = smov (!%p304_p4, %s6410_s18), 1  ;;  %5795 = vmatpush3.bf16.msra.mxu0 %v6267_v0  ;;  %6234 = vmatpush3.bf16.msra.mxu1 %v6267_v0  ;;  %vm6517_vm2 = vmor %vm412_vm0, %vm413_vm1  ;;  %v6273_v58 = vld [vmem:[%s9380_s3 + $0x48] sm:$0xff]   ;;  %vm1410_vm3 = vcmask 1042432   ;;  %vm1411_vm4 = vcmask 1046532  }
   0xf   : > { %5796 = vmatprep.subr.bf16.mxu0 %v6268_v1  ;;  %6227 = vmatprep.subr.bf16.mxu1 %v6268_v1  ;;  %s6480_s28 = smul.u32 192, %s9842_s18  ;;  %v9448_v27 = vsel %vm6517_vm2, 4294967295, %v9447_v27  ;;  %vm6826_vm5 = vmor %vm1410_vm3, %vm1411_vm4 }
  0x10   : > { %9449 = vst [vmem:[#allocation2_spill] sm:$0xff] %v9448_v27 }
  0x11   : > { %s6486_s6 = scalar_lea.vmem %s9377_s0, %s6480_s28  ;;  %s7039_s22 = scalar_lea.vmem %s9378_s1, %s6480_s28 }
  0x12   : > { %5797 = vmatpush3.bf16.msra.mxu0 %v6268_v1  ;;  %6235 = vmatpush3.bf16.msra.mxu1 %v6268_v1  ;;  %v6492_v4 = vld [vmem:[%s6486_s6] sm:$0xf]  ;;  %v6495_v5 = vld [vmem:[%s6486_s6 + $0x4] sm:$0xf]  ;;  %v6498_v6 = vld [vmem:[%s6486_s6 + $0x8] sm:$0x1]  ;;  %s7678_s7 = scalar_lea.vmem %s9379_s2, %s6480_s28 }
  0x13   : > { %5798 = vmatprep.subr.bf16.mxu0 %v6269_v2  ;;  %6228 = vmatprep.subr.bf16.mxu1 %v6269_v2  ;;  %v416_v7 = vshrl.u32 %v6492_v4, 16  ;;  %v419_v8 = vshll.u32 %v6492_v4, 16  ;;  %v425_v9 = vshll.u32 %v6495_v5, 16  ;;  %v429_v10 = vshrl.u32 %v6495_v5, 16  ;;  %v372_v12 = vld [vmem:[%s6486_s6 + $0x60] sm:$0xf] }
  0x14   : > { %v435_v11 = vshll.u32 %v6498_v6, 16  ;;  %v373_v15 = vld [vmem:[%s6486_s6 + $0x64] sm:$0xf]  ;;  %v374_v16 = vld [vmem:[%s6486_s6 + $0x68] sm:$0x1]  ;;  %v608_v21 = vshrl.u32 %v372_v12, 16 }
  0x15   : > { %v418_v13 = vrot.slane %v416_v7, 4  ;;  %v421_v14 = vrot.slane %v419_v8, 5  ;;  %v427_v18 = vrot.slane %v425_v9, 5  ;;  %v431_v19 = vrot.slane %v429_v10, 4  ;;  %v6513_v26 = vld [vmem:[%s6486_s6 + $0xc] sm:$0xf] }
  0x16   : > { %5799 = vmatpush3.bf16.msra.mxu0 %v6269_v2  ;;  %6236 = vmatpush3.bf16.msra.mxu1 %v6269_v2  ;;  %v611_v23 = vshll.u32 %v372_v12, 16  ;;  %v617_v24 = vshll.u32 %v373_v15, 16  ;;  %v621_v25 = vshrl.u32 %v373_v15, 16  ;;  %v437_v29 = vrot.slane %v435_v11, 5  ;;  %v6522_v32 = vld [vmem:[%s6486_s6 + $0x10] sm:$0xf] }
  0x17   : > { %5800 = vmatprep.subr.bf16.mxu0 %v6270_v3  ;;  %6229 = vmatprep.subr.bf16.mxu1 %v6270_v3  ;;  %v422_v22 = vor.u32 %v421_v14, %v418_v13  ;;  %v432_v28 = vor.u32 %v431_v19, %v427_v18  ;;  %v610_v30 = vrot.slane %v608_v21, 4  ;;  %v627_v31 = vshll.u32 %v374_v16, 16  ;;  %v6528_v40 = vld [vmem:[%s6486_s6 + $0x14] sm:$0x1]  ;;  %v375_v47 = vld [vmem:[%s6486_s6 + $0x6c] sm:$0xf] }
  0x18   : > { %v613_v35 = vrot.slane %v611_v23, 5  ;;  %v619_v36 = vrot.slane %v617_v24, 5  ;;  %v623_v37 = vrot.slane %v621_v25, 4  ;;  %v440_v41 = vshrl.u32 %v6513_v26, 16  ;;  %v376_v52 = vld [vmem:[%s6486_s6 + $0x70] sm:$0xf] }
  0x19   : > { %v423_v34 = vrot.slane %v422_v22, 4  ;;  %v433_v38 = vrot.slane %v432_v28, 4  ;;  %v629_v39 = vrot.slane %v627_v31, 5  ;;  %v443_v42 = vshll.u32 %v6513_v26, 16  ;;  %v377_v57 = vld [vmem:[%s6486_s6 + $0x74] sm:$0x1] }
  0x1a   : > { %5801 = vmatpush3.bf16.msra.mxu0 %v6270_v3  ;;  %6237 = vmatpush3.bf16.msra.mxu1 %v6270_v3  ;;  %v614_v44 = vor.u32 %v613_v35, %v610_v30  ;;  %v624_v45 = vor.u32 %v623_v37, %v619_v36  ;;  %v449_v46 = vshll.u32 %v6522_v32, 16  ;;  %v442_v49 = vrot.slane %v440_v41, 4  ;;  %v6551_v14 = vld [vmem:[%s6486_s6 + $0x18] sm:$0xf]  ;;  %v6274_v15 = vld [vmem:[%s9380_s3 + $0x40] sm:$0xff]  }
  0x1b   : > { %5802 = vmatprep.subr.bf16.mxu0 %v6271_v17  ;;  %6230 = vmatprep.subr.bf16.mxu1 %v6271_v17  ;;  %v428_v43 = vsel %vm6517_vm2, %v423_v34, %v427_v18  ;;  %v438_v48 = vsel %vm6517_vm2, %v433_v38, %v437_v29  ;;  %v445_v50 = vrot.slane %v443_v42, 5  ;;  %v453_v51 = vshrl.u32 %v6522_v32, 16  ;;  %v6559_v19 = vld [vmem:[%s6486_s6 + $0x1c] sm:$0xf]  ;;  %v6564_v25 = vld [vmem:[%s6486_s6 + $0x20] sm:$0x1] }
  0x1c   : > { %v5198_v53 = vcombine.low %v428_v43, %v438_v48  ;;  %v615_v54 = vrot.slane %v614_v44, 4  ;;  %v625_v55 = vrot.slane %v624_v45, 4  ;;  %v451_v56 = vrot.slane %v449_v46, 5  ;;  %v378_v34 = vld [vmem:[%s6486_s6 + $0x78] sm:$0xf] }
  0x1d   : > { %v446_v59 = vor.u32 %v445_v50, %v442_v49  ;;  %v455_v60 = vrot.slane %v453_v51, 4  ;;  %v459_v61 = vshll.u32 %v6528_v40, 16  ;;  %v632_v1 = vshrl.u32 %v375_v47, 16  ;;  %v6275_v41 = vld [vmem:[%s9380_s3 + $0x38] sm:$0xff]   ;;  %v380_v49 = vld [vmem:[%s6486_s6 + $0x80] sm:$0x1] }
  0x1e   : > { %5803 = vmatpush3.bf16.msra.mxu0 %v6271_v17  ;;  %6238 = vmatpush3.bf16.msra.mxu1 %v6271_v17  ;;  %v620_v63 = vsel %vm6517_vm2, %v615_v54, %v619_v36  ;;  %v630_v0 = vsel %vm6517_vm2, %v625_v55, %v629_v39  ;;  %v635_v2 = vshll.u32 %v375_v47, 16  ;;  %v641_v12 = vshll.u32 %v376_v52, 16  ;;  %v6573_v39 = vld [vmem:[%s6486_s6 + $0x7c] sm:$0xf] }
  0x1f   : > { %5804 = vmatprep.subr.bf16.mxu0 %v6272_v33  ;;  %6231 = vmatprep.subr.bf16.mxu1 %v6272_v33  ;;  %v5206_v3 = vcombine.low %v620_v63, %v630_v0  ;;  %v447_v7 = vrot.slane %v446_v59, 4  ;;  %v456_v8 = vor.u32 %v455_v60, %v451_v56  ;;  %v461_v9 = vrot.slane %v459_v61, 5  ;;  %v6276_v42 = vld [vmem:[%s9380_s3 + $0xb8] sm:$0xff]   ;;  %v6278_v59 = vld [vmem:[%s9380_s3 + $0xb0] sm:$0xff]   ;;  %v6600_v0 = vld [vmem:[%s6486_s6 + $0x28] sm:$0xf] }
  0x20   : > { %5810 = vmatprep.mubr.bf16.mxu0 %v5198_v53  ;;  %v634_v10 = vrot.slane %v632_v1, 4  ;;  %v637_v11 = vrot.slane %v635_v2, 5  ;;  %v645_v13 = vshrl.u32 %v376_v52, 16  ;;  %v651_v18 = vshll.u32 %v377_v57, 16  ;;  %v6277_v52 = vld [vmem:[%s9380_s3 + $0x30] sm:$0xff]  }
  0x21   : > { %v452_v16 = vsel %vm6517_vm2, %v447_v7, %v451_v56  ;;  %v457_v17 = vrot.slane %v456_v8, 4  ;;  %5826 = vmatprep.mubr.bf16.mxu1 %v5206_v3  ;;  %v643_v23 = vrot.slane %v641_v12, 5  ;;  %v464_v28 = vshrl.u32 %v6551_v14, 16  ;;  %v6591_v57 = vld [vmem:[%s6486_s6 + $0x24] sm:$0xf] }
  0x22   : > { %5805 = vmatpush3.bf16.msra.mxu0 %v6272_v33  ;;  %6239 = vmatpush3.bf16.msra.mxu1 %v6272_v33  ;;  %v638_v22 = vor.u32 %v637_v11, %v634_v10  ;;  %v647_v24 = vrot.slane %v645_v13, 4  ;;  %v653_v30 = vrot.slane %v651_v18, 5  ;;  %v467_v31 = vshll.u32 %v6551_v14, 16  ;;  %v6603_v8 = vld [vmem:[%s6486_s6 + $0x2c] sm:$0x1] }
  0x23   : > { %5806 = vmatprep.subr.bf16.mxu0 %v6273_v58  ;;  %6232 = vmatprep.subr.bf16.mxu1 %v6273_v58  ;;  %v462_v29 = vsel %vm6517_vm2, %v457_v17, %v461_v9  ;;  %v473_v33 = vshll.u32 %v6559_v19, 16  ;;  %v466_v38 = vrot.slane %v464_v28, 4  ;;  %v477_v45 = vshrl.u32 %v6559_v19, 16  ;;  %v6607_v13 = vld [vmem:[%s6486_s6 + $0x84] sm:$0xf] }
  0x24   : > { %v5199_v35 = vcombine.low %v452_v16, %v462_v29  ;;  %v639_v36 = vrot.slane %v638_v22, 4  ;;  %v648_v37 = vor.u32 %v647_v24, %v643_v23  ;;  %v469_v43 = vrot.slane %v467_v31, 5  ;;  %v6614_v22 = vld [vmem:[%s6486_s6 + $0x88] sm:$0xf]  ;;  %v6812_v20 = vld [vmem:[%s6486_s6 + $0xbc] sm:$0x1] }
  0x25   : > { %v475_v44 = vrot.slane %v473_v33, 5  ;;  %v483_v46 = vshll.u32 %v6564_v25, 16  ;;  %v656_v50 = vshrl.u32 %v378_v34, 16  ;;  %v659_v51 = vshll.u32 %v378_v34, 16  ;;  %9451 = vst [vmem:[#allocation4_spill] sm:$0xff] %v6812_v20 }
  0x26   : > { %5807 = vmatpush3.bf16.msra.mxu0 %v6273_v58  ;;  %6240 = vmatpush3.bf16.msra.mxu1 %v6273_v58  ;;  %v644_v47 = vsel %vm6517_vm2, %v639_v36, %v643_v23  ;;  %v649_v48 = vrot.slane %v648_v37, 4  ;;  %v470_v53 = vor.u32 %v469_v43, %v466_v38  ;;  %v479_v54 = vrot.slane %v477_v45, 4  ;;  %v6623_v36 = vld [vmem:[%s6486_s6 + $0x8c] sm:$0x1] }
  0x27   : > { %5808 = vmatprep.subr.bf16.mxu0 %v6274_v15  ;;  %6233 = vmatprep.subr.bf16.mxu1 %v6274_v15  ;;  %v485_v55 = vrot.slane %v483_v46, 5  ;;  %v665_v56 = vshll.u32 %v6573_v39, 16  ;;  %v658_v60 = vrot.slane %v656_v50, 4  ;;  %v661_v61 = vrot.slane %v659_v51, 5  ;;  %v6280_v37 = vld [vmem:[%s9380_s3 + $0xa8] sm:$0xff]  }
  0x28   : > { %v654_v58 = vsel %vm6517_vm2, %v649_v48, %v653_v30  ;;  %v669_v63 = vshrl.u32 %v6573_v39, 16  ;;  %v471_v2 = vrot.slane %v470_v53, 4  ;;  %v480_v3 = vor.u32 %v479_v54, %v475_v44  ;;  %v6279_v30 = vld [vmem:[%s9380_s3 + $0x28] sm:$0xff]   ;;  %v6638_v53 = vld [vmem:[%s6486_s6 + $0x30] sm:$0xf] }
  0x29   : > { %v5207_v1 = vcombine.low %v644_v47, %v654_v58  ;;  %v667_v7 = vrot.slane %v665_v56, 5  ;;  %v662_v9 = vor.u32 %v661_v61, %v658_v60  ;;  %v675_v11 = vshll.u32 %v380_v49, 16  ;;  %v6647_v60 = vld [vmem:[%s6486_s6 + $0x34] sm:$0xf] }
  0x2a   : > { %5809 = vmatpush3.bf16.msra.mxu0 %v6274_v15  ;;  %6241 = vmatpush3.bf16.msra.mxu1 %v6274_v15  ;;  %v671_v10 = vrot.slane %v669_v63, 4  ;;  %v488_v12 = vshrl.u32 %v6591_v57, 16  ;;  %v476_v15 = vsel %vm6517_vm2, %v471_v2, %v475_v44  ;;  %v481_v16 = vrot.slane %v480_v3, 4 }
  0x2b   : > { %5842 = vmatprep.subr.bf16.mxu1 %v6275_v41  ;;  %5890 = vmatprep.subr.bf16.mxu0 %v6276_v42  ;;  %v491_v17 = vshll.u32 %v6591_v57, 16  ;;  %v497_v18 = vshll.u32 %v6600_v0, 16  ;;  %v663_v23 = vrot.slane %v662_v9, 4  ;;  %v677_v28 = vrot.slane %v675_v11, 5 }
  0x2c   : > { %v672_v24 = vor.u32 %v671_v10, %v667_v7  ;;  %v490_v29 = vrot.slane %v488_v12, 4  ;;  %v486_v31 = vsel %vm6517_vm2, %v481_v16, %v485_v55  ;;  %v507_v43 = vshll.u32 %v6603_v8, 16  ;;  %v6655_v16 = vld [vmem:[%s6486_s6 + $0x38] sm:$0x1] }
  0x2d   : > { %5811 = vmatmul.mubr.bf16.vlgmr.msra.gmra.mxu0 %v5199_v35  ;;  %5827 = vmatmul.mubr.bf16.vlgmr.msra.gmra.mxu1 %v5207_v1  ;;  %v493_v33 = vrot.slane %v491_v17, 5  ;;  %v499_v34 = vrot.slane %v497_v18, 5  ;;  %v501_v35 = vshrl.u32 %v6600_v0, 16  ;;  %v5200_v38 = vcombine.low %v476_v15, %v486_v31  ;;  %v6659_v18 = vld [vmem:[%s6486_s6 + $0x90] sm:$0xf] }
  0x2e   : > { %5843 = vmatpush3.bf16.msra.mxu1 %v6275_v41  ;;  %5891 = vmatpush3.bf16.msra.mxu0 %v6276_v42  ;;  %v668_v41 = vsel %vm6517_vm2, %v663_v23, %v667_v7  ;;  %v673_v42 = vrot.slane %v672_v24, 4  ;;  %v680_v46 = vshrl.u32 %v6607_v13, 16  ;;  %v683_v47 = vshll.u32 %v6607_v13, 16  ;;  %v6665_v31 = vld [vmem:[%s6486_s6 + $0x94] sm:$0xf] }
  0x2f   : > { %5844 = vmatprep.subr.bf16.mxu1 %v6277_v52  ;;  %5892 = vmatprep.subr.bf16.mxu0 %v6278_v59  ;;  %v494_v44 = vor.u32 %v493_v33, %v490_v29  ;;  %v503_v45 = vrot.slane %v501_v35, 4  ;;  %v509_v49 = vrot.slane %v507_v43, 5  ;;  %v689_v50 = vshll.u32 %v6614_v22, 16 }
  0x30   : > { %v678_v48 = vsel %vm6517_vm2, %v673_v42, %v677_v28  ;;  %v693_v51 = vshrl.u32 %v6614_v22, 16  ;;  %5814 = vmatprep.mubr.bf16.mxu0 %v5200_v38  ;;  %v682_v58 = vrot.slane %v680_v46, 4  ;;  %v685_v61 = vrot.slane %v683_v47, 5  ;;  %v6284_v38 = vld [vmem:[%s9380_s3 + $0x98] sm:$0xff]   ;;  %v6285_v46 = vld [vmem:[%s9380_s3 + $0x10] sm:$0xff]  }
  0x31   : > { %v5208_v54 = vcombine.low %v668_v41, %v678_v48  ;;  %v495_v55 = vrot.slane %v494_v44, 4  ;;  %v504_v56 = vor.u32 %v503_v45, %v499_v34  ;;  %v691_v63 = vrot.slane %v689_v50, 5  ;;  %v6675_v44 = vld [vmem:[%s6486_s6 + $0x98] sm:$0x1] }
  0x32   : > { %5845 = vmatpush3.bf16.msra.mxu1 %v6277_v52  ;;  %5893 = vmatpush3.bf16.msra.mxu0 %v6278_v59  ;;  %v6281_v52 = vld [vmem:[%s9380_s3 + $0x20] sm:$0xff]   ;;  %v695_v1 = vrot.slane %v693_v51, 4  ;;  %v699_v2 = vshll.u32 %v6623_v36, 16  ;;  %v512_v9 = vshrl.u32 %v6638_v53, 16  ;;  %v515_v10 = vshll.u32 %v6638_v53, 16 }
  0x33   : > { %5846 = vmatprep.subr.bf16.mxu1 %v6279_v30  ;;  %v6282_v59 = vld [vmem:[%s9380_s3 + $0xa0] sm:$0xff]   ;;  %5894 = vmatprep.subr.bf16.mxu0 %v6280_v37  ;;  %v500_v3 = vsel %vm6517_vm2, %v495_v55, %v499_v34  ;;  %v505_v7 = vrot.slane %v504_v56, 4  ;;  %v686_v11 = vor.u32 %v685_v61, %v682_v58  ;;  %v521_v17 = vshll.u32 %v6647_v60, 16  ;;  %v6688_v51 = vld [vmem:[%s6486_s6 + $0x3c] sm:$0xf]  ;;  %v6286_v55 = vld [vmem:[%s9380_s3 + $0x90] sm:$0xff]  }
  0x34   : > { %5830 = vmatprep.mubr.bf16.mxu1 %v5208_v54  ;;  %v696_v12 = vor.u32 %v695_v1, %v691_v63  ;;  %v701_v15 = vrot.slane %v699_v2, 5  ;;  %v514_v24 = vrot.slane %v512_v9, 4  ;;  %v517_v28 = vrot.slane %v515_v10, 5  ;;  %v6691_v54 = vld [vmem:[%s6486_s6 + $0x40] sm:$0xf] }
  0x35   : > { %v510_v23 = vsel %vm6517_vm2, %v505_v7, %v509_v49  ;;  %v525_v29 = vshrl.u32 %v6647_v60, 16  ;;  %v687_v34 = vrot.slane %v686_v11, 4  ;;  %v531_v43 = vshll.u32 %v6655_v16, 16  ;;  %v6698_v7 = vld [vmem:[%s6486_s6 + $0x44] sm:$0x1] }
  0x36   : > { %5847 = vmatpush3.bf16.msra.mxu1 %v6279_v30  ;;  %5895 = vmatpush3.bf16.msra.mxu0 %v6280_v37  ;;  %v6283_v30 = vld [vmem:[%s9380_s3 + $0x18] sm:$0xff]   ;;  %v5201_v33 = vcombine.low %v500_v3, %v510_v23  ;;  %v697_v35 = vrot.slane %v696_v12, 4  ;;  %v523_v37 = vrot.slane %v521_v17, 5  ;;  %v518_v41 = vor.u32 %v517_v28, %v514_v24  ;;  %v6710_v28 = vld [vmem:[%s6486_s6 + $0xa0] sm:$0xf] }
  0x37   : > { %5848 = vmatprep.subr.bf16.mxu1 %v6281_v52  ;;  %5896 = vmatprep.subr.bf16.mxu0 %v6282_v59  ;;  %v527_v42 = vrot.slane %v525_v29, 4  ;;  %v704_v45 = vshrl.u32 %v6659_v18, 16  ;;  %v692_v47 = vsel %vm6517_vm2, %v687_v34, %v691_v63  ;;  %v707_v49 = vshll.u32 %v6659_v18, 16  ;;  %v6701_v9 = vld [vmem:[%s6486_s6 + $0x9c] sm:$0xf]  ;;  %v6287_v29 = vld [vmem:[%s9380_s3 + $0x8] sm:$0xff]  }
  0x38   : > { %5815 = vmatmul.mubr.bf16.gmra.mxu0 %v5201_v33  ;;  %v702_v48 = vsel %vm6517_vm2, %v697_v35, %v701_v15  ;;  %v713_v50 = vshll.u32 %v6665_v31, 16  ;;  %v519_v58 = vrot.slane %v518_v41, 4  ;;  %v533_v63 = vrot.slane %v531_v43, 5  ;;  %v6288_v41 = vld [vmem:[%s9380_s3 + $0x88] sm:$0xff]  }
  0x39   : > { %v5209_v56 = vcombine.low %v692_v47, %v702_v48  ;;  %v528_v61 = vor.u32 %v527_v42, %v523_v37  ;;  %v709_v1 = vrot.slane %v707_v49, 5  ;;  %v717_v3 = vshrl.u32 %v6665_v31, 16 }
  0x3a   : > { %5849 = vmatpush3.bf16.msra.mxu1 %v6281_v52  ;;  %5897 = vmatpush3.bf16.msra.mxu0 %v6282_v59  ;;  %v706_v52 = vrot.slane %v704_v45, 4  ;;  %v715_v2 = vrot.slane %v713_v50, 5  ;;  %v524_v10 = vsel %vm6517_vm2, %v519_v58, %v523_v37  ;;  %v723_v11 = vshll.u32 %v6675_v44, 16 }
  0x3b   : > { %5850 = vmatprep.subr.bf16.mxu1 %v6283_v30  ;;  %5898 = vmatprep.subr.bf16.mxu0 %v6284_v38  ;;  %v529_v59 = vrot.slane %v528_v61, 4  ;;  %v536_v12 = vshrl.u32 %v6688_v51, 16  ;;  %v719_v17 = vrot.slane %v717_v3, 4  ;;  %v539_v23 = vshll.u32 %v6688_v51, 16  ;;  %v6726_v61 = vld [vmem:[%s6486_s6 + $0xa4] sm:$0x1] }
  0x3c   : > { %5831 = vmatmul.mubr.bf16.gmra.mxu1 %v5209_v56  ;;  %v710_v15 = vor.u32 %v709_v1, %v706_v52  ;;  %v545_v24 = vshll.u32 %v6691_v54, 16  ;;  %v725_v34 = vrot.slane %v723_v11, 5  ;;  %v549_v37 = vshrl.u32 %v6691_v54, 16 }
  0x3d   : > { %v534_v33 = vsel %vm6517_vm2, %v529_v59, %v533_v63  ;;  %v538_v35 = vrot.slane %v536_v12, 4  ;;  %v720_v43 = vor.u32 %v719_v17, %v715_v2  ;;  %v541_v45 = vrot.slane %v539_v23, 5  ;;  %v6731_v59 = vld [vmem:[%s6486_s6 + $0x48] sm:$0xf]  ;;  %v6740_v17 = vld [vmem:[%s6486_s6 + $0x4c] sm:$0xf] }
  0x3e   : > { %5851 = vmatpush3.bf16.msra.mxu1 %v6283_v30  ;;  %5899 = vmatpush3.bf16.msra.mxu0 %v6284_v38  ;;  %v5202_v42 = vcombine.low %v524_v10, %v534_v33  ;;  %v711_v30 = vrot.slane %v710_v15, 4  ;;  %v547_v47 = vrot.slane %v545_v24, 5  ;;  %v551_v48 = vrot.slane %v549_v37, 4 }
  0x3f   : > { %5852 = vmatprep.subr.bf16.mxu1 %v6285_v46  ;;  %5900 = vmatprep.subr.bf16.mxu0 %v6286_v55  ;;  %v555_v49 = vshll.u32 %v6698_v7, 16  ;;  %v728_v50 = vshrl.u32 %v6701_v9, 16  ;;  %v721_v56 = vrot.slane %v720_v43, 4  ;;  %v542_v58 = vor.u32 %v541_v45, %v538_v35 }
  0x40   : > { %5818 = vmatprep.mubr.bf16.mxu0 %v5202_v42  ;;  %v716_v38 = vsel %vm6517_vm2, %v711_v30, %v715_v2  ;;  %v731_v63 = vshll.u32 %v6701_v9, 16  ;;  %v552_v52 = vor.u32 %v551_v48, %v547_v47  ;;  %v737_v10 = vshll.u32 %v6710_v28, 16  ;;  %v6289_v2 = vld [vmem:[%s9380_s3] sm:$0xff]   ;;  %v6749_v30 = vld [vmem:[%s6486_s6 + $0x50] sm:$0x1] }
  0x41   : > { %v557_v1 = vrot.slane %v555_v49, 5  ;;  %v730_v3 = vrot.slane %v728_v50, 4  ;;  %v726_v11 = vsel %vm6517_vm2, %v721_v56, %v725_v34  ;;  %v543_v12 = vrot.slane %v542_v58, 4 }
  0x42   : > { %5853 = vmatpush3.bf16.msra.mxu1 %v6285_v46  ;;  %5901 = vmatpush3.bf16.msra.mxu0 %v6286_v55  ;;  %v733_v15 = vrot.slane %v731_v63, 5  ;;  %v741_v46 = vshrl.u32 %v6710_v28, 16  ;;  %v6290_v55 = vld [vmem:[%s9380_s3 + $0x80] sm:$0xff]   ;;  %v5210_v23 = vcombine.low %v716_v38, %v726_v11  ;;  %v553_v24 = vrot.slane %v552_v52, 4  ;;  %v6757_v38 = vld [vmem:[%s6486_s6 + $0xa8] sm:$0xf] }
  0x43   : > { %5854 = vmatprep.subr.bf16.mxu1 %v6287_v29  ;;  %5902 = vmatprep.subr.bf16.mxu0 %v6288_v41  ;;  %v739_v33 = vrot.slane %v737_v10, 5  ;;  %v747_v35 = vshll.u32 %v6726_v61, 16  ;;  %v548_v34 = vsel %vm6517_vm2, %v543_v12, %v547_v47  ;;  %v560_v43 = vshrl.u32 %v6731_v59, 16  ;;  %v6762_v47 = vld [vmem:[%s9380_s3 + $0xf8] sm:$0xff]   ;;  %v6765_v52 = vld [vmem:[%s6486_s6 + $0xac] sm:$0xf] }
  0x44   : > { %v734_v37 = vor.u32 %v733_v15, %v730_v3  ;;  %v743_v42 = vrot.slane %v741_v46, 4  ;;  %5834 = vmatprep.mubr.bf16.mxu1 %v5210_v23  ;;  %v558_v45 = vsel %vm6517_vm2, %v553_v24, %v557_v1  ;;  %v563_v49 = vshll.u32 %v6731_v59, 16  ;;  %v6770_v1 = vld [vmem:[%s9380_s3 + $0x138] sm:$0xff]   ;;  %v6775_v12 = vld [vmem:[%s6486_s6 + $0xb0] sm:$0x1] }
  0x45   : > { %v749_v48 = vrot.slane %v747_v35, 5  ;;  %v569_v50 = vshll.u32 %v6740_v17, 16  ;;  %v562_v63 = vrot.slane %v560_v43, 4  ;;  %v573_v10 = vshrl.u32 %v6740_v17, 16  ;;  %9450 = vst [vmem:[#allocation3_spill] sm:$0xff] %v6775_v12 }
  0x46   : > { %5855 = vmatpush3.bf16.msra.mxu1 %v6287_v29  ;;  %5903 = vmatpush3.bf16.msra.mxu0 %v6288_v41  ;;  %v5203_v29 = vcombine.low %v548_v34, %v558_v45  ;;  %v735_v56 = vrot.slane %v734_v37, 4  ;;  %v744_v58 = vor.u32 %v743_v42, %v739_v33  ;;  %v565_v41 = vrot.slane %v563_v49, 5  ;;  %v6778_v15 = vld [vmem:[%s6486_s6 + $0x54] sm:$0xf]  ;;  %v6785_v34 = vld [vmem:[%s6486_s6 + $0x58] sm:$0xf] }
  0x47   : > { %5856 = vmatprep.subr.bf16.mxu1 %v6289_v2  ;;  %5904 = vmatprep.subr.bf16.mxu0 %v6290_v55  ;;  %v571_v3 = vrot.slane %v569_v50, 5  ;;  %v579_v11 = vshll.u32 %v6749_v30, 16  ;;  %v752_v24 = vshrl.u32 %v6757_v38, 16  ;;  %v755_v35 = vshll.u32 %v6757_v38, 16 }
  0x48   : > { %5819 = vmatmul.mubr.bf16.gmra.mxu0 %v5203_v29  ;;  %v740_v46 = vsel %vm6517_vm2, %v735_v56, %v739_v33  ;;  %v745_v23 = vrot.slane %v744_v58, 4  ;;  %v566_v37 = vor.u32 %v565_v41, %v562_v63  ;;  %v575_v42 = vrot.slane %v573_v10, 4 }
  0x49   : > { %v581_v43 = vrot.slane %v579_v11, 5  ;;  %v761_v45 = vshll.u32 %v6765_v52, 16  ;;  %v754_v49 = vrot.slane %v752_v24, 4  ;;  %v757_v50 = vrot.slane %v755_v35, 5 }
  0x4a   : > { %5857 = vmatpush3.bf16.msra.mxu1 %v6289_v2  ;;  %5905 = vmatpush3.bf16.msra.mxu0 %v6290_v55  ;;  %v750_v33 = vsel %vm6517_vm2, %v745_v23, %v749_v48  ;;  %v765_v29 = vshrl.u32 %v6765_v52, 16  ;;  %v567_v56 = vrot.slane %v566_v37, 4  ;;  %v576_v58 = vor.u32 %v575_v42, %v571_v3  ;;  %v6794_v55 = vld [vmem:[%s6486_s6 + $0x5c] sm:$0x1]  ;;  %v6799_v48 = vld [vmem:[%s6486_s6 + $0xb4] sm:$0xf] }
  0x4b   : > { %5938 = vmatprep.subr.bf16.mxu1 %v6762_v47  ;;  %5986 = vmatprep.subr.bf16.mxu0 %v6770_v1  ;;  %v5211_v2 = vcombine.low %v740_v46, %v750_v33  ;;  %v763_v63 = vrot.slane %v761_v45, 5  ;;  %v758_v41 = vor.u32 %v757_v50, %v754_v49  ;;  %v771_v11 = vshll.u32 %v6775_v12, 16  ;;  %v6806_v37 = vld [vmem:[%s6486_s6 + $0xb8] sm:$0xf] }
  0x4c   : > { %v767_v10 = vrot.slane %v765_v29, 4  ;;  %v584_v21 = vshrl.u32 %v6778_v15, 16  ;;  %v572_v23 = vsel %vm6517_vm2, %v567_v56, %v571_v3  ;;  %v577_v24 = vrot.slane %v576_v58, 4 }
  0x4d   : > { %5835 = vmatmul.mubr.bf16.gmra.mxu1 %v5211_v2  ;;  %v587_v46 = vshll.u32 %v6778_v15, 16  ;;  %v593_v35 = vshll.u32 %v6785_v34, 16  ;;  %v759_v42 = vrot.slane %v758_v41, 4  ;;  %v773_v33 = vrot.slane %v771_v11, 5 }
  0x4e   : > { %v768_v45 = vor.u32 %v767_v10, %v763_v63  ;;  %v586_v49 = vrot.slane %v584_v21, 4  ;;  %v582_v50 = vsel %vm6517_vm2, %v577_v24, %v581_v43  ;;  %v597_v2 = vshrl.u32 %v6785_v34, 16 }
  0x4f   : > { %v589_v29 = vrot.slane %v587_v46, 5  ;;  %v595_v62 = vrot.slane %v593_v35, 5  ;;  %v5204_v3 = vcombine.low %v572_v23, %v582_v50  ;;  %v764_v56 = vsel %vm6517_vm2, %v759_v42, %v763_v63 }
  0x50   : > { %v769_v58 = vrot.slane %v768_v45, 4  ;;  %v603_v12 = vshll.u32 %v6794_v55, 16  ;;  %v599_v10 = vrot.slane %v597_v2, 4  ;;  %v776_v21 = vshrl.u32 %v6799_v48, 16 }
  0x51   : > { %v590_v41 = vor.u32 %v589_v29, %v586_v49  ;;  %v779_v11 = vshll.u32 %v6799_v48, 16  ;;  %5822 = vmatprep.mubr.bf16.mxu0 %v5204_v3  ;;  %v785_v46 = vshll.u32 %v6806_v37, 16  ;;  %v789_v23 = vshrl.u32 %v6806_v37, 16 }
  0x52   : > { %v774_v43 = vsel %vm6517_vm2, %v769_v58, %v773_v33  ;;  %v605_v24 = vrot.slane %v603_v12, 5  ;;  %v600_v42 = vor.u32 %v599_v10, %v595_v62  ;;  %v778_v45 = vrot.slane %v776_v21, 4 }
  0x53   : > { %v5212_v35 = vcombine.low %v764_v56, %v774_v43  ;;  %v591_v63 = vrot.slane %v590_v41, 4  ;;  %v781_v50 = vrot.slane %v779_v11, 5  ;;  %v787_v49 = vrot.slane %v785_v46, 5 }
  0x54   : > { %v791_v29 = vrot.slane %v789_v23, 4  ;;  %v795_v2 = vshll.u32 %v6812_v20, 16  ;;  %v9452_v3 = vmov 0  ;;  %v601_v33 = vrot.slane %v600_v42, 4 }
  0x55   : > { %v9453_v3 = vsel %vm6826_vm5, 4294967295, %v9452_v3  ;;  %5838 = vmatprep.mubr.bf16.mxu1 %v5212_v35  ;;  %v596_v12 = vsel %vm6517_vm2, %v591_v63, %v595_v62  ;;  %v5246_v56 = vrot.slane %v6492_v4, 9  ;;  %v1415_v58 = vrot.slane %v6495_v5, 5 }
  0x56   : > { %9454 = vst [vmem:[#allocation5_spill] sm:$0xff] %v9453_v3  ;;  %v782_v41 = vor.u32 %v781_v50, %v778_v45  ;;  %v792_v10 = vor.u32 %v791_v29, %v787_v49  ;;  %v797_v21 = vrot.slane %v795_v2, 5  ;;  %v5247_v11 = vrot.slane %v6513_v26, 9 }
  0x57   : > { %v606_v43 = vsel %vm6517_vm2, %v601_v33, %v605_v24  ;;  %v1416_v46 = vsel %vm6826_vm5, %v5246_v56, %v1415_v58  ;;  %v1417_v23 = vrot.slane %v1415_v58, 4  ;;  %v1422_v35 = vrot.slane %v6522_v32, 5 }
  0x58   : > { %v5205_v62 = vcombine.low %v596_v12, %v606_v43  ;;  %v783_v63 = vrot.slane %v782_v41, 4  ;;  %v793_v42 = vrot.slane %v792_v10, 4  ;;  %v5222_v20 = vcombine.low %v6492_v4, %v6495_v5 }
  0x59   : > { %v9455_v45 = vrot.slane %v6498_v6, 5  ;;  %v1424_v29 = vrot.slane %v1422_v35, 4  ;;  %v5248_v24 = vrot.slane %v6551_v14, 9  ;;  %v1429_v56 = vrot.slane %v6559_v19, 5 }
  0x5a   : > { %5823 = vmatmul.mubr.bf16.gmra.mxu0 %v5205_v62  ;;  %v788_v2 = vsel %vm6517_vm2, %v783_v63, %v787_v49  ;;  %v798_v12 = vsel %vm6517_vm2, %v793_v42, %v797_v21  ;;  %v1423_v4 = vsel %vm6826_vm5, %v5247_v11, %v1422_v35  ;;  %v9456_v5 = vrot.slane %v6528_v40, 5  ;;  %v6298_v42 = vld [vmem:[%s9380_s3 + $0x130] sm:$0xff]  }
  0x5b   : > { %v1419_v50 = vsel %vm6826_vm5, %v1417_v23, %v9455_v45  ;;  %v5213_v58 = vcombine.low %v788_v2, %v798_v12  ;;  %v1432_v41 = vrot.slane %v6564_v25, 5  ;;  %v1430_v49 = vsel %vm6826_vm5, %v5248_v24, %v1429_v56 }
  0x5c   : > { %v5278_v33 = vcombine.low %v1416_v46, %v1419_v50  ;;  %v1426_v6 = vsel %vm6826_vm5, %v1424_v29, %v9456_v5  ;;  %v1431_v10 = vrot.slane %v1429_v56, 4  ;;  %v5249_v21 = vrot.slane %v6591_v57, 9 }
  0x5d   : > { %5839 = vmatmul.mubr.bf16.gmra.mxu1 %v5213_v58  ;;  %v1436_v43 = vrot.slane %v6600_v0, 5  ;;  %v1439_v46 = vrot.slane %v6603_v8, 5  ;;  %v5279_v11 = vcombine.low %v1423_v4, %v1426_v6  ;;  %v5250_v23 = vrot.slane %v6638_v53, 9 }
  0x5e   : > { %5906 = vmatprep.mubr.bf16.mxu0 %v5278_v33  ;;  %5858 = vmatprep.mubr.bf16.mxu1 %v5222_v20  ;;  %v1433_v40 = vsel %vm6826_vm5, %v1431_v10, %v1432_v41  ;;  %v1443_v25 = vrot.slane %v6647_v60, 5  ;;  %v1446_v63 = vrot.slane %v6655_v16, 5  ;;  %v1450_v8 = vrot.slane %v6691_v54, 5  ;;  %v6920_v10 = vld [vmem:[%s6486_s6 + $0x64] sm:$0xf] }
  0x5f   : > { %v5280_v35 = vcombine.low %v1430_v49, %v1433_v40  ;;  %v1438_v62 = vrot.slane %v1436_v43, 4  ;;  %v5224_v20 = vcombine.low %v6551_v14, %v6559_v19  ;;  %v1437_v50 = vsel %vm6826_vm5, %v5249_v21, %v1436_v43  ;;  %v6297_v14 = vld [vmem:[%s9380_s3 + $0xf0] sm:$0xff]  }
  0x60   : > { %v1445_v45 = vrot.slane %v1443_v25, 4  ;;  %v5251_v29 = vrot.slane %v6688_v51, 9  ;;  %v1457_v24 = vrot.slane %v6740_v17, 5  ;;  %v1444_v2 = vsel %vm6826_vm5, %v5250_v23, %v1443_v25 }
  0x61   : > { %v1440_v16 = vsel %vm6826_vm5, %v1438_v62, %v1439_v46  ;;  %v1453_v12 = vrot.slane %v6698_v7, 5  ;;  %v5252_v33 = vrot.slane %v6731_v59, 9  ;;  %v1452_v56 = vrot.slane %v1450_v8, 4  ;;  %v6302_v7 = vld [vmem:[%s9380_s3 + $0x128] sm:$0xff]   ;;  %v6306_v62 = vld [vmem:[%s9380_s3 + $0x120] sm:$0xff]  }
  0x62   : > { %5907 = vmatmul.mubr.bf16.vlgmr.msra.gmra.mxu0 %v5279_v11  ;;  %v1447_v19 = vsel %vm6826_vm5, %v1445_v45, %v1446_v63  ;;  %v1459_v58 = vrot.slane %v1457_v24, 4  ;;  %v1460_v4 = vrot.slane %v6749_v30, 5  ;;  %v9457_v5 = vcombine.low %v6513_v26, %v6522_v32  ;;  %v6301_v26 = vld [vmem:[%s9380_s3 + $0xe8] sm:$0xff]   ;;  %v6305_v45 = vld [vmem:[%s9380_s3 + $0xe0] sm:$0xff]  }
  0x63   : > { %5987 = vmatpush3.bf16.msra.mxu0 %v6770_v1  ;;  %5910 = vmatprep.mubr.bf16.mxu0 %v5280_v35  ;;  %v1464_v1 = vrot.slane %v6785_v34, 5  ;;  %v5281_v6 = vcombine.low %v1437_v50, %v1440_v16  ;;  %v5282_v41 = vcombine.low %v1444_v2, %v1447_v19  ;;  %v6902_v30 = vsel %vm6826_vm5, %v5251_v29, %v1450_v8  ;;  %v6389_v63 = vld [vmem:[%s6486_s6 + $0x68] sm:$0x1]  ;;  %v6962_v2 = vld [vmem:[%s6486_s6 + $0x6c] sm:$0xf]  ;;  %v6310_v19 = vld [vmem:[%s9380_s3 + $0x118] sm:$0xff]  }
  0x64   : > { %5988 = vmatprep.subr.bf16.mxu0 %v6298_v42  ;;  %v6906_v49 = vsel %vm6826_vm5, %v1452_v56, %v1453_v12  ;;  %v6913_v32 = vsel %vm6826_vm5, %v5252_v33, %v1457_v24  ;;  %v1471_v21 = vrot.slane %v6920_v10, 5  ;;  %v5225_v43 = vcombine.low %v6591_v57, %v6600_v0  ;;  %v6937_v57 = vld [vmem:[%s6486_s6 + $0x60] sm:$0xf]  ;;  %v6966_v33 = vld [vmem:[%s6486_s6 + $0x70] sm:$0xf] }
  0x65   : > { %5859 = vmatmul.mubr.bf16.vlgmr.msra.gmra.mxu1 %v9457_v5  ;;  %v5253_v46 = vrot.slane %v6778_v15, 9  ;;  %v1466_v11 = vrot.slane %v1464_v1, 4  ;;  %v1467_v40 = vrot.slane %v6794_v55, 5  ;;  %v5226_v23 = vcombine.low %v6638_v53, %v6647_v60 }
  0x66   : > { %5939 = vmatpush3.bf16.msra.mxu1 %v6762_v47  ;;  %5862 = vmatprep.mubr.bf16.mxu1 %v5224_v20  ;;  %v6917_v47 = vsel %vm6826_vm5, %v1459_v58, %v1460_v4  ;;  %v5227_v25 = vcombine.low %v6688_v51, %v6691_v54  ;;  %v5228_v35 = vcombine.low %v6731_v59, %v6740_v17  ;;  %v5254_v0 = vrot.slane %v6937_v57, 9  ;;  %v7080_v59 = vld [vmem:[%s6486_s6 + $0x78] sm:$0xf]  ;;  %v7194_v4 = vld [vmem:[%s7039_s22 + $0x2c] sm:$0x1] }
  0x67   : > { %5940 = vmatprep.subr.bf16.mxu1 %v6297_v14  ;;  %5989 = vmatpush3.bf16.msra.mxu0 %v6298_v42  ;;  %v1474_v42 = vrot.slane %v6389_v63, 5  ;;  %v5283_v53 = vcombine.low %v6902_v30, %v6906_v49  ;;  %v5284_v60 = vcombine.low %v6913_v32, %v6917_v47  ;;  %v1473_v8 = vrot.slane %v1471_v21, 4  ;;  %v6309_v30 = vld [vmem:[%s9380_s3 + $0xd8] sm:$0xff]   ;;  %9465 = vst [vmem:[#allocation9_spill] sm:$0xff] %v7194_v4 }
  0x68   : > { %5990 = vmatprep.subr.bf16.mxu0 %v6302_v7  ;;  %v5257_v20 = vrot.slane %v6607_v13, 9  ;;  %v1492_v50 = vrot.slane %v6614_v22, 5  ;;  %v1495_v29 = vrot.slane %v6623_v36, 5  ;;  %v6955_v24 = vsel %vm6826_vm5, %v5253_v46, %v1464_v1  ;;  %v6314_v46 = vld [vmem:[%s9380_s3 + $0x110] sm:$0xff]  }
  0x69   : > { %v6959_v16 = vsel %vm6826_vm5, %v1466_v11, %v1467_v40  ;;  %v5255_v12 = vrot.slane %v6962_v2, 9  ;;  %v6971_v36 = vsel %vm6826_vm5, %v5254_v0, %v1471_v21  ;;  %v5258_v1 = vrot.slane %v6659_v18, 9  ;;  %v7171_v40 = vld [vmem:[%s7039_s22 + $0x24] sm:$0xf] }
  0x6a   : > { %5911 = vmatmul.mubr.bf16.gmra.mxu0 %v5281_v6  ;;  %5941 = vmatpush3.bf16.msra.mxu1 %v6297_v14  ;;  %v1478_v14 = vrot.slane %v6966_v33, 5  ;;  %v6978_v56 = vsel %vm6826_vm5, %v5257_v20, %v1492_v50  ;;  %v1494_v58 = vrot.slane %v1492_v50, 4  ;;  %v1499_v5 = vrot.slane %v6665_v31, 5  ;;  %v6313_v20 = vld [vmem:[%s9380_s3 + $0xd0] sm:$0xff]   ;;  %9462 = vst [vmem:[#allocation6_spill] sm:$0xff] %v7171_v40 }
  0x6b   : > { %5914 = vmatprep.mubr.bf16.mxu0 %v5282_v41  ;;  %5942 = vmatprep.subr.bf16.mxu1 %v6301_v26  ;;  %v1502_v6 = vrot.slane %v6675_v44, 5  ;;  %v6988_v41 = vsel %vm6826_vm5, %v1473_v8, %v1474_v42  ;;  %v5259_v32 = vrot.slane %v6701_v9, 9  ;;  %v1509_v11 = vrot.slane %v6726_v61, 5  ;;  %v9458_v61 = vld [vmem:[#allocation3_spill] sm:$0xff] }
  0x6c   : > { %5991 = vmatpush3.bf16.msra.mxu0 %v6302_v7  ;;  %v1485_v7 = vrot.slane %v6573_v39, 5  ;;  %v6995_v49 = vsel %vm6826_vm5, %v1494_v58, %v1495_v29  ;;  %v7004_v47 = vsel %vm6826_vm5, %v5258_v1, %v1499_v5  ;;  %v1501_v21 = vrot.slane %v1499_v5, 4  ;;  %v9459_v5 = vld [vmem:[#allocation4_spill] sm:$0xff] }
  0x6d   : > { %5863 = vmatmul.mubr.bf16.gmra.mxu1 %v5225_v43  ;;  %5992 = vmatprep.subr.bf16.mxu0 %v6306_v62  ;;  %v5289_v44 = vcombine.low %v6978_v56, %v6995_v49  ;;  %v1506_v43 = vrot.slane %v6710_v28, 5  ;;  %v1516_v8 = vrot.slane %v9458_v61, 5  ;;  %v5261_v58 = vrot.slane %v6799_v48, 9  ;;  %v7168_v29 = vld [vmem:[%s7039_s22 + $0x14] sm:$0x1] }
  0x6e   : > { %5866 = vmatprep.mubr.bf16.mxu1 %v5226_v23  ;;  %5943 = vmatpush3.bf16.msra.mxu1 %v6301_v26  ;;  %v5260_v23 = vrot.slane %v6757_v38, 9  ;;  %v7017_v0 = vsel %vm6826_vm5, %v1501_v21, %v1502_v6  ;;  %v1520_v1 = vrot.slane %v6806_v37, 5  ;;  %v1523_v6 = vrot.slane %v9459_v5, 5 }
  0x6f   : > { %5944 = vmatprep.subr.bf16.mxu1 %v6305_v45  ;;  %v7021_v63 = vsel %vm6826_vm5, %v5259_v32, %v1506_v43  ;;  %v1508_v42 = vrot.slane %v1506_v43, 4  ;;  %v5285_v32 = vcombine.low %v6955_v24, %v6959_v16  ;;  %v1480_v51 = vrot.slane %v1478_v14, 4  ;;  %v7075_v16 = vld [vmem:[%s7039_s22] sm:$0xf] }
  0x70   : > { %5993 = vmatpush3.bf16.msra.mxu0 %v6306_v62  ;;  %v1513_v62 = vrot.slane %v6765_v52, 5  ;;  %v1522_v24 = vrot.slane %v1520_v1, 4  ;;  %v5256_v17 = vrot.slane %v7080_v59, 9  ;;  %v1487_v61 = vrot.slane %v1485_v7, 4 }
  0x71   : > { %5994 = vmatprep.subr.bf16.mxu0 %v6310_v19 }
  0x72   : > { %5915 = vmatmul.mubr.bf16.gmra.mxu0 %v5283_v53  ;;  %5945 = vmatpush3.bf16.msra.mxu1 %v6305_v45  ;;  %v7031_v45 = vsel %vm6826_vm5, %v5260_v23, %v1513_v62  ;;  %v1515_v50 = vrot.slane %v1513_v62, 4  ;;  %v5286_v62 = vcombine.low %v6971_v36, %v6988_v41  ;;  %v7096_v36 = vsel %vm6826_vm5, %v1522_v24, %v1523_v6  ;;  %v6321_v6 = vld [vmem:[%s9380_s3 + $0xc0] sm:$0xff]   ;;  %v7143_v24 = vld [vmem:[%s7039_s22 + $0x18] sm:$0xf] }
  0x73   : > { %5918 = vmatprep.mubr.bf16.mxu0 %v5284_v60  ;;  %5946 = vmatprep.subr.bf16.mxu1 %v6309_v30  ;;  %v7043_v60 = vsel %vm6826_vm5, %v1508_v42, %v1509_v11  ;;  %v6318_v11 = vld [vmem:[%s9380_s3 + $0x108] sm:$0xff]   ;;  %v5229_v42 = vcombine.low %v6778_v15, %v6785_v34  ;;  %v5230_v41 = vcombine.low %v6937_v57, %v6920_v10  ;;  %v6322_v15 = vld [vmem:[%s9380_s3 + $0x100] sm:$0xff]   ;;  %v2250_v34 = vshrl.u32 %v7075_v16, 16 }
  0x74   : > { %5995 = vmatpush3.bf16.msra.mxu0 %v6310_v19  ;;  %v6392_v19 = vld [vmem:[%s6486_s6 + $0x74] sm:$0x1]  ;;  %v7061_v23 = vsel %vm6826_vm5, %v1515_v50, %v1516_v8  ;;  %v6394_v8 = vld [vmem:[%s6486_s6 + $0x80] sm:$0x1]  ;;  %v1479_v10 = vsel %vm6826_vm5, %v5255_v12, %v1478_v14  ;;  %v1486_v12 = vsel %vm6826_vm5, %v5256_v17, %v1485_v7  ;;  %v7140_v7 = vld [vmem:[%s9380_s3 + $0x178] sm:$0xff]   ;;  %9460 = vst [vmem:[#allocation3_spill] sm:$0xff] %v7143_v24 }
  0x75   : > { %5867 = vmatmul.mubr.bf16.gmra.mxu1 %v5227_v25  ;;  %v1481_v21 = vrot.slane %v6392_v19, 5  ;;  %5996 = vmatprep.subr.bf16.mxu0 %v6314_v46  ;;  %v7072_v25 = vsel %vm6826_vm5, %v5261_v58, %v1520_v1  ;;  %v1488_v50 = vrot.slane %v6394_v8, 5  ;;  %v7135_v19 = vld [vmem:[%s9380_s3 + $0x1b8] sm:$0xff]  }
  0x76   : > { %5870 = vmatprep.mubr.bf16.mxu1 %v5228_v35  ;;  %5947 = vmatpush3.bf16.msra.mxu1 %v6309_v30  ;;  %v6317_v35 = vld [vmem:[%s9380_s3 + $0xc8] sm:$0xff]   ;;  %v7087_v30 = vld [vmem:[%s7039_s22 + $0x4] sm:$0xf] }
  0x77   : > { %5948 = vmatprep.subr.bf16.mxu1 %v6313_v20  ;;  %v1482_v57 = vsel %vm6826_vm5, %v1480_v51, %v1481_v21  ;;  %v2263_v1 = vshrl.u32 %v7087_v30, 16  ;;  %v2259_v5 = vshll.u32 %v7087_v30, 16  ;;  %v1489_v14 = vsel %vm6826_vm5, %v1487_v61, %v1488_v50 }
  0x78   : > { %5997 = vmatpush3.bf16.msra.mxu0 %v6314_v46  ;;  %v2253_v46 = vshll.u32 %v7075_v16, 16  ;;  %v5287_v21 = vcombine.low %v1479_v10, %v1482_v57  ;;  %v2252_v51 = vrot.slane %v2250_v34, 4  ;;  %v5288_v50 = vcombine.low %v1486_v12, %v1489_v14  ;;  %v6395_v12 = vld [vmem:[%s6486_s6 + $0x7c] sm:$0xf] }
  0x79   : > { %5998 = vmatprep.subr.bf16.mxu0 %v6318_v11  ;;  %v7151_v17 = vrot.slane %v2259_v5, 5 }
  0x7a   : > { %5919 = vmatmul.mubr.bf16.gmra.mxu0 %v5285_v32  ;;  %5949 = vmatpush3.bf16.msra.mxu1 %v6313_v20  ;;  %v7121_v32 = vld [vmem:[%s7039_s22 + $0xc] sm:$0xf]  ;;  %v7130_v20 = vld [vmem:[%s7039_s22 + $0x10] sm:$0xf]  ;;  %v2255_v39 = vrot.slane %v2253_v46, 5 }
  0x7b   : > { %5922 = vmatprep.mubr.bf16.mxu0 %v5286_v62  ;;  %5950 = vmatprep.subr.bf16.mxu1 %v6317_v35  ;;  %v7149_v62 = vld [vmem:[%s7039_s22 + $0x8] sm:$0x1]  ;;  %v2274_v61 = vshrl.u32 %v7121_v32, 16  ;;  %v2277_v8 = vshll.u32 %v7121_v32, 16  ;;  %v2287_v34 = vshrl.u32 %v7130_v20, 16  ;;  %v2283_v46 = vshll.u32 %v7130_v20, 16 }
  0x7c   : > { %5999 = vmatpush3.bf16.msra.mxu0 %v6318_v11  ;;  %v7146_v11 = vld [vmem:[%s7039_s22 + $0x1c] sm:$0xf]  ;;  %v2269_v5 = vshll.u32 %v7149_v62, 16  ;;  %v2256_v14 = vor.u32 %v2255_v39, %v2252_v51  ;;  %v9489_v3 = vcombine.low %v7121_v32, %v7130_v20 }
  0x7d   : > { %5871 = vmatmul.mubr.bf16.gmra.mxu1 %v5229_v42  ;;  %6000 = vmatprep.subr.bf16.mxu0 %v6322_v15  ;;  %9461 = vst [vmem:[#allocation4_spill] sm:$0xff] %v7146_v11  ;;  %v2265_v42 = vrot.slane %v2263_v1, 4  ;;  %v2311_v10 = vshrl.u32 %v7146_v11, 16  ;;  %v2307_v57 = vshll.u32 %v7146_v11, 16  ;;  %v5231_v1 = vcombine.low %v6962_v2, %v6966_v33 }
  0x7e   : > { %5874 = vmatprep.mubr.bf16.mxu1 %v5230_v41  ;;  %5951 = vmatpush3.bf16.msra.mxu1 %v6317_v35  ;;  %v2298_v35 = vshrl.u32 %v7143_v24, 16  ;;  %v2301_v41 = vshll.u32 %v7143_v24, 16  ;;  %v2276_v58 = vrot.slane %v2274_v61, 4  ;;  %v2279_v33 = vrot.slane %v2277_v8, 5 }
  0x7f   : > { %5952 = vmatprep.subr.bf16.mxu1 %v6321_v6  ;;  %v2266_v2 = vor.u32 %v2265_v42, %v7151_v17  ;;  %v7174_v26 = vrot.slane %v2283_v46, 5  ;;  %v2289_v54 = vrot.slane %v2287_v34, 4  ;;  %v7180_v51 = vrot.slane %v2307_v57, 5 }
  0x80   : > { %6001 = vmatpush3.bf16.msra.mxu0 %v6322_v15  ;;  %v5232_v15 = vcombine.low %v7080_v59, %v6395_v12  ;;  %v2300_v59 = vrot.slane %v2298_v35, 4  ;;  %v2313_v39 = vrot.slane %v2311_v10, 4  ;;  %v2271_v61 = vrot.slane %v2269_v5, 5  ;;  %v7184_v12 = vld [vmem:[%s7039_s22 + $0x20] sm:$0x1] }
  0x81   : > { %6082 = vmatprep.subr.bf16.mxu0 %v7135_v19  ;;  %9464 = vst [vmem:[#allocation8_spill] sm:$0xff] %v7184_v12  ;;  %v2322_v42 = vshrl.u32 %v7171_v40, 16  ;;  %v2325_v8 = vshll.u32 %v7171_v40, 16  ;;  %v2257_v35 = vrot.slane %v2256_v14, 4  ;;  %v2280_v10 = vor.u32 %v2279_v33, %v2276_v58 }
  0x82   : > { %5923 = vmatmul.mubr.bf16.gmra.mxu0 %v5287_v21  ;;  %5953 = vmatpush3.bf16.msra.mxu1 %v6321_v6  ;;  %v7178_v21 = vld [vmem:[%s7039_s22 + $0x28] sm:$0xf]  ;;  %v2303_v6 = vrot.slane %v2301_v41, 5  ;;  %v2267_v41 = vrot.slane %v2266_v2, 4  ;;  %v2290_v57 = vor.u32 %v2289_v54, %v7174_v26  ;;  %v2314_v5 = vor.u32 %v2313_v39, %v7180_v51  ;;  %v7202_v2 = vld [vmem:[%s7039_s22 + $0x30] sm:$0xf] }
  0x83   : > { %5926 = vmatprep.mubr.bf16.mxu0 %v5288_v50  ;;  %6034 = vmatprep.subr.bf16.mxu1 %v7140_v7  ;;  %9463 = vst [vmem:[#allocation7_spill] sm:$0xff] %v7178_v21  ;;  %v2293_v50 = vshll.u32 %v7168_v29, 16  ;;  %v2335_v34 = vshrl.u32 %v7178_v21, 16  ;;  %v2331_v46 = vshll.u32 %v7178_v21, 16  ;;  %v2317_v43 = vshll.u32 %v7184_v12, 16  ;;  %9466 = vst [vmem:[#allocation10_spill] sm:$0xff] %v7202_v2 }
  0x84   : > { %v2324_v55 = vrot.slane %v2322_v42, 4  ;;  %v9467_v54 = vcombine.low %v7004_v47, %v7017_v0  ;;  %v2262_v33 = vsel %vm6517_vm2, %v2257_v35, %v7151_v17  ;;  %v2281_v56 = vrot.slane %v2280_v10, 4 }
  0x85   : > { %5875 = vmatmul.mubr.bf16.gmra.mxu1 %v5231_v1  ;;  %v2304_v1 = vor.u32 %v2303_v6, %v2300_v59  ;;  %v2295_v53 = vrot.slane %v2293_v50, 5  ;;  %v7199_v14 = vrot.slane %v2331_v46, 5  ;;  %v2337_v58 = vrot.slane %v2335_v34, 4 }
  0x86   : > { %5878 = vmatprep.mubr.bf16.mxu1 %v5232_v15  ;;  %v2327_v15 = vrot.slane %v2325_v8, 5  ;;  %v2272_v59 = vsel %vm6517_vm2, %v2267_v41, %v2271_v61  ;;  %v2291_v49 = vrot.slane %v2290_v57, 4  ;;  %v2315_v39 = vrot.slane %v2314_v5, 4  ;;  %v7250_v5 = vld [vmem:[%s7039_s22 + $0x40] sm:$0xf] }
  0x87   : > { %v2305_v6 = vrot.slane %v2304_v1, 4  ;;  %v2319_v50 = vrot.slane %v2317_v43, 5  ;;  %v2341_v42 = vshll.u32 %v7194_v4, 16  ;;  %v9469_v47 = vcombine.low %v6607_v13, %v6614_v22  ;;  %v7229_v13 = vld [vmem:[%s7039_s22 + $0x38] sm:$0x1]  ;;  %9473 = vst [vmem:[#allocation14_spill] sm:$0xff] %v7250_v5 }
  0x88   : > { %v2328_v0 = vor.u32 %v2327_v15, %v2324_v55  ;;  %v2346_v17 = vshrl.u32 %v7202_v2, 16  ;;  %v2349_v61 = vshll.u32 %v7202_v2, 16  ;;  %v9470_v8 = vcombine.low %v6659_v18, %v6665_v31  ;;  %9471 = vst [vmem:[#allocation12_spill] sm:$0xff] %v7229_v13  ;;  %v7237_v31 = vld [vmem:[%s7039_s22 + $0x3c] sm:$0xf] }
  0x89   : > { %v5318_v34 = vcombine.low %v7075_v16, %v7087_v30  ;;  %v2338_v43 = vor.u32 %v2337_v58, %v7199_v14  ;;  %v5358_v22 = vcombine.low %v2262_v33, %v2272_v59  ;;  %9472 = vst [vmem:[#allocation13_spill] sm:$0xff] %v7237_v31  ;;  %v2286_v41 = vsel %vm6517_vm2, %v2281_v56, %v7174_v26  ;;  %v7253_v59 = vld [vmem:[%s7039_s22 + $0x48] sm:$0xf]  ;;  %v7388_v4 = vld [vmem:[%s7039_s22 + $0x78] sm:$0xf] }
  0x8a   : > { %5927 = vmatmul.mubr.bf16.gmra.mxu0 %v5289_v44  ;;  %v7213_v44 = vld [vmem:[%s7039_s22 + $0x34] sm:$0xf]  ;;  %v2296_v10 = vsel %vm6517_vm2, %v2291_v49, %v2295_v53  ;;  %v2310_v57 = vsel %vm6517_vm2, %v2305_v6, %v7180_v51  ;;  %v2320_v1 = vsel %vm6517_vm2, %v2315_v39, %v2319_v50  ;;  %v2329_v15 = vrot.slane %v2328_v0, 4  ;;  %9474 = vst [vmem:[#allocation15_spill] sm:$0xff] %v7253_v59  ;;  %v7261_v6 = vld [vmem:[%s7039_s22 + $0x4c] sm:$0xf] }
  0x8b   : > { %5930 = vmatprep.mubr.bf16.mxu0 %v9467_v54  ;;  %9468 = vst [vmem:[#allocation11_spill] sm:$0xff] %v7213_v44  ;;  %v2359_v46 = vshrl.u32 %v7213_v44, 16  ;;  %v2355_v18 = vshll.u32 %v7213_v44, 16  ;;  %v2343_v58 = vrot.slane %v2341_v42, 5  ;;  %v2348_v54 = vrot.slane %v2346_v17, 4  ;;  %9476 = vst [vmem:[#allocation16_spill] sm:$0xff] %v7261_v6 }
  0x8c   : > { %v2351_v33 = vrot.slane %v2349_v61, 5  ;;  %v9475_v26 = vcombine.low %v7021_v63, %v7043_v60  ;;  %v2339_v53 = vrot.slane %v2338_v43, 4  ;;  %v2365_v51 = vshll.u32 %v7229_v13, 16  ;;  %v7271_v63 = vld [vmem:[%s7039_s22 + $0x44] sm:$0x1] }
  0x8d   : > { %5879 = vmatmul.mubr.bf16.gmra.mxu1 %v9469_v47  ;;  %v2361_v56 = vrot.slane %v2359_v46, 4  ;;  %v2370_v49 = vshrl.u32 %v7237_v31, 16  ;;  %v9477_v39 = vcombine.low %v7031_v45, %v7061_v23  ;;  %v7266_v50 = vrot.slane %v2355_v18, 5  ;;  %9478 = vst [vmem:[#allocation17_spill] sm:$0xff] %v7271_v63 }
  0x8e   : > { %5882 = vmatprep.mubr.bf16.mxu1 %v9470_v8  ;;  %v2373_v42 = vshll.u32 %v7237_v31, 16  ;;  %v2383_v47 = vshrl.u32 %v7250_v5, 16  ;;  %v2379_v60 = vshll.u32 %v7250_v5, 16  ;;  %v7274_v0 = vcombine.low %v2286_v41, %v2296_v10 }
  0x8f   : > { %v2394_v45 = vshrl.u32 %v7253_v59, 16  ;;  %v2397_v23 = vshll.u32 %v7253_v59, 16  ;;  %v9479_v61 = vcombine.low %v6701_v9, %v6710_v28  ;;  %v7283_v8 = vcombine.low %v2310_v57, %v2320_v1  ;;  %v7300_v1 = vld [vmem:[%s7039_s22 + $0x54] sm:$0xf] }
  0x90   : > { %v2407_v46 = vshrl.u32 %v7261_v6, 16  ;;  %v2403_v18 = vshll.u32 %v7261_v6, 16  ;;  %v9480_v41 = vcombine.low %v6757_v38, %v6765_v52  ;;  %v2334_v9 = vsel %vm6517_vm2, %v2329_v15, %v7199_v14  ;;  %v7312_v14 = vld [vmem:[%s7039_s22 + $0x60] sm:$0xf] }
  0x91   : > { %v2344_v28 = vsel %vm6517_vm2, %v2339_v53, %v2343_v58  ;;  %v2352_v10 = vor.u32 %v2351_v33, %v2348_v54  ;;  %v7297_v57 = vrot.slane %v2365_v51, 5  ;;  %v2375_v38 = vrot.slane %v2373_v42, 5  ;;  %v7316_v53 = vld [vmem:[%s7039_s22 + $0x64] sm:$0xf] }
  0x92   : > { %5931 = vmatmul.mubr.bf16.gmra.mxu0 %v9475_v26  ;;  %v7303_v26 = vld [vmem:[%s7039_s22 + $0x58] sm:$0xf]  ;;  %v7306_v52 = vrot.slane %v2379_v60, 5  ;;  %v2385_v15 = vrot.slane %v2383_v47, 4  ;;  %v2389_v58 = vshll.u32 %v7271_v63, 16  ;;  %v2396_v54 = vrot.slane %v2394_v45, 4 }
  0x93   : > { %5934 = vmatprep.mubr.bf16.mxu0 %v9477_v39  ;;  %v2362_v39 = vor.u32 %v2361_v56, %v7266_v50  ;;  %v2399_v33 = vrot.slane %v2397_v23, 5  ;;  %v7318_v51 = vrot.slane %v2403_v18, 5  ;;  %v2409_v43 = vrot.slane %v2407_v46, 4 }
  0x94   : > { %v2418_v56 = vshrl.u32 %v7300_v1, 16  ;;  %v9482_v42 = vcombine.low %v7072_v25, %v7096_v36  ;;  %v7325_v60 = vcombine.low %v2334_v9, %v2344_v28  ;;  %v2431_v45 = vshrl.u32 %v7303_v26, 16 }
  0x95   : > { %5883 = vmatmul.mubr.bf16.gmra.mxu1 %v9479_v61  ;;  %v2372_v61 = vrot.slane %v2370_v49, 4  ;;  %v2421_v49 = vshll.u32 %v7300_v1, 16  ;;  %v2427_v23 = vshll.u32 %v7303_v26, 16  ;;  %v2353_v46 = vrot.slane %v2352_v10, 4 }
  0x96   : > { %5886 = vmatprep.mubr.bf16.mxu1 %v9480_v41  ;;  %v7309_v41 = vld [vmem:[%s7039_s22 + $0x50] sm:$0x1]  ;;  %v2363_v18 = vrot.slane %v2362_v39, 4  ;;  %v2442_v17 = vshrl.u32 %v7312_v14, 16  ;;  %v2445_v25 = vshll.u32 %v7312_v14, 16  ;;  %v2386_v9 = vor.u32 %v2385_v15, %v7306_v52 }
  0x97   : > { %9481 = vst [vmem:[#allocation18_spill] sm:$0xff] %v7309_v41  ;;  %v2376_v36 = vor.u32 %v2375_v38, %v2372_v61  ;;  %v7334_v28 = vrot.slane %v2389_v58, 5  ;;  %v9483_v47 = vcombine.low %v6799_v48, %v6806_v37  ;;  %v2410_v10 = vor.u32 %v2409_v43, %v7318_v51  ;;  %v7342_v39 = vld [vmem:[%s7039_s22 + $0x5c] sm:$0x1]  ;;  %v7347_v38 = vld [vmem:[%s7039_s22 + $0x6c] sm:$0xf] }
  0x98   : > { %9484 = vst [vmem:[#allocation19_spill] sm:$0xff] %v7342_v39  ;;  %v2455_v35 = vshrl.u32 %v7316_v53, 16  ;;  %v2451_v61 = vshll.u32 %v7316_v53, 16  ;;  %9485 = vst [vmem:[#allocation20_spill] sm:$0xff] %v7347_v38  ;;  %v7350_v15 = vld [vmem:[%s7039_s22 + $0x70] sm:$0xf]  ;;  %v2368_v55 = vsel %vm6517_vm2, %v2363_v18, %v7297_v57 }
  0x99   : > { %9486 = vst [vmem:[#allocation21_spill] sm:$0xff] %v7350_v15  ;;  %v6330_v48 = vld [vmem:[%s9380_s3 + $0x1b0] sm:$0xff]   ;;  %v2420_v37 = vrot.slane %v2418_v56, 4  ;;  %v2423_v43 = vrot.slane %v2421_v49, 5  ;;  %v7358_v58 = vrot.slane %v2427_v23, 5  ;;  %v2466_v63 = vshrl.u32 %v7347_v38, 16 }
  0x9a   : > { %5935 = vmatmul.mubr.bf16.gmra.mxu0 %v9482_v42  ;;  %v2413_v42 = vshll.u32 %v7309_v41, 16  ;;  %v2447_v41 = vrot.slane %v2445_v25, 5  ;;  %v2469_v56 = vshll.u32 %v7347_v38, 16  ;;  %v2479_v49 = vshrl.u32 %v7350_v15, 16 }
  0x9b   : > { %6002 = vmatprep.mubr.bf16.mxu0 %v5358_v22  ;;  %v2400_v22 = vor.u32 %v2399_v33, %v2396_v54  ;;  %v2433_v54 = vrot.slane %v2431_v45, 4  ;;  %v7361_v33 = vld [vmem:[%s7039_s22 + $0x68] sm:$0x1]  ;;  %v2475_v45 = vshll.u32 %v7350_v15, 16  ;;  %v7373_v23 = vrot.slane %v2376_v36, 4 }
  0x9c   : > { %9487 = vst [vmem:[#allocation22_spill] sm:$0xff] %v7361_v33  ;;  %v7375_v13 = vrot.slane %v2386_v9, 4  ;;  %v7382_v57 = vrot.slane %v2410_v10, 4  ;;  %v7384_v18 = vrot.slane %v2413_v42, 5  ;;  %v2437_v25 = vshll.u32 %v7342_v39, 16 }
  0x9d   : > { %5887 = vmatmul.mubr.bf16.gmra.mxu1 %v9483_v47  ;;  %v2358_v47 = vsel %vm6517_vm2, %v2353_v46, %v7266_v50  ;;  %v7377_v50 = vrot.slane %v2451_v61, 5  ;;  %v2457_v46 = vrot.slane %v2455_v35, 4  ;;  %v6329_v35 = vld [vmem:[%s9380_s3 + $0x170] sm:$0xff]   ;;  %v2424_v36 = vor.u32 %v2423_v43, %v2420_v37  ;;  %v7401_v10 = vld [vmem:[%s7039_s22 + $0x7c] sm:$0xf] }
  0x9e   : > { %5954 = vmatprep.mubr.bf16.mxu1 %v5318_v34  ;;  %v2444_v34 = vrot.slane %v2442_v17, 4  ;;  %v7380_v17 = vrot.slane %v2400_v22, 4  ;;  %v2434_v9 = vor.u32 %v2433_v54, %v7358_v58  ;;  %v2461_v22 = vshll.u32 %v7361_v33, 16 }
  0x9f   : > { %v2471_v61 = vrot.slane %v2469_v56, 5  ;;  %v7406_v39 = vrot.slane %v2475_v45, 5  ;;  %v2481_v12 = vrot.slane %v2479_v49, 4  ;;  %v5362_v37 = vcombine.low %v2358_v47, %v2368_v55  ;;  %v7440_v49 = vld [vmem:[%s7039_s22 + $0x84] sm:$0xf] }
  0xa0   : > { %v2448_v42 = vor.u32 %v2447_v41, %v2444_v34  ;;  %v2458_v43 = vor.u32 %v2457_v46, %v7377_v50  ;;  %v2490_v41 = vshrl.u32 %v7388_v4, 16  ;;  %v2493_v54 = vshll.u32 %v7388_v4, 16 }
  0xa1   : > { %v2382_v34 = vsel %vm6517_vm2, %v7373_v23, %v7306_v52  ;;  %v2503_v55 = vshrl.u32 %v7401_v10, 16  ;;  %v2499_v47 = vshll.u32 %v7401_v10, 16  ;;  %v2406_v52 = vsel %vm6517_vm2, %v7380_v17, %v7318_v51  ;;  %v6337_v51 = vld [vmem:[%s9380_s3 + $0x160] sm:$0xff]  }
  0xa2   : > { %6003 = vmatmul.mubr.bf16.vlgmr.msra.gmra.mxu0 %v7274_v0  ;;  %v6334_v0 = vld [vmem:[%s9380_s3 + $0x1a8] sm:$0xff]   ;;  %v2439_v56 = vrot.slane %v2437_v25, 5  ;;  %v2449_v45 = vrot.slane %v2448_v42, 4  ;;  %v2463_v23 = vrot.slane %v2461_v22, 5  ;;  %v6338_v17 = vld [vmem:[%s9380_s3 + $0x1a0] sm:$0xff]   ;;  %v2482_v22 = vor.u32 %v2481_v12, %v7406_v39 }
  0xa3   : > { %6083 = vmatpush3.bf16.msra.mxu0 %v7135_v19  ;;  %6006 = vmatprep.mubr.bf16.mxu0 %v7283_v8  ;;  %v7404_v19 = vld [vmem:[%s7039_s22 + $0x74] sm:$0x1]  ;;  %v2468_v8 = vrot.slane %v2466_v63, 4  ;;  %v9490_v63 = vcombine.low %v7143_v24, %v7146_v11  ;;  %v7453_v25 = vld [vmem:[%s7039_s22 + $0x80] sm:$0x1]  ;;  %v2505_v33 = vrot.slane %v2503_v55, 4  ;;  %v9492_v55 = vcombine.low %v7171_v40, %v7178_v21 }
  0xa4   : > { %6084 = vmatprep.subr.bf16.mxu0 %v6330_v48  ;;  %9488 = vst [vmem:[#allocation23_spill] sm:$0xff] %v7404_v19  ;;  %v2485_v46 = vshll.u32 %v7404_v19, 16  ;;  %9491 = vst [vmem:[#allocation24_spill] sm:$0xff] %v7453_v25  ;;  %v7459_v19 = vrot.slane %v2499_v47, 5  ;;  %v7486_v47 = vld [vmem:[%s7039_s22 + $0x90] sm:$0xf] }
  0xa5   : > { %5955 = vmatmul.mubr.bf16.vlgmr.msra.gmra.mxu1 %v9489_v3  ;;  %v2392_v3 = vsel %vm6517_vm2, %v7375_v13, %v7334_v28  ;;  %v2416_v13 = vsel %vm6517_vm2, %v7382_v57, %v7384_v18  ;;  %v2425_v28 = vrot.slane %v2424_v36, 4  ;;  %v2459_v57 = vrot.slane %v2458_v43, 4  ;;  %v7554_v42 = vld [vmem:[%s7039_s22 + $0x98] sm:$0x1] }
  0xa6   : > { %6035 = vmatpush3.bf16.msra.mxu1 %v7140_v7  ;;  %5958 = vmatprep.mubr.bf16.mxu1 %v9490_v63  ;;  %v6333_v7 = vld [vmem:[%s9380_s3 + $0x168] sm:$0xff]   ;;  %v2472_v18 = vor.u32 %v2471_v61, %v2468_v8  ;;  %v2492_v36 = vrot.slane %v2490_v41, 4  ;;  %v2514_v43 = vshrl.u32 %v7440_v49, 16  ;;  %v2517_v8 = vshll.u32 %v7440_v49, 16  ;;  %9495 = vst [vmem:[#allocation26_spill] sm:$0xff] %v7554_v42 }
  0xa7   : > { %6036 = vmatprep.subr.bf16.mxu1 %v6329_v35  ;;  %6085 = vmatpush3.bf16.msra.mxu0 %v6330_v48  ;;  %v2435_v48 = vrot.slane %v2434_v9, 4  ;;  %v7444_v63 = vld [vmem:[%s7039_s22 + $0x88] sm:$0xf]  ;;  %v2495_v9 = vrot.slane %v2493_v54, 5  ;;  %v5364_v41 = vcombine.low %v2406_v52, %v2416_v13  ;;  %v2430_v12 = vsel %vm6517_vm2, %v2425_v28, %v7358_v58  ;;  %v6342_v54 = vld [vmem:[%s9380_s3 + $0x198] sm:$0xff]  }
  0xa8   : > { %6086 = vmatprep.subr.bf16.mxu0 %v6334_v0  ;;  %v2527_v61 = vshrl.u32 %v7444_v63, 16  ;;  %v2464_v58 = vsel %vm6517_vm2, %v2459_v57, %v2463_v23  ;;  %v7489_v52 = vld [vmem:[%s7039_s22 + $0x94] sm:$0xf]  ;;  %v9493_v13 = vcombine.low %v7202_v2, %v7213_v44  ;;  %v7494_v28 = vrot.slane %v2482_v22, 4  ;;  %v7502_v23 = vld [vmem:[%s7039_s22 + $0x8c] sm:$0x1] }
  0xa9   : > { %9494 = vst [vmem:[#allocation25_spill] sm:$0xff] %v7502_v23  ;;  %v2519_v57 = vrot.slane %v2517_v8, 5  ;;  %v2557_v21 = vshll.u32 %v7554_v42, 16  ;;  %v3022_v27 = vrot.slane %v7303_v26, 5 }
  0xaa   : > { %6007 = vmatmul.mubr.bf16.gmra.mxu0 %v7325_v60  ;;  %6037 = vmatpush3.bf16.msra.mxu1 %v6329_v35  ;;  %v2523_v60 = vshll.u32 %v7444_v63, 16  ;;  %v5363_v35 = vcombine.low %v2382_v34, %v2392_v3  ;;  %v7481_v34 = vrot.slane %v2472_v18, 4  ;;  %v7483_v3 = vrot.slane %v2485_v46, 5 }
  0xab   : > { %6010 = vmatprep.mubr.bf16.mxu0 %v5362_v37  ;;  %6038 = vmatprep.subr.bf16.mxu1 %v6333_v7  ;;  %v2440_v37 = vsel %vm6517_vm2, %v2435_v48, %v2439_v56  ;;  %v2496_v56 = vor.u32 %v2495_v9, %v2492_v36  ;;  %v2506_v48 = vor.u32 %v2505_v33, %v7459_v19  ;;  %v2516_v46 = vrot.slane %v2514_v43, 4 }
  0xac   : > { %6087 = vmatpush3.bf16.msra.mxu0 %v6334_v0  ;;  %v2454_v0 = vsel %vm6517_vm2, %v2449_v45, %v7377_v50  ;;  %v6341_v50 = vld [vmem:[%s9380_s3 + $0x158] sm:$0xff]   ;;  %v2509_v45 = vshll.u32 %v7453_v25, 16  ;;  %v7504_v18 = vrot.slane %v2523_v60, 5  ;;  %v2538_v36 = vshrl.u32 %v7486_v47, 16 }
  0xad   : > { %5959 = vmatmul.mubr.bf16.gmra.mxu1 %v9492_v55  ;;  %6088 = vmatprep.subr.bf16.mxu0 %v6338_v17  ;;  %v2529_v55 = vrot.slane %v2527_v61, 4  ;;  %v2541_v33 = vshll.u32 %v7486_v47, 16  ;;  %v2551_v9 = vshrl.u32 %v7489_v52, 16  ;;  %v7516_v8 = vcombine.low %v2454_v0, %v2464_v58  ;;  %v6346_v61 = vld [vmem:[%s9380_s3 + $0x190] sm:$0xff]  }
  0xae   : > { %5962 = vmatprep.mubr.bf16.mxu1 %v9493_v13  ;;  %6039 = vmatpush3.bf16.msra.mxu1 %v6333_v7  ;;  %v7507_v7 = vld [vmem:[%s7039_s22 + $0x9c] sm:$0xf]  ;;  %v5365_v13 = vcombine.low %v2430_v12, %v2440_v37  ;;  %v7530_v37 = vrot.slane %v2496_v56, 4  ;;  %v7532_v0 = vrot.slane %v2509_v45, 5  ;;  %v7540_v58 = vrot.slane %v2506_v48, 4  ;;  %v6350_v56 = vld [vmem:[%s9380_s3 + $0x188] sm:$0xff]  }
  0xaf   : > { %6040 = vmatprep.subr.bf16.mxu1 %v6337_v51  ;;  %v2520_v43 = vor.u32 %v2519_v57, %v2516_v46  ;;  %v2530_v22 = vor.u32 %v2529_v55, %v7504_v18  ;;  %v2533_v60 = vshll.u32 %v7502_v23, 16  ;;  %v7548_v45 = vld [vmem:[%s7039_s22 + $0xa8] sm:$0xf]  ;;  %v7551_v12 = vld [vmem:[%s7039_s22 + $0xac] sm:$0xf]  ;;  %v2543_v25 = vrot.slane %v2541_v33, 5 }
  0xb0   : > { %6089 = vmatpush3.bf16.msra.mxu0 %v6338_v17  ;;  %v2547_v17 = vshll.u32 %v7489_v52, 16  ;;  %v2553_v48 = vrot.slane %v2551_v9, 4  ;;  %v2562_v46 = vshrl.u32 %v7507_v7, 16  ;;  %v9496_v57 = vcombine.low %v7237_v31, %v7250_v5  ;;  %v7576_v5 = vld [vmem:[%s7039_s22 + $0xb4] sm:$0xf] }
  0xb1   : > { %6090 = vmatprep.subr.bf16.mxu0 %v6342_v54  ;;  %v2565_v23 = vshll.u32 %v7507_v7, 16  ;;  %v9497_v33 = vcombine.low %v7253_v59, %v7261_v6  ;;  %v2586_v9 = vshrl.u32 %v7548_v45, 16  ;;  %v2595_v31 = vshll.u32 %v7551_v12, 16  ;;  %9498 = vst [vmem:[#allocation27_spill] sm:$0xff] %v7576_v5  ;;  %v7591_v6 = vld [vmem:[%s7039_s22 + $0xa4] sm:$0x1] }
  0xb2   : > { %6011 = vmatmul.mubr.bf16.gmra.mxu0 %v5363_v35  ;;  %6041 = vmatpush3.bf16.msra.mxu1 %v6337_v51  ;;  %v6345_v35 = vld [vmem:[%s9380_s3 + $0x150] sm:$0xff]   ;;  %v7538_v51 = vld [vmem:[%s7039_s22 + $0xa0] sm:$0xf]  ;;  %v7560_v55 = vrot.slane %v2547_v17, 5  ;;  %v2589_v17 = vshll.u32 %v7548_v45, 16  ;;  %v2502_v44 = vsel %vm6517_vm2, %v7530_v37, %v7459_v19  ;;  %v7588_v59 = vrot.slane %v2533_v60, 5 }
  0xb3   : > { %6014 = vmatprep.mubr.bf16.mxu0 %v5364_v41  ;;  %6042 = vmatprep.subr.bf16.mxu1 %v6341_v50  ;;  %v2540_v41 = vrot.slane %v2538_v36, 4  ;;  %v2571_v2 = vshll.u32 %v7538_v51, 16  ;;  %v6349_v36 = vld [vmem:[%s9380_s3 + $0x148] sm:$0xff]   ;;  %v7593_v40 = vrot.slane %v2530_v22, 4  ;;  %v2564_v19 = vrot.slane %v2562_v46, 4  ;;  %v6353_v22 = vld [vmem:[%s9380_s3 + $0x140] sm:$0xff]  }
  0xb4   : > { %6091 = vmatpush3.bf16.msra.mxu0 %v6342_v54  ;;  %v2575_v54 = vshrl.u32 %v7538_v51, 16  ;;  %v7597_v37 = vld [vmem:[%s7039_s22 + $0xb8] sm:$0xf]  ;;  %v2554_v11 = vor.u32 %v2553_v48, %v7560_v55  ;;  %v7603_v60 = vld [vmem:[%s7039_s22 + $0xb0] sm:$0x1]  ;;  %v7611_v48 = vrot.slane %v2595_v31, 5  ;;  %v9499_v31 = vsel %vm6517_vm2, %v7494_v28, %v7483_v3 }
  0xb5   : > { %5963 = vmatmul.mubr.bf16.gmra.mxu1 %v9496_v57  ;;  %6092 = vmatprep.subr.bf16.mxu0 %v6346_v61  ;;  %v2599_v57 = vshrl.u32 %v7551_v12, 16  ;;  %v2544_v24 = vor.u32 %v2543_v25, %v2540_v41  ;;  %v6354_v25 = vld [vmem:[%s9380_s3 + $0x180] sm:$0xff]   ;;  %v2591_v41 = vrot.slane %v2589_v17, 5  ;;  %v2613_v46 = vshll.u32 %v7576_v5, 16 }
  0xb6   : > { %5966 = vmatprep.mubr.bf16.mxu1 %v9497_v33  ;;  %6043 = vmatpush3.bf16.msra.mxu1 %v6341_v50  ;;  %v2512_v50 = vsel %vm6517_vm2, %v7540_v58, %v7532_v0  ;;  %v7586_v33 = vrot.slane %v2520_v43, 4  ;;  %v2567_v0 = vrot.slane %v2565_v23, 5  ;;  %v7600_v58 = vrot.slane %v2571_v2, 5 }
  0xb7   : > { %6044 = vmatprep.subr.bf16.mxu1 %v6345_v35  ;;  %v2577_v43 = vrot.slane %v2575_v54, 4  ;;  %v2601_v2 = vrot.slane %v2599_v57, 4  ;;  %v2610_v23 = vshrl.u32 %v7576_v5, 16  ;;  %v2623_v54 = vshrl.u32 %v7597_v37, 16 }
  0xb8   : > { %6093 = vmatpush3.bf16.msra.mxu0 %v6346_v61  ;;  %v2588_v61 = vrot.slane %v2586_v9, 4  ;;  %v2619_v42 = vshll.u32 %v7597_v37, 16  ;;  %v2559_v9 = vrot.slane %v2557_v21, 5  ;;  %v2581_v17 = vshll.u32 %v7591_v6, 16 }
  0xb9   : > { %6094 = vmatprep.subr.bf16.mxu0 %v6350_v56  ;;  %v9501_v57 = vcombine.low %v7300_v1, %v7303_v26  ;;  %v2568_v5 = vor.u32 %v2567_v0, %v2564_v19  ;;  %v2578_v3 = vor.u32 %v2577_v43, %v7600_v58  ;;  %v9502_v21 = vcombine.low %v7312_v14, %v7316_v53  ;;  %v7651_v19 = vld [vmem:[%s9380_s3 + $0x1f8] sm:$0xff]  }
  0xba   : > { %6015 = vmatmul.mubr.bf16.gmra.mxu0 %v5365_v13  ;;  %6045 = vmatpush3.bf16.msra.mxu1 %v6345_v35  ;;  %v5327_v13 = vcombine.low %v7347_v38, %v7350_v15  ;;  %v2545_v38 = vrot.slane %v2544_v24, 4  ;;  %v2555_v15 = vrot.slane %v2554_v11, 4  ;;  %v2592_v28 = vor.u32 %v2591_v41, %v2588_v61  ;;  %v7646_v11 = vld [vmem:[%s7039_s22 + $0xbc] sm:$0x1] }
  0xbb   : > { %6018 = vmatprep.mubr.bf16.mxu0 %v7516_v8  ;;  %6046 = vmatprep.subr.bf16.mxu1 %v6349_v36  ;;  %v9500_v8 = vsel %vm6517_vm2, %v7481_v34, %v7406_v39  ;;  %v7638_v39 = vld [vmem:[%s9380_s3 + $0x238] sm:$0xff]   ;;  %v5368_v34 = vcombine.low %v2502_v44, %v2512_v50  ;;  %v2605_v24 = vshll.u32 %v7603_v60, 16  ;;  %v2612_v0 = vrot.slane %v2610_v23, 4 }
  0xbc   : > { %v5367_v35 = vcombine.low %v9500_v8, %v9499_v31  ;;  %6095 = vmatpush3.bf16.msra.mxu0 %v6350_v56  ;;  %v2602_v56 = vor.u32 %v2601_v2, %v7611_v48  ;;  %v2615_v43 = vrot.slane %v2613_v46, 5  ;;  %v7653_v31 = vrot.slane %v2619_v42, 5 }
  0xbd   : > { %5967 = vmatmul.mubr.bf16.gmra.mxu1 %v9501_v57  ;;  %6096 = vmatprep.subr.bf16.mxu0 %v6354_v25  ;;  %v2625_v8 = vrot.slane %v2623_v54, 4  ;;  %v5328_v44 = vcombine.low %v7388_v4, %v7401_v10  ;;  %v2536_v50 = vsel %vm6517_vm2, %v7593_v40, %v7588_v59  ;;  %v2583_v61 = vrot.slane %v2581_v17, 5 }
  0xbe   : > { %5970 = vmatprep.mubr.bf16.mxu1 %v9502_v21  ;;  %6047 = vmatpush3.bf16.msra.mxu1 %v6349_v36  ;;  %v2526_v36 = vsel %vm6517_vm2, %v7586_v33, %v7504_v18  ;;  %v2550_v42 = vsel %vm6517_vm2, %v2545_v38, %v7560_v55  ;;  %v2560_v41 = vsel %vm6517_vm2, %v2555_v15, %v2559_v9  ;;  %v2569_v2 = vrot.slane %v2568_v5, 4  ;;  %v7703_v21 = vld [vmem:[%s7678_s7 + $0x4] sm:$0xf] }
  0xbf   : > { %6048 = vmatprep.subr.bf16.mxu1 %v6353_v22  ;;  %v2579_v23 = vrot.slane %v2578_v3, 4  ;;  %v2593_v18 = vrot.slane %v2592_v28, 4  ;;  %v2603_v33 = vrot.slane %v2602_v56, 4  ;;  %v2607_v46 = vrot.slane %v2605_v24, 5 }
  0xc0   : > { %6097 = vmatpush3.bf16.msra.mxu0 %v6354_v25  ;;  %v2629_v40 = vshll.u32 %v7646_v11, 16  ;;  %v2616_v59 = vor.u32 %v2615_v43, %v2612_v0  ;;  %v2626_v25 = vor.u32 %v2625_v8, %v7653_v31  ;;  %v2973_v38 = vrot.slane %v7087_v30, 5 }
  0xc1   : > { %6178 = vmatprep.subr.bf16.mxu0 %v7638_v39  ;;  %v5329_v5 = vcombine.low %v7440_v49, %v7444_v63  ;;  %v5330_v15 = vcombine.low %v7486_v47, %v7489_v52  ;;  %v5331_v55 = vcombine.low %v7507_v7, %v7538_v51  ;;  %v2980_v30 = vrot.slane %v7130_v20, 5 }
  0xc2   : > { %6019 = vmatmul.mubr.bf16.gmra.mxu0 %v5367_v35  ;;  %6049 = vmatpush3.bf16.msra.mxu1 %v6353_v22  ;;  %v5369_v22 = vcombine.low %v2526_v36, %v2536_v50  ;;  %v5370_v54 = vcombine.low %v2550_v42, %v2560_v41  ;;  %v2574_v35 = vsel %vm6517_vm2, %v2569_v2, %v7600_v58  ;;  %v2631_v3 = vrot.slane %v2629_v40, 5  ;;  %v7723_v41 = vld [vmem:[%s7678_s7 + $0x10] sm:$0xf] }
  0xc3   : > { %6022 = vmatprep.mubr.bf16.mxu0 %v5368_v34  ;;  %6130 = vmatprep.subr.bf16.mxu1 %v7651_v19  ;;  %v2584_v9 = vsel %vm6517_vm2, %v2579_v23, %v2583_v61  ;;  %v2598_v17 = vsel %vm6517_vm2, %v2593_v18, %v7611_v48  ;;  %v2608_v57 = vsel %vm6517_vm2, %v2603_v33, %v2607_v46  ;;  %v5382_v20 = vrot.slane %v7075_v16, 9  ;;  %v7715_v61 = vld [vmem:[%s7678_s7 + $0xc] sm:$0xf] }
  0xc4   : > { %v2617_v58 = vrot.slane %v2616_v59, 4  ;;  %v2627_v34 = vrot.slane %v2626_v25, 4  ;;  %v2975_v28 = vrot.slane %v2973_v38, 4  ;;  %v2976_v56 = vrot.slane %v7149_v62, 5  ;;  %9506 = vst [vmem:[#allocation5_spill] sm:$0xff] %v7723_v41 }
  0xc5   : > { %5971 = vmatmul.mubr.bf16.gmra.mxu1 %v5327_v13  ;;  %v7700_v13 = vld [vmem:[%s7678_s7] sm:$0xf]  ;;  %v5332_v48 = vcombine.low %v7548_v45, %v7551_v12  ;;  %v5383_v24 = vrot.slane %v7121_v32, 9  ;;  %v2982_v0 = vrot.slane %v2980_v30, 4  ;;  %v2983_v43 = vrot.slane %v7168_v29, 5 }
  0xc6   : > { %5974 = vmatprep.mubr.bf16.mxu1 %v5328_v44  ;;  %v5371_v8 = vcombine.low %v2574_v35, %v2584_v9  ;;  %v5372_v16 = vcombine.low %v2598_v17, %v2608_v57  ;;  %v9503_v44 = vld [vmem:[#allocation27_spill] sm:$0xff]  ;;  %v7719_v42 = vsel %vm6826_vm5, %v5382_v20, %v2973_v38  ;;  %v3832_v29 = vshrl.u32 %v7715_v61, 16  ;;  %v7786_v32 = vld [vmem:[%s7678_s7 + $0x24] sm:$0xf] }
  0xc7   : > { %9504 = vst [vmem:[#allocation27_spill] sm:$0xff] %v7715_v61  ;;  %v3835_v2 = vshll.u32 %v7715_v61, 16  ;;  %v2622_v23 = vsel %vm6517_vm2, %v2617_v58, %v7653_v31  ;;  %v2632_v18 = vsel %vm6517_vm2, %v2627_v34, %v2631_v3  ;;  %v7734_v33 = vsel %vm6826_vm5, %v2975_v28, %v2976_v56  ;;  %v9507_v31 = vld [vmem:[#allocation4_spill] sm:$0xff]  ;;  %v9508_v9 = vld [vmem:[#allocation7_spill] sm:$0xff]  ;;  %v7768_v56 = vld [vmem:[%s7678_s7 + $0x1c] sm:$0xf] }
  0xc8   : > { %v3841_v46 = vshll.u32 %v7723_v41, 16  ;;  %v7739_v40 = vsel %vm6826_vm5, %v5383_v24, %v2980_v30  ;;  %v7743_v59 = vsel %vm6826_vm5, %v2982_v0, %v2983_v43  ;;  %v3845_v25 = vshrl.u32 %v7723_v41, 16  ;;  %v9513_v0 = vld [vmem:[#allocation3_spill] sm:$0xff]  ;;  %v9517_v28 = vld [vmem:[#allocation9_spill] sm:$0xff] }
  0xc9   : > { %v2987_v38 = vrot.slane %v9507_v31, 5  ;;  %v9412_v35 = vrot.slane %v7723_v41, 5  ;;  %v2994_v30 = vrot.slane %v9508_v9, 5  ;;  %v7755_v3 = vrot.slane %v3832_v29, 4 }
  0xca   : > { %6023 = vmatmul.mubr.bf16.gmra.mxu0 %v5369_v22  ;;  %v7757_v20 = vrot.slane %v3835_v2, 5  ;;  %v7761_v34 = vrot.slane %v3841_v46, 5  ;;  %v7770_v24 = vrot.slane %v3845_v25, 4  ;;  %v5384_v43 = vrot.slane %v9513_v0, 9  ;;  %v9514_v2 = vld [vmem:[#allocation8_spill] sm:$0xff]  ;;  %v9516_v46 = vld [vmem:[#allocation6_spill] sm:$0xff] }
  0xcb   : > { %6026 = vmatprep.mubr.bf16.mxu0 %v5370_v54  ;;  %9509 = vst [vmem:[#allocation4_spill] sm:$0xff] %v7755_v3  ;;  %v2989_v29 = vrot.slane %v2987_v38, 4  ;;  %v5385_v31 = vrot.slane %v9516_v46, 9  ;;  %v2996_v9 = vrot.slane %v2994_v30, 4  ;;  %v2997_v54 = vrot.slane %v9517_v28, 5  ;;  %9518 = vst [vmem:[#allocation8_spill] sm:$0xff] %v7786_v32 }
  0xcc   : > { %9510 = vst [vmem:[#allocation7_spill] sm:$0xff] %v7757_v20  ;;  %9511 = vst [vmem:[#allocation28_spill] sm:$0xff] %v7761_v34  ;;  %v3880_v28 = vshrl.u32 %v7786_v32, 16  ;;  %v7800_v0 = vsel %vm6826_vm5, %v5384_v43, %v2987_v38  ;;  %v9520_v43 = vld [vmem:[#allocation10_spill] sm:$0xff]  ;;  %v9521_v46 = vld [vmem:[#allocation12_spill] sm:$0xff]  ;;  %v9535_v26 = vcombine.low %v7719_v42, %v7734_v33  ;;  %v3029_v3 = vrot.slane %v7316_v53, 5 }
  0xcd   : > { %5975 = vmatmul.mubr.bf16.gmra.mxu1 %v5329_v5  ;;  %v5373_v5 = vcombine.low %v2622_v23, %v2632_v18  ;;  %9512 = vst [vmem:[#allocation29_spill] sm:$0xff] %v7770_v24  ;;  %v2990_v23 = vrot.slane %v9514_v2, 5  ;;  %v7776_v18 = vrot.slane %v9412_v35, 4  ;;  %v7789_v2 = vld [vmem:[%s7678_s7 + $0x28] sm:$0xf]  ;;  %v7813_v25 = vsel %vm6826_vm5, %v5385_v31, %v2994_v30  ;;  %v9523_v31 = vld [vmem:[#allocation14_spill] sm:$0xff] }
  0xce   : > { %5978 = vmatprep.mubr.bf16.mxu1 %v5330_v15  ;;  %v7765_v15 = vld [vmem:[%s7678_s7 + $0x18] sm:$0xf]  ;;  %v9519_v35 = vld [vmem:[#allocation11_spill] sm:$0xff]  ;;  %v3889_v22 = vshll.u32 %v7789_v2, 16  ;;  %v7817_v38 = vsel %vm6826_vm5, %v2996_v9, %v2997_v54  ;;  %v3004_v57 = vrot.slane %v9521_v46, 5  ;;  %v3008_v17 = vrot.slane %v9523_v31, 5 }
  0xcf   : > { %9515 = vst [vmem:[#allocation3_spill] sm:$0xff] %v7776_v18  ;;  %v3001_v58 = vrot.slane %v9519_v35, 5  ;;  %v7804_v35 = vsel %vm6826_vm5, %v2989_v29, %v2990_v23  ;;  %v5386_v29 = vrot.slane %v9520_v43, 9  ;;  %v7827_v30 = vld [vmem:[%s7678_s7 + $0x30] sm:$0xf]  ;;  %v7832_v9 = vrot.slane %v3880_v28, 4 }
  0xd0   : > { %9522 = vst [vmem:[#allocation6_spill] sm:$0xff] %v7827_v30  ;;  %v7836_v36 = vrot.slane %v3889_v22, 5  ;;  %v7848_v18 = vld [vmem:[%s7678_s7 + $0x3c] sm:$0xf]  ;;  %v7856_v54 = vld [vmem:[%s7678_s7 + $0x40] sm:$0xf] }
  0xd1   : > { %v3003_v23 = vrot.slane %v3001_v58, 4  ;;  %9524 = vst [vmem:[#allocation9_spill] sm:$0xff] %v7832_v9  ;;  %v7852_v28 = vsel %vm6826_vm5, %v5386_v29, %v3001_v58  ;;  %v3010_v46 = vrot.slane %v3008_v17, 4  ;;  %v9529_v31 = vld [vmem:[#allocation17_spill] sm:$0xff]  ;;  %v9531_v29 = vcombine.low %v7700_v13, %v7703_v21 }
  0xd2   : > { %6027 = vmatmul.mubr.bf16.gmra.mxu0 %v5371_v8  ;;  %v3883_v8 = vshll.u32 %v7786_v32, 16  ;;  %9526 = vst [vmem:[#allocation10_spill] sm:$0xff] %v7836_v36  ;;  %v3928_v36 = vshrl.u32 %v7848_v18, 16  ;;  %v7928_v33 = vld [vmem:[%s7678_s7 + $0x58] sm:$0xf] }
  0xd3   : > { %6030 = vmatprep.mubr.bf16.mxu0 %v5372_v16  ;;  %v3893_v16 = vshrl.u32 %v7789_v2, 16 }
  0xd4   : > { %v7834_v43 = vrot.slane %v3883_v8, 5  ;;  %v9528_v8 = vld [vmem:[#allocation13_spill] sm:$0xff]  ;;  %v7888_v34 = vrot.slane %v3928_v36, 4 }
  0xd5   : > { %5979 = vmatmul.mubr.bf16.gmra.mxu1 %v5331_v55  ;;  %v7843_v50 = vrot.slane %v3893_v16, 4  ;;  %v5387_v22 = vrot.slane %v9528_v8, 9  ;;  %v3931_v55 = vshll.u32 %v7848_v18, 16  ;;  %v7862_v16 = vsel %vm6826_vm5, %v3003_v23, %v3004_v57 }
  0xd6   : > { %5982 = vmatprep.mubr.bf16.mxu1 %v5332_v48  ;;  %9525 = vst [vmem:[#allocation11_spill] sm:$0xff] %v7834_v43  ;;  %v7839_v48 = vld [vmem:[%s7678_s7 + $0x34] sm:$0xf]  ;;  %v3941_v57 = vshrl.u32 %v7856_v54, 16  ;;  %9533 = vst [vmem:[#allocation14_spill] sm:$0xff] %v7888_v34 }
  0xd7   : > { %9527 = vst [vmem:[#allocation12_spill] sm:$0xff] %v7843_v50  ;;  %v3011_v50 = vrot.slane %v9529_v31, 5  ;;  %v9530_v43 = vld [vmem:[#allocation16_spill] sm:$0xff]  ;;  %v7886_v8 = vsel %vm6826_vm5, %v5387_v22, %v3008_v17  ;;  %v7890_v23 = vrot.slane %v3931_v55, 5  ;;  %v7893_v31 = vld [vmem:[%s7678_s7 + $0x48] sm:$0xf] }
  0xd8   : > { %v3015_v58 = vrot.slane %v9530_v43, 5  ;;  %v9536_v43 = vld [vmem:[#allocation15_spill] sm:$0xff]  ;;  %v9537_v17 = vld [vmem:[#allocation18_spill] sm:$0xff]  ;;  %v6362_v55 = vld [vmem:[%s9380_s3 + $0x230] sm:$0xff]   ;;  %v7912_v42 = vrot.slane %v3941_v57, 4  ;;  %v3985_v57 = vshll.u32 %v7928_v33, 16 }
  0xd9   : > { %9534 = vst [vmem:[#allocation13_spill] sm:$0xff] %v7890_v23  ;;  %v5388_v9 = vrot.slane %v9536_v43, 9  ;;  %v3018_v36 = vrot.slane %v9537_v17, 5  ;;  %v7905_v22 = vld [vmem:[%s7678_s7 + $0x4c] sm:$0xf]  ;;  %v3024_v43 = vrot.slane %v3022_v27, 4 }
  0xda   : > { %6031 = vmatmul.mubr.bf16.gmra.mxu0 %v5373_v5  ;;  %v3937_v5 = vshll.u32 %v7856_v54, 16  ;;  %v3017_v24 = vrot.slane %v3015_v58, 4  ;;  %9539 = vst [vmem:[#allocation16_spill] sm:$0xff] %v7912_v42  ;;  %v7919_v17 = vld [vmem:[%s7678_s7 + $0x54] sm:$0xf] }
  0xdb   : > { %6098 = vmatprep.mubr.bf16.mxu0 %v9531_v29  ;;  %v9532_v29 = vcombine.low %v9503_v44, %v7597_v37  ;;  %v3979_v20 = vshll.u32 %v7919_v17, 16 }
  0xdc   : > { %v7910_v23 = vrot.slane %v3937_v5, 5  ;;  %v7940_v53 = vsel %vm6826_vm5, %v3017_v24, %v3018_v36  ;;  %v9542_v5 = vcombine.low %v7765_v15, %v7768_v56  ;;  %v9543_v36 = vld [vmem:[#allocation21_spill] sm:$0xff]  ;;  %v9544_v24 = vld [vmem:[#allocation22_spill] sm:$0xff] }
  0xdd   : > { %5983 = vmatmul.mubr.bf16.gmra.mxu1 %v9532_v29  ;;  %v7900_v29 = vsel %vm6826_vm5, %v3010_v46, %v3011_v50  ;;  %v5389_v50 = vrot.slane %v7300_v1, 9  ;;  %v3976_v1 = vshrl.u32 %v7919_v17, 16  ;;  %v9541_v46 = vcombine.low %v7715_v61, %v7723_v41 }
  0xde   : > { %6050 = vmatprep.mubr.bf16.mxu1 %v9535_v26  ;;  %9538 = vst [vmem:[#allocation17_spill] sm:$0xff] %v7910_v23  ;;  %v9540_v26 = vld [vmem:[#allocation19_spill] sm:$0xff]  ;;  %v3031_v23 = vrot.slane %v3029_v3, 4  ;;  %v3032_v61 = vrot.slane %v9544_v24, 5  ;;  %v7989_v24 = vrot.slane %v3985_v57, 5 }
  0xdf   : > { %v3025_v34 = vrot.slane %v9540_v26, 5  ;;  %v7936_v26 = vsel %vm6826_vm5, %v5388_v9, %v3015_v58  ;;  %v7955_v58 = vsel %vm6826_vm5, %v5389_v50, %v3022_v27  ;;  %v5390_v9 = vrot.slane %v7312_v14, 9  ;;  %v7981_v14 = vld [vmem:[%s7678_s7 + $0x64] sm:$0xf]  ;;  %v9552_v57 = vld [vmem:[#allocation23_spill] sm:$0xff] }
  0xe0   : > { %v9545_v27 = vcombine.low %v7739_v40, %v7743_v59  ;;  %v7974_v41 = vrot.slane %v3976_v1, 4  ;;  %v9547_v40 = vcombine.low %v7800_v0, %v7804_v35  ;;  %v7987_v59 = vrot.slane %v3979_v20, 5  ;;  %9549 = vst [vmem:[#allocation19_spill] sm:$0xff] %v7989_v24  ;;  %v9551_v35 = vld [vmem:[#allocation20_spill] sm:$0xff] }
  0xe1   : > { %v7963_v42 = vsel %vm6826_vm5, %v3024_v43, %v3025_v34  ;;  %v3989_v34 = vshrl.u32 %v7928_v33, 16  ;;  %v7978_v43 = vld [vmem:[%s7678_s7 + $0x60] sm:$0xf]  ;;  %v5391_v20 = vrot.slane %v9551_v35, 9  ;;  %v3039_v50 = vrot.slane %v9552_v57, 5 }
  0xe2   : > { %6099 = vmatmul.mubr.bf16.vlgmr.msra.gmra.mxu0 %v9541_v46  ;;  %v6361_v46 = vld [vmem:[%s9380_s3 + $0x1f0] sm:$0xff]   ;;  %9546 = vst [vmem:[#allocation15_spill] sm:$0xff] %v7974_v41  ;;  %9548 = vst [vmem:[#allocation18_spill] sm:$0xff] %v7987_v59  ;;  %v8008_v1 = vsel %vm6826_vm5, %v5390_v9, %v3029_v3  ;;  %v6370_v35 = vld [vmem:[%s9380_s3 + $0x220] sm:$0xff]   ;;  %v9556_v41 = vcombine.low %v7827_v30, %v7839_v48 }
  0xe3   : > { %6179 = vmatpush3.bf16.msra.mxu0 %v7638_v39  ;;  %6102 = vmatprep.mubr.bf16.mxu0 %v9542_v5  ;;  %v3036_v39 = vrot.slane %v9543_v36, 5  ;;  %v6366_v5 = vld [vmem:[%s9380_s3 + $0x228] sm:$0xff]   ;;  %v8004_v24 = vld [vmem:[%s7678_s7 + $0x70] sm:$0xf]  ;;  %v8016_v59 = vrot.slane %v3989_v34, 4 }
  0xe4   : > { %6180 = vmatprep.subr.bf16.mxu0 %v6362_v55  ;;  %v7994_v36 = vld [vmem:[%s7678_s7 + $0x6c] sm:$0xf]  ;;  %9553 = vst [vmem:[#allocation22_spill] sm:$0xff] %v8004_v24  ;;  %v4033_v3 = vshll.u32 %v8004_v24, 16  ;;  %v4037_v9 = vshrl.u32 %v8004_v24, 16 }
  0xe5   : > { %6051 = vmatmul.mubr.bf16.vlgmr.msra.gmra.mxu1 %v9545_v27  ;;  %9550 = vst [vmem:[#allocation21_spill] sm:$0xff] %v7994_v36  ;;  %v4024_v27 = vshrl.u32 %v7994_v36, 16  ;;  %v4027_v0 = vshll.u32 %v7994_v36, 16  ;;  %9554 = vst [vmem:[#allocation20_spill] sm:$0xff] %v8016_v59  ;;  %v8045_v59 = vsel %vm6826_vm5, %v5391_v20, %v3036_v39  ;;  %v8053_v57 = vld [vmem:[%s7678_s7 + $0x78] sm:$0xf]  ;;  %v9562_v20 = vcombine.low %v7813_v25, %v7817_v38 }
  0xe6   : > { %6131 = vmatpush3.bf16.msra.mxu1 %v7651_v19  ;;  %6054 = vmatprep.mubr.bf16.mxu1 %v9547_v40  ;;  %v6365_v19 = vld [vmem:[%s9380_s3 + $0x1e8] sm:$0xff]   ;;  %v3038_v40 = vrot.slane %v3036_v39, 4  ;;  %9558 = vst [vmem:[#allocation30_spill] sm:$0xff] %v8053_v57  ;;  %v5395_v39 = vrot.slane %v7507_v7, 9  ;;  %v3067_v7 = vrot.slane %v7591_v6, 5  ;;  %v9566_v25 = vcombine.low %v7852_v28, %v7862_v16  ;;  %v6373_v6 = vld [vmem:[%s9380_s3 + $0x1d8] sm:$0xff]  }
  0xe7   : > { %6132 = vmatprep.subr.bf16.mxu1 %v6361_v46  ;;  %6181 = vmatpush3.bf16.msra.mxu0 %v6362_v55  ;;  %v8012_v55 = vsel %vm6826_vm5, %v3031_v23, %v3032_v61  ;;  %v9555_v61 = vcombine.low %v7786_v32, %v7789_v2  ;;  %v8055_v32 = vrot.slane %v4024_v27, 4  ;;  %v8057_v30 = vrot.slane %v4027_v0, 5  ;;  %v8094_v16 = vld [vmem:[%s7678_s7 + $0x84] sm:$0xf] }
  0xe8   : > { %6182 = vmatprep.subr.bf16.mxu0 %v6366_v5  ;;  %v8049_v34 = vsel %vm6826_vm5, %v3038_v40, %v3039_v50  ;;  %v3064_v27 = vrot.slane %v7538_v51, 5  ;;  %v9573_v38 = vcombine.low %v7848_v18, %v7856_v54  ;;  %v3074_v0 = vrot.slane %v7603_v60, 5 }
  0xe9   : > { %9559 = vst [vmem:[#allocation31_spill] sm:$0xff] %v8055_v32  ;;  %9560 = vst [vmem:[#allocation32_spill] sm:$0xff] %v8057_v30  ;;  %v9628_v30 = vld [vmem:[#allocation9_spill] sm:$0xff] }
  0xea   : > { %6103 = vmatmul.mubr.bf16.gmra.mxu0 %v9555_v61  ;;  %6133 = vmatpush3.bf16.msra.mxu1 %v6361_v46  ;;  %v6369_v61 = vld [vmem:[%s9380_s3 + $0x1e0] sm:$0xff]   ;;  %v5392_v46 = vrot.slane %v7388_v4, 9  ;;  %v6374_v4 = vld [vmem:[%s9380_s3 + $0x218] sm:$0xff]  }
  0xeb   : > { %6106 = vmatprep.mubr.bf16.mxu0 %v9556_v41  ;;  %6134 = vmatprep.subr.bf16.mxu1 %v6365_v19  ;;  %v3043_v41 = vrot.slane %v7401_v10, 5  ;;  %v8069_v10 = vrot.slane %v4033_v3, 5 }
  0xec   : > { %6183 = vmatpush3.bf16.msra.mxu0 %v6366_v5  ;;  %v8071_v5 = vrot.slane %v4037_v9, 4  ;;  %v9568_v9 = vld [vmem:[#allocation24_spill] sm:$0xff] }
  0xed   : > { %v8041_v23 = vpop.f32.mrf.mxu0  ;;  %6055 = vmatmul.mubr.bf16.gmra.mxu1 %v9562_v20  ;;  %6184 = vmatprep.subr.bf16.mxu0 %v6370_v35  ;;  %v8067_v50 = vpop.f32.mrf.mxu1  ;;  %9564 = vst [vmem:[#allocation35_spill] sm:$0xff] %v8069_v10  ;;  %v3046_v20 = vrot.slane %v9568_v9, 5  ;;  %v3045_v51 = vrot.slane %v3043_v41, 4  ;;  %9569 = vst [vmem:[#allocation24_spill] sm:$0xff] %v8094_v16  ;;  %v8102_v9 = vsel %vm6826_vm5, %v5392_v46, %v3043_v41  ;;  %v6378_v46 = vld [vmem:[%s9380_s3 + $0x210] sm:$0xff]  }
  0xee   : > { %9557 = vst [vmem:[#allocation23_spill] sm:$0xff] %v8041_v23  ;;  %v8061_v23 = vld [vmem:[%s7678_s7 + $0x7c] sm:$0xf]  ;;  %9563 = vst [vmem:[#allocation34_spill] sm:$0xff] %v8067_v50  ;;  %6058 = vmatprep.mubr.bf16.mxu1 %v9566_v25  ;;  %6135 = vmatpush3.bf16.msra.mxu1 %v6365_v19  ;;  %v8098_v19 = vsel %vm6826_vm5, %v5395_v39, %v3064_v27  ;;  %v3066_v25 = vrot.slane %v3064_v27, 4  ;;  %v5393_v39 = vrot.slane %v7440_v49, 9 }
  0xef   : > { %9561 = vst [vmem:[#allocation33_spill] sm:$0xff] %v8061_v23  ;;  %9565 = vst [vmem:[#allocation36_spill] sm:$0xff] %v8071_v5  ;;  %v8085_v3 = vpop.f32.mrf.mxu0  ;;  %6136 = vmatprep.subr.bf16.mxu1 %v6369_v61  ;;  %v8108_v50 = vld [vmem:[%s7678_s7 + $0x88] sm:$0xf]  ;;  %v8110_v28 = vpop.f32.mrf.mxu1  ;;  %v3050_v27 = vrot.slane %v7444_v63, 5  ;;  %v5396_v63 = vrot.slane %v7548_v45, 9  ;;  %v9576_v49 = vcombine.low %v7886_v8, %v7900_v29 }
  0xf0   : > { %9567 = vst [vmem:[#allocation37_spill] sm:$0xff] %v8085_v3  ;;  %6185 = vmatpush3.bf16.msra.mxu0 %v6370_v35  ;;  %9570 = vst [vmem:[#allocation38_spill] sm:$0xff] %v8108_v50  ;;  %v9572_v35 = vld [vmem:[#allocation25_spill] sm:$0xff]  ;;  %v8120_v41 = vsel %vm6826_vm5, %v3066_v25, %v3067_v7  ;;  %v9575_v7 = vcombine.low %v7893_v31, %v7905_v22  ;;  %v4072_v25 = vshrl.u32 %v8094_v16, 16  ;;  %v3057_v45 = vrot.slane %v7489_v52, 5 }
  0xf1   : > { %9571 = vst [vmem:[#allocation39_spill] sm:$0xff] %v8110_v28  ;;  %6186 = vmatprep.subr.bf16.mxu0 %v6374_v4  ;;  %v3053_v3 = vrot.slane %v9572_v35, 5  ;;  %v8125_v40 = vpop.f32.mrf.mxu0  ;;  %v3071_v35 = vrot.slane %v7551_v12, 5  ;;  %v6377_v12 = vld [vmem:[%s9380_s3 + $0x1d0] sm:$0xff]   ;;  %v3052_v28 = vrot.slane %v3050_v27, 4  ;;  %v4081_v52 = vshll.u32 %v8108_v50, 16 }
  0xf2   : > { %6107 = vmatmul.mubr.bf16.gmra.mxu0 %v9573_v38  ;;  %6137 = vmatpush3.bf16.msra.mxu1 %v6369_v61  ;;  %9574 = vst [vmem:[#allocation25_spill] sm:$0xff] %v8125_v40  ;;  %v8137_v38 = vsel %vm6826_vm5, %v3045_v51, %v3046_v20  ;;  %v5397_v20 = vrot.slane %v9503_v44, 9  ;;  %v3078_v51 = vrot.slane %v7597_v37, 5  ;;  %v8155_v61 = vpop.f32.mrf.mxu1  ;;  %v4075_v40 = vshll.u32 %v8094_v16, 16  ;;  %v3416_v10 = vld [vmem:[%s7678_s7 + $0x2c] sm:$0x1] }
  0xf3   : > { %6110 = vmatprep.mubr.bf16.mxu0 %v9575_v7  ;;  %6138 = vmatprep.subr.bf16.mxu1 %v6373_v6  ;;  %v8148_v60 = vsel %vm6826_vm5, %v5396_v63, %v3071_v35  ;;  %v3073_v7 = vrot.slane %v3071_v35, 4  ;;  %9577 = vst [vmem:[#allocation40_spill] sm:$0xff] %v8155_v61  ;;  %v3081_v44 = vrot.slane %v7646_v11, 5  ;;  %v9578_v37 = vcombine.low %v7936_v26, %v7940_v53  ;;  %v8166_v8 = vpop.f32.mrf.mxu0 }
  0xf4   : > { %6187 = vmatpush3.bf16.msra.mxu0 %v6374_v4  ;;  %v6382_v4 = vld [vmem:[%s9380_s3 + $0x208] sm:$0xff]   ;;  %9579 = vst [vmem:[#allocation41_spill] sm:$0xff] %v8166_v8  ;;  %v4085_v29 = vshrl.u32 %v8108_v50, 16  ;;  %v8175_v63 = vsel %vm6826_vm5, %v5397_v20, %v3078_v51  ;;  %v3080_v11 = vrot.slane %v3078_v51, 4  ;;  %v5394_v26 = vrot.slane %v7486_v47, 9 }
  0xf5   : > { %6059 = vmatmul.mubr.bf16.gmra.mxu1 %v9576_v49  ;;  %6188 = vmatprep.subr.bf16.mxu0 %v6378_v46  ;;  %v8171_v49 = vsel %vm6826_vm5, %v3073_v7, %v3074_v0  ;;  %v3059_v53 = vrot.slane %v3057_v45, 4  ;;  %v8188_v20 = vsel %vm6826_vm5, %v5393_v39, %v3050_v27  ;;  %v8190_v47 = vrot.slane %v4072_v25, 4  ;;  %v8193_v51 = vld [vmem:[%s7678_s7 + $0x90] sm:$0xf]  ;;  %v6386_v0 = vld [vmem:[%s9380_s3 + $0x200] sm:$0xff]   ;;  %v8205_v7 = vpop.f32.mrf.mxu1 }
  0xf6   : > { %6062 = vmatprep.mubr.bf16.mxu1 %v9578_v37  ;;  %6139 = vmatpush3.bf16.msra.mxu1 %v6373_v6  ;;  %v9580_v6 = vld [vmem:[#allocation26_spill] sm:$0xff]  ;;  %v6381_v37 = vld [vmem:[%s9380_s3 + $0x1c8] sm:$0xff]   ;;  %v8200_v61 = vsel %vm6826_vm5, %v3080_v11, %v3081_v44  ;;  %9582 = vst [vmem:[#allocation42_spill] sm:$0xff] %v8205_v7  ;;  %v8209_v39 = vsel %vm6826_vm5, %v3052_v28, %v3053_v3  ;;  %v8211_v27 = vrot.slane %v4075_v40, 5  ;;  %v8216_v25 = vld [vmem:[%s7678_s7 + $0x9c] sm:$0xf] }
  0xf7   : > { %6140 = vmatprep.subr.bf16.mxu1 %v6377_v12  ;;  %v3060_v35 = vrot.slane %v9580_v6, 5  ;;  %9581 = vst [vmem:[#allocation26_spill] sm:$0xff] %v8190_v47  ;;  %v8196_v6 = vld [vmem:[%s7678_s7 + $0x94] sm:$0xf]  ;;  %9585 = vst [vmem:[#allocation45_spill] sm:$0xff] %v8216_v25  ;;  %v9587_v11 = vcombine.low %v7919_v17, %v7928_v33  ;;  %v4120_v40 = vshrl.u32 %v8216_v25, 16 }
  0xf8   : > { %6189 = vmatpush3.bf16.msra.mxu0 %v6378_v46  ;;  %9583 = vst [vmem:[#allocation43_spill] sm:$0xff] %v8211_v27  ;;  %v8213_v46 = vrot.slane %v4081_v52, 5  ;;  %v8219_v47 = vld [vmem:[%s7678_s7 + $0xa0] sm:$0xf]  ;;  %v8226_v7 = vpop.f32.mrf.mxu0  ;;  %v4123_v28 = vshll.u32 %v8216_v25, 16  ;;  %v8235_v44 = vrot.slane %v4085_v29, 4  ;;  %v9630_v32 = vcombine.low %v8193_v51, %v8196_v6 }
  0xf9   : > { %9586 = vst [vmem:[#allocation46_spill] sm:$0xff] %v8219_v47  ;;  %6190 = vmatprep.subr.bf16.mxu0 %v6382_v4  ;;  %9588 = vst [vmem:[#allocation47_spill] sm:$0xff] %v8226_v7  ;;  %v4129_v52 = vshll.u32 %v8219_v47, 16  ;;  %v4133_v3 = vshrl.u32 %v8219_v47, 16  ;;  %v6385_v27 = vld [vmem:[%s9380_s3 + $0x1c0] sm:$0xff]   ;;  %v8278_v29 = vrot.slane %v4120_v40, 4 }
  0xfa   : > { %9584 = vst [vmem:[#allocation44_spill] sm:$0xff] %v8213_v46  ;;  %6111 = vmatmul.mubr.bf16.gmra.mxu0 %v9587_v11  ;;  %6141 = vmatpush3.bf16.msra.mxu1 %v6377_v12  ;;  %v9589_v46 = vcombine.low %v7978_v43, %v7981_v14  ;;  %9590 = vst [vmem:[#allocation48_spill] sm:$0xff] %v8235_v44  ;;  %v8239_v11 = vsel %vm6826_vm5, %v5394_v26, %v3057_v45  ;;  %v8268_v7 = vld [vmem:[%s7678_s7 + $0xac] sm:$0xf]  ;;  %v8285_v45 = vld [vmem:[%s7678_s7 + $0xb4] sm:$0xf] }
  0xfb   : > { %v8243_v12 = vsel %vm6826_vm5, %v3059_v53, %v3060_v35  ;;  %6142 = vmatprep.subr.bf16.mxu1 %v6381_v37  ;;  %v8256_v53 = vld [vmem:[%s7678_s7 + $0xa8] sm:$0xf]  ;;  %v9591_v35 = vcombine.low %v7955_v58, %v7963_v42  ;;  %v9593_v42 = vcombine.low %v8008_v1, %v8012_v55  ;;  %v8274_v58 = vpop.f32.mrf.mxu0  ;;  %9595 = vst [vmem:[#allocation51_spill] sm:$0xff] %v8278_v29  ;;  %v8282_v26 = vrot.slane %v4129_v52, 5  ;;  %v8290_v8 = vld [vmem:[%s7678_s7 + $0xb8] sm:$0xf] }
  0xfc   : > { %6114 = vmatprep.mubr.bf16.mxu0 %v9589_v46  ;;  %6191 = vmatpush3.bf16.msra.mxu0 %v6382_v4  ;;  %v8261_v44 = vpop.f32.mrf.mxu1  ;;  %v3817_v4 = vshll.u32 %v7703_v21, 16  ;;  %9594 = vst [vmem:[#allocation50_spill] sm:$0xff] %v8274_v58  ;;  %v8280_v46 = vrot.slane %v4123_v28, 5  ;;  %9598 = vst [vmem:[#allocation54_spill] sm:$0xff] %v8285_v45  ;;  %v4168_v1 = vshrl.u32 %v8285_v45, 16  ;;  %v9601_v55 = vshrl.u32 %v7700_v13, 16 }
  0xfd   : > { %6063 = vmatmul.mubr.bf16.gmra.mxu1 %v9591_v35  ;;  %9592 = vst [vmem:[#allocation49_spill] sm:$0xff] %v8261_v44  ;;  %6192 = vmatprep.subr.bf16.mxu0 %v6386_v0  ;;  %9597 = vst [vmem:[#allocation53_spill] sm:$0xff] %v8282_v26  ;;  %v8287_v44 = vrot.slane %v4133_v3, 4  ;;  %v9602_v40 = vshll.u32 %v7700_v13, 16  ;;  %v4177_v3 = vshll.u32 %v8290_v8, 16  ;;  %v9604_v28 = vshrl.u32 %v7703_v21, 16  ;;  %v8316_v58 = vpop.f32.mrf.mxu0 }
  0xfe   : > { %6066 = vmatprep.mubr.bf16.mxu1 %v9593_v42  ;;  %9596 = vst [vmem:[#allocation52_spill] sm:$0xff] %v8280_v46  ;;  %6143 = vmatpush3.bf16.msra.mxu1 %v6381_v37  ;;  %9600 = vst [vmem:[#allocation56_spill] sm:$0xff] %v8290_v8  ;;  %v3810_v42 = vrot.slane %v9601_v55, 4  ;;  %v4171_v37 = vshll.u32 %v8285_v45, 16  ;;  %v8304_v26 = vpop.f32.mrf.mxu1  ;;  %v9605_v29 = vcombine.low %v7994_v36, %v8004_v24  ;;  %v4181_v46 = vshrl.u32 %v8290_v8, 16 }
  0xff   : > { %9599 = vst [vmem:[#allocation55_spill] sm:$0xff] %v8287_v44  ;;  %6144 = vmatprep.subr.bf16.mxu1 %v6385_v27  ;;  %v3813_v35 = vrot.slane %v9602_v40, 5  ;;  %v8302_v44 = vld [vmem:[%s7678_s7 + $0x8] sm:$0x1]  ;;  %9603 = vst [vmem:[#allocation57_spill] sm:$0xff] %v8304_v26  ;;  %v8309_v40 = vrot.slane %v3817_v4, 5 }
 0x100   : > { %6193 = vmatpush3.bf16.msra.mxu0 %v6386_v0  ;;  %v3823_v52 = vrot.slane %v9604_v28, 4  ;;  %9606 = vst [vmem:[#allocation58_spill] sm:$0xff] %v8316_v58  ;;  %v3410_v4 = vld [vmem:[%s7678_s7 + $0x14] sm:$0x1]  ;;  %v9607_v28 = vcombine.low %v8053_v57, %v8061_v23  ;;  %v8327_v5 = vrot.slane %v4168_v1, 4  ;;  %v3827_v58 = vshll.u32 %v8302_v44, 16  ;;  %v8340_v1 = vpop.f32.mrf.mxu1 }
 0x101   : > { %v3865_v0 = vshll.u32 %v7768_v56, 16  ;;  %v8331_v36 = vrot.slane %v4171_v37, 5  ;;  %v8333_v26 = vrot.slane %v4177_v3, 5  ;;  %v5518_v55 = vrot.slane %v7700_v13, 9  ;;  %9612 = vst [vmem:[#allocation62_spill] sm:$0xff] %v8340_v1  ;;  %v9614_v37 = vld [vmem:[#allocation4_spill] sm:$0xff] }
 0x102   : > { %6115 = vmatmul.mubr.bf16.gmra.mxu0 %v9605_v29  ;;  %6145 = vmatpush3.bf16.msra.mxu1 %v6385_v27  ;;  %9608 = vst [vmem:[#allocation59_spill] sm:$0xff] %v8327_v5  ;;  %v3814_v29 = vor.u32 %v3813_v35, %v3810_v42  ;;  %v4531_v27 = vrot.slane %v7703_v21, 5  ;;  %v9611_v57 = vcombine.low %v8045_v59, %v8049_v34  ;;  %v8350_v21 = vpop.f32.mrf.mxu0  ;;  %v8352_v5 = vrot.slane %v4181_v46, 4 }
 0x103   : > { %6118 = vmatprep.mubr.bf16.mxu0 %v9607_v28  ;;  %9609 = vst [vmem:[#allocation60_spill] sm:$0xff] %v8331_v36  ;;  %9610 = vst [vmem:[#allocation61_spill] sm:$0xff] %v8333_v26  ;;  %v3824_v42 = vor.u32 %v3823_v52, %v8309_v40  ;;  %v9613_v28 = vld [vmem:[#allocation7_spill] sm:$0xff]  ;;  %v3851_v26 = vshll.u32 %v3410_v4, 16  ;;  %v9616_v13 = vcombine.low %v8102_v9, %v8137_v38  ;;  %v4534_v59 = vrot.slane %v8302_v44, 5 }
 0x104   : > { %v9615_v36 = vor.u32 %v9613_v28, %v9614_v37  ;;  %9617 = vst [vmem:[#allocation7_spill] sm:$0xff] %v8350_v21  ;;  %9618 = vst [vmem:[#allocation4_spill] sm:$0xff] %v8352_v5  ;;  %v9620_v52 = vshll.u32 %v7765_v15, 16  ;;  %v3815_v28 = vrot.slane %v3814_v29, 4  ;;  %v3413_v37 = vld [vmem:[%s7678_s7 + $0x20] sm:$0x1]  ;;  %v8366_v46 = vsel %vm6826_vm5, %v5518_v55, %v4531_v27 }
 0x105   : > { %6067 = vmatmul.mubr.bf16.gmra.mxu1 %v9611_v57  ;;  %v9619_v57 = vshrl.u32 %v7765_v15, 16  ;;  %v8360_v1 = vrot.slane %v3865_v0, 5  ;;  %v9621_v9 = vshrl.u32 %v7768_v56, 16  ;;  %v4533_v44 = vrot.slane %v4531_v27, 4  ;;  %v9623_v5 = vld [vmem:[#allocation28_spill] sm:$0xff] }
 0x106   : > { %v3839_v3 = vrot.slane %v9615_v36, 4  ;;  %6070 = vmatprep.mubr.bf16.mxu1 %v9616_v13  ;;  %v3861_v35 = vrot.slane %v9620_v52, 5  ;;  %v3829_v36 = vrot.slane %v3827_v58, 5  ;;  %v9622_v13 = vld [vmem:[#allocation29_spill] sm:$0xff]  ;;  %v4545_v24 = vrot.slane %v7768_v56, 5  ;;  %v8372_v52 = vpop.f32.mrf.mxu1 }
 0x107   : > { %v3858_v34 = vrot.slane %v9619_v57, 4  ;;  %v3871_v38 = vrot.slane %v9621_v9, 4  ;;  %v9624_v57 = vor.u32 %v9622_v13, %v9623_v5  ;;  %9625 = vst [vmem:[#allocation29_spill] sm:$0xff] %v8372_v52  ;;  %v3825_v58 = vrot.slane %v3824_v42, 4  ;;  %v9629_v52 = vld [vmem:[#allocation11_spill] sm:$0xff] }
 0x108   : > { %v3844_v29 = vsel %vm6517_vm2, %v3839_v3, %v9623_v5  ;;  %v3853_v23 = vrot.slane %v3851_v26, 5  ;;  %v4541_v9 = vrot.slane %v3410_v4, 5  ;;  %v9627_v55 = vcombine.low %v8094_v16, %v8108_v50  ;;  %v8381_v27 = vpop.f32.mrf.mxu0  ;;  %v9631_v26 = vld [vmem:[#allocation5_spill] sm:$0xff]  ;;  %v9633_v3 = vld [vmem:[#allocation27_spill] sm:$0xff] }
 0x109   : > { %v3849_v21 = vrot.slane %v9624_v57, 4  ;;  %v3862_v13 = vor.u32 %v3861_v35, %v3858_v34  ;;  %v3875_v57 = vshll.u32 %v3413_v37, 16  ;;  %v5520_v56 = vrot.slane %v7765_v15, 9  ;;  %v9635_v34 = vld [vmem:[#allocation10_spill] sm:$0xff] }
 0x10a   : > { %6119 = vmatmul.mubr.bf16.gmra.mxu0 %v9627_v55  ;;  %v3886_v42 = vor.u32 %v9629_v52, %v9628_v30  ;;  %v3820_v5 = vsel %vm6517_vm2, %v3815_v28, %v8309_v40  ;;  %v9632_v4 = vrot.slane %v9631_v26, 5  ;;  %v9634_v55 = vrot.slane %v9633_v3, 9  ;;  %v9636_v30 = vld [vmem:[#allocation12_spill] sm:$0xff]  ;;  %v9639_v3 = vld [vmem:[#allocation3_spill] sm:$0xff] }
 0x10b   : > { %6122 = vmatprep.mubr.bf16.mxu0 %v9630_v32  ;;  %v3872_v15 = vor.u32 %v3871_v38, %v8360_v1  ;;  %v3896_v52 = vor.u32 %v9636_v30, %v9635_v34  ;;  %v8405_v32 = vsel %vm6826_vm5, %v4533_v44, %v4534_v59  ;;  %v4547_v16 = vrot.slane %v4545_v24, 4 }
 0x10c   : > { %v8398_v35 = vsel %vm6826_vm5, %v9634_v55, %v9632_v4  ;;  %v4548_v50 = vrot.slane %v3413_v37, 5  ;;  %v3899_v40 = vshll.u32 %v3416_v10, 16  ;;  %v9637_v28 = vcombine.low %v8188_v20, %v8209_v39  ;;  %v8425_v20 = vpop.f32.mrf.mxu0 }
 0x10d   : > { %v8410_v26 = vpop.f32.mrf.mxu1  ;;  %v3830_v4 = vsel %vm6517_vm2, %v3825_v58, %v3829_v36  ;;  %v3854_v38 = vsel %vm6517_vm2, %v3849_v21, %v3853_v23  ;;  %v8419_v59 = vsel %vm6826_vm5, %v9639_v3, %v4541_v9  ;;  %v3913_v37 = vshll.u32 %v7839_v48, 16  ;;  %v9642_v3 = vld [vmem:[#allocation6_spill] sm:$0xff] }
 0x10e   : > { %6071 = vmatmul.mubr.bf16.gmra.mxu1 %v9637_v28  ;;  %9638 = vst [vmem:[#allocation28_spill] sm:$0xff] %v8410_v26  ;;  %v9640_v44 = vcombine.low %v8239_v11, %v8243_v12  ;;  %v3863_v39 = vrot.slane %v3862_v13, 4  ;;  %v3877_v55 = vrot.slane %v3875_v57, 5  ;;  %v8429_v36 = vsel %vm6826_vm5, %v5520_v56, %v4545_v24 }
 0x10f   : > { %v3887_v23 = vrot.slane %v3886_v42, 4  ;;  %v3873_v21 = vrot.slane %v3872_v15, 4  ;;  %v3897_v58 = vrot.slane %v3896_v52, 4  ;;  %v9641_v9 = vrot.slane %v7789_v2, 5  ;;  %v8441_v24 = vpop.f32.mrf.mxu1 }
 0x110   : > { %6074 = vmatprep.mubr.bf16.mxu1 %v9640_v44  ;;  %v4555_v28 = vrot.slane %v3416_v10, 5  ;;  %v8435_v11 = vsel %vm6826_vm5, %v4547_v16, %v4548_v50  ;;  %v3901_v12 = vrot.slane %v3899_v40, 5  ;;  %v9643_v44 = vshrl.u32 %v9642_v3, 16  ;;  %9645 = vst [vmem:[#allocation2_spill] sm:$0xff] %v8441_v24  ;;  %v8448_v10 = vld [vmem:[%s7678_s7 + $0x38] sm:$0x1]  ;;  %v8457_v40 = vpop.f32.mrf.mxu0 }
 0x111   : > { %v4554_v30 = vrot.slane %v9641_v9, 4  ;;  %v9644_v57 = vshll.u32 %v9642_v3, 16  ;;  %v5550_v56 = vcombine.low %v8366_v46, %v8405_v32  ;;  %v8445_v42 = vcombine.low %v3844_v29, %v3854_v38  ;;  %v9649_v38 = vld [vmem:[#allocation8_spill] sm:$0xff]  ;;  %v8536_v24 = vld [vmem:[%s7678_s7 + $0x5c] sm:$0x1] }
 0x112   : > { %v3906_v13 = vrot.slane %v9643_v44, 4  ;;  %v8450_v15 = vrot.slane %v3913_v37, 5  ;;  %v9646_v50 = vshrl.u32 %v7839_v48, 16  ;;  %v9647_v52 = vcombine.low %v8216_v25, %v8219_v47 }
 0x113   : > { %v3909_v26 = vrot.slane %v9644_v57, 5  ;;  %v8459_v9 = vcombine.low %v3820_v5, %v3830_v4  ;;  %v3868_v29 = vsel %vm6517_vm2, %v3863_v39, %v8360_v1  ;;  %v9648_v32 = vrot.slane %v7789_v2, 5  ;;  %v8486_v2 = vld [vmem:[%s7678_s7 + $0x44] sm:$0x1] }
 0x114   : > { %v3919_v16 = vrot.slane %v9646_v50, 4  ;;  %6123 = vmatmul.mubr.bf16.gmra.mxu0 %v9647_v52  ;;  %v9650_v37 = vrot.slane %v9649_v38, 9  ;;  %v9651_v57 = vcombine.low %v8256_v53, %v8268_v7  ;;  %v3878_v5 = vsel %vm6517_vm2, %v3873_v21, %v3877_v55 }
 0x115   : > { %v8483_v1 = vsel %vm6826_vm5, %v4554_v30, %v4555_v28  ;;  %v3961_v39 = vshll.u32 %v7905_v22, 16  ;;  %v3892_v50 = vsel %vm6517_vm2, %v3887_v23, %v9635_v34  ;;  %v3902_v52 = vsel %vm6517_vm2, %v3897_v58, %v3901_v12  ;;  %v8498_v30 = vpop.f32.mrf.mxu1  ;;  %v9655_v34 = vld [vmem:[#allocation13_spill] sm:$0xff]  ;;  %v8505_v58 = vpop.f32.mrf.mxu0 }
 0x116   : > { %v8472_v44 = vsel %vm6826_vm5, %v9650_v37, %v9648_v32  ;;  %6126 = vmatprep.mubr.bf16.mxu0 %v9651_v57  ;;  %v3910_v32 = vor.u32 %v3909_v26, %v3906_v13  ;;  %v3923_v55 = vshll.u32 %v8448_v10, 16  ;;  %v9652_v21 = vcombine.low %v8098_v19, %v8120_v41  ;;  %9653 = vst [vmem:[#allocation9_spill] sm:$0xff] %v8498_v30  ;;  %v9654_v57 = vld [vmem:[#allocation14_spill] sm:$0xff]  ;;  %v9657_v12 = vld [vmem:[#allocation17_spill] sm:$0xff]  ;;  %v9658_v13 = vld [vmem:[#allocation16_spill] sm:$0xff] }
 0x117   : > { %v3920_v28 = vor.u32 %v3919_v16, %v8450_v15  ;;  %v5522_v38 = vrot.slane %v9642_v3, 9  ;;  %v4559_v37 = vrot.slane %v7839_v48, 5  ;;  %v3934_v23 = vor.u32 %v9655_v34, %v9654_v57  ;;  %v3425_v41 = vld [vmem:[%s7678_s7 + $0x50] sm:$0x1]  ;;  %v8529_v46 = vpop.f32.mrf.mxu1 }
 0x118   : > { %6075 = vmatmul.mubr.bf16.gmra.mxu1 %v9652_v21  ;;  %v9656_v26 = vcombine.low %v8148_v60, %v8171_v49  ;;  %v8510_v19 = vcombine.low %v3868_v29, %v3878_v5  ;;  %v3944_v3 = vor.u32 %v9658_v13, %v9657_v12  ;;  %v3947_v48 = vshll.u32 %v8486_v2, 16  ;;  %9662 = vst [vmem:[#allocation11_spill] sm:$0xff] %v8529_v46 }
 0x119   : > { %v9659_v16 = vshrl.u32 %v7893_v31, 16  ;;  %v9660_v57 = vshll.u32 %v7893_v31, 16  ;;  %v8521_v4 = vrot.slane %v3961_v39, 5  ;;  %v9661_v60 = vshrl.u32 %v7905_v22, 16 }
 0x11a   : > { %6078 = vmatprep.mubr.bf16.mxu1 %v9656_v26  ;;  %v8525_v29 = vcombine.low %v3892_v50, %v3902_v52  ;;  %v3911_v5 = vrot.slane %v3910_v32, 4  ;;  %v3925_v26 = vrot.slane %v3923_v55, 5  ;;  %v4562_v13 = vrot.slane %v8448_v10, 5  ;;  %v8538_v25 = vpop.f32.mrf.mxu0 }
 0x11b   : > { %v3954_v21 = vrot.slane %v9659_v16, 4  ;;  %v3957_v34 = vrot.slane %v9660_v57, 5  ;;  %v3967_v49 = vrot.slane %v9661_v60, 4  ;;  %v3921_v30 = vrot.slane %v3920_v28, 4 }
 0x11c   : > { %v8533_v16 = vsel %vm6826_vm5, %v5522_v38, %v4559_v37  ;;  %v4561_v57 = vrot.slane %v4559_v37, 4  ;;  %v3935_v39 = vrot.slane %v3934_v23, 4  ;;  %v9663_v50 = vcombine.low %v8285_v45, %v8290_v8  ;;  %v8548_v46 = vpop.f32.mrf.mxu0  ;;  %v9667_v8 = vld [vmem:[#allocation19_spill] sm:$0xff] }
 0x11d   : > { %v3945_v52 = vrot.slane %v3944_v3, 4  ;;  %v3949_v10 = vrot.slane %v3947_v48, 5  ;;  %v9664_v32 = vrot.slane %v7856_v54, 5  ;;  %v4573_v28 = vrot.slane %v7905_v22, 5  ;;  %v9665_v3 = vld [vmem:[#allocation15_spill] sm:$0xff]  ;;  %v9666_v48 = vld [vmem:[#allocation18_spill] sm:$0xff] }
 0x11e   : > { %6127 = vmatmul.mubr.bf16.gmra.mxu0 %v9663_v50  ;;  %v4569_v38 = vrot.slane %v8486_v2, 5  ;;  %v3958_v37 = vor.u32 %v3957_v34, %v3954_v21  ;;  %v3968_v23 = vor.u32 %v3967_v49, %v8521_v4  ;;  %v3971_v60 = vshll.u32 %v3425_v41, 16 }
 0x11f   : > { %v4568_v55 = vrot.slane %v9664_v32, 4  ;;  %6194 = vmatprep.mubr.bf16.mxu0 %v5550_v56  ;;  %v3916_v50 = vsel %vm6517_vm2, %v3911_v5, %v8450_v15  ;;  %v3982_v45 = vor.u32 %v9666_v48, %v9665_v3  ;;  %v9668_v32 = vld [vmem:[#allocation20_spill] sm:$0xff]  ;;  %v3995_v22 = vshll.u32 %v8536_v24, 16  ;;  %v8558_v56 = vpop.f32.mrf.mxu1  ;;  %v9751_v0 = vld [vmem:[#allocation11_spill] sm:$0xff] }
 0x120   : > { %v3992_v47 = vor.u32 %v9668_v32, %v9667_v8  ;;  %v9669_v2 = vcombine.low %v8175_v63, %v8200_v61  ;;  %v3926_v21 = vsel %vm6517_vm2, %v3921_v30, %v3925_v26  ;;  %v8567_v15 = vsel %vm6826_vm5, %v4561_v57, %v4562_v13  ;;  %v8580_v61 = vpop.f32.mrf.mxu0 }
 0x121   : > { %v3940_v34 = vsel %vm6517_vm2, %v3935_v39, %v9657_v12  ;;  %v9670_v49 = vrot.slane %v7856_v54, 5  ;;  %v9671_v5 = vrot.slane %v7848_v18, 9  ;;  %v3950_v63 = vsel %vm6517_vm2, %v3945_v52, %v3949_v10  ;;  %v8586_v12 = vpop.f32.mrf.mxu1 }
 0x122   : > { %6079 = vmatmul.mubr.bf16.gmra.mxu1 %v9669_v2  ;;  %v5524_v30 = vrot.slane %v7893_v31, 9  ;;  %v4575_v26 = vrot.slane %v4573_v28, 4  ;;  %v4576_v13 = vrot.slane %v3425_v41, 5  ;;  %v8590_v18 = vsel %vm6826_vm5, %v4568_v55, %v4569_v38  ;;  %v8592_v48 = vpop.f32.mrf.mxu0 }
 0x123   : > { %v8578_v3 = vsel %vm6826_vm5, %v9671_v5, %v9670_v49  ;;  %6146 = vmatprep.mubr.bf16.mxu1 %v8459_v9  ;;  %v3959_v54 = vrot.slane %v3958_v37, 4  ;;  %v3969_v57 = vrot.slane %v3968_v23, 4  ;;  %v3973_v39 = vrot.slane %v3971_v60, 5  ;;  %v8595_v31 = vpop.f32.mrf.mxu1 }
 0x124   : > { %v3983_v9 = vrot.slane %v3982_v45, 4  ;;  %v3993_v32 = vrot.slane %v3992_v47, 4  ;;  %v3997_v2 = vrot.slane %v3995_v22, 5  ;;  %v4009_v52 = vshll.u32 %v7981_v14, 16  ;;  %9672 = vst [vmem:[#allocation5_spill] sm:$0xff] %v8595_v31  ;;  %v5908_v23 = vpop.f32.mrf.mxu0 }
 0x125   : > { %v8597_v41 = vcombine.low %v3916_v50, %v3926_v21  ;;  %v5554_v10 = vcombine.low %v8533_v16, %v8567_v15  ;;  %v9673_v55 = vrot.slane %v7928_v33, 5  ;;  %v4583_v37 = vrot.slane %v8536_v24, 5  ;;  %v8616_v16 = vld [vmem:[%s7678_s7 + $0x68] sm:$0x1]  ;;  %v8622_v15 = vpop.f32.mrf.mxu1 }
 0x126   : > { %v9674_v45 = vcombine.low %v8398_v35, %v8419_v59  ;;  %v8609_v47 = vsel %vm6826_vm5, %v5524_v30, %v4573_v28  ;;  %v8613_v60 = vsel %vm6826_vm5, %v4575_v26, %v4576_v13  ;;  %v9675_v50 = vshrl.u32 %v7978_v43, 16  ;;  %9677 = vst [vmem:[#allocation27_spill] sm:$0xff] %v8622_v15  ;;  %v1688_v30 = vpop.f32.mrf.mxu0  ;;  %v8646_v13 = vld [vmem:[%s7678_s7 + $0x74] sm:$0x1] }
 0x127   : > { %v4582_v38 = vrot.slane %v9673_v55, 4  ;;  %v9676_v24 = vshll.u32 %v7978_v43, 16  ;;  %v9678_v35 = vcombine.low %v8429_v36, %v8435_v11  ;;  %v8627_v59 = vcombine.low %v3940_v34, %v3950_v63  ;;  %v5860_v55 = vpop.f32.mrf.mxu1 }
 0x128   : > { %6195 = vmatmul.mubr.bf16.vlgmr.msra.gmra.mxu0 %v9674_v45  ;;  %v4002_v22 = vrot.slane %v9675_v50, 4  ;;  %v3964_v49 = vsel %vm6517_vm2, %v3959_v54, %v8521_v4  ;;  %v3974_v5 = vsel %vm6517_vm2, %v3969_v57, %v3973_v39  ;;  %v3988_v26 = vsel %vm6517_vm2, %v3983_v9, %v9667_v8 }
 0x129   : > { %v4005_v21 = vrot.slane %v9676_v24, 5  ;;  %6198 = vmatprep.mubr.bf16.mxu0 %v9678_v35  ;;  %v3998_v36 = vsel %vm6517_vm2, %v3993_v32, %v3997_v2  ;;  %v8641_v11 = vrot.slane %v4009_v52, 5  ;;  %v9679_v34 = vshrl.u32 %v7981_v14, 16  ;;  %v9682_v32 = vld [vmem:[#allocation23_spill] sm:$0xff]  ;;  %v1267_v45 = vpop.f32.mrf.mxu1  ;;  %v9684_v35 = vld [vmem:[#allocation32_spill] sm:$0xff] }
 0x12a   : > { %6147 = vmatmul.mubr.bf16.vlgmr.msra.gmra.mxu1 %v8445_v42  ;;  %v9680_v54 = vrot.slane %v7928_v33, 5  ;;  %v9681_v8 = vrot.slane %v7919_v17, 9  ;;  %v8661_v39 = vsel %vm6826_vm5, %v4582_v38, %v4583_v37  ;;  %v4019_v9 = vshll.u32 %v8616_v16, 16  ;;  %v5909_v42 = vpop.f32.mrf.mxu0  ;;  %v9683_v24 = vld [vmem:[#allocation31_spill] sm:$0xff]  ;;  %v9686_v37 = vld [vmem:[#allocation36_spill] sm:$0xff] }
 0x12b   : > { %v4015_v63 = vrot.slane %v9679_v34, 4  ;;  %v1276_v2 = vadd.f32 %v5860_v55, %v9682_v32  ;;  %6150 = vmatprep.mubr.bf16.mxu1 %v8510_v19  ;;  %v8666_v52 = vcombine.low %v3964_v49, %v3974_v5  ;;  %v4006_v33 = vor.u32 %v4005_v21, %v4002_v22  ;;  %v9685_v38 = vld [vmem:[#allocation35_spill] sm:$0xff]  ;;  %v9688_v32 = vld [vmem:[#allocation37_spill] sm:$0xff]  ;;  %v5861_v21 = vpop.f32.mrf.mxu1 }
 0x12c   : > { %v8657_v57 = vsel %vm6826_vm5, %v9681_v8, %v9680_v54  ;;  %v4587_v17 = vrot.slane %v7981_v14, 5  ;;  %v8669_v50 = vcombine.low %v3988_v26, %v3998_v36  ;;  %v4030_v34 = vor.u32 %v9684_v35, %v9683_v24  ;;  %v1691_v49 = vpop.f32.mrf.mxu0  ;;  %v9689_v24 = vld [vmem:[#allocation33_spill] sm:$0xff] }
 0x12d   : > { %v4040_v54 = vor.u32 %v9686_v37, %v9685_v38  ;;  %v4043_v8 = vshll.u32 %v8646_v13, 16  ;;  %v8676_v55 = vadd.f32 %v5908_v23, %v1276_v2  ;;  %v1268_v19 = vadd.f32 %v1267_v45, %v9688_v32  ;;  %v9690_v23 = vld [vmem:[#allocation25_spill] sm:$0xff] }
 0x12e   : > { %v4016_v14 = vor.u32 %v4015_v63, %v8641_v11  ;;  %v4021_v5 = vrot.slane %v4019_v9, 5  ;;  %v5526_v26 = vrot.slane %v7978_v43, 9  ;;  %v4590_v36 = vrot.slane %v8616_v16, 5  ;;  %v5912_v4 = vpop.f32.mrf.mxu0  ;;  %v1270_v63 = vpop.f32.mrf.mxu1 }
 0x12f   : > { %9687 = vst [vmem:[#allocation10_spill] sm:$0xff] %v8676_v55  ;;  %v4057_v35 = vshll.u32 %v9689_v24, 16  ;;  %v8685_v37 = vadd.f32 %v1688_v30, %v1268_v19  ;;  %v1279_v2 = vadd.f32 %v5861_v21, %v9690_v23  ;;  %v9691_v45 = vcombine.low %v8472_v44, %v8483_v1  ;;  %v9692_v55 = vld [vmem:[#allocation22_spill] sm:$0xff]  ;;  %v9694_v30 = vld [vmem:[#allocation41_spill] sm:$0xff] }
 0x130   : > { %v4007_v32 = vrot.slane %v4006_v33, 4  ;;  %v4589_v22 = vrot.slane %v4587_v17, 4  ;;  %v4031_v9 = vrot.slane %v4030_v34, 4  ;;  %v4041_v28 = vrot.slane %v4040_v54, 4  ;;  %v1704_v21 = vpop.f32.mrf.mxu0  ;;  %v5864_v1 = vpop.f32.mrf.mxu1  ;;  %v9695_v33 = vld [vmem:[#allocation30_spill] sm:$0xff] }
 0x131   : > { %6199 = vmatmul.mubr.bf16.gmra.mxu0 %v9691_v45  ;;  %v4045_v43 = vrot.slane %v4043_v8, 5  ;;  %v9693_v16 = vrot.slane %v9692_v55, 5  ;;  %v8693_v31 = vadd.f32 %v5909_v42, %v1279_v2  ;;  %v1271_v19 = vadd.f32 %v1270_v63, %v9694_v30 }
 0x132   : > { %6202 = vmatprep.mubr.bf16.mxu0 %v5554_v10  ;;  %v4017_v23 = vrot.slane %v4016_v14, 4  ;;  %v4597_v44 = vrot.slane %v8646_v13, 5  ;;  %6151 = vmatmul.mubr.bf16.gmra.mxu1 %v8525_v29  ;;  %v9696_v10 = vshrl.u32 %v9695_v33, 16  ;;  %v9697_v54 = vshll.u32 %v9695_v33, 16  ;;  %v5913_v30 = vpop.f32.mrf.mxu0 }
 0x133   : > { %v4596_v15 = vrot.slane %v9693_v16, 4  ;;  %v8702_v45 = vrot.slane %v4057_v35, 5  ;;  %v9698_v42 = vshrl.u32 %v9689_v24, 16  ;;  %v8706_v63 = vadd.f32 %v1691_v49, %v1271_v19  ;;  %v9699_v16 = vld [vmem:[#allocation47_spill] sm:$0xff]  ;;  %6154 = vmatprep.mubr.bf16.mxu1 %v8597_v41  ;;  %v8719_v35 = vld [vmem:[%s7678_s7 + $0x80] sm:$0x1] }
 0x134   : > { %v4050_v34 = vrot.slane %v9696_v10, 4  ;;  %v4053_v8 = vrot.slane %v9697_v54, 5  ;;  %v1292_v14 = vadd.f32 %v5864_v1, %v9699_v16  ;;  %v8712_v29 = vsel %vm6826_vm5, %v5526_v26, %v4587_v17  ;;  %v1283_v10 = vpop.f32.mrf.mxu1  ;;  %v9701_v19 = vld [vmem:[#allocation21_spill] sm:$0xff]  ;;  %v9703_v54 = vld [vmem:[#allocation50_spill] sm:$0xff]  ;;  %v8751_v16 = vld [vmem:[%s7678_s7 + $0x8c] sm:$0x1] }
 0x135   : > { %v4063_v2 = vrot.slane %v9698_v42, 4  ;;  %v8716_v13 = vsel %vm6826_vm5, %v4589_v22, %v4590_v36  ;;  %v4012_v49 = vsel %vm6517_vm2, %v4007_v32, %v8641_v11  ;;  %v4036_v41 = vsel %vm6517_vm2, %v4031_v9, %v9685_v38  ;;  %v1707_v11 = vpop.f32.mrf.mxu0 }
 0x136   : > { %v4046_v17 = vsel %vm6517_vm2, %v4041_v28, %v4045_v43  ;;  %v9700_v26 = vrot.slane %v9692_v55, 5  ;;  %v9702_v22 = vrot.slane %v9701_v19, 9  ;;  %v8737_v1 = vadd.f32 %v5912_v4, %v1292_v14  ;;  %v5865_v28 = vpop.f32.mrf.mxu1  ;;  %v9708_v19 = vld [vmem:[#allocation43_spill] sm:$0xff] }
 0x137   : > { %v1284_v42 = vadd.f32 %v1283_v10, %v9703_v54  ;;  %v4022_v32 = vsel %vm6517_vm2, %v4017_v23, %v4021_v5  ;;  %v8744_v38 = vsel %vm6826_vm5, %v4596_v15, %v4597_v44  ;;  %v5558_v55 = vcombine.low %v8712_v29, %v8716_v13  ;;  %v9704_v10 = vld [vmem:[#allocation58_spill] sm:$0xff]  ;;  %v5916_v5 = vpop.f32.mrf.mxu0  ;;  %v9711_v54 = vld [vmem:[#allocation48_spill] sm:$0xff] }
 0x138   : > { %v8735_v36 = vsel %vm6826_vm5, %v9702_v22, %v9700_v26  ;;  %v4054_v9 = vor.u32 %v4053_v8, %v4050_v34  ;;  %v4064_v43 = vor.u32 %v4063_v2, %v8702_v45  ;;  %v4067_v4 = vshll.u32 %v8719_v35, 16  ;;  %v1286_v34 = vpop.f32.mrf.mxu1  ;;  %v9707_v13 = vld [vmem:[#allocation26_spill] sm:$0xff] }
 0x139   : > { %v8753_v14 = vadd.f32 %v1704_v21, %v1284_v42  ;;  %v1295_v26 = vadd.f32 %v5865_v28, %v9704_v10  ;;  %v9705_v15 = vcombine.low %v8578_v3, %v8590_v18  ;;  %v8759_v23 = vcombine.low %v4036_v41, %v4046_v17  ;;  %v9709_v18 = vld [vmem:[#allocation7_spill] sm:$0xff]  ;;  %v1720_v17 = vpop.f32.mrf.mxu0 }
 0x13a   : > { %v5528_v44 = vrot.slane %v9695_v33, 9  ;;  %v9706_v8 = vcombine.low %v8609_v47, %v8613_v60  ;;  %v5502_v2 = vcombine.low %v4012_v49, %v4022_v32  ;;  %v5559_v21 = vcombine.low %v8735_v36, %v8744_v38  ;;  %v9710_v33 = vld [vmem:[#allocation44_spill] sm:$0xff]  ;;  %v5868_v60 = vpop.f32.mrf.mxu1  ;;  %6155 = vmatmul.mubr.bf16.gmra.mxu1 %v8627_v59 }
 0x13b   : > { %6203 = vmatmul.mubr.bf16.gmra.mxu0 %v9705_v15  ;;  %v4601_v29 = vrot.slane %v9689_v24, 5  ;;  %v4078_v22 = vor.u32 %v9708_v19, %v9707_v13  ;;  %v8770_v3 = vadd.f32 %v5913_v30, %v1295_v26  ;;  %v1287_v41 = vadd.f32 %v1286_v34, %v9709_v18  ;;  %v5917_v26 = vpop.f32.mrf.mxu0  ;;  %6158 = vmatprep.mubr.bf16.mxu1 %v8666_v52 }
 0x13c   : > { %6206 = vmatprep.mubr.bf16.mxu0 %v9706_v8  ;;  %v4088_v42 = vor.u32 %v9711_v54, %v9710_v33  ;;  %v4091_v47 = vshll.u32 %v8751_v16, 16  ;;  %v4055_v49 = vrot.slane %v4054_v9, 4  ;;  %v4065_v32 = vrot.slane %v4064_v43, 4  ;;  %v1299_v8 = vpop.f32.mrf.mxu1 }
 0x13d   : > { %v4069_v28 = vrot.slane %v4067_v4, 5  ;;  %v4105_v24 = vshll.u32 %v8196_v6, 16  ;;  %v8778_v10 = vadd.f32 %v1707_v11, %v1287_v41  ;;  %v1308_v30 = vadd.f32 %v5868_v60, %v8381_v27  ;;  %v1723_v52 = vpop.f32.mrf.mxu0 }
 0x13e   : > { %v8784_v15 = vsel %vm6826_vm5, %v5528_v44, %v4601_v29  ;;  %v4604_v34 = vrot.slane %v8719_v35, 5  ;;  %v4603_v59 = vrot.slane %v4601_v29, 4  ;;  %v4079_v9 = vrot.slane %v4078_v22, 4  ;;  %v5869_v41 = vpop.f32.mrf.mxu1 }
 0x13f   : > { %v9712_v43 = vshrl.u32 %v8193_v51, 16  ;;  %v9713_v11 = vshll.u32 %v8193_v51, 16  ;;  %v8791_v19 = vadd.f32 %v5916_v5, %v1308_v30  ;;  %v1300_v27 = vadd.f32 %v1299_v8, %v8425_v20  ;;  %v5920_v30 = vpop.f32.mrf.mxu0 }
 0x140   : > { %v4089_v18 = vrot.slane %v4088_v42, 4  ;;  %v4093_v44 = vrot.slane %v4091_v47, 5  ;;  %v4060_v35 = vsel %vm6517_vm2, %v4055_v49, %v8702_v45  ;;  %v4070_v29 = vsel %vm6517_vm2, %v4065_v32, %v4069_v28  ;;  %v9716_v47 = vld [vmem:[#allocation38_spill] sm:$0xff]  ;;  %v3443_v32 = vld [vmem:[%s7678_s7 + $0x98] sm:$0x1]  ;;  %v1302_v28 = vpop.f32.mrf.mxu1 }
 0x141   : > { %v4098_v4 = vrot.slane %v9712_v43, 4  ;;  %v4101_v13 = vrot.slane %v9713_v11, 5  ;;  %v8799_v22 = vrot.slane %v4105_v24, 5  ;;  %v9714_v54 = vshrl.u32 %v8196_v6, 16  ;;  %v9719_v43 = vld [vmem:[#allocation24_spill] sm:$0xff] }
 0x142   : > { %v8803_v60 = vadd.f32 %v1720_v17, %v1300_v27  ;;  %v1311_v20 = vadd.f32 %v5869_v41, %v8457_v40  ;;  %v9715_v42 = vcombine.low %v8657_v57, %v8661_v39  ;;  %v9717_v8 = vrot.slane %v9716_v47, 5  ;;  %v1736_v27 = vpop.f32.mrf.mxu0  ;;  %6159 = vmatmul.mubr.bf16.gmra.mxu1 %v8669_v50 }
 0x143   : > { %v4111_v5 = vrot.slane %v9714_v54, 4  ;;  %v4611_v49 = vrot.slane %v8751_v16, 5  ;;  %v4605_v24 = vsel %vm6826_vm5, %v4603_v59, %v4604_v34  ;;  %v4084_v40 = vsel %vm6517_vm2, %v4079_v9, %v9710_v33  ;;  %v5872_v33 = vpop.f32.mrf.mxu1  ;;  %6162 = vmatprep.mubr.bf16.mxu1 %v5502_v2 }
 0x144   : > { %6207 = vmatmul.mubr.bf16.gmra.mxu0 %v9715_v42  ;;  %v4610_v45 = vrot.slane %v9717_v8, 4  ;;  %v9718_v17 = vmov %v9717_v8  ;;  %v9720_v57 = vrot.slane %v9719_v43, 9  ;;  %v4102_v11 = vor.u32 %v4101_v13, %v4098_v4 }
 0x145   : > { %6210 = vmatprep.mubr.bf16.mxu0 %v5558_v55  ;;  %v8826_v16 = vadd.f32 %v5917_v26, %v1311_v20  ;;  %v1303_v55 = vadd.f32 %v1302_v28, %v8505_v58  ;;  %v4094_v34 = vsel %vm6517_vm2, %v4089_v18, %v4093_v44  ;;  %v4615_v59 = vrot.slane %v8196_v6, 5  ;;  %v5921_v58 = vpop.f32.mrf.mxu0  ;;  %v1315_v18 = vpop.f32.mrf.mxu1 }
 0x146   : > { %v8824_v39 = vsel %vm6826_vm5, %v9720_v57, %v9718_v17  ;;  %v5504_v9 = vcombine.low %v4060_v35, %v4070_v29  ;;  %v4112_v41 = vor.u32 %v4111_v5, %v8799_v22  ;;  %v4115_v54 = vshll.u32 %v3443_v32, 16  ;;  %v9721_v35 = vld [vmem:[#allocation51_spill] sm:$0xff]  ;;  %v9722_v29 = vld [vmem:[#allocation52_spill] sm:$0xff] }
 0x147   : > { %v5530_v42 = vrot.slane %v8193_v51, 9  ;;  %v8835_v4 = vadd.f32 %v1723_v52, %v1303_v55  ;;  %v1324_v26 = vadd.f32 %v5872_v33, %v8538_v25  ;;  %v5560_v13 = vcombine.low %v8784_v15, %v4605_v24  ;;  %v1739_v2 = vpop.f32.mrf.mxu0  ;;  %v5873_v47 = vpop.f32.mrf.mxu1  ;;  %v3449_v33 = vld [vmem:[%s7678_s7 + $0xb0] sm:$0x1] }
 0x148   : > { %v8841_v6 = vsel %vm6826_vm5, %v4610_v45, %v4611_v49  ;;  %v8843_v50 = vcombine.low %v4084_v40, %v4094_v34  ;;  %v4103_v44 = vrot.slane %v4102_v11, 4  ;;  %v4126_v5 = vor.u32 %v9722_v29, %v9721_v35  ;;  %v9730_v35 = vld [vmem:[#allocation34_spill] sm:$0xff] }
 0x149   : > { %v4153_v51 = vshll.u32 %v8268_v7, 16  ;;  %v8848_v52 = vadd.f32 %v5920_v30, %v1324_v26  ;;  %v1316_v25 = vadd.f32 %v1315_v18, %v8548_v46  ;;  %v4617_v15 = vrot.slane %v4615_v59, 4  ;;  %v5924_v30 = vpop.f32.mrf.mxu0  ;;  %v3446_v46 = vld [vmem:[%s7678_s7 + $0xa4] sm:$0x1]  ;;  %v9727_v26 = vld [vmem:[#allocation55_spill] sm:$0xff] }
 0x14a   : > { %v4618_v20 = vrot.slane %v3443_v32, 5  ;;  %v5561_v8 = vcombine.low %v8824_v39, %v8841_v6  ;;  %v4113_v45 = vrot.slane %v4112_v41, 4  ;;  %v4117_v49 = vrot.slane %v4115_v54, 5  ;;  %v1318_v39 = vpop.f32.mrf.mxu1  ;;  %6163 = vmatmul.mubr.bf16.gmra.mxu1 %v8759_v23  ;;  %v9728_v6 = vld [vmem:[#allocation46_spill] sm:$0xff] }
 0x14b   : > { %v4616_v28 = vsel %vm6826_vm5, %v5530_v42, %v4615_v59  ;;  %v8855_v24 = vadd.f32 %v1736_v27, %v1316_v25  ;;  %v1327_v40 = vadd.f32 %v5873_v47, %v8580_v61  ;;  %v9723_v32 = vshrl.u32 %v8256_v53, 16  ;;  %v1752_v34 = vpop.f32.mrf.mxu0  ;;  %v9726_v42 = vld [vmem:[#allocation53_spill] sm:$0xff]  ;;  %6166 = vmatprep.mubr.bf16.mxu1 %v5504_v9 }
 0x14c   : > { %6211 = vmatmul.mubr.bf16.gmra.mxu0 %v5559_v21  ;;  %v9724_v43 = vshll.u32 %v8256_v53, 16  ;;  %v4108_v11 = vsel %vm6517_vm2, %v4103_v44, %v8799_v22  ;;  %v8869_v61 = vrot.slane %v4126_v5, 4  ;;  %v8871_v55 = vrot.slane %v4153_v51, 5  ;;  %v5876_v54 = vpop.f32.mrf.mxu1 }
 0x14d   : > { %v4146_v17 = vrot.slane %v9723_v32, 4  ;;  %6214 = vmatprep.mubr.bf16.mxu0 %v5560_v13  ;;  %v9725_v36 = vshrl.u32 %v8268_v7, 16  ;;  %v8875_v21 = vadd.f32 %v5921_v58, %v1327_v40  ;;  %v1319_v27 = vadd.f32 %v1318_v39, %v8592_v48  ;;  %v5925_v5 = vpop.f32.mrf.mxu0 }
 0x14e   : > { %v4149_v57 = vrot.slane %v9724_v43, 5  ;;  %v4619_v59 = vsel %vm6826_vm5, %v4617_v15, %v4618_v20  ;;  %v4629_v41 = vrot.slane %v8268_v7, 5  ;;  %v4118_v22 = vsel %vm6517_vm2, %v4113_v45, %v4117_v49  ;;  %v1331_v25 = vpop.f32.mrf.mxu1  ;;  %v9731_v49 = vld [vmem:[#allocation39_spill] sm:$0xff] }
 0x14f   : > { %v4159_v38 = vrot.slane %v9725_v36, 4  ;;  %v4136_v13 = vor.u32 %v9727_v26, %v9726_v42  ;;  %v4139_v58 = vshll.u32 %v3446_v46, 16  ;;  %v9729_v18 = vrot.slane %v9728_v6, 5  ;;  %v1755_v32 = vpop.f32.mrf.mxu0  ;;  %v3452_v6 = vld [vmem:[%s7678_s7 + $0xbc] sm:$0x1]  ;;  %s5577_s7 = sshll.u32 %s9842_s18, 8 }
 0x150   : > { %v8889_v44 = vadd.f32 %v1739_v2, %v1319_v27  ;;  %v1340_v29 = vadd.f32 %v5876_v54, %v9730_v35  ;;  %v4625_v7 = vrot.slane %v3446_v46, 5  ;;  %v4150_v51 = vor.u32 %v4149_v57, %v4146_v17  ;;  %v5877_v39 = vpop.f32.mrf.mxu1  ;;  %v9736_v54 = vld [vmem:[#allocation56_spill] sm:$0xff]  ;;  %v9737_v35 = vld [vmem:[#allocation42_spill] sm:$0xff]  ;;  %s9221_s17 = scalar_lea.vmem %s9382_s5, %s5577_s7 }
 0x151   : > { %v4624_v48 = vrot.slane %v9729_v18, 4  ;;  %v5562_v23 = vcombine.low %v4616_v28, %v4619_v59  ;;  %v4160_v15 = vor.u32 %v4159_v38, %v8871_v55  ;;  %v4163_v20 = vshll.u32 %v3449_v33, 16  ;;  %v9733_v28 = vld [vmem:[#allocation45_spill] sm:$0xff]  ;;  %v5928_v59 = vpop.f32.mrf.mxu0 }
 0x152   : > { %v5532_v47 = vrot.slane %v8256_v53, 9  ;;  %v8894_v45 = vadd.f32 %v5924_v30, %v1340_v29  ;;  %v1332_v40 = vadd.f32 %v1331_v25, %v9731_v49  ;;  %v4631_v2 = vrot.slane %v4629_v41, 4  ;;  %v9735_v30 = vld [vmem:[#allocation40_spill] sm:$0xff]  ;;  %v1334_v26 = vpop.f32.mrf.mxu1  ;;  %6167 = vmatmul.mubr.bf16.gmra.mxu1 %v8843_v50  ;;  %v9738_v25 = vld [vmem:[#allocation59_spill] sm:$0xff] }
 0x153   : > { %v4632_v43 = vrot.slane %v3449_v33, 5  ;;  %v5506_v36 = vcombine.low %v4108_v11, %v4118_v22  ;;  %v4137_v9 = vrot.slane %v4136_v13, 4  ;;  %v4141_v46 = vrot.slane %v4139_v58, 5  ;;  %v1768_v29 = vpop.f32.mrf.mxu0 }
 0x154   : > { %v9732_v17 = vmov %v9729_v18  ;;  %v9734_v57 = vrot.slane %v9733_v28, 9  ;;  %v8903_v53 = vadd.f32 %v1752_v34, %v1332_v40  ;;  %v1343_v27 = vadd.f32 %v5877_v39, %v9735_v30  ;;  %6215 = vmatmul.mubr.bf16.gmra.mxu0 %v5561_v8  ;;  %v9742_v39 = vld [vmem:[#allocation49_spill] sm:$0xff] }
 0x155   : > { %v4626_v33 = vsel %vm6826_vm5, %v4624_v48, %v4625_v7  ;;  %v4151_v11 = vrot.slane %v4150_v51, 4  ;;  %v4636_v22 = vrot.slane %v9736_v54, 5  ;;  %6218 = vmatprep.mubr.bf16.mxu0 %v5562_v23  ;;  %v4132_v13 = vsel %vm6517_vm2, %v8869_v61, %v9726_v42  ;;  %v5880_v51 = vpop.f32.mrf.mxu1  ;;  %v9739_v23 = vld [vmem:[#allocation60_spill] sm:$0xff]  ;;  %6170 = vmatprep.mubr.bf16.mxu1 %v5506_v36 }
 0x156   : > { %v4623_v38 = vsel %vm6826_vm5, %v9734_v57, %v9732_v17  ;;  %v4161_v58 = vrot.slane %v4160_v15, 4  ;;  %v4165_v34 = vrot.slane %v4163_v20, 5  ;;  %v8914_v18 = vadd.f32 %v5925_v5, %v1343_v27  ;;  %v9740_v15 = vld [vmem:[#allocation61_spill] sm:$0xff]  ;;  %v9741_v20 = vld [vmem:[#allocation4_spill] sm:$0xff] }
 0x157   : > { %v1335_v8 = vadd.f32 %v1334_v26, %v9737_v35  ;;  %v4630_v48 = vsel %vm6826_vm5, %v5532_v47, %v4629_v41  ;;  %v4633_v7 = vsel %vm6826_vm5, %v4631_v2, %v4632_v43  ;;  %v4142_v61 = vsel %vm6517_vm2, %v4137_v9, %v4141_v46  ;;  %v5929_v47 = vpop.f32.mrf.mxu0  ;;  %v1347_v43 = vpop.f32.mrf.mxu1 }
 0x158   : > { %v5563_v42 = vcombine.low %v4623_v38, %v4626_v33  ;;  %v4174_v5 = vor.u32 %v9739_v23, %v9738_v25  ;;  %v4184_v49 = vor.u32 %v9741_v20, %v9740_v15  ;;  %v1356_v41 = vadd.f32 %v5880_v51, %v9742_v39 }
 0x159   : > { %v8928_v40 = vadd.f32 %v1755_v32, %v1335_v8  ;;  %v4156_v50 = vsel %vm6517_vm2, %v4151_v11, %v8871_v55  ;;  %v4187_v2 = vshll.u32 %v3452_v6, 16  ;;  %v4166_v9 = vsel %vm6517_vm2, %v4161_v58, %v4165_v34  ;;  %v9743_v32 = vld [vmem:[#allocation57_spill] sm:$0xff]  ;;  %v1771_v30 = vpop.f32.mrf.mxu0  ;;  %v5881_v27 = vpop.f32.mrf.mxu1  ;;  %v9744_v55 = vld [vmem:[#allocation62_spill] sm:$0xff] }
 0x15a   : > { %v5564_v46 = vcombine.low %v4630_v48, %v4633_v7  ;;  %v4638_v17 = vrot.slane %v4636_v22, 4  ;;  %v4639_v28 = vrot.slane %v3452_v6, 5  ;;  %v8936_v57 = vadd.f32 %v5928_v59, %v1356_v41  ;;  %v9745_v6 = vld [vmem:[#allocation54_spill] sm:$0xff] }
 0x15b   : > { %v1348_v38 = vadd.f32 %v1347_v43, %v9743_v32  ;;  %v5507_v33 = vcombine.low %v4132_v13, %v4142_v61  ;;  %v4175_v36 = vrot.slane %v4174_v5, 4  ;;  %v4185_v54 = vrot.slane %v4184_v49, 4  ;;  %v5932_v35 = vpop.f32.mrf.mxu0  ;;  %v1350_v34 = vpop.f32.mrf.mxu1  ;;  %v9748_v5 = vld [vmem:[#allocation28_spill] sm:$0xff] }
 0x15c   : > { %v1359_v11 = vadd.f32 %v5881_v27, %v9744_v55  ;;  %6219 = vmatmul.mubr.bf16.gmra.mxu0 %v5563_v42  ;;  %v5508_v8 = vcombine.low %v4156_v50, %v4166_v9  ;;  %v4189_v58 = vrot.slane %v4187_v2, 5  ;;  %v9746_v59 = vrot.slane %v9745_v6, 9 }
 0x15d   : > { %v8939_v26 = vadd.f32 %v1768_v29, %v1348_v38  ;;  %6222 = vmatprep.mubr.bf16.mxu0 %v5564_v46  ;;  %v4640_v13 = vsel %vm6826_vm5, %v4638_v17, %v4639_v28  ;;  %v9747_v29 = vld [vmem:[#allocation29_spill] sm:$0xff]  ;;  %v1784_v61 = vpop.f32.mrf.mxu0  ;;  %v5884_v25 = vpop.f32.mrf.mxu1  ;;  %6171 = vmatmul.mubr.bf16.gmra.mxu1 %v5507_v33  ;;  %v4180_v42 = vsel %vm6517_vm2, %v4175_v36, %v9740_v15 }
 0x15e   : > { %v4637_v48 = vsel %vm6826_vm5, %v9746_v59, %v4636_v22  ;;  %v8948_v7 = vadd.f32 %v5929_v47, %v1359_v11  ;;  %v1351_v51 = vadd.f32 %v1350_v34, %v9747_v29  ;;  %v1372_v20 = vadd.f32 %v5884_v25, %v9748_v5  ;;  %6174 = vmatprep.mubr.bf16.mxu1 %v5508_v8  ;;  %v9749_v47 = vld [vmem:[#allocation2_spill] sm:$0xff]  ;;  %v9750_v15 = vld [vmem:[#allocation9_spill] sm:$0xff] }
 0x15f   : > { %v5933_v49 = vpop.f32.mrf.mxu0  ;;  %v4190_v62 = vsel %vm6517_vm2, %v4185_v54, %v4189_v58  ;;  %v5565_v22 = vcombine.low %v4637_v48, %v4640_v13  ;;  %v1363_v39 = vpop.f32.mrf.mxu1  ;;  %v9752_v59 = vld [vmem:[#allocation5_spill] sm:$0xff] }
 0x160   : > { %v8954_v23 = vadd.f32 %v1771_v30, %v1351_v51  ;;  %v8959_v41 = vadd.f32 %v5932_v35, %v1372_v20  ;;  %v1364_v50 = vadd.f32 %v1363_v39, %v9749_v47  ;;  %v5509_v9 = vcombine.low %v4180_v42, %v4190_v62  ;;  %v9754_v20 = vld [vmem:[#allocation10_spill] sm:$0xff] }
 0x161   : > { %v1787_v2 = vpop.f32.mrf.mxu0  ;;  %v5885_v43 = vpop.f32.mrf.mxu1 }
 0x162   : > { %v8962_v46 = vadd.f32 %v1784_v61, %v1364_v50  ;;  %v1375_v17 = vadd.f32 %v5885_v43, %v9750_v15  ;;  %v9753_v61 = vld [vmem:[#allocation27_spill] sm:$0xff] }
 0x163   : > { %v5936_v28 = vpop.f32.mrf.mxu0  ;;  %v1366_v32 = vpop.f32.mrf.mxu1 }
 0x164   : > { %6223 = vmatmul.mubr.bf16.gmra.mxu0 %v5565_v22  ;;  %v8965_v38 = vadd.f32 %v5933_v49, %v1375_v17  ;;  %v1367_v30 = vadd.f32 %v1366_v32, %v9751_v0 }
 0x165   : > { %v1800_v27 = vpop.f32.mrf.mxu0  ;;  %v5888_v33 = vpop.f32.mrf.mxu1  ;;  %6175 = vmatmul.mubr.bf16.gmra.mxu1 %v5509_v9 }
 0x166   : > { %v8968_v36 = vadd.f32 %v1787_v2, %v1367_v30  ;;  %v1388_v54 = vadd.f32 %v5888_v33, %v8558_v56 }
 0x167   : > { %v5937_v55 = vpop.f32.mrf.mxu0  ;;  %v1379_v11 = vpop.f32.mrf.mxu1 }
 0x168   : > { %v8971_v35 = vadd.f32 %v5936_v28, %v1388_v54  ;;  %v1380_v8 = vadd.f32 %v1379_v11, %v8586_v12 }
 0x169   : > { %v1803_v58 = vpop.f32.mrf.mxu0  ;;  %v5889_v34 = vpop.f32.mrf.mxu1 }
 0x16a   : > { %v8974_v6 = vadd.f32 %v1800_v27, %v1380_v8  ;;  %v1391_v48 = vadd.f32 %v5889_v34, %v9752_v59 }
 0x16b   : > { %v6004_v13 = vpop.f32.mrf.mxu0  ;;  %v1382_v29 = vpop.f32.mrf.mxu1 }
 0x16c   : > { %v8977_v51 = vadd.f32 %v5937_v55, %v1391_v48  ;;  %v1383_v25 = vadd.f32 %v1382_v29, %v9753_v61 }
 0x16d   : > { %v2796_v42 = vpop.f32.mrf.mxu0  ;;  %v5956_v56 = vpop.f32.mrf.mxu1 }
 0x16e   : > { %v8980_v5 = vadd.f32 %v1803_v58, %v1383_v25  ;;  %v2219_v49 = vadd.f32 %v5956_v56, %v9754_v20 }
 0x16f   : > { %v6005_v62 = vpop.f32.mrf.mxu0  ;;  %v2090_v12 = vpop.f32.mrf.mxu1 }
 0x170   : > { %v8983_v22 = vadd.f32 %v6004_v13, %v2219_v49  ;;  %v2217_v39 = vadd.f32 %v2090_v12, %v8685_v37 }
 0x171   : > { %v2799_v47 = vpop.f32.mrf.mxu0  ;;  %v5957_v50 = vpop.f32.mrf.mxu1 }
 0x172   : > { %v8986_v2 = vadd.f32 %v2796_v42, %v2217_v39  ;;  %v2220_v43 = vadd.f32 %v5957_v50, %v8693_v31 }
 0x173   : > { %v6008_v9 = vpop.f32.mrf.mxu0  ;;  %v2093_v15 = vpop.f32.mrf.mxu1 }
 0x174   : > { %v8989_v17 = vadd.f32 %v6005_v62, %v2220_v43  ;;  %v2218_v28 = vadd.f32 %v2093_v15, %v8706_v63 }
 0x175   : > { %v2812_v32 = vpop.f32.mrf.mxu0  ;;  %v5960_v0 = vpop.f32.mrf.mxu1 }
 0x176   : > { %v8992_v30 = vadd.f32 %v2799_v47, %v2218_v28  ;;  %v2223_v27 = vadd.f32 %v5960_v0, %v8737_v1 }
 0x177   : > { %v6009_v33 = vpop.f32.mrf.mxu0  ;;  %v2106_v37 = vpop.f32.mrf.mxu1 }
 0x178   : > { %v8995_v54 = vadd.f32 %v6008_v9, %v2223_v27  ;;  %v2221_v55 = vadd.f32 %v2106_v37, %v8753_v14 }
 0x179   : > { %v2815_v11 = vpop.f32.mrf.mxu0  ;;  %v5961_v31 = vpop.f32.mrf.mxu1 }
 0x17a   : > { %v8998_v8 = vadd.f32 %v2812_v32, %v2221_v55  ;;  %v2224_v58 = vadd.f32 %v5961_v31, %v8770_v3 }
 0x17b   : > { %v6012_v34 = vpop.f32.mrf.mxu0  ;;  %v2109_v63 = vpop.f32.mrf.mxu1 }
 0x17c   : > { %v9001_v59 = vadd.f32 %v6009_v33, %v2224_v58  ;;  %v2222_v48 = vadd.f32 %v2109_v63, %v8778_v10 }
 0x17d   : > { %v2828_v13 = vpop.f32.mrf.mxu0  ;;  %v5964_v1 = vpop.f32.mrf.mxu1 }
 0x17e   : > { %v9004_v29 = vadd.f32 %v2815_v11, %v2222_v48  ;;  %v2227_v61 = vadd.f32 %v5964_v1, %v8791_v19 }
 0x17f   : > { %v6013_v25 = vpop.f32.mrf.mxu0  ;;  %v2122_v14 = vpop.f32.mrf.mxu1 }
 0x180   : > { %v9007_v42 = vadd.f32 %v6012_v34, %v2227_v61  ;;  %v2225_v56 = vadd.f32 %v2122_v14, %v8803_v60 }
 0x181   : > { %v2831_v20 = vpop.f32.mrf.mxu0  ;;  %v5965_v3 = vpop.f32.mrf.mxu1 }
 0x182   : > { %v9010_v49 = vadd.f32 %v2828_v13, %v2225_v56  ;;  %v2228_v62 = vadd.f32 %v5965_v3, %v8826_v16 }
 0x183   : > { %v6016_v12 = vpop.f32.mrf.mxu0  ;;  %v2125_v10 = vpop.f32.mrf.mxu1 }
 0x184   : > { %v9013_v39 = vadd.f32 %v6013_v25, %v2228_v62  ;;  %v2226_v47 = vadd.f32 %v2125_v10, %v8835_v4 }
 0x185   : > { %v2844_v50 = vpop.f32.mrf.mxu0  ;;  %v5968_v19 = vpop.f32.mrf.mxu1 }
 0x186   : > { %v9016_v43 = vadd.f32 %v2831_v20, %v2226_v47  ;;  %v2231_v9 = vadd.f32 %v5968_v19, %v8848_v52 }
 0x187   : > { %v6017_v15 = vpop.f32.mrf.mxu0  ;;  %v2138_v60 = vpop.f32.mrf.mxu1 }
 0x188   : > { %v9019_v28 = vadd.f32 %v6016_v12, %v2231_v9  ;;  %v2229_v32 = vadd.f32 %v2138_v60, %v8855_v24 }
 0x189   : > { %v2847_v0 = vpop.f32.mrf.mxu0  ;;  %v5969_v16 = vpop.f32.mrf.mxu1 }
 0x18a   : > { %v9022_v27 = vadd.f32 %v2844_v50, %v2229_v32  ;;  %v2232_v33 = vadd.f32 %v5969_v16, %v8875_v21 }
 0x18b   : > { %v6020_v37 = vpop.f32.mrf.mxu0  ;;  %v2141_v4 = vpop.f32.mrf.mxu1 }
 0x18c   : > { %v9025_v55 = vadd.f32 %v6017_v15, %v2232_v33  ;;  %v2230_v11 = vadd.f32 %v2141_v4, %v8889_v44 }
 0x18d   : > { %v2860_v31 = vpop.f32.mrf.mxu0  ;;  %v5972_v52 = vpop.f32.mrf.mxu1 }
 0x18e   : > { %v9028_v58 = vadd.f32 %v2847_v0, %v2230_v11  ;;  %v2235_v34 = vadd.f32 %v5972_v52, %v8894_v45 }
 0x18f   : > { %v6021_v63 = vpop.f32.mrf.mxu0  ;;  %v2154_v24 = vpop.f32.mrf.mxu1 }
 0x190   : > { %v9031_v48 = vadd.f32 %v6020_v37, %v2235_v34  ;;  %v2233_v13 = vadd.f32 %v2154_v24, %v8903_v53 }
 0x191   : > { %v2863_v1 = vpop.f32.mrf.mxu0  ;;  %v5973_v21 = vpop.f32.mrf.mxu1 }
 0x192   : > { %v9034_v61 = vadd.f32 %v2860_v31, %v2233_v13  ;;  %v2236_v25 = vadd.f32 %v5973_v21, %v8914_v18 }
 0x193   : > { %v6024_v14 = vpop.f32.mrf.mxu0  ;;  %v2157_v44 = vpop.f32.mrf.mxu1 }
 0x194   : > { %v9037_v56 = vadd.f32 %v6021_v63, %v2236_v25  ;;  %v2234_v20 = vadd.f32 %v2157_v44, %v8928_v40 }
 0x195   : > { %v2876_v3 = vpop.f32.mrf.mxu0  ;;  %v5976_v45 = vpop.f32.mrf.mxu1 }
 0x196   : > { %9755 = vst [vmem:[#allocation12_spill] sm:$0xff] %v9037_v56  ;;  %v9040_v62 = vadd.f32 %v2863_v1, %v2234_v20  ;;  %v2239_v12 = vadd.f32 %v5976_v45, %v8936_v57 }
 0x197   : > { %v6025_v10 = vpop.f32.mrf.mxu0  ;;  %v2170_v53 = vpop.f32.mrf.mxu1 }
 0x198   : > { %9756 = vst [vmem:[#allocation3_spill] sm:$0xff] %v9040_v62  ;;  %v9043_v47 = vadd.f32 %v6024_v14, %v2239_v12  ;;  %v2237_v50 = vadd.f32 %v2170_v53, %v8939_v26 }
 0x199   : > { %v2879_v19 = vpop.f32.mrf.mxu0  ;;  %v5977_v18 = vpop.f32.mrf.mxu1 }
 0x19a   : > { %9757 = vst [vmem:[#allocation6_spill] sm:$0xff] %v9043_v47  ;;  %v9046_v9 = vadd.f32 %v2876_v3, %v2237_v50  ;;  %v2240_v15 = vadd.f32 %v5977_v18, %v8948_v7 }
 0x19b   : > { %v6028_v60 = vpop.f32.mrf.mxu0  ;;  %v2173_v40 = vpop.f32.mrf.mxu1 }
 0x19c   : > { %9758 = vst [vmem:[#allocation8_spill] sm:$0xff] %v9046_v9  ;;  %v9049_v32 = vadd.f32 %v6025_v10, %v2240_v15  ;;  %v2238_v0 = vadd.f32 %v2173_v40, %v8954_v23 }
 0x19d   : > { %v2892_v16 = vpop.f32.mrf.mxu0  ;;  %v5980_v57 = vpop.f32.mrf.mxu1 }
 0x19e   : > { %9759 = vst [vmem:[#allocation14_spill] sm:$0xff] %v9049_v32  ;;  %v9052_v33 = vadd.f32 %v2879_v19, %v2238_v0  ;;  %v2243_v37 = vadd.f32 %v5980_v57, %v8959_v41 }
 0x19f   : > { %v6029_v4 = vpop.f32.mrf.mxu0  ;;  %v2186_v26 = vpop.f32.mrf.mxu1 }
 0x1a0   : > { %9760 = vst [vmem:[#allocation13_spill] sm:$0xff] %v9052_v33  ;;  %v9055_v11 = vadd.f32 %v6028_v60, %v2243_v37  ;;  %v2241_v31 = vadd.f32 %v2186_v26, %v8962_v46 }
 0x1a1   : > { %v2895_v52 = vpop.f32.mrf.mxu0  ;;  %v5981_v7 = vpop.f32.mrf.mxu1 }
 0x1a2   : > { %9761 = vst [vmem:[#allocation17_spill] sm:$0xff] %v9055_v11  ;;  %v9058_v34 = vadd.f32 %v2892_v16, %v2241_v31  ;;  %v2244_v63 = vadd.f32 %v5981_v7, %v8965_v38 }
 0x1a3   : > { %v6032_v24 = vpop.f32.mrf.mxu0  ;;  %v2189_v23 = vpop.f32.mrf.mxu1 }
 0x1a4   : > { %9762 = vst [vmem:[#allocation16_spill] sm:$0xff] %v9058_v34  ;;  %v9061_v13 = vadd.f32 %v6029_v4, %v2244_v63  ;;  %v2242_v1 = vadd.f32 %v2189_v23, %v8968_v36 }
 0x1a5   : > { %v2908_v21 = vpop.f32.mrf.mxu0  ;;  %v5984_v41 = vpop.f32.mrf.mxu1 }
 0x1a6   : > { %9763 = vst [vmem:[#allocation15_spill] sm:$0xff] %v9061_v13  ;;  %v9064_v25 = vadd.f32 %v2895_v52, %v2242_v1  ;;  %v2247_v14 = vadd.f32 %v5984_v41, %v8971_v35 }
 0x1a7   : > { %v6033_v44 = vpop.f32.mrf.mxu0  ;;  %v2202_v46 = vpop.f32.mrf.mxu1 }
 0x1a8   : > { %9764 = vst [vmem:[#allocation18_spill] sm:$0xff] %v9064_v25  ;;  %v9067_v20 = vadd.f32 %v6032_v24, %v2247_v14  ;;  %v2245_v3 = vadd.f32 %v2202_v46, %v8974_v6 }
 0x1a9   : > { %v2911_v45 = vpop.f32.mrf.mxu0  ;;  %v5985_v38 = vpop.f32.mrf.mxu1 }
 0x1aa   : > { %9765 = vst [vmem:[#allocation19_spill] sm:$0xff] %v9067_v20  ;;  %v9070_v12 = vadd.f32 %v2908_v21, %v2245_v3  ;;  %v2248_v10 = vadd.f32 %v5985_v38, %v8977_v51 }
 0x1ab   : > { %v9073_v53 = vpop.f32.mrf.mxu0  ;;  %v2205_v36 = vpop.f32.mrf.mxu1 }
 0x1ac   : > { %9766 = vst [vmem:[#allocation20_spill] sm:$0xff] %v9070_v12  ;;  %v9075_v50 = vadd.f32 %v6033_v44, %v2248_v10  ;;  %v2246_v19 = vadd.f32 %v2205_v36, %v8980_v5 }
 0x1ad   : > { %v9078_v35 = vpop.f32.mrf.mxu0  ;;  %v6052_v18 = vpop.f32.mrf.mxu1 }
 0x1ae   : > { %9767 = vst [vmem:[#allocation23_spill] sm:$0xff] %v9075_v50  ;;  %v9080_v15 = vadd.f32 %v2911_v45, %v2246_v19 }
 0x1af   : > { %v9082_v60 = vpop.f32.mrf.mxu0  ;;  %v3246_v6 = vpop.f32.mrf.mxu1 }
 0x1b0   : > { %9768 = vst [vmem:[#allocation31_spill] sm:$0xff] %v9080_v15 }
 0x1b1   : > { %v9084_v40 = vpop.f32.mrf.mxu0  ;;  %v6053_v0 = vpop.f32.mrf.mxu1 }
 0x1b3   : > { %v9086_v16 = vpop.f32.mrf.mxu0  ;;  %v9088_v51 = vpop.f32.mrf.mxu1 }
 0x1b5   : > { %v9090_v57 = vpop.f32.mrf.mxu0  ;;  %v9092_v37 = vpop.f32.mrf.mxu1 }
 0x1b7   : > { %v9094_v5 = vpop.f32.mrf.mxu0  ;;  %v9096_v4 = vpop.f32.mrf.mxu1 }
 0x1b9   : > { %v9098_v26 = vpop.f32.mrf.mxu0  ;;  %v9100_v31 = vpop.f32.mrf.mxu1 }
 0x1bb   : > { %v9102_v52 = vpop.f32.mrf.mxu0  ;;  %v9104_v7 = vpop.f32.mrf.mxu1 }
 0x1bd   : > { %v9106_v63 = vpop.f32.mrf.mxu0  ;;  %v9108_v24 = vpop.f32.mrf.mxu1 }
 0x1bf   : > { %v9110_v23 = vpop.f32.mrf.mxu0  ;;  %v9112_v1 = vpop.f32.mrf.mxu1 }
 0x1c1   : > { %v9114_v21 = vpop.f32.mrf.mxu0  ;;  %v9116_v41 = vpop.f32.mrf.mxu1 }
 0x1c3   : > { %v9118_v14 = vpop.f32.mrf.mxu0  ;;  %v9120_v44 = vpop.f32.mrf.mxu1 }
 0x1c5   : > { %v9122_v46 = vpop.f32.mrf.mxu0  ;;  %v9124_v3 = vpop.f32.mrf.mxu1 }
 0x1c7   : > { %v9126_v45 = vpop.f32.mrf.mxu0  ;;  %v9128_v38 = vpop.f32.mrf.mxu1 }
 0x1c9   : > { %v9130_v10 = vpop.f32.mrf.mxu0  ;;  %v9132_v36 = vpop.f32.mrf.mxu1 }
 0x1cb   : > { %v9134_v19 = vpop.f32.mrf.mxu0  ;;  %v9136_v15 = vpop.f32.mrf.mxu1 }
 0x1cc   : > { %9769 = vst [vmem:[#allocation32_spill] sm:$0xff] %v9134_v19 }
 0x1cd   : > { %v9138_v50 = vpop.f32.mrf.mxu0  ;;  %v9140_v12 = vpop.f32.mrf.mxu1 }
 0x1ce   : > { %9770 = vst [vmem:[#allocation35_spill] sm:$0xff] %v9138_v50 }
 0x1cf   : > { %v9142_v20 = vpop.f32.mrf.mxu0  ;;  %v9144_v25 = vpop.f32.mrf.mxu1 }
 0x1d0   : > { %9771 = vst [vmem:[#allocation36_spill] sm:$0xff] %v9142_v20 }
 0x1d1   : > { %v9146_v13 = vpop.f32.mrf.mxu0  ;;  %v9148_v34 = vpop.f32.mrf.mxu1 }
 0x1d2   : > { %9772 = vst [vmem:[#allocation37_spill] sm:$0xff] %v9146_v13  ;;  %9773 = vst [vmem:[#allocation33_spill] sm:$0xff] %v9148_v34 }
 0x1d3   : > { %v9150_v11 = vpop.f32.mrf.mxu0  ;;  %v9152_v33 = vpop.f32.mrf.mxu1 }
 0x1d4   : > { %9774 = vst [vmem:[#allocation25_spill] sm:$0xff] %v9150_v11  ;;  %9775 = vst [vmem:[#allocation22_spill] sm:$0xff] %v9152_v33 }
 0x1d5   : > { %v9154_v32 = vpop.f32.mrf.mxu0  ;;  %v9156_v9 = vpop.f32.mrf.mxu1 }
 0x1d6   : > { %9776 = vst [vmem:[#allocation41_spill] sm:$0xff] %v9154_v32  ;;  %9777 = vst [vmem:[#allocation30_spill] sm:$0xff] %v9156_v9 }
 0x1d7   : > { %v9158_v47 = vpop.f32.mrf.mxu0  ;;  %v9160_v62 = vpop.f32.mrf.mxu1 }
 0x1d8   : > { %9778 = vst [vmem:[#allocation47_spill] sm:$0xff] %v9158_v47  ;;  %9779 = vst [vmem:[#allocation21_spill] sm:$0xff] %v9160_v62 }
 0x1d9   : > { %v9162_v50 = vpop.f32.mrf.mxu0  ;;  %v9164_v20 = vpop.f32.mrf.mxu1 }
 0x1da   : > { %9780 = vst [vmem:[#allocation50_spill] sm:$0xff] %v9162_v50  ;;  %9781 = vst [vmem:[#allocation58_spill] sm:$0xff] %v9164_v20 }
 0x1db   : > { %v9166_v56 = vpop.f32.mrf.mxu0  ;;  %v9168_v13 = vpop.f32.mrf.mxu1 }
 0x1dc   : > { %9782 = vst [vmem:[#allocation26_spill] sm:$0xff] %v9166_v56  ;;  %9783 = vst [vmem:[#allocation43_spill] sm:$0xff] %v9168_v13 }
 0x1dd   : > { %v9170_v34 = vpop.f32.mrf.mxu0  ;;  %v9172_v11 = vpop.f32.mrf.mxu1 }
 0x1de   : > { %9784 = vst [vmem:[#allocation7_spill] sm:$0xff] %v9170_v34  ;;  %9785 = vst [vmem:[#allocation44_spill] sm:$0xff] %v9172_v11 }
 0x1df   : > { %v9174_v33 = vpop.f32.mrf.mxu0  ;;  %v9176_v32 = vpop.f32.mrf.mxu1 }
 0x1e0   : > { %9786 = vst [vmem:[#allocation48_spill] sm:$0xff] %v9174_v33  ;;  %9787 = vst [vmem:[#allocation38_spill] sm:$0xff] %v9176_v32  ;;  %v3375_v33 = vadd.f32 %v6052_v18, %v8983_v22  ;;  %v3374_v22 = vadd.f32 %v9088_v51, %v8992_v30  ;;  %v3377_v30 = vadd.f32 %v9096_v4, %v8998_v8 }
 0x1e1   : > { %v9178_v9 = vpop.f32.mrf.mxu0  ;;  %v9180_v47 = vpop.f32.mrf.mxu1  ;;  %v3380_v8 = vadd.f32 %v9100_v31, %v9001_v59  ;;  %v3383_v31 = vadd.f32 %v9108_v24, %v9007_v42 }
 0x1e2   : > { %9788 = vst [vmem:[#allocation24_spill] sm:$0xff] %v9178_v9  ;;  %9789 = vst [vmem:[#allocation51_spill] sm:$0xff] %v9180_v47  ;;  %v3373_v47 = vadd.f32 %v3246_v6, %v8986_v2  ;;  %v3379_v2 = vadd.f32 %v9092_v37, %v8995_v54  ;;  %v9213_v6 = vld [vmem:[%s9381_s4] ss:$0 sm:$0xff] }
 0x1e3   : > { %v9182_v62 = vpop.f32.mrf.mxu0  ;;  %v9184_v50 = vpop.f32.mrf.mxu1 }
 0x1e4   : > { %9790 = vst [vmem:[#allocation52_spill] sm:$0xff] %v9182_v62  ;;  %9791 = vst [vmem:[#allocation53_spill] sm:$0xff] %v9184_v50 }
 0x1e5   : > { %v9186_v20 = vpop.f32.mrf.mxu0  ;;  %v9188_v56 = vpop.f32.mrf.mxu1 }
 0x1e6   : > { %9792 = vst [vmem:[#allocation55_spill] sm:$0xff] %v9186_v20  ;;  %9793 = vst [vmem:[#allocation46_spill] sm:$0xff] %v9188_v56  ;;  %v3777_v20 = vadd.f32 %v9073_v53, %v3375_v33  ;;  %v3376_v56 = vadd.f32 %v6053_v0, %v8989_v17 }
 0x1e7   : > { %v9190_v34 = vpop.f32.mrf.mxu0  ;;  %v9192_v11 = vpop.f32.mrf.mxu1 }
 0x1e8   : > { %9794 = vst [vmem:[#allocation34_spill] sm:$0xff] %v9190_v34  ;;  %v3775_v34 = vadd.f32 %v9078_v35, %v3373_v47  ;;  %v3778_v17 = vadd.f32 %v9082_v60, %v3376_v56 }
 0x1e9   : > { %v9195_v32 = vpop.f32.mrf.mxu0  ;;  %v9197_v9 = vpop.f32.mrf.mxu1 }
 0x1ea   : > { %9795 = vst [vmem:[#allocation39_spill] sm:$0xff] %v9195_v32 }
 0x1eb   : > { %v6196_v62 = vpop.f32.mrf.mxu0  ;;  %v9200_v13 = vpop.f32.mrf.mxu1 }
 0x1ed   : > { %v4804_v50 = vpop.f32.mrf.mxu0  ;;  %v6148_v19 = vpop.f32.mrf.mxu1 }
 0x1ee   : > { %v4483_v18 = vadd.f32 %v6148_v19, %v3777_v20  ;;  %v3776_v20 = vadd.f32 %v9084_v40, %v3374_v22  ;;  %v3779_v40 = vadd.f32 %v9090_v57, %v3377_v30 }
 0x1ef   : > { %v6197_v32 = vpop.f32.mrf.mxu0  ;;  %v4354_v33 = vpop.f32.mrf.mxu1 }
 0x1f0   : > { %v4933_v53 = vadd.f32 %v6196_v62, %v4483_v18  ;;  %v4481_v0 = vadd.f32 %v4354_v33, %v3775_v34  ;;  %v3781_v34 = vadd.f32 %v9086_v16, %v3379_v2 }
 0x1f1   : > { %v4807_v47 = vpop.f32.mrf.mxu0  ;;  %v6149_v54 = vpop.f32.mrf.mxu1 }
 0x1f2   : > { %v4972_v35 = vadd.f32 %v9213_v6, %v4933_v53  ;;  %v4931_v51 = vadd.f32 %v4804_v50, %v4481_v0  ;;  %v4484_v56 = vadd.f32 %v6149_v54, %v3778_v17  ;;  %v3378_v50 = vadd.f32 %v9104_v7, %v9004_v29 }
 0x1f3   : > { %v6200_v62 = vpop.f32.mrf.mxu0  ;;  %v4357_v60 = vpop.f32.mrf.mxu1  ;;  %v3381_v7 = vadd.f32 %v9112_v1, %v9010_v49 }
 0x1f4   : > { %5004 = vst [vmem:[%s9221_s17 + $0x10] sm:$0xff] %v4972_v35  ;;  %v4970_v37 = vadd.f32 %v9213_v6, %v4931_v51  ;;  %v4934_v4 = vadd.f32 %v6197_v32, %v4484_v56  ;;  %v4482_v19 = vadd.f32 %v4357_v60, %v3776_v20  ;;  %v3782_v32 = vadd.f32 %v9094_v5, %v3380_v8 }
 0x1f5   : > { %v4820_v18 = vpop.f32.mrf.mxu0  ;;  %v6152_v22 = vpop.f32.mrf.mxu1  ;;  %v3785_v20 = vadd.f32 %v9102_v52, %v3383_v31  ;;  %v3384_v51 = vadd.f32 %v9116_v41, %v9013_v39  ;;  %v3382_v60 = vadd.f32 %v9120_v44, %v9016_v43  ;;  %v3387_v41 = vadd.f32 %v9124_v3, %v9019_v28 }
 0x1f6   : > { %5002 = vst [vmem:[%s9221_s17] sm:$0xff] %v4970_v37  ;;  %v4973_v16 = vadd.f32 %v9213_v6, %v4934_v4  ;;  %v4932_v2 = vadd.f32 %v4807_v47, %v4482_v19  ;;  %v4487_v33 = vadd.f32 %v6152_v22, %v3781_v34  ;;  %v3780_v47 = vadd.f32 %v9098_v26, %v3378_v50 }
 0x1f7   : > { %v6201_v59 = vpop.f32.mrf.mxu0  ;;  %v4370_v17 = vpop.f32.mrf.mxu1  ;;  %v3786_v19 = vadd.f32 %v9110_v23, %v3384_v51  ;;  %v3385_v44 = vadd.f32 %v9128_v38, %v9022_v27  ;;  %v3784_v50 = vadd.f32 %v9114_v21, %v3382_v60  ;;  %v9797_v51 = vld [vmem:[#allocation12_spill] sm:$0xff]  ;;  %v9800_v60 = vld [vmem:[#allocation3_spill] sm:$0xff] }
 0x1f8   : > { %5005 = vst [vmem:[%s9221_s17 + $0x18] sm:$0xff] %v4973_v16  ;;  %v4971_v57 = vadd.f32 %v9213_v6, %v4932_v2  ;;  %v4937_v53 = vadd.f32 %v6200_v62, %v4487_v33  ;;  %v4485_v0 = vadd.f32 %v4370_v17, %v3779_v40  ;;  %v3783_v62 = vadd.f32 %v9106_v63, %v3381_v7 }
 0x1f9   : > { %v4823_v29 = vpop.f32.mrf.mxu0  ;;  %v6153_v30 = vpop.f32.mrf.mxu1  ;;  %v3789_v2 = vadd.f32 %v9118_v14, %v3387_v41  ;;  %v3787_v17 = vadd.f32 %v9122_v46, %v3385_v44 }
 0x1fa   : > { %5003 = vst [vmem:[%s9221_s17 + $0x8] sm:$0xff] %v4971_v57  ;;  %v4976_v42 = vadd.f32 %v9213_v6, %v4937_v53  ;;  %v4935_v24 = vadd.f32 %v4820_v18, %v4485_v0  ;;  %v4488_v54 = vadd.f32 %v6153_v30, %v3782_v32  ;;  %v3386_v57 = vadd.f32 %v9136_v15, %v9028_v58 }
 0x1fb   : > { %v6204_v5 = vpop.f32.mrf.mxu0  ;;  %v4373_v35 = vpop.f32.mrf.mxu1  ;;  %v3389_v15 = vadd.f32 %v9144_v25, %v9034_v61 }
 0x1fc   : > { %5008 = vst [vmem:[%s9221_s17 + $0x30] sm:$0xff] %v4976_v42  ;;  %v4974_v49 = vadd.f32 %v9213_v6, %v4935_v24  ;;  %v4938_v1 = vadd.f32 %v6201_v59, %v4488_v54  ;;  %v4486_v56 = vadd.f32 %v4373_v35, %v3780_v47  ;;  %v3388_v59 = vadd.f32 %v9132_v36, %v9025_v55 }
 0x1fd   : > { %v4836_v26 = vpop.f32.mrf.mxu0  ;;  %v6156_v34 = vpop.f32.mrf.mxu1  ;;  %v3391_v36 = vadd.f32 %v9140_v12, %v9031_v48  ;;  %v3788_v24 = vadd.f32 %v9130_v10, %v3386_v57 }
 0x1fe   : > { %5006 = vst [vmem:[%s9221_s17 + $0x20] sm:$0xff] %v4974_v49  ;;  %v4977_v52 = vadd.f32 %v9213_v6, %v4938_v1  ;;  %v4936_v8 = vadd.f32 %v4823_v29, %v4486_v56  ;;  %v4491_v37 = vadd.f32 %v6156_v34, %v3785_v20  ;;  %v3790_v7 = vadd.f32 %v9126_v45, %v3388_v59  ;;  %v9798_v49 = vld [vmem:[#allocation33_spill] sm:$0xff] }
 0x1ff   : > { %v6205_v39 = vpop.f32.mrf.mxu0  ;;  %v4386_v4 = vpop.f32.mrf.mxu1  ;;  %v3392_v1 = vadd.f32 %v9798_v49, %v9797_v51  ;;  %v9807_v59 = vld [vmem:[#allocation37_spill] sm:$0xff]  ;;  %v9816_v49 = vld [vmem:[#allocation47_spill] sm:$0xff] }
 0x200   : > { %5009 = vst [vmem:[%s9221_s17 + $0x38] sm:$0xff] %v4977_v52  ;;  %v4975_v63 = vadd.f32 %v9213_v6, %v4936_v8  ;;  %v4941_v18 = vadd.f32 %v6204_v5, %v4491_v37  ;;  %v4489_v40 = vadd.f32 %v4386_v4, %v3783_v62  ;;  %v9796_v5 = vld [vmem:[#allocation32_spill] sm:$0xff]  ;;  %v9801_v52 = vld [vmem:[#allocation22_spill] sm:$0xff] }
 0x201   : > { %v4839_v43 = vpop.f32.mrf.mxu0  ;;  %v6157_v22 = vpop.f32.mrf.mxu1  ;;  %v3793_v20 = vadd.f32 %v9796_v5, %v3391_v36  ;;  %v3390_v8 = vadd.f32 %v9801_v52, %v9800_v60  ;;  %v9814_v5 = vld [vmem:[#allocation17_spill] sm:$0xff]  ;;  %v9819_v52 = vld [vmem:[#allocation50_spill] sm:$0xff] }
 0x202   : > { %5007 = vst [vmem:[%s9221_s17 + $0x28] sm:$0xff] %v4975_v63  ;;  %v4980_v28 = vadd.f32 %v9213_v6, %v4941_v18  ;;  %v4939_v3 = vadd.f32 %v4836_v26, %v4489_v40  ;;  %v4492_v16 = vadd.f32 %v6157_v22, %v3786_v19  ;;  %v9799_v26 = vld [vmem:[#allocation35_spill] sm:$0xff]  ;;  %v9802_v19 = vld [vmem:[#allocation6_spill] sm:$0xff] }
 0x203   : > { %v4389_v33 = vpop.f32.mrf.mxu1  ;;  %v3791_v62 = vadd.f32 %v9799_v26, %v3389_v15  ;;  %v9803_v63 = vld [vmem:[#allocation30_spill] sm:$0xff]  ;;  %v9812_v15 = vld [vmem:[#allocation13_spill] sm:$0xff]  ;;  %v9817_v26 = vld [vmem:[#allocation16_spill] sm:$0xff] }
 0x204   : > { %v6208_v23 = vpop.f32.mrf.mxu0  ;;  %5012 = vst [vmem:[%s9221_s17 + $0x50] sm:$0xff] %v4980_v28  ;;  %v4978_v27 = vadd.f32 %v9213_v6, %v4939_v3  ;;  %v4942_v38 = vadd.f32 %v6205_v39, %v4492_v16  ;;  %v4490_v31 = vadd.f32 %v4389_v33, %v3784_v50  ;;  %v3395_v18 = vadd.f32 %v9803_v63, %v9802_v19  ;;  %v9805_v16 = vld [vmem:[#allocation8_spill] sm:$0xff]  ;;  %v9820_v19 = vld [vmem:[#allocation26_spill] sm:$0xff] }
 0x205   : > { %v6160_v32 = vpop.f32.mrf.mxu1 }
 0x206   : > { %v4852_v21 = vpop.f32.mrf.mxu0  ;;  %5010 = vst [vmem:[%s9221_s17 + $0x40] sm:$0xff] %v4978_v27  ;;  %v4981_v14 = vadd.f32 %v9213_v6, %v4942_v38  ;;  %v4940_v53 = vadd.f32 %v4839_v43, %v4490_v31  ;;  %v4495_v0 = vadd.f32 %v6160_v32, %v3789_v2  ;;  %v9804_v43 = vld [vmem:[#allocation36_spill] sm:$0xff]  ;;  %v3792_v27 = vadd.f32 %v9807_v59, %v3390_v8  ;;  %v9808_v32 = vld [vmem:[#allocation25_spill] sm:$0xff] }
 0x207   : > { %v4402_v29 = vpop.f32.mrf.mxu1  ;;  %v3794_v44 = vadd.f32 %v9804_v43, %v3392_v1  ;;  %v3797_v57 = vadd.f32 %v9808_v32, %v3395_v18  ;;  %v9822_v43 = vld [vmem:[#allocation51_spill] sm:$0xff]  ;;  %v9825_v59 = vld [vmem:[#allocation53_spill] sm:$0xff] }
 0x208   : > { %v6209_v55 = vpop.f32.mrf.mxu0  ;;  %5013 = vst [vmem:[%s9221_s17 + $0x58] sm:$0xff] %v4981_v14  ;;  %v4979_v46 = vadd.f32 %v9213_v6, %v4940_v53  ;;  %v4945_v30 = vadd.f32 %v6208_v23, %v4495_v0  ;;  %v4493_v47 = vadd.f32 %v4402_v29, %v3787_v17  ;;  %v9806_v23 = vld [vmem:[#allocation21_spill] sm:$0xff]  ;;  %v9809_v53 = vld [vmem:[#allocation14_spill] sm:$0xff]  ;;  %v9826_v32 = vld [vmem:[#allocation19_spill] sm:$0xff] }
 0x209   : > { %v6161_v42 = vpop.f32.mrf.mxu1  ;;  %v3393_v2 = vadd.f32 %v9806_v23, %v9805_v16  ;;  %v9810_v0 = vld [vmem:[#allocation58_spill] sm:$0xff]  ;;  %v9823_v16 = vld [vmem:[#allocation7_spill] sm:$0xff] }
 0x20a   : > { %v4855_v58 = vpop.f32.mrf.mxu0  ;;  %5011 = vst [vmem:[%s9221_s17 + $0x48] sm:$0xff] %v4979_v46  ;;  %v4984_v48 = vadd.f32 %v9213_v6, %v4945_v30  ;;  %v4943_v12 = vadd.f32 %v4852_v21, %v4493_v47  ;;  %v4496_v54 = vadd.f32 %v6161_v42, %v3790_v7  ;;  %v9811_v30 = vld [vmem:[#allocation41_spill] sm:$0xff]  ;;  %v9813_v42 = vld [vmem:[#allocation43_spill] sm:$0xff] }
 0x20b   : > { %v4405_v35 = vpop.f32.mrf.mxu1  ;;  %v3795_v47 = vadd.f32 %v9811_v30, %v3393_v2  ;;  %v9829_v30 = vld [vmem:[#allocation20_spill] sm:$0xff] }
 0x20c   : > { %v6212_v45 = vpop.f32.mrf.mxu0  ;;  %5016 = vst [vmem:[%s9221_s17 + $0x70] sm:$0xff] %v4984_v48  ;;  %v4982_v61 = vadd.f32 %v9213_v6, %v4943_v12  ;;  %v4946_v25 = vadd.f32 %v6209_v55, %v4496_v54  ;;  %v4494_v56 = vadd.f32 %v4405_v35, %v3788_v24  ;;  %v3396_v55 = vadd.f32 %v9810_v0, %v9809_v53  ;;  %v9828_v0 = vld [vmem:[#allocation48_spill] sm:$0xff] }
 0x20d   : > { %v6164_v34 = vpop.f32.mrf.mxu1  ;;  %v3394_v24 = vadd.f32 %v9813_v42, %v9812_v15  ;;  %v9830_v15 = vld [vmem:[#allocation24_spill] sm:$0xff] }
 0x20e   : > { %v4868_v10 = vpop.f32.mrf.mxu0  ;;  %5014 = vst [vmem:[%s9221_s17 + $0x60] sm:$0xff] %v4982_v61  ;;  %v4985_v37 = vadd.f32 %v9213_v6, %v4946_v25  ;;  %v4944_v39 = vadd.f32 %v4855_v58, %v4494_v56  ;;  %v4499_v41 = vadd.f32 %v6164_v34, %v3793_v20  ;;  %v9815_v20 = vld [vmem:[#allocation44_spill] sm:$0xff]  ;;  %v3798_v1 = vadd.f32 %v9816_v49, %v3396_v55 }
 0x20f   : > { %v4418_v40 = vpop.f32.mrf.mxu1  ;;  %v3399_v35 = vadd.f32 %v9815_v20, %v9814_v5  ;;  %v3796_v8 = vadd.f32 %v9819_v52, %v3394_v24 }
 0x210   : > { %v6213_v4 = vpop.f32.mrf.mxu0  ;;  %5017 = vst [vmem:[%s9221_s17 + $0x78] sm:$0xff] %v4985_v37  ;;  %v4983_v22 = vadd.f32 %v9213_v6, %v4944_v39  ;;  %v4949_v50 = vadd.f32 %v6212_v45, %v4499_v41  ;;  %v4497_v28 = vadd.f32 %v4418_v40, %v3791_v62  ;;  %v9818_v62 = vld [vmem:[#allocation38_spill] sm:$0xff]  ;;  %v9821_v40 = vld [vmem:[#allocation15_spill] sm:$0xff] }
 0x211   : > { %v6165_v33 = vpop.f32.mrf.mxu1  ;;  %v3397_v34 = vadd.f32 %v9818_v62, %v9817_v26  ;;  %v3801_v63 = vadd.f32 %v9820_v19, %v3399_v35  ;;  %v9832_v35 = vld [vmem:[#allocation23_spill] sm:$0xff] }
 0x212   : > { %v4871_v3 = vpop.f32.mrf.mxu0  ;;  %5015 = vst [vmem:[%s9221_s17 + $0x68] sm:$0xff] %v4983_v22  ;;  %v4988_v38 = vadd.f32 %v9213_v6, %v4949_v50  ;;  %v4947_v31 = vadd.f32 %v4868_v10, %v4497_v28  ;;  %v4500_v21 = vadd.f32 %v6165_v33, %v3794_v44  ;;  %v3400_v44 = vadd.f32 %v9822_v43, %v9821_v40  ;;  %v9824_v33 = vld [vmem:[#allocation18_spill] sm:$0xff]  ;;  %v9834_v26 = vld [vmem:[#allocation31_spill] sm:$0xff] }
 0x213   : > { %v4421_v14 = vpop.f32.mrf.mxu1  ;;  %v3799_v23 = vadd.f32 %v9823_v16, %v3397_v34  ;;  %v3402_v62 = vadd.f32 %v9200_v13, %v9834_v26 }
 0x214   : > { %v6216_v17 = vpop.f32.mrf.mxu0  ;;  %5020 = vst [vmem:[%s9221_s17 + $0x90] sm:$0xff] %v4988_v38  ;;  %v4986_v36 = vadd.f32 %v9213_v6, %v4947_v31  ;;  %v4950_v29 = vadd.f32 %v6213_v4, %v4500_v21  ;;  %v4498_v7 = vadd.f32 %v4421_v14, %v3792_v27  ;;  %v3398_v27 = vadd.f32 %v9825_v59, %v9824_v33 }
 0x215   : > { %v6168_v58 = vpop.f32.mrf.mxu1  ;;  %v3802_v55 = vadd.f32 %v9828_v0, %v3400_v44 }
 0x216   : > { %v4884_v46 = vpop.f32.mrf.mxu0  ;;  %5018 = vst [vmem:[%s9221_s17 + $0x80] sm:$0xff] %v4986_v36  ;;  %v4989_v48 = vadd.f32 %v9213_v6, %v4950_v29  ;;  %v4948_v12 = vadd.f32 %v4871_v3, %v4498_v7  ;;  %v4503_v54 = vadd.f32 %v6168_v58, %v3797_v57  ;;  %v9827_v57 = vld [vmem:[#allocation46_spill] sm:$0xff]  ;;  %v3800_v42 = vadd.f32 %v9830_v15, %v3398_v27 }
 0x217   : > { %v4434_v51 = vpop.f32.mrf.mxu1  ;;  %v3403_v14 = vadd.f32 %v9827_v57, %v9826_v32 }
 0x218   : > { %v6217_v45 = vpop.f32.mrf.mxu0  ;;  %5021 = vst [vmem:[%s9221_s17 + $0x98] sm:$0xff] %v4989_v48  ;;  %v4987_v61 = vadd.f32 %v9213_v6, %v4948_v12  ;;  %v4953_v25 = vadd.f32 %v6216_v17, %v4503_v54  ;;  %v4501_v56 = vadd.f32 %v4434_v51, %v3795_v47  ;;  %v3401_v47 = vadd.f32 %v9192_v11, %v9829_v30 }
 0x219   : > { %v6169_v60 = vpop.f32.mrf.mxu1  ;;  %v3404_v51 = vadd.f32 %v9197_v9, %v9832_v35 }
 0x21a   : > { %v4887_v10 = vpop.f32.mrf.mxu0  ;;  %5019 = vst [vmem:[%s9221_s17 + $0x88] sm:$0xff] %v4987_v61  ;;  %v4992_v37 = vadd.f32 %v9213_v6, %v4953_v25  ;;  %v4951_v39 = vadd.f32 %v4884_v46, %v4501_v56  ;;  %v4504_v41 = vadd.f32 %v6169_v60, %v3798_v1  ;;  %v9833_v61 = vld [vmem:[#allocation55_spill] sm:$0xff] }
 0x21b   : > { %v4437_v18 = vpop.f32.mrf.mxu1  ;;  %v3803_v25 = vadd.f32 %v9833_v61, %v3401_v47 }
 0x21c   : > { %v6220_v4 = vpop.f32.mrf.mxu0  ;;  %5024 = vst [vmem:[%s9221_s17 + $0xb0] sm:$0xff] %v4992_v37  ;;  %v4990_v22 = vadd.f32 %v9213_v6, %v4951_v39  ;;  %v4954_v50 = vadd.f32 %v6217_v45, %v4504_v41  ;;  %v4502_v28 = vadd.f32 %v4437_v18, %v3796_v8  ;;  %v9831_v45 = vld [vmem:[#allocation52_spill] sm:$0xff]  ;;  %v9835_v8 = vld [vmem:[#allocation34_spill] sm:$0xff]  ;;  %v9836_v18 = vld [vmem:[#allocation39_spill] sm:$0xff] }
 0x21d   : > { %v6172_v2 = vpop.f32.mrf.mxu1  ;;  %v3805_v5 = vadd.f32 %v9831_v45, %v3403_v14  ;;  %v3806_v37 = vadd.f32 %v9835_v8, %v3404_v51  ;;  %v3804_v13 = vadd.f32 %v9836_v18, %v3402_v62 }
 0x21e   : > { %v4900_v3 = vpop.f32.mrf.mxu0  ;;  %5022 = vst [vmem:[%s9221_s17 + $0xa0] sm:$0xff] %v4990_v22  ;;  %v4993_v38 = vadd.f32 %v9213_v6, %v4954_v50  ;;  %v4952_v31 = vadd.f32 %v4887_v10, %v4502_v28  ;;  %v4507_v21 = vadd.f32 %v6172_v2, %v3801_v63 }
 0x21f   : > { %v4450_v53 = vpop.f32.mrf.mxu1 }
 0x220   : > { %v6221_v17 = vpop.f32.mrf.mxu0  ;;  %5025 = vst [vmem:[%s9221_s17 + $0xb8] sm:$0xff] %v4993_v38  ;;  %v4991_v36 = vadd.f32 %v9213_v6, %v4952_v31  ;;  %v4957_v29 = vadd.f32 %v6220_v4, %v4507_v21  ;;  %v4505_v7 = vadd.f32 %v4450_v53, %v3799_v23 }
 0x221   : > { %v6173_v58 = vpop.f32.mrf.mxu1 }
 0x222   : > { %v4903_v46 = vpop.f32.mrf.mxu0  ;;  %5023 = vst [vmem:[%s9221_s17 + $0xa8] sm:$0xff] %v4991_v36  ;;  %v4996_v24 = vadd.f32 %v9213_v6, %v4957_v29  ;;  %v4955_v48 = vadd.f32 %v4900_v3, %v4505_v7  ;;  %v4508_v12 = vadd.f32 %v6173_v58, %v3802_v55 }
 0x223   : > { %v4453_v20 = vpop.f32.mrf.mxu1 }
 0x224   : > { %v6224_v54 = vpop.f32.mrf.mxu0  ;;  %5028 = vst [vmem:[%s9221_s17 + $0xd0] sm:$0xff] %v4996_v24  ;;  %v4994_v11 = vadd.f32 %v9213_v6, %v4955_v48  ;;  %v4958_v49 = vadd.f32 %v6221_v17, %v4508_v12  ;;  %v4506_v1 = vadd.f32 %v4453_v20, %v3800_v42 }
 0x225   : > { %v6176_v56 = vpop.f32.mrf.mxu1 }
 0x226   : > { %v4916_v10 = vpop.f32.mrf.mxu0  ;;  %5026 = vst [vmem:[%s9221_s17 + $0xc0] sm:$0xff] %v4994_v11  ;;  %v4997_v34 = vadd.f32 %v9213_v6, %v4958_v49  ;;  %v4956_v60 = vadd.f32 %v4903_v46, %v4506_v1  ;;  %v4511_v52 = vadd.f32 %v6176_v56, %v3805_v5 }
 0x227   : > { %v4466_v9 = vpop.f32.mrf.mxu1 }
 0x228   : > { %5029 = vst [vmem:[%s9221_s17 + $0xd8] sm:$0xff] %v4997_v34  ;;  %v4995_v39 = vadd.f32 %v9213_v6, %v4956_v60  ;;  %v4961_v41 = vadd.f32 %v6224_v54, %v4511_v52  ;;  %v4509_v4 = vadd.f32 %v4466_v9, %v3803_v25  ;;  %v6225_v63 = vpop.f32.mrf.mxu0 }
 0x229   : > { %v6177_v19 = vpop.f32.mrf.mxu1 }
 0x22a   : > { %5027 = vst [vmem:[%s9221_s17 + $0xc8] sm:$0xff] %v4995_v39  ;;  %v5000_v40 = vadd.f32 %v9213_v6, %v4961_v41  ;;  %v4959_v43 = vadd.f32 %v4916_v10, %v4509_v4  ;;  %v4512_v44 = vadd.f32 %v6177_v19, %v3806_v37  ;;  %v4919_v16 = vpop.f32.mrf.mxu0 }
 0x22b   : > { %v4469_v22 = vpop.f32.mrf.mxu1 }
 0x22c   : > { %5032 = vst [vmem:[%s9221_s17 + $0xf0] sm:$0xff] %v5000_v40  ;;  %v4998_v50 = vadd.f32 %v9213_v6, %v4959_v43  ;;  %v4962_v28 = vadd.f32 %v6225_v63, %v4512_v44  ;;  %v4510_v3 = vadd.f32 %v4469_v22, %v3804_v13 }
 0x22e   : > { %5030 = vst [vmem:[%s9221_s17 + $0xe0] sm:$0xff] %v4998_v50  ;;  %v5001_v23 = vadd.f32 %v9213_v6, %v4962_v28  ;;  %v4960_v2 = vadd.f32 %v4919_v16, %v4510_v3 }
 0x230   : > { %5033 = vst [vmem:[%s9221_s17 + $0xf8] sm:$0xff] %v5001_v23  ;;  %v4999_v33 = vadd.f32 %v9213_v6, %v4960_v2 }
 0x232   : > { %5031 = vst [vmem:[%s9221_s17 + $0xe8] sm:$0xff] %v4999_v33 }
 0x233 PF: > { %s15_s20 = sadd.s32 1, %s6418_s20   ;;  %s9837_s18 = smov %s6414_s19 }
 0x234   : > { %p12_p5 = scmp.ge.s32.totalorder %s15_s20, 4   ;;  %s9838_s19 = smov %s9840_s21 }
 0x236   :  { %14 = sbr.rel (!%p12_p5) target bundleno = 2 (0x2), region = 84 }

</bundles_post_ra>
